<compile_context>
chip_gen: v5e
topology: v5e:2x2
jax: 0.10.0
libtpu: 0.0.40
codegen_flags: <defaults>
</compile_context>

<pallas_src>
import jax
import jax.numpy as jnp
from jax import lax
from jax.experimental import pallas as pl
from jax.experimental.pallas import tpu as pltpu


def _round_up(x, m):
    return (x + m - 1) // m * m


# ----------------------------------------------------------------------------
# Pixel shuffle (matches torch.nn.PixelShuffle) on an NHWC tensor -> NCHW out
# ----------------------------------------------------------------------------
def pixel_shuffle_nhwc_to_nchw(x, r):
    # PyTorch PixelShuffle: out[n, c, h*r+i, w*r+j] = in[n, c*r*r + i*r + j, h, w]
    N, H, W, Crr = x.shape
    C = Crr // (r * r)
    x = x.reshape(N, H, W, C, r, r)
    x = jnp.transpose(x, (0, 3, 1, 4, 2, 5))      # N, C, H, r, W, r
    return x.reshape(N, C, H * r, W * r)


# ----------------------------------------------------------------------------
# Wrapper: layout prep, fused pallas_call, pixel shuffle
# ----------------------------------------------------------------------------
def segment_head_forward(x_nchw, p, up_factor):
    N, Cin, H, W = x_nchw.shape
    Cmid = p["w1"].shape[-1]
    Cup = p["w2"].shape[-1]
    Cout = p["w3"].shape[-1]
    Cpad = _round_up(max(Cout, 128), 128)        # lane-dense output channels

    Wp = _round_up(W + 2, 8)                     # flat row pitch (>= W+2, aligned)
    L = H * Wp                                   # flat rows per image (incl. junk)
    B = _round_up(Wp + 1, 8)                     # interior base row (aligned)
    spad = _round_up(B + L + Wp + 1, 8)          # padded buffer rows (taps in-bounds)

    # NCHW -> NHWC, zero-pad columns W..Wp-1 (junk cols), flatten to (N, L, Cin).
    x = jnp.transpose(x_nchw, (0, 2, 3, 1)).astype(jnp.float32)
    x = jnp.pad(x, ((0, 0), (0, 0), (0, Wp - W), (0, 0)))
    x_flat = x.reshape(N, L, Cin)

    # Tap-major conv weights (bf16 for the MXU); BN affine / bias stay f32.
    w1 = p["w1"].reshape(9, Cin, Cmid).astype(jnp.bfloat16)
    w2 = p["w2"].reshape(9, Cmid, Cup).astype(jnp.bfloat16)
    w3 = jnp.zeros((Cup, Cpad), jnp.bfloat16).at[:, :Cout].set(
        p["w3"].astype(jnp.bfloat16))
    b3 = jnp.zeros((1, Cpad), jnp.float32).at[0, :Cout].set(
        p["b3"].astype(jnp.float32))
    s1 = p["scale1"].reshape(1, Cmid).astype(jnp.float32)
    t1 = p["shift1"].reshape(1, Cmid).astype(jnp.float32)
    s2 = p["scale2"].reshape(1, Cup).astype(jnp.float32)
    t2 = p["shift2"].reshape(1, Cup).astype(jnp.float32)

    def kernel(x_ref, w1_ref, s1_ref, t1_ref, w2_ref, s2_ref, t2_ref,
               w3_ref, b3_ref, o_ref, xp1, xp2):
        # validity mask for flat row o = h*Wp + w: valid iff w < W
        col_ok = (lax.broadcasted_iota(jnp.int32, (L, 1), 0) % Wp) < W

        def conv3x3(xp, w_ref, n_out):
            # 3x3 "same" conv: the tap for (dy, dx) is a CONTIGUOUS L-row slice
            # of the flat padded buffer; accumulate 9 small MXU matmuls.
            acc = jnp.zeros((L, n_out), jnp.float32)
            for t in range(9):
                dy, dx = divmod(t, 3)
                start = B - Wp - 1 + dy * Wp + dx          # >= 0 by construction
                tap = xp[pl.ds(start, L), :].astype(jnp.bfloat16)
                acc = acc + jnp.dot(tap, w_ref[t],
                                    preferred_element_type=jnp.float32)
            return acc

        # ---- zero ONLY the halo rows (interior is fully overwritten below) ----
        xp1[pl.ds(0, B), :] = jnp.zeros((B, Cin), xp1.dtype)
        xp1[pl.ds(B + L, spad - B - L), :] = jnp.zeros((spad - B - L, Cin), xp1.dtype)
        xp2[pl.ds(0, B), :] = jnp.zeros((B, Cmid), xp2.dtype)
        xp2[pl.ds(B + L, spad - B - L), :] = jnp.zeros((spad - B - L, Cmid), xp2.dtype)

        # ---- stage 0: one contiguous, aligned interior store ----
        # (junk columns are already zero from the wrapper pad, so they act as
        #  the left/right halo of neighboring rows)
        xp1[pl.ds(B, L), :] = x_ref[0]

        # ---- conv1 (3x3, no bias) + folded BatchNorm + ReLU ----
        f1 = jnp.maximum(conv3x3(xp1, w1_ref, Cmid) * s1_ref[0] + t1_ref[0], 0.0)
        # Dropout(0.1): identity at inference.
        # TODO(synk): training-mode dropout (random masking) is not implemented.

        # ---- re-pad conv1 output (stays entirely in VMEM) ----
        # Junk columns are masked to zero so they become neighbors' halos.
        xp2[pl.ds(B, L), :] = jnp.where(col_ok, f1, 0.0)

        # ---- conv2 (3x3, no bias) + folded BatchNorm + ReLU ----
        f2 = jnp.maximum(conv3x3(xp2, w2_ref, Cup) * s2_ref[0] + t2_ref[0], 0.0)

        # ---- conv3 (1x1, bias); output channels zero-padded to Cpad ----
        y = jnp.dot(f2.astype(jnp.bfloat16), w3_ref[...],
                    preferred_element_type=jnp.float32) + b3_ref[0]
        o_ref[0] = y.astype(o_ref.dtype)

    out_flat = pl.pallas_call(
        kernel,
        out_shape=jax.ShapeDtypeStruct((N, L, Cpad), jnp.float32),
        grid=(N,),
        in_specs=[
            pl.BlockSpec((1, L, Cin), lambda n: (n, 0, 0)),
            pl.BlockSpec((9, Cin, Cmid), lambda n: (0, 0, 0)),
            pl.BlockSpec((1, Cmid), lambda n: (0, 0)),
            pl.BlockSpec((1, Cmid), lambda n: (0, 0)),
            pl.BlockSpec((9, Cmid, Cup), lambda n: (0, 0, 0)),
            pl.BlockSpec((1, Cup), lambda n: (0, 0)),
            pl.BlockSpec((1, Cup), lambda n: (0, 0)),
            pl.BlockSpec((Cup, Cpad), lambda n: (0, 0)),
            pl.BlockSpec((1, Cpad), lambda n: (0, 0)),
        ],
        out_specs=pl.BlockSpec((1, L, Cpad), lambda n: (n, 0, 0)),
        scratch_shapes=[
            pltpu.VMEM((spad, Cin), jnp.float32),       # xp1: padded input
            pltpu.VMEM((spad, Cmid), jnp.float32),      # xp2: padded conv1 out
        ],
        compiler_params=pltpu.CompilerParams(
            dimension_semantics=("parallel",)),
    )(x_flat, w1, s1, t1, w2, s2, t2, w3, b3)

    # Drop junk columns / padded channels, then pixel-shuffle to NCHW.
    y = out_flat.reshape(N, H, Wp, Cpad)[:, :, :W, :Cout]
    return pixel_shuffle_nhwc_to_nchw(y, up_factor)


# ----------------------------------------------------------------------------
# Pure-JAX reference (for correctness check)
# ----------------------------------------------------------------------------
def segment_head_ref(x_nchw, p, up_factor):
    def conv3(x, w):
        return lax.conv_general_dilated(
            x, w, (1, 1), ((1, 1), (1, 1)),
            dimension_numbers=("NHWC", "HWIO", "NHWC"))
    x = jnp.transpose(x_nchw, (0, 2, 3, 1))
    f = jnp.maximum(conv3(x, p["w1"]) * p["scale1"] + p["shift1"], 0.0)
    f = jnp.maximum(conv3(f, p["w2"]) * p["scale2"] + p["shift2"], 0.0)
    f = jnp.einsum("nhwc,cd->nhwd", f, p["w3"]) + p["b3"]
    return pixel_shuffle_nhwc_to_nchw(f, up_factor)


# ----------------------------------------------------------------------------
# Deterministic parameter init + run
# ----------------------------------------------------------------------------
def make_params(key, in_chan, mid_chan, n_classes, up_factor):
    ks = jax.random.split(key, 12)
    eps = 1e-5
    upsq = up_factor * up_factor
    out_chan = n_classes * upsq

    def bn_fold(kg, kb, km, kv, c):
        gamma = 1.0 + 0.1 * jax.random.normal(kg, (c,), jnp.float32)
        beta = 0.1 * jax.random.normal(kb, (c,), jnp.float32)
        mean = 0.1 * jax.random.normal(km, (c,), jnp.float32)
        var = jnp.abs(jax.random.normal(kv, (c,), jnp.float32)) + 0.5
        scale = gamma / jnp.sqrt(var + eps)
        shift = beta - mean * scale
        return scale, shift

    p = {}
    p["w1"] = 0.1 * jax.random.normal(ks[0], (3, 3, in_chan, mid_chan), jnp.float32)
    p["scale1"], p["shift1"] = bn_fold(ks[1], ks[2], ks[3], ks[4], mid_chan)
    p["w2"] = 0.1 * jax.random.normal(ks[5], (3, 3, mid_chan, upsq), jnp.float32)
    p["scale2"], p["shift2"] = bn_fold(ks[6], ks[7], ks[8], ks[9], upsq)
    p["w3"] = 0.1 * jax.random.normal(ks[10], (upsq, out_chan), jnp.float32)
    p["b3"] = 0.1 * jax.random.normal(ks[11], (out_chan,), jnp.float32)
    return p


if __name__ == "__main__":
    key = jax.random.PRNGKey(0)
    k_x, k_p = jax.random.split(key)

    batch, in_chan, mid_chan, n_classes, up_factor = 2, 4, 8, 3, 4
    H = W = 16
    x = jax.random.normal(k_x, (batch, in_chan, H, W), jnp.float32)   # NCHW input
    params = make_params(k_p, in_chan, mid_chan, n_classes, up_factor)

    out = segment_head_forward(x, params, up_factor)
    out = jax.block_until_ready(out)

    ref = jax.block_until_ready(segment_head_ref(x, params, up_factor))

    assert out.shape == (batch, n_classes, H * up_factor, W * up_factor), out.shape
    assert jnp.allclose(out, ref, rtol=5e-2, atol=5e-2), float(
        jnp.max(jnp.abs(out - ref)))

    print("KERNEL_OK")
</pallas_src>

<mosaic_0001>
module attributes {stable_mosaic.version = 11 : i64} {
  func.func @kernel(%arg0: i32, %arg1: memref<1x384x4xf32, #tpu.memory_space<vmem>>, %arg2: memref<9x4x8xbf16, #tpu.memory_space<vmem>>, %arg3: memref<1x8xf32, #tpu.memory_space<vmem>>, %arg4: memref<1x8xf32, #tpu.memory_space<vmem>>, %arg5: memref<9x8x16xbf16, #tpu.memory_space<vmem>>, %arg6: memref<1x16xf32, #tpu.memory_space<vmem>>, %arg7: memref<1x16xf32, #tpu.memory_space<vmem>>, %arg8: memref<16x128xbf16, #tpu.memory_space<vmem>>, %arg9: memref<1x128xf32, #tpu.memory_space<vmem>>, %arg10: memref<1x384x128xf32, #tpu.memory_space<vmem>>, %arg11: memref<448x4xf32, #tpu.memory_space<vmem>>, %arg12: memref<448x8xf32, #tpu.memory_space<vmem>>) attributes {dimension_semantics = [#tpu.dimension_semantics<parallel>], iteration_bounds = array<i64: 2>, scalar_prefetch = 0 : i64, scratch_operands = 2 : i64, tpu.core_type = #tpu.core_type<tc>, window_params = [{transform_indices = @transform_0, window_bounds = array<i64: 1, 384, 4>}, {pipeline_mode = #tpu.pipeline_mode<synchronous>, transform_indices = @transform_1, window_bounds = array<i64: 9, 4, 8>}, {pipeline_mode = #tpu.pipeline_mode<synchronous>, transform_indices = @transform_2, window_bounds = array<i64: 1, 8>}, {pipeline_mode = #tpu.pipeline_mode<synchronous>, transform_indices = @transform_3, window_bounds = array<i64: 1, 8>}, {pipeline_mode = #tpu.pipeline_mode<synchronous>, transform_indices = @transform_4, window_bounds = array<i64: 9, 8, 16>}, {pipeline_mode = #tpu.pipeline_mode<synchronous>, transform_indices = @transform_5, window_bounds = array<i64: 1, 16>}, {pipeline_mode = #tpu.pipeline_mode<synchronous>, transform_indices = @transform_6, window_bounds = array<i64: 1, 16>}, {pipeline_mode = #tpu.pipeline_mode<synchronous>, transform_indices = @transform_7, window_bounds = array<i64: 16, 128>}, {pipeline_mode = #tpu.pipeline_mode<synchronous>, transform_indices = @transform_8, window_bounds = array<i64: 1, 128>}, {transform_indices = @transform_9, window_bounds = array<i64: 1, 384, 128>}]} {
    %0 = tpu.iota {dimensions = array<i32: 0>} : vector<384x1xi32>
    %c24_i32 = arith.constant 24 : i32
    %c0_i32 = arith.constant 0 : i32
    %1 = arith.cmpi eq, %c24_i32, %c0_i32 : i32
    %c1_i32 = arith.constant 1 : i32
    %2 = arith.select %1, %c1_i32, %c24_i32 : i32
    %3 = vector.broadcast %2 : i32 to vector<384x1xi32>
    %4 = arith.remsi %0, %3 : vector<384x1xi32>
    %c0_i32_0 = arith.constant 0 : i32
    %5 = vector.broadcast %c0_i32_0 : i32 to vector<384x1xi32>
    %6 = arith.cmpi ne, %4, %5 : vector<384x1xi32>
    %c0_i32_1 = arith.constant 0 : i32
    %7 = vector.broadcast %c0_i32_1 : i32 to vector<384x1xi32>
    %8 = arith.cmpi slt, %4, %7 : vector<384x1xi32>
    %c0_i32_2 = arith.constant 0 : i32
    %9 = arith.cmpi slt, %2, %c0_i32_2 : i32
    %10 = vector.broadcast %9 : i1 to vector<384x1xi1>
    %11 = vector.broadcast %10 : vector<384x1xi1> to vector<384x1xi1>
    %12 = arith.xori %8, %11 : vector<384x1xi1>
    %13 = arith.andi %12, %6 : vector<384x1xi1>
    %14 = vector.broadcast %2 : i32 to vector<384x1xi32>
    %15 = arith.addi %4, %14 : vector<384x1xi32>
    %16 = arith.select %13, %15, %4 : vector<384x1xi1>, vector<384x1xi32>
    %c16_i32 = arith.constant 16 : i32
    %17 = vector.broadcast %c16_i32 : i32 to vector<384x1xi32>
    %18 = arith.cmpi slt, %16, %17 : vector<384x1xi32>
    %cst = arith.constant 0.000000e+00 : f32
    %19 = vector.broadcast %cst : f32 to vector<32x4xf32>
    %c0 = arith.constant 0 : index
    %c0_3 = arith.constant 0 : index
    %20 = vector.load %arg11[%c0, %c0_3] : memref<448x4xf32, #tpu.memory_space<vmem>>, vector<32x4xf32>
    tpu.vector_store %arg11[%c0, %c0_3], %19 {strides = array<i32>} : memref<448x4xf32, #tpu.memory_space<vmem>>, vector<32x4xf32>,
    %cst_4 = arith.constant 0.000000e+00 : f32
    %21 = vector.broadcast %cst_4 : f32 to vector<32x4xf32>
    %c416 = arith.constant 416 : index
    %c0_5 = arith.constant 0 : index
    %22 = vector.load %arg11[%c416, %c0_5] : memref<448x4xf32, #tpu.memory_space<vmem>>, vector<32x4xf32>
    tpu.vector_store %arg11[%c416, %c0_5], %21 {strides = array<i32>} : memref<448x4xf32, #tpu.memory_space<vmem>>, vector<32x4xf32>,
    %cst_6 = arith.constant 0.000000e+00 : f32
    %23 = vector.broadcast %cst_6 : f32 to vector<32x8xf32>
    %c0_7 = arith.constant 0 : index
    %c0_8 = arith.constant 0 : index
    %24 = vector.load %arg12[%c0_7, %c0_8] : memref<448x8xf32, #tpu.memory_space<vmem>>, vector<32x8xf32>
    tpu.vector_store %arg12[%c0_7, %c0_8], %23 {strides = array<i32>} : memref<448x8xf32, #tpu.memory_space<vmem>>, vector<32x8xf32>,
    %cst_9 = arith.constant 0.000000e+00 : f32
    %25 = vector.broadcast %cst_9 : f32 to vector<32x8xf32>
    %c416_10 = arith.constant 416 : index
    %c0_11 = arith.constant 0 : index
    %26 = vector.load %arg12[%c416_10, %c0_11] : memref<448x8xf32, #tpu.memory_space<vmem>>, vector<32x8xf32>
    tpu.vector_store %arg12[%c416_10, %c0_11], %25 {strides = array<i32>} : memref<448x8xf32, #tpu.memory_space<vmem>>, vector<32x8xf32>,
    %c0_12 = arith.constant 0 : index
    %c0_13 = arith.constant 0 : index
    %c0_14 = arith.constant 0 : index
    %27 = vector.load %arg1[%c0_12, %c0_13, %c0_14] : memref<1x384x4xf32, #tpu.memory_space<vmem>>, vector<1x384x4xf32>
    %28 = vector.shape_cast %27 : vector<1x384x4xf32> to vector<384x4xf32>
    %c32 = arith.constant 32 : index
    %c0_15 = arith.constant 0 : index
    %29 = vector.load %arg11[%c32, %c0_15] : memref<448x4xf32, #tpu.memory_space<vmem>>, vector<384x4xf32>
    tpu.vector_store %arg11[%c32, %c0_15], %28 {strides = array<i32>} : memref<448x4xf32, #tpu.memory_space<vmem>>, vector<384x4xf32>,
    %cst_16 = arith.constant 0.000000e+00 : f32
    %30 = vector.broadcast %cst_16 : f32 to vector<384x8xf32>
    %c7 = arith.constant 7 : index
    %c0_17 = arith.constant 0 : index
    %31 = vector.load %arg11[%c7, %c0_17] : memref<448x4xf32, #tpu.memory_space<vmem>>, vector<384x4xf32>
    %32 = arith.truncf %31 : vector<384x4xf32> to vector<384x4xbf16>
    %c0_18 = arith.constant 0 : index
    %c0_19 = arith.constant 0 : index
    %c0_20 = arith.constant 0 : index
    %33 = vector.load %arg2[%c0_18, %c0_19, %c0_20] : memref<9x4x8xbf16, #tpu.memory_space<vmem>>, vector<1x4x8xbf16>
    %34 = vector.shape_cast %33 : vector<1x4x8xbf16> to vector<4x8xbf16>
    %cst_21 = arith.constant dense<0.000000e+00> : vector<384x8xf32>
    %35 = tpu.matmul %32, %34, %cst_21 {dimension_numbers = #tpu.dot_dimension_numbers<[1], [0], [0], [1], [0, 0, 1, 1], [], []>} : vector<384x4xbf16>, vector<4x8xbf16>, vector<384x8xf32> -> vector<384x8xf32>
    %36 = arith.addf %30, %35 : vector<384x8xf32>
    %c8 = arith.constant 8 : index
    %c0_22 = arith.constant 0 : index
    %37 = vector.load %arg11[%c8, %c0_22] : memref<448x4xf32, #tpu.memory_space<vmem>>, vector<384x4xf32>
    %38 = arith.truncf %37 : vector<384x4xf32> to vector<384x4xbf16>
    %c1 = arith.constant 1 : index
    %c0_23 = arith.constant 0 : index
    %c0_24 = arith.constant 0 : index
    %39 = vector.load %arg2[%c1, %c0_23, %c0_24] : memref<9x4x8xbf16, #tpu.memory_space<vmem>>, vector<1x4x8xbf16>
    %40 = vector.shape_cast %39 : vector<1x4x8xbf16> to vector<4x8xbf16>
    %cst_25 = arith.constant dense<0.000000e+00> : vector<384x8xf32>
    %41 = tpu.matmul %38, %40, %cst_25 {dimension_numbers = #tpu.dot_dimension_numbers<[1], [0], [0], [1], [0, 0, 1, 1], [], []>} : vector<384x4xbf16>, vector<4x8xbf16>, vector<384x8xf32> -> vector<384x8xf32>
    %42 = arith.addf %36, %41 : vector<384x8xf32>
    %c9 = arith.constant 9 : index
    %c0_26 = arith.constant 0 : index
    %43 = vector.load %arg11[%c9, %c0_26] : memref<448x4xf32, #tpu.memory_space<vmem>>, vector<384x4xf32>
    %44 = arith.truncf %43 : vector<384x4xf32> to vector<384x4xbf16>
    %c2 = arith.constant 2 : index
    %c0_27 = arith.constant 0 : index
    %c0_28 = arith.constant 0 : index
    %45 = vector.load %arg2[%c2, %c0_27, %c0_28] : memref<9x4x8xbf16, #tpu.memory_space<vmem>>, vector<1x4x8xbf16>
    %46 = vector.shape_cast %45 : vector<1x4x8xbf16> to vector<4x8xbf16>
    %cst_29 = arith.constant dense<0.000000e+00> : vector<384x8xf32>
    %47 = tpu.matmul %44, %46, %cst_29 {dimension_numbers = #tpu.dot_dimension_numbers<[1], [0], [0], [1], [0, 0, 1, 1], [], []>} : vector<384x4xbf16>, vector<4x8xbf16>, vector<384x8xf32> -> vector<384x8xf32>
    %48 = arith.addf %42, %47 : vector<384x8xf32>
    %c31 = arith.constant 31 : index
    %c0_30 = arith.constant 0 : index
    %49 = vector.load %arg11[%c31, %c0_30] : memref<448x4xf32, #tpu.memory_space<vmem>>, vector<384x4xf32>
    %50 = arith.truncf %49 : vector<384x4xf32> to vector<384x4xbf16>
    %c3 = arith.constant 3 : index
    %c0_31 = arith.constant 0 : index
    %c0_32 = arith.constant 0 : index
    %51 = vector.load %arg2[%c3, %c0_31, %c0_32] : memref<9x4x8xbf16, #tpu.memory_space<vmem>>, vector<1x4x8xbf16>
    %52 = vector.shape_cast %51 : vector<1x4x8xbf16> to vector<4x8xbf16>
    %cst_33 = arith.constant dense<0.000000e+00> : vector<384x8xf32>
    %53 = tpu.matmul %50, %52, %cst_33 {dimension_numbers = #tpu.dot_dimension_numbers<[1], [0], [0], [1], [0, 0, 1, 1], [], []>} : vector<384x4xbf16>, vector<4x8xbf16>, vector<384x8xf32> -> vector<384x8xf32>
    %54 = arith.addf %48, %53 : vector<384x8xf32>
    %c32_34 = arith.constant 32 : index
    %c0_35 = arith.constant 0 : index
    %55 = vector.load %arg11[%c32_34, %c0_35] : memref<448x4xf32, #tpu.memory_space<vmem>>, vector<384x4xf32>
    %56 = arith.truncf %55 : vector<384x4xf32> to vector<384x4xbf16>
    %c4 = arith.constant 4 : index
    %c0_36 = arith.constant 0 : index
    %c0_37 = arith.constant 0 : index
    %57 = vector.load %arg2[%c4, %c0_36, %c0_37] : memref<9x4x8xbf16, #tpu.memory_space<vmem>>, vector<1x4x8xbf16>
    %58 = vector.shape_cast %57 : vector<1x4x8xbf16> to vector<4x8xbf16>
    %cst_38 = arith.constant dense<0.000000e+00> : vector<384x8xf32>
    %59 = tpu.matmul %56, %58, %cst_38 {dimension_numbers = #tpu.dot_dimension_numbers<[1], [0], [0], [1], [0, 0, 1, 1], [], []>} : vector<384x4xbf16>, vector<4x8xbf16>, vector<384x8xf32> -> vector<384x8xf32>
    %60 = arith.addf %54, %59 : vector<384x8xf32>
    %c33 = arith.constant 33 : index
    %c0_39 = arith.constant 0 : index
    %61 = vector.load %arg11[%c33, %c0_39] : memref<448x4xf32, #tpu.memory_space<vmem>>, vector<384x4xf32>
    %62 = arith.truncf %61 : vector<384x4xf32> to vector<384x4xbf16>
    %c5 = arith.constant 5 : index
    %c0_40 = arith.constant 0 : index
    %c0_41 = arith.constant 0 : index
    %63 = vector.load %arg2[%c5, %c0_40, %c0_41] : memref<9x4x8xbf16, #tpu.memory_space<vmem>>, vector<1x4x8xbf16>
    %64 = vector.shape_cast %63 : vector<1x4x8xbf16> to vector<4x8xbf16>
    %cst_42 = arith.constant dense<0.000000e+00> : vector<384x8xf32>
    %65 = tpu.matmul %62, %64, %cst_42 {dimension_numbers = #tpu.dot_dimension_numbers<[1], [0], [0], [1], [0, 0, 1, 1], [], []>} : vector<384x4xbf16>, vector<4x8xbf16>, vector<384x8xf32> -> vector<384x8xf32>
    %66 = arith.addf %60, %65 : vector<384x8xf32>
    %c55 = arith.constant 55 : index
    %c0_43 = arith.constant 0 : index
    %67 = vector.load %arg11[%c55, %c0_43] : memref<448x4xf32, #tpu.memory_space<vmem>>, vector<384x4xf32>
    %68 = arith.truncf %67 : vector<384x4xf32> to vector<384x4xbf16>
    %c6 = arith.constant 6 : index
    %c0_44 = arith.constant 0 : index
    %c0_45 = arith.constant 0 : index
    %69 = vector.load %arg2[%c6, %c0_44, %c0_45] : memref<9x4x8xbf16, #tpu.memory_space<vmem>>, vector<1x4x8xbf16>
    %70 = vector.shape_cast %69 : vector<1x4x8xbf16> to vector<4x8xbf16>
    %cst_46 = arith.constant dense<0.000000e+00> : vector<384x8xf32>
    %71 = tpu.matmul %68, %70, %cst_46 {dimension_numbers = #tpu.dot_dimension_numbers<[1], [0], [0], [1], [0, 0, 1, 1], [], []>} : vector<384x4xbf16>, vector<4x8xbf16>, vector<384x8xf32> -> vector<384x8xf32>
    %72 = arith.addf %66, %71 : vector<384x8xf32>
    %c56 = arith.constant 56 : index
    %c0_47 = arith.constant 0 : index
    %73 = vector.load %arg11[%c56, %c0_47] : memref<448x4xf32, #tpu.memory_space<vmem>>, vector<384x4xf32>
    %74 = arith.truncf %73 : vector<384x4xf32> to vector<384x4xbf16>
    %c7_48 = arith.constant 7 : index
    %c0_49 = arith.constant 0 : index
    %c0_50 = arith.constant 0 : index
    %75 = vector.load %arg2[%c7_48, %c0_49, %c0_50] : memref<9x4x8xbf16, #tpu.memory_space<vmem>>, vector<1x4x8xbf16>
    %76 = vector.shape_cast %75 : vector<1x4x8xbf16> to vector<4x8xbf16>
    %cst_51 = arith.constant dense<0.000000e+00> : vector<384x8xf32>
    %77 = tpu.matmul %74, %76, %cst_51 {dimension_numbers = #tpu.dot_dimension_numbers<[1], [0], [0], [1], [0, 0, 1, 1], [], []>} : vector<384x4xbf16>, vector<4x8xbf16>, vector<384x8xf32> -> vector<384x8xf32>
    %78 = arith.addf %72, %77 : vector<384x8xf32>
    %c57 = arith.constant 57 : index
    %c0_52 = arith.constant 0 : index
    %79 = vector.load %arg11[%c57, %c0_52] : memref<448x4xf32, #tpu.memory_space<vmem>>, vector<384x4xf32>
    %80 = arith.truncf %79 : vector<384x4xf32> to vector<384x4xbf16>
    %c8_53 = arith.constant 8 : index
    %c0_54 = arith.constant 0 : index
    %c0_55 = arith.constant 0 : index
    %81 = vector.load %arg2[%c8_53, %c0_54, %c0_55] : memref<9x4x8xbf16, #tpu.memory_space<vmem>>, vector<1x4x8xbf16>
    %82 = vector.shape_cast %81 : vector<1x4x8xbf16> to vector<4x8xbf16>
    %cst_56 = arith.constant dense<0.000000e+00> : vector<384x8xf32>
    %83 = tpu.matmul %80, %82, %cst_56 {dimension_numbers = #tpu.dot_dimension_numbers<[1], [0], [0], [1], [0, 0, 1, 1], [], []>} : vector<384x4xbf16>, vector<4x8xbf16>, vector<384x8xf32> -> vector<384x8xf32>
    %84 = arith.addf %78, %83 : vector<384x8xf32>
    %c0_57 = arith.constant 0 : index
    %c0_58 = arith.constant 0 : index
    %85 = vector.load %arg3[%c0_57, %c0_58] : memref<1x8xf32, #tpu.memory_space<vmem>>, vector<1x8xf32>
    %86 = vector.shape_cast %85 : vector<1x8xf32> to vector<8xf32>
    %87 = vector.shape_cast %86 : vector<8xf32> to vector<1x8xf32>
    %88 = vector.broadcast %87 : vector<1x8xf32> to vector<384x8xf32>
    %89 = arith.mulf %84, %88 : vector<384x8xf32>
    %c0_59 = arith.constant 0 : index
    %c0_60 = arith.constant 0 : index
    %90 = vector.load %arg4[%c0_59, %c0_60] : memref<1x8xf32, #tpu.memory_space<vmem>>, vector<1x8xf32>
    %91 = vector.shape_cast %90 : vector<1x8xf32> to vector<8xf32>
    %92 = vector.shape_cast %91 : vector<8xf32> to vector<1x8xf32>
    %93 = vector.broadcast %92 : vector<1x8xf32> to vector<384x8xf32>
    %94 = arith.addf %89, %93 : vector<384x8xf32>
    %cst_61 = arith.constant 0.000000e+00 : f32
    %95 = vector.broadcast %cst_61 : f32 to vector<384x8xf32>
    %96 = arith.maximumf %94, %95 : vector<384x8xf32>
    %cst_62 = arith.constant 0.000000e+00 : f32
    %97 = vector.shape_cast %18 : vector<384x1xi1> to vector<384x1xi1>
    %98 = vector.broadcast %97 : vector<384x1xi1> to vector<384x8xi1>
    %99 = vector.broadcast %cst_62 : f32 to vector<384x8xf32>
    %100 = arith.select %98, %96, %99 : vector<384x8xi1>, vector<384x8xf32>
    %c32_63 = arith.constant 32 : index
    %c0_64 = arith.constant 0 : index
    %101 = vector.load %arg12[%c32_63, %c0_64] : memref<448x8xf32, #tpu.memory_space<vmem>>, vector<384x8xf32>
    tpu.vector_store %arg12[%c32_63, %c0_64], %100 {strides = array<i32>} : memref<448x8xf32, #tpu.memory_space<vmem>>, vector<384x8xf32>,
    %cst_65 = arith.constant 0.000000e+00 : f32
    %102 = vector.broadcast %cst_65 : f32 to vector<384x16xf32>
    %c7_66 = arith.constant 7 : index
    %c0_67 = arith.constant 0 : index
    %103 = vector.load %arg12[%c7_66, %c0_67] : memref<448x8xf32, #tpu.memory_space<vmem>>, vector<384x8xf32>
    %104 = arith.truncf %103 : vector<384x8xf32> to vector<384x8xbf16>
    %c0_68 = arith.constant 0 : index
    %c0_69 = arith.constant 0 : index
    %c0_70 = arith.constant 0 : index
    %105 = vector.load %arg5[%c0_68, %c0_69, %c0_70] : memref<9x8x16xbf16, #tpu.memory_space<vmem>>, vector<1x8x16xbf16>
    %106 = vector.shape_cast %105 : vector<1x8x16xbf16> to vector<8x16xbf16>
    %cst_71 = arith.constant dense<0.000000e+00> : vector<384x16xf32>
    %107 = tpu.matmul %104, %106, %cst_71 {dimension_numbers = #tpu.dot_dimension_numbers<[1], [0], [0], [1], [0, 0, 1, 1], [], []>} : vector<384x8xbf16>, vector<8x16xbf16>, vector<384x16xf32> -> vector<384x16xf32>
    %108 = arith.addf %102, %107 : vector<384x16xf32>
    %c8_72 = arith.constant 8 : index
    %c0_73 = arith.constant 0 : index
    %109 = vector.load %arg12[%c8_72, %c0_73] : memref<448x8xf32, #tpu.memory_space<vmem>>, vector<384x8xf32>
    %110 = arith.truncf %109 : vector<384x8xf32> to vector<384x8xbf16>
    %c1_74 = arith.constant 1 : index
    %c0_75 = arith.constant 0 : index
    %c0_76 = arith.constant 0 : index
    %111 = vector.load %arg5[%c1_74, %c0_75, %c0_76] : memref<9x8x16xbf16, #tpu.memory_space<vmem>>, vector<1x8x16xbf16>
    %112 = vector.shape_cast %111 : vector<1x8x16xbf16> to vector<8x16xbf16>
    %cst_77 = arith.constant dense<0.000000e+00> : vector<384x16xf32>
    %113 = tpu.matmul %110, %112, %cst_77 {dimension_numbers = #tpu.dot_dimension_numbers<[1], [0], [0], [1], [0, 0, 1, 1], [], []>} : vector<384x8xbf16>, vector<8x16xbf16>, vector<384x16xf32> -> vector<384x16xf32>
    %114 = arith.addf %108, %113 : vector<384x16xf32>
    %c9_78 = arith.constant 9 : index
    %c0_79 = arith.constant 0 : index
    %115 = vector.load %arg12[%c9_78, %c0_79] : memref<448x8xf32, #tpu.memory_space<vmem>>, vector<384x8xf32>
    %116 = arith.truncf %115 : vector<384x8xf32> to vector<384x8xbf16>
    %c2_80 = arith.constant 2 : index
    %c0_81 = arith.constant 0 : index
    %c0_82 = arith.constant 0 : index
    %117 = vector.load %arg5[%c2_80, %c0_81, %c0_82] : memref<9x8x16xbf16, #tpu.memory_space<vmem>>, vector<1x8x16xbf16>
    %118 = vector.shape_cast %117 : vector<1x8x16xbf16> to vector<8x16xbf16>
    %cst_83 = arith.constant dense<0.000000e+00> : vector<384x16xf32>
    %119 = tpu.matmul %116, %118, %cst_83 {dimension_numbers = #tpu.dot_dimension_numbers<[1], [0], [0], [1], [0, 0, 1, 1], [], []>} : vector<384x8xbf16>, vector<8x16xbf16>, vector<384x16xf32> -> vector<384x16xf32>
    %120 = arith.addf %114, %119 : vector<384x16xf32>
    %c31_84 = arith.constant 31 : index
    %c0_85 = arith.constant 0 : index
    %121 = vector.load %arg12[%c31_84, %c0_85] : memref<448x8xf32, #tpu.memory_space<vmem>>, vector<384x8xf32>
    %122 = arith.truncf %121 : vector<384x8xf32> to vector<384x8xbf16>
    %c3_86 = arith.constant 3 : index
    %c0_87 = arith.constant 0 : index
    %c0_88 = arith.constant 0 : index
    %123 = vector.load %arg5[%c3_86, %c0_87, %c0_88] : memref<9x8x16xbf16, #tpu.memory_space<vmem>>, vector<1x8x16xbf16>
    %124 = vector.shape_cast %123 : vector<1x8x16xbf16> to vector<8x16xbf16>
    %cst_89 = arith.constant dense<0.000000e+00> : vector<384x16xf32>
    %125 = tpu.matmul %122, %124, %cst_89 {dimension_numbers = #tpu.dot_dimension_numbers<[1], [0], [0], [1], [0, 0, 1, 1], [], []>} : vector<384x8xbf16>, vector<8x16xbf16>, vector<384x16xf32> -> vector<384x16xf32>
    %126 = arith.addf %120, %125 : vector<384x16xf32>
    %c32_90 = arith.constant 32 : index
    %c0_91 = arith.constant 0 : index
    %127 = vector.load %arg12[%c32_90, %c0_91] : memref<448x8xf32, #tpu.memory_space<vmem>>, vector<384x8xf32>
    %128 = arith.truncf %127 : vector<384x8xf32> to vector<384x8xbf16>
    %c4_92 = arith.constant 4 : index
    %c0_93 = arith.constant 0 : index
    %c0_94 = arith.constant 0 : index
    %129 = vector.load %arg5[%c4_92, %c0_93, %c0_94] : memref<9x8x16xbf16, #tpu.memory_space<vmem>>, vector<1x8x16xbf16>
    %130 = vector.shape_cast %129 : vector<1x8x16xbf16> to vector<8x16xbf16>
    %cst_95 = arith.constant dense<0.000000e+00> : vector<384x16xf32>
    %131 = tpu.matmul %128, %130, %cst_95 {dimension_numbers = #tpu.dot_dimension_numbers<[1], [0], [0], [1], [0, 0, 1, 1], [], []>} : vector<384x8xbf16>, vector<8x16xbf16>, vector<384x16xf32> -> vector<384x16xf32>
    %132 = arith.addf %126, %131 : vector<384x16xf32>
    %c33_96 = arith.constant 33 : index
    %c0_97 = arith.constant 0 : index
    %133 = vector.load %arg12[%c33_96, %c0_97] : memref<448x8xf32, #tpu.memory_space<vmem>>, vector<384x8xf32>
    %134 = arith.truncf %133 : vector<384x8xf32> to vector<384x8xbf16>
    %c5_98 = arith.constant 5 : index
    %c0_99 = arith.constant 0 : index
    %c0_100 = arith.constant 0 : index
    %135 = vector.load %arg5[%c5_98, %c0_99, %c0_100] : memref<9x8x16xbf16, #tpu.memory_space<vmem>>, vector<1x8x16xbf16>
    %136 = vector.shape_cast %135 : vector<1x8x16xbf16> to vector<8x16xbf16>
    %cst_101 = arith.constant dense<0.000000e+00> : vector<384x16xf32>
    %137 = tpu.matmul %134, %136, %cst_101 {dimension_numbers = #tpu.dot_dimension_numbers<[1], [0], [0], [1], [0, 0, 1, 1], [], []>} : vector<384x8xbf16>, vector<8x16xbf16>, vector<384x16xf32> -> vector<384x16xf32>
    %138 = arith.addf %132, %137 : vector<384x16xf32>
    %c55_102 = arith.constant 55 : index
    %c0_103 = arith.constant 0 : index
    %139 = vector.load %arg12[%c55_102, %c0_103] : memref<448x8xf32, #tpu.memory_space<vmem>>, vector<384x8xf32>
    %140 = arith.truncf %139 : vector<384x8xf32> to vector<384x8xbf16>
    %c6_104 = arith.constant 6 : index
    %c0_105 = arith.constant 0 : index
    %c0_106 = arith.constant 0 : index
    %141 = vector.load %arg5[%c6_104, %c0_105, %c0_106] : memref<9x8x16xbf16, #tpu.memory_space<vmem>>, vector<1x8x16xbf16>
    %142 = vector.shape_cast %141 : vector<1x8x16xbf16> to vector<8x16xbf16>
    %cst_107 = arith.constant dense<0.000000e+00> : vector<384x16xf32>
    %143 = tpu.matmul %140, %142, %cst_107 {dimension_numbers = #tpu.dot_dimension_numbers<[1], [0], [0], [1], [0, 0, 1, 1], [], []>} : vector<384x8xbf16>, vector<8x16xbf16>, vector<384x16xf32> -> vector<384x16xf32>
    %144 = arith.addf %138, %143 : vector<384x16xf32>
    %c56_108 = arith.constant 56 : index
    %c0_109 = arith.constant 0 : index
    %145 = vector.load %arg12[%c56_108, %c0_109] : memref<448x8xf32, #tpu.memory_space<vmem>>, vector<384x8xf32>
    %146 = arith.truncf %145 : vector<384x8xf32> to vector<384x8xbf16>
    %c7_110 = arith.constant 7 : index
    %c0_111 = arith.constant 0 : index
    %c0_112 = arith.constant 0 : index
    %147 = vector.load %arg5[%c7_110, %c0_111, %c0_112] : memref<9x8x16xbf16, #tpu.memory_space<vmem>>, vector<1x8x16xbf16>
    %148 = vector.shape_cast %147 : vector<1x8x16xbf16> to vector<8x16xbf16>
    %cst_113 = arith.constant dense<0.000000e+00> : vector<384x16xf32>
    %149 = tpu.matmul %146, %148, %cst_113 {dimension_numbers = #tpu.dot_dimension_numbers<[1], [0], [0], [1], [0, 0, 1, 1], [], []>} : vector<384x8xbf16>, vector<8x16xbf16>, vector<384x16xf32> -> vector<384x16xf32>
    %150 = arith.addf %144, %149 : vector<384x16xf32>
    %c57_114 = arith.constant 57 : index
    %c0_115 = arith.constant 0 : index
    %151 = vector.load %arg12[%c57_114, %c0_115] : memref<448x8xf32, #tpu.memory_space<vmem>>, vector<384x8xf32>
    %152 = arith.truncf %151 : vector<384x8xf32> to vector<384x8xbf16>
    %c8_116 = arith.constant 8 : index
    %c0_117 = arith.constant 0 : index
    %c0_118 = arith.constant 0 : index
    %153 = vector.load %arg5[%c8_116, %c0_117, %c0_118] : memref<9x8x16xbf16, #tpu.memory_space<vmem>>, vector<1x8x16xbf16>
    %154 = vector.shape_cast %153 : vector<1x8x16xbf16> to vector<8x16xbf16>
    %cst_119 = arith.constant dense<0.000000e+00> : vector<384x16xf32>
    %155 = tpu.matmul %152, %154, %cst_119 {dimension_numbers = #tpu.dot_dimension_numbers<[1], [0], [0], [1], [0, 0, 1, 1], [], []>} : vector<384x8xbf16>, vector<8x16xbf16>, vector<384x16xf32> -> vector<384x16xf32>
    %156 = arith.addf %150, %155 : vector<384x16xf32>
    %c0_120 = arith.constant 0 : index
    %c0_121 = arith.constant 0 : index
    %157 = vector.load %arg6[%c0_120, %c0_121] : memref<1x16xf32, #tpu.memory_space<vmem>>, vector<1x16xf32>
    %158 = vector.shape_cast %157 : vector<1x16xf32> to vector<16xf32>
    %159 = vector.shape_cast %158 : vector<16xf32> to vector<1x16xf32>
    %160 = vector.broadcast %159 : vector<1x16xf32> to vector<384x16xf32>
    %161 = arith.mulf %156, %160 : vector<384x16xf32>
    %c0_122 = arith.constant 0 : index
    %c0_123 = arith.constant 0 : index
    %162 = vector.load %arg7[%c0_122, %c0_123] : memref<1x16xf32, #tpu.memory_space<vmem>>, vector<1x16xf32>
    %163 = vector.shape_cast %162 : vector<1x16xf32> to vector<16xf32>
    %164 = vector.shape_cast %163 : vector<16xf32> to vector<1x16xf32>
    %165 = vector.broadcast %164 : vector<1x16xf32> to vector<384x16xf32>
    %166 = arith.addf %161, %165 : vector<384x16xf32>
    %cst_124 = arith.constant 0.000000e+00 : f32
    %167 = vector.broadcast %cst_124 : f32 to vector<384x16xf32>
    %168 = arith.maximumf %166, %167 : vector<384x16xf32>
    %169 = arith.truncf %168 : vector<384x16xf32> to vector<384x16xbf16>
    %c0_125 = arith.constant 0 : index
    %c0_126 = arith.constant 0 : index
    %170 = vector.load %arg8[%c0_125, %c0_126] : memref<16x128xbf16, #tpu.memory_space<vmem>>, vector<16x128xbf16>
    %cst_127 = arith.constant dense<0.000000e+00> : vector<384x128xf32>
    %171 = tpu.matmul %169, %170, %cst_127 {dimension_numbers = #tpu.dot_dimension_numbers<[1], [0], [0], [1], [0, 0, 1, 1], [], []>} : vector<384x16xbf16>, vector<16x128xbf16>, vector<384x128xf32> -> vector<384x128xf32>
    %c0_128 = arith.constant 0 : index
    %c0_129 = arith.constant 0 : index
    %172 = vector.load %arg9[%c0_128, %c0_129] : memref<1x128xf32, #tpu.memory_space<vmem>>, vector<1x128xf32>
    %173 = vector.shape_cast %172 : vector<1x128xf32> to vector<128xf32>
    %174 = vector.shape_cast %173 : vector<128xf32> to vector<1x128xf32>
    %175 = vector.broadcast %174 : vector<1x128xf32> to vector<384x128xf32>
    %176 = arith.addf %171, %175 : vector<384x128xf32>
    %c0_130 = arith.constant 0 : index
    %c0_131 = arith.constant 0 : index
    %c0_132 = arith.constant 0 : index
    %177 = vector.load %arg10[%c0_130, %c0_131, %c0_132] : memref<1x384x128xf32, #tpu.memory_space<vmem>>, vector<1x384x128xf32>
    %178 = vector.shape_cast %177 : vector<1x384x128xf32> to vector<384x128xf32>
    %179 = vector.shape_cast %176 : vector<384x128xf32> to vector<1x384x128xf32>
    tpu.vector_store %arg10[%c0_130, %c0_131, %c0_132], %179 {strides = array<i32>} : memref<1x384x128xf32, #tpu.memory_space<vmem>>, vector<1x384x128xf32>,
    return
  }
  func.func @transform_0(%arg0: i32) -> (i32, i32, i32) {
    %c0_i32 = arith.constant 0 : i32
    %c0_i32_0 = arith.constant 0 : i32
    %c0_i32_1 = arith.constant 0 : i32
    return %arg0, %c0_i32, %c0_i32_0 : i32, i32, i32
  }
  func.func @transform_1(%arg0: i32) -> (i32, i32, i32) {
    %c0_i32 = arith.constant 0 : i32
    %c0_i32_0 = arith.constant 0 : i32
    %c0_i32_1 = arith.constant 0 : i32
    %c0_i32_2 = arith.constant 0 : i32
    return %c0_i32, %c0_i32_0, %c0_i32_1 : i32, i32, i32
  }
  func.func @transform_2(%arg0: i32) -> (i32, i32) {
    %c0_i32 = arith.constant 0 : i32
    %c0_i32_0 = arith.constant 0 : i32
    %c0_i32_1 = arith.constant 0 : i32
    return %c0_i32, %c0_i32_0 : i32, i32
  }
  func.func @transform_3(%arg0: i32) -> (i32, i32) {
    %c0_i32 = arith.constant 0 : i32
    %c0_i32_0 = arith.constant 0 : i32
    %c0_i32_1 = arith.constant 0 : i32
    return %c0_i32, %c0_i32_0 : i32, i32
  }
  func.func @transform_4(%arg0: i32) -> (i32, i32, i32) {
    %c0_i32 = arith.constant 0 : i32
    %c0_i32_0 = arith.constant 0 : i32
    %c0_i32_1 = arith.constant 0 : i32
    %c0_i32_2 = arith.constant 0 : i32
    return %c0_i32, %c0_i32_0, %c0_i32_1 : i32, i32, i32
  }
  func.func @transform_5(%arg0: i32) -> (i32, i32) {
    %c0_i32 = arith.constant 0 : i32
    %c0_i32_0 = arith.constant 0 : i32
    %c0_i32_1 = arith.constant 0 : i32
    return %c0_i32, %c0_i32_0 : i32, i32
  }
  func.func @transform_6(%arg0: i32) -> (i32, i32) {
    %c0_i32 = arith.constant 0 : i32
    %c0_i32_0 = arith.constant 0 : i32
    %c0_i32_1 = arith.constant 0 : i32
    return %c0_i32, %c0_i32_0 : i32, i32
  }
  func.func @transform_7(%arg0: i32) -> (i32, i32) {
    %c0_i32 = arith.constant 0 : i32
    %c0_i32_0 = arith.constant 0 : i32
    %c0_i32_1 = arith.constant 0 : i32
    return %c0_i32, %c0_i32_0 : i32, i32
  }
  func.func @transform_8(%arg0: i32) -> (i32, i32) {
    %c0_i32 = arith.constant 0 : i32
    %c0_i32_0 = arith.constant 0 : i32
    %c0_i32_1 = arith.constant 0 : i32
    return %c0_i32, %c0_i32_0 : i32, i32
  }
  func.func @transform_9(%arg0: i32) -> (i32, i32, i32) {
    %c0_i32 = arith.constant 0 : i32
    %c0_i32_0 = arith.constant 0 : i32
    %c0_i32_1 = arith.constant 0 : i32
    return %arg0, %c0_i32, %c0_i32_0 : i32, i32, i32
  }
}

</mosaic_0001>

<bundles_post_ra>
// kernel: tpu_custom_call.1
= control target key start
LH: loop header
LB: loop body
LE: loop exit
PB: predicated region body
PF: predicated region fallthrough
CT: control target
= control target key end

     0   :  { %14 = vsyncpa [#allocation5], 0  ;;  %s13948_s0 = inlined_call_operand.vmem [shape: f32[2,384,4], index: 0, kind: input, shape index: {}]   ;;  %s13949_s1 = inlined_call_operand.vmem [shape: bf16[9,4,8], index: 1, kind: input, shape index: {}]   ;;  %s13950_s2 = inlined_call_operand.vmem [shape: f32[1,8], index: 2, kind: input, shape index: {}]   ;;  %s13951_s3 = inlined_call_operand.vmem [shape: f32[1,8], index: 3, kind: input, shape index: {}]   ;;  %s13952_s4 = inlined_call_operand.vmem [shape: bf16[9,8,16], index: 4, kind: input, shape index: {}]   ;;  %s13953_s5 = inlined_call_operand.vmem [shape: f32[1,16], index: 5, kind: input, shape index: {}]   ;;  %s13954_s6 = inlined_call_operand.vmem [shape: f32[1,16], index: 6, kind: input, shape index: {}]   ;;  %s13955_s7 = inlined_call_operand.vmem [shape: bf16[16,128], index: 7, kind: input, shape index: {}]   ;;  %s13956_s8 = inlined_call_operand.vmem [shape: f32[1,128], index: 8, kind: input, shape index: {}]   ;;  %s13957_s9 = inlined_call_operand.hbm [shape: f32[2,384,128], index: 9, kind: output, shape index: {}]  }
   0x1   :  { %16 = vsyncpa [#allocation5 + $0x1], 0  ;;  %s9381_s30 = smov 0   ;;  %s9383_s10 = smov 0  }
   0x2   :  { %s9385_s11 = smov 0   ;;  %s9387_s12 = smov 0  }
   0x3 LB: > { %s9402_s13 = sadd.s32 4294967295, %s9325_s12   ;;  %s8711_s14 = sadd.s32 4294967294, %s9325_s12   ;;  %s9325_s12 = sphi %s9387_s12, %s14602_s12   ;;  %s9321_s11 = sphi %s9385_s11, %s14601_s11   ;;  %s9317_s10 = sphi %s9383_s10, %s14600_s10   ;;  %s9313_s30 = sphi %s9381_s30, %s14599_s30  }
   0x4   : > { %s9406_s15 = sadd.s32 1, %s9325_s12   ;;  %s223_s16 = sadd.s32 1, %s9321_s11 }
   0x5   : > { %s220_s17 = ssub.s32 %s9325_s12, %s9406_s15  ;;  %p233_p0 = scmp.ne.s32.totalorder %s9321_s11, %s9317_s10 }
   0x6   : > { %p221_p1 = scmp.eq.s32.totalorder %s220_s17, 0  ;;  %p234_p2 = scmp.eq.s32.totalorder %s9402_s13, 1 }
   0x7   : > { %p239_p3 = scmp.ne.s32.totalorder %s9317_s10, %s9313_s30  ;;  %p240_p4 = scmp.eq.s32.totalorder %s8711_s14, 1 }
   0x8   : > { %s9417_s18 = scalar_select %p221_p1, %s9321_s11, %s223_s16  }
   0x9   : > { %p9419_p5 = por %p234_p2, %p233_p0  ;;  %p9423_p6 = por %p240_p4, %p239_p3 }
   0xa   : > { %p8714_p7 = scmp.ge.s32.totalorder %s9325_s12, 1  ;;  %p290_p8 = scmp.lt.s32.totalorder %s9325_s12, 3 }
   0xc   : > { %p291_p9 = pnand %p8714_p7, %p290_p8 }
   0xe   : > { %294 = sbr.rel (%p291_p9) target bundleno = 2303 (0x8ff), region = 56 }
  0x13   : > { %v8716_v0 = vld [vmem:[%s13949_s1 + $0x2] sm:$0x3]  ;;  %vm2394_vm0 = vcmask 1041408   ;;  %vm2061_vm1 = vcmask 31744   ;;  %p326_p10 = scmp.lt.s32.totalorder %s9402_s13, 1  ;;  %v13958_v2 = vmov 0.0  }
  0x14   : > { %v2396_v1 = vsel %vm2394_vm0, %v8716_v0, 0  ;;  %2063 = vst.msk [vmem:[#allocation2 + $0x8] sm:$0xff] %vm2061_vm1, %v13958_v2  ;;  %v8765_v3 = vld [vmem:[%s13949_s1 + $0x4] sm:$0x3]  ;;  %v2247_v4 = vld [vmem:[%s13949_s1] sm:$0x3] }
  0x15   : > { %2405 = vmatpush.bf16.msra.mxu0 %v2396_v1  ;;  %2064 = vst.msk [vmem:[#allocation2 + $0x10] sm:$0xff] %vm2061_vm1, %v13958_v2  ;;  %v2878_v5 = vsel %vm2394_vm0, %v8765_v3, 0  ;;  %9196 = vmatpush.bf16.msra.mxu3 %v2396_v1  ;;  %v2600_v6 = vsel %vm2394_vm0, %v2247_v4, 0  ;;  %s327_s27 = scalar_select %p326_p10, %s9402_s13, 1  ;;  %v8815_v7 = vld [vmem:[%s13949_s1 + $0x8] sm:$0x3] }
  0x16   : > { %2062 = vst.msk [vmem:[#allocation2] sm:$0xff] %vm2061_vm1, %v13958_v2  ;;  %2887 = vmatpush.bf16.msra.mxu2 %v2878_v5  ;;  %2609 = vmatpush.bf16.msra.mxu1 %v2600_v6  ;;  %v3530_v8 = vsel %vm2394_vm0, %v8815_v7, 0  ;;  %vm5576_vm2 = vcmask 1043456   ;;  %vm2070_vm3 = vcmask 64512   ;;  %s323_s28 = sand.u32 1, %s9317_s10   ;;  %s9201_s25 = smul.u32 384, %s9402_s13 }
  0x17   : > { %2065 = vst.msk [vmem:[#allocation2 + $0x18] sm:$0xff] %vm2061_vm1, %v13958_v2  ;;  %s9200_s14 = smul.u32 384, %s327_s27  ;;  %s8634_s22 = scalar_lea.sflag [#allocation5], %s323_s28 }
  0x18   : > { %2066 = vst.msk [vmem:[#allocation2 + $0x1a0] sm:$0xff] %vm2061_vm1, %v13958_v2  ;;  %s9199_s29 = smul.u32 384, %s323_s28 }
  0x19   : > { %9197 = vmatpush.bf16.msrb.mxu3 %v2600_v6  ;;  %3539 = vmatpush.bf16.msrb.mxu0 %v3530_v8  ;;  %2067 = vst.msk [vmem:[#allocation2 + $0x1a8] sm:$0xff] %vm2061_vm1, %v13958_v2  ;;  %s9462_s21 = scalar_lea.vmem %s13948_s0, %s9200_s14 }
  0x1a   : > { %2068 = vst.msk [vmem:[#allocation2 + $0x1b0] sm:$0xff] %vm2061_vm1, %v13958_v2  ;;  %v2112_v9 = vld [vmem:[%s9462_s21 + $0x108] sm:$0xff]  ;;  %v2113_v10 = vld [vmem:[%s9462_s21 + $0x110] sm:$0xff]  ;;  %v2079_v12 = vld [vmem:[%s9462_s21] sm:$0xff]  ;;  %s13635_s17 = scalar_lea.vmem [#allocation4], %s9199_s29  ;;  %s8645_s29 = scalar_lea.hbm %s13957_s9, %s9201_s25 }
  0x1b   : > { %v2248_v11 = vld [vmem:[#allocation2 + $0x8] sm:$0xff]  ;;  %2069 = vst.msk [vmem:[#allocation2 + $0x1b8] sm:$0xff] %vm2061_vm1, %v13958_v2  ;;  %v2114_v19 = vld [vmem:[%s9462_s21 + $0x118] sm:$0xff]  ;;  %v2115_v22 = vld [vmem:[%s9462_s21 + $0x120] sm:$0xff]  ;;  %s8646_s14 = sshll.u32 %s13635_s17, 4  ;;  %s8648_s16 = sshll.u32 %s8645_s29, 4  ;;  %s8647_s14 = int_to_ptr.vmem [resolvable:$true] %s8646_s14  ;;  %s8649_s16 = int_to_ptr.hbm [resolvable:$true] %s8648_s16 }
  0x1c   : > { %v2080_v13 = vld [vmem:[%s9462_s21 + $0x8] sm:$0xff]  ;;  %v2249_v14 = vld [vmem:[#allocation2 + $0x10] sm:$0xff]  ;;  %2160 = vst.msk [vmem:[#allocation2 + $0x128] sm:$0xff] %vm2061_vm1, %v2112_v9  ;;  %v2082_v25 = vld [vmem:[%s9462_s21 + $0x18] sm:$0xff]  ;;  %s9277_s13 = sshra.s32 %s8649_s16, 4  ;;  %s9283_s25 = scalar_lea.hbm %s13957_s9, 768  ;;  %s9278_s13 = int_to_ptr.hbm [resolvable:$true] %s9277_s13 }
  0x1d   : > { %v2731_v15 = vld [vmem:[#allocation2 + $0x9] sm:$0xff]  ;;  %v2296_v17 = vpack.c.bf16 %v2249_v14, %v2248_v11  ;;  %2161 = vst.msk [vmem:[#allocation2 + $0x130] sm:$0xff] %vm2061_vm1, %v2113_v10  ;;  %v2083_v31 = vld [vmem:[%s9462_s21 + $0x20] sm:$0xff]  ;;  %v2118_v41 = vld [vmem:[%s9462_s21 + $0x138] sm:$0xff]  ;;  %s9279_s23 = scalar_lea.hbm %s9278_s13, 384  ;;  %p9284_p0 = scmp.lt.s32.totalorder %s9278_s13, %s13957_s9 }
  0x1e   : > { %v2176_v16 = vld [vmem:[#allocation2 + $0xf] sm:$0xff]  ;;  %v2175_v18 = vld [vmem:[#allocation2 + $0x7] sm:$0xff]  ;;  %2127 = vst.msk [vmem:[#allocation2 + $0x20] sm:$0xff] %vm2061_vm1, %v2079_v12  ;;  %v2250_v32 = vld [vmem:[#allocation2 + $0x18] sm:$0xff]  ;;  %p9280_p11 = scmp.ne.s32.totalorder %s9278_s13, %s9279_s23  ;;  %p9285_p1 = scmp.lt.s32.totalorder %s9283_s25, %s9279_s23 }
  0x1f   : > { %v2732_v20 = vld [vmem:[#allocation2 + $0x11] sm:$0xff]  ;;  %v2223_v21 = vpack.c.bf16 %v2176_v16, %v2175_v18  ;;  %8717 = vmatmul.msk.bf16.vlgmr.msra.gmra.mxu0 %vm2061_vm1, %v2296_v17  ;;  %2128 = vst.msk [vmem:[#allocation2 + $0x28] sm:$0xff] %vm2061_vm1, %v2080_v13  ;;  %v2116_v26 = vld [vmem:[%s9462_s21 + $0x128] sm:$0xff]  ;;  %v2119_v42 = vld [vmem:[%s9462_s21 + $0x140] sm:$0xff] }
  0x20   : > { %v2779_v23 = vpack.c.bf16 %v2732_v20, %v2731_v15  ;;  %v2081_v24 = vld [vmem:[%s9462_s21 + $0x10] sm:$0xff]  ;;  %2162 = vst.msk [vmem:[#allocation2 + $0x138] sm:$0xff] %vm2061_vm1, %v2114_v19  ;;  %v2084_v34 = vld [vmem:[%s9462_s21 + $0x28] sm:$0xff]  ;;  %v2086_v50 = vld [vmem:[%s9462_s21 + $0x38] sm:$0xff]  ;;  %p9281_p12 = pnand %p9280_p11, %p9419_p5  ;;  %p9286_p2 = por %p9285_p1, %p9284_p0 }
  0x21   : > { %8741 = vmatmul.msk.bf16.vlgmr.msra.gmra.mxu1 %vm2061_vm1, %v2223_v21  ;;  %2163 = vst.msk [vmem:[#allocation2 + $0x140] sm:$0xff] %vm2061_vm1, %v2115_v22  ;;  %v2117_v27 = vld [vmem:[%s9462_s21 + $0x130] sm:$0xff]  ;;  %v2120_v57 = vld [vmem:[%s9462_s21 + $0x148] sm:$0xff]  ;;  %v2087_v63 = vld [vmem:[%s9462_s21 + $0x40] sm:$0xff] }
  0x22   : > { %8766 = vmatmul.msk.bf16.vlgmr.msra.gmra.mxu2 %vm2061_vm1, %v2779_v23  ;;  %2129 = vst.msk [vmem:[#allocation2 + $0x30] sm:$0xff] %vm2061_vm1, %v2081_v24  ;;  %v2177_v35 = vld [vmem:[#allocation2 + $0x17] sm:$0xff]  ;;  %v2088_v3 = vld [vmem:[%s9462_s21 + $0x48] sm:$0xff]  ;;  %v2123_v11 = vld [vmem:[%s9462_s21 + $0x160] sm:$0xff]  ;;  %p9282_p13 = pneg %p9281_p12 }
  0x23   : > { %v2284_v28 = vld [vmem:[#allocation2 + $0x128] sm:$0xff]  ;;  %2130 = vst.msk [vmem:[#allocation2 + $0x38] sm:$0xff] %vm2061_vm1, %v2082_v25  ;;  %v2085_v47 = vld [vmem:[%s9462_s21 + $0x30] sm:$0xff]  ;;  %v2122_v10 = vld [vmem:[%s9462_s21 + $0x158] sm:$0xff] }
  0x24   : > { %v2285_v29 = vld [vmem:[#allocation2 + $0x130] sm:$0xff]  ;;  %2164 = vst.msk [vmem:[#allocation2 + $0x148] sm:$0xff] %vm2061_vm1, %v2116_v26  ;;  %v2090_v19 = vld [vmem:[%s9462_s21 + $0x58] sm:$0xff]  ;;  %v2111_v26 = vld [vmem:[%s9462_s21 + $0x100] sm:$0xff]  ;;  %p9287_p3 = pnand %p9286_p2, %p9282_p13 }
  0x25   : > { %v2314_v30 = vpack.c.bf16 %v2285_v29, %v2284_v28  ;;  %2165 = vst.msk [vmem:[#allocation2 + $0x150] sm:$0xff] %vm2061_vm1, %v2117_v27  ;;  %v9493_v33 = vld [vmem:[#allocation2 + $0x20] sm:$0xff]  ;;  %v2121_v58 = vld [vmem:[%s9462_s21 + $0x150] sm:$0xff] }
  0x26   : > { %2131 = vst.msk [vmem:[#allocation2 + $0x40] sm:$0xff] %vm2061_vm1, %v2083_v31  ;;  %v9497_v36 = vld [vmem:[#allocation2 + $0x1f] sm:$0xff]  ;;  %v2297_v39 = vpack.c.bf16 %v9493_v33, %v2250_v32  ;;  %v9512_v48 = vld [vmem:[#allocation2 + $0x28] sm:$0xff]  ;;  %v2089_v16 = vld [vmem:[%s9462_s21 + $0x50] sm:$0xff] }
  0x27   : > { %8735 = vmatmul.msk.bf16.vlgmr.msra.gmra.mxu3 %vm2061_vm1, %v2314_v30  ;;  %2132 = vst.msk [vmem:[#allocation2 + $0x48] sm:$0xff] %vm2061_vm1, %v2084_v34  ;;  %v2733_v37 = vld [vmem:[#allocation2 + $0x19] sm:$0xff]  ;;  %v2734_v38 = vld [vmem:[#allocation2 + $0x21] sm:$0xff]  ;;  %v2224_v40 = vpack.c.bf16 %v9497_v36, %v2177_v35 }
  0x28   : > { %9198 = vmatpush.bf16.msra.mxu3 %v2878_v5  ;;  %v2780_v43 = vpack.c.bf16 %v2734_v38, %v2733_v37  ;;  %2166 = vst.msk [vmem:[#allocation2 + $0x158] sm:$0xff] %vm2061_vm1, %v2118_v41  ;;  %v2286_v44 = vld [vmem:[#allocation2 + $0x138] sm:$0xff]  ;;  %v2287_v45 = vld [vmem:[#allocation2 + $0x140] sm:$0xff]  ;;  %v2092_v35 = vld [vmem:[%s9462_s21 + $0x68] sm:$0xff] }
  0x29   : > { %2167 = vst.msk [vmem:[#allocation2 + $0x160] sm:$0xff] %vm2061_vm1, %v2119_v42  ;;  %v2315_v46 = vpack.c.bf16 %v2287_v45, %v2286_v44  ;;  %v9514_v49 = vld [vmem:[#allocation2 + $0x30] sm:$0xff]  ;;  %v9517_v51 = vld [vmem:[#allocation2 + $0x27] sm:$0xff] }
  0x2a   : > { %2133 = vst.msk [vmem:[#allocation2 + $0x50] sm:$0xff] %vm2061_vm1, %v2085_v47  ;;  %v9519_v52 = vld [vmem:[#allocation2 + $0x2f] sm:$0xff]  ;;  %v2298_v55 = vpack.c.bf16 %v9514_v49, %v9512_v48  ;;  %v9539_v0 = vld [vmem:[#allocation2 + $0x38] sm:$0xff]  ;;  %v2091_v31 = vld [vmem:[%s9462_s21 + $0x60] sm:$0xff] }
  0x2b   : > { %2134 = vst.msk [vmem:[#allocation2 + $0x58] sm:$0xff] %vm2061_vm1, %v2086_v50  ;;  %v9522_v53 = vld [vmem:[#allocation2 + $0x29] sm:$0xff]  ;;  %v2736_v54 = vld [vmem:[#allocation2 + $0x31] sm:$0xff]  ;;  %v2225_v56 = vpack.c.bf16 %v9519_v52, %v9517_v51 }
  0x2c   : > { %v2781_v59 = vpack.c.bf16 %v2736_v54, %v9522_v53  ;;  %2168 = vst.msk [vmem:[#allocation2 + $0x168] sm:$0xff] %vm2061_vm1, %v2120_v57  ;;  %v2288_v60 = vld [vmem:[#allocation2 + $0x148] sm:$0xff]  ;;  %v2289_v61 = vld [vmem:[#allocation2 + $0x150] sm:$0xff] }
  0x2d   : > { %2169 = vst.msk [vmem:[#allocation2 + $0x170] sm:$0xff] %vm2061_vm1, %v2121_v58  ;;  %v2316_v62 = vpack.c.bf16 %v2289_v61, %v2288_v60  ;;  %v9541_v1 = vld [vmem:[#allocation2 + $0x40] sm:$0xff]  ;;  %v9544_v4 = vld [vmem:[#allocation2 + $0x37] sm:$0xff] }
  0x2e   : > { %2135 = vst.msk [vmem:[#allocation2 + $0x60] sm:$0xff] %vm2061_vm1, %v2087_v63  ;;  %v9546_v5 = vld [vmem:[#allocation2 + $0x3f] sm:$0xff]  ;;  %v2299_v8 = vpack.c.bf16 %v9541_v1, %v9539_v0  ;;  %v9569_v17 = vld [vmem:[#allocation2 + $0x48] sm:$0xff]  ;;  %v2093_v47 = vld [vmem:[%s9462_s21 + $0x70] sm:$0xff] }
  0x2f   : > { %8718 = vmatmul.msk.bf16.gmra.mxu0 %vm2061_vm1, %v2297_v39  ;;  %2136 = vst.msk [vmem:[#allocation2 + $0x68] sm:$0xff] %vm2061_vm1, %v2088_v3  ;;  %v9549_v6 = vld [vmem:[#allocation2 + $0x39] sm:$0xff]  ;;  %v2738_v7 = vld [vmem:[#allocation2 + $0x41] sm:$0xff]  ;;  %v9555_v9 = vpack.c.bf16 %v9546_v5, %v9544_v4  ;;  %v2212_v3 = vld [vmem:[#allocation2 + $0x12f] sm:$0xff] }
  0x30   : > { %v2782_v12 = vpack.c.bf16 %v2738_v7, %v9549_v6  ;;  %2170 = vst.msk [vmem:[#allocation2 + $0x178] sm:$0xff] %vm2061_vm1, %v2122_v10  ;;  %v2290_v13 = vld [vmem:[#allocation2 + $0x158] sm:$0xff]  ;;  %v2291_v14 = vld [vmem:[#allocation2 + $0x160] sm:$0xff] }
  0x31   : > { %8742 = vmatmul.msk.bf16.gmra.mxu1 %vm2061_vm1, %v2224_v40  ;;  %2171 = vst.msk [vmem:[#allocation2 + $0x180] sm:$0xff] %vm2061_vm1, %v2123_v11  ;;  %v2317_v15 = vpack.c.bf16 %v2291_v14, %v2290_v13  ;;  %v2257_v18 = vld [vmem:[#allocation2 + $0x50] sm:$0xff]  ;;  %v9572_v20 = vld [vmem:[#allocation2 + $0x47] sm:$0xff] }
  0x32   : > { %8767 = vmatmul.msk.bf16.gmra.mxu2 %vm2061_vm1, %v2780_v43  ;;  %2137 = vst.msk [vmem:[#allocation2 + $0x70] sm:$0xff] %vm2061_vm1, %v2089_v16  ;;  %v9574_v21 = vld [vmem:[#allocation2 + $0x4f] sm:$0xff]  ;;  %v2300_v24 = vpack.c.bf16 %v2257_v18, %v9569_v17  ;;  %v9591_v32 = vld [vmem:[#allocation2 + $0x58] sm:$0xff] }
  0x33   : > { %2138 = vst.msk [vmem:[#allocation2 + $0x78] sm:$0xff] %vm2061_vm1, %v2090_v19  ;;  %v2739_v22 = vld [vmem:[#allocation2 + $0x49] sm:$0xff]  ;;  %v2740_v23 = vld [vmem:[#allocation2 + $0x51] sm:$0xff]  ;;  %v9580_v25 = vpack.c.bf16 %v9574_v21, %v9572_v20 }
  0x34   : > { %v2783_v27 = vpack.c.bf16 %v2740_v23, %v2739_v22  ;;  %2159 = vst.msk [vmem:[#allocation2 + $0x120] sm:$0xff] %vm2061_vm1, %v2111_v26  ;;  %v2292_v28 = vld [vmem:[#allocation2 + $0x168] sm:$0xff]  ;;  %v2293_v29 = vld [vmem:[#allocation2 + $0x170] sm:$0xff]  ;;  %v2214_v26 = vld [vmem:[#allocation2 + $0x13f] sm:$0xff] }
  0x35   : > { %v2318_v30 = vpack.c.bf16 %v2293_v29, %v2292_v28  ;;  %2139 = vst.msk [vmem:[#allocation2 + $0x80] sm:$0xff] %vm2061_vm1, %v2091_v31  ;;  %v2259_v34 = vld [vmem:[#allocation2 + $0x60] sm:$0xff]  ;;  %v9594_v37 = vld [vmem:[#allocation2 + $0x57] sm:$0xff]  ;;  %v8840_v23 = vld [vmem:[%s13949_s1 + $0xa] sm:$0x3] }
  0x36   : > { %v2186_v38 = vld [vmem:[#allocation2 + $0x5f] sm:$0xff]  ;;  %2140 = vst.msk [vmem:[#allocation2 + $0x88] sm:$0xff] %vm2061_vm1, %v2092_v35  ;;  %v2301_v41 = vpack.c.bf16 %v2259_v34, %v9591_v32  ;;  %v9608_v50 = vld [vmem:[#allocation2 + $0x68] sm:$0xff]  ;;  %v2097_v29 = vld [vmem:[%s9462_s21 + $0x90] sm:$0xff] }
  0x37   : > { %8736 = vmatmul.msk.bf16.gmra.mxu3 %vm2061_vm1, %v2315_v46  ;;  %v2741_v39 = vld [vmem:[#allocation2 + $0x59] sm:$0xff]  ;;  %v2742_v40 = vld [vmem:[#allocation2 + $0x61] sm:$0xff]  ;;  %v9599_v42 = vpack.c.bf16 %v2186_v38, %v9594_v37  ;;  %2141 = vst.msk [vmem:[#allocation2 + $0x90] sm:$0xff] %vm2061_vm1, %v2093_v47 }
  0x38   : > { %v2784_v43 = vpack.c.bf16 %v2742_v40, %v2741_v39  ;;  %v2294_v44 = vld [vmem:[#allocation2 + $0x178] sm:$0xff]  ;;  %v2295_v45 = vld [vmem:[#allocation2 + $0x180] sm:$0xff]  ;;  %2145 = vst.msk [vmem:[#allocation2 + $0xb0] sm:$0xff] %vm2061_vm1, %v2097_v29 }
  0x39   : > { %v2319_v46 = vpack.c.bf16 %v2295_v45, %v2294_v44  ;;  %v2261_v54 = vld [vmem:[#allocation2 + $0x70] sm:$0xff]  ;;  %v2098_v34 = vld [vmem:[%s9462_s21 + $0x98] sm:$0xff] }
  0x3a   : > { %v2188_v57 = vld [vmem:[#allocation2 + $0x6f] sm:$0xff]  ;;  %v2302_v60 = vpack.c.bf16 %v2261_v54, %v9608_v50  ;;  %v9625_v10 = vld [vmem:[#allocation2 + $0x78] sm:$0xff]  ;;  %2146 = vst.msk [vmem:[#allocation2 + $0xb8] sm:$0xff] %vm2061_vm1, %v2098_v34  ;;  %v2215_v54 = vld [vmem:[#allocation2 + $0x147] sm:$0xff] }
  0x3b   : > { %v2743_v58 = vld [vmem:[#allocation2 + $0x69] sm:$0xff]  ;;  %v9628_v13 = vld [vmem:[#allocation2 + $0x77] sm:$0xff]  ;;  %v2218_v34 = vld [vmem:[#allocation2 + $0x15f] sm:$0xff] }
  0x3c   : > { %v2211_v63 = vld [vmem:[#allocation2 + $0x127] sm:$0xff]  ;;  %v2190_v14 = vld [vmem:[#allocation2 + $0x7f] sm:$0xff] }
  0x3d   : > { %v2241_v7 = vpack.c.bf16 %v2212_v3, %v2211_v63  ;;  %v2263_v11 = vld [vmem:[#allocation2 + $0x80] sm:$0xff]  ;;  %v9633_v19 = vpack.c.bf16 %v2190_v14, %v9628_v13 }
  0x3e   : > { %v2746_v16 = vld [vmem:[#allocation2 + $0x81] sm:$0xff]  ;;  %v2303_v18 = vpack.c.bf16 %v2263_v11, %v9625_v10  ;;  %v2265_v31 = vld [vmem:[#allocation2 + $0x90] sm:$0xff] }
  0x3f   : > { %8719 = vmatmul.msk.bf16.gmra.mxu0 %vm2061_vm1, %v2298_v55  ;;  %v2094_v55 = vld [vmem:[%s9462_s21 + $0x78] sm:$0xff]  ;;  %v2191_v35 = vld [vmem:[#allocation2 + $0x87] sm:$0xff]  ;;  %v2192_v38 = vld [vmem:[#allocation2 + $0x8f] sm:$0xff] }
  0x40   : > { %2142 = vst.msk [vmem:[#allocation2 + $0x98] sm:$0xff] %vm2061_vm1, %v2094_v55  ;;  %v2747_v39 = vld [vmem:[#allocation2 + $0x89] sm:$0xff]  ;;  %v9648_v44 = vpack.c.bf16 %v2192_v38, %v2191_v35  ;;  %v2099_v63 = vld [vmem:[%s9462_s21 + $0xa0] sm:$0xff] }
  0x41   : > { %8743 = vmatmul.msk.bf16.gmra.mxu1 %vm2061_vm1, %v2225_v56  ;;  %v9611_v56 = vld [vmem:[#allocation2 + $0x67] sm:$0xff]  ;;  %v2216_v55 = vld [vmem:[#allocation2 + $0x14f] sm:$0xff]  ;;  %2147 = vst.msk [vmem:[#allocation2 + $0xc0] sm:$0xff] %vm2061_vm1, %v2099_v63 }
  0x42   : > { %8768 = vmatmul.msk.bf16.gmra.mxu2 %vm2061_vm1, %v2781_v59  ;;  %v2744_v59 = vld [vmem:[#allocation2 + $0x71] sm:$0xff]  ;;  %v9616_v61 = vpack.c.bf16 %v2188_v57, %v9611_v56  ;;  %v2243_v57 = vpack.c.bf16 %v2216_v55, %v2215_v54  ;;  %v2100_v11 = vld [vmem:[%s9462_s21 + $0xa8] sm:$0xff] }
  0x43   : > { %2148 = vst.msk [vmem:[#allocation2 + $0xc8] sm:$0xff] %vm2061_vm1, %v2100_v11  ;;  %v2269_v54 = vld [vmem:[#allocation2 + $0xb0] sm:$0xff]  ;;  %v2102_v55 = vld [vmem:[%s9462_s21 + $0xb8] sm:$0xff] }
  0x44   : > { %2150 = vst.msk [vmem:[#allocation2 + $0xd8] sm:$0xff] %vm2061_vm1, %v2102_v55  ;;  %v2752_v63 = vld [vmem:[#allocation2 + $0xb1] sm:$0xff]  ;;  %v2104_v55 = vld [vmem:[%s9462_s21 + $0xc8] sm:$0xff] }
  0x45   : > { %2152 = vst.msk [vmem:[#allocation2 + $0xe8] sm:$0xff] %vm2061_vm1, %v2104_v55 }
  0x47   : > { %8737 = vmatmul.msk.bf16.gmra.mxu3 %vm2061_vm1, %v2316_v62  ;;  %v2785_v62 = vpack.c.bf16 %v2744_v59, %v2743_v58  ;;  %v2748_v40 = vld [vmem:[#allocation2 + $0x91] sm:$0xff] }
  0x48   : > { %v2787_v45 = vpack.c.bf16 %v2748_v40, %v2747_v39 }
  0x4f   : > { %8720 = vmatmul.msk.bf16.gmra.mxu0 %vm2061_vm1, %v2299_v8  ;;  %v2095_v8 = vld [vmem:[%s9462_s21 + $0x80] sm:$0xff] }
  0x50   : > { %2143 = vst.msk [vmem:[#allocation2 + $0xa0] sm:$0xff] %vm2061_vm1, %v2095_v8 }
  0x51   : > { %8744 = vmatmul.msk.bf16.gmra.mxu1 %vm2061_vm1, %v9555_v9 }
  0x52   : > { %8769 = vmatmul.msk.bf16.gmra.mxu2 %vm2061_vm1, %v2782_v12  ;;  %v2096_v12 = vld [vmem:[%s9462_s21 + $0x88] sm:$0xff] }
  0x53   : > { %2144 = vst.msk [vmem:[#allocation2 + $0xa8] sm:$0xff] %vm2061_vm1, %v2096_v12  ;;  %v9660_v12 = vld [vmem:[#allocation2 + $0x97] sm:$0xff] }
  0x57   : > { %8738 = vmatmul.msk.bf16.gmra.mxu3 %vm2061_vm1, %v2317_v15  ;;  %v2745_v15 = vld [vmem:[#allocation2 + $0x79] sm:$0xff] }
  0x58   : > { %v2786_v22 = vpack.c.bf16 %v2746_v16, %v2745_v15  ;;  %v2267_v8 = vld [vmem:[#allocation2 + $0xa0] sm:$0xff] }
  0x59   : > { %v2194_v14 = vld [vmem:[#allocation2 + $0x9f] sm:$0xff] }
  0x5a   : > { %v2749_v16 = vld [vmem:[#allocation2 + $0x99] sm:$0xff] }
  0x5f   : > { %8721 = vmatmul.msk.bf16.gmra.mxu0 %vm2061_vm1, %v2300_v24  ;;  %v2213_v24 = vld [vmem:[#allocation2 + $0x137] sm:$0xff] }
  0x60   : > { %v2242_v28 = vpack.c.bf16 %v2214_v26, %v2213_v24  ;;  %v9666_v26 = vpack.c.bf16 %v2194_v14, %v9660_v12 }
  0x61   : > { %8745 = vmatmul.msk.bf16.gmra.mxu1 %vm2061_vm1, %v9580_v25 }
  0x62   : > { %8770 = vmatmul.msk.bf16.gmra.mxu2 %vm2061_vm1, %v2783_v27  ;;  %v3856_v27 = vsel %vm2394_vm0, %v8840_v23, 0 }
  0x63   : > { %3865 = vmatpush.bf16.msrb.mxu1 %v3856_v27 }
  0x67   : > { %8739 = vmatmul.msk.bf16.gmra.mxu3 %vm2061_vm1, %v2318_v30  ;;  %v2264_v30 = vld [vmem:[#allocation2 + $0x88] sm:$0xff] }
  0x6f   : > { %8722 = vmatmul.msk.bf16.gmra.mxu0 %vm2061_vm1, %v2301_v41  ;;  %v2304_v41 = vpack.c.bf16 %v2265_v31, %v2264_v30  ;;  %v2217_v31 = vld [vmem:[#allocation2 + $0x157] sm:$0xff] }
  0x70   : > { %v2244_v38 = vpack.c.bf16 %v2218_v34, %v2217_v31 }
  0x71   : > { %8746 = vmatmul.msk.bf16.gmra.mxu1 %vm2061_vm1, %v9599_v42 }
  0x72   : > { %8771 = vmatmul.msk.bf16.gmra.mxu2 %vm2061_vm1, %v2784_v43 }
  0x77   : > { %8740 = vmatmul.msk.bf16.gmra.mxu3 %vm2061_vm1, %v2319_v46 }
  0x7f   : > { %8723 = vmatmul.msk.bf16.gmra.mxu0 %vm2061_vm1, %v2302_v60 }
  0x81   : > { %8747 = vmatmul.msk.bf16.gmra.mxu1 %vm2061_vm1, %v9616_v61 }
  0x82   : > { %8772 = vmatmul.msk.bf16.gmra.mxu2 %vm2061_vm1, %v2785_v62 }
  0x87   : > { %8759 = vmatmul.msk.bf16.vlgmr.msrb.gmra.mxu3 %vm2061_vm1, %v2241_v7  ;;  %v2266_v7 = vld [vmem:[#allocation2 + $0x98] sm:$0xff] }
  0x8f   : > { %8724 = vmatmul.msk.bf16.gmra.mxu0 %vm2061_vm1, %v2303_v18  ;;  %v2750_v18 = vld [vmem:[#allocation2 + $0xa1] sm:$0xff] }
  0x91   : > { %8748 = vmatmul.msk.bf16.gmra.mxu1 %vm2061_vm1, %v9633_v19 }
  0x92   : > { %8773 = vmatmul.msk.bf16.gmra.mxu2 %vm2061_vm1, %v2786_v22  ;;  %v2305_v22 = vpack.c.bf16 %v2267_v8, %v2266_v7 }
  0x97   : > { %8760 = vmatmul.msk.bf16.gmra.mxu3 %vm2061_vm1, %v2242_v28  ;;  %v2788_v28 = vpack.c.bf16 %v2750_v18, %v2749_v16 }
  0x9c   : > { %v2407_v43 = vpop.f32.mrf.mxu0 }
  0x9e   : > { %v2611_v46 = vpop.f32.mrf.mxu1 }
  0x9f   : > { %v2612_v47 = vadd.f32 %v2611_v46, %v2407_v43  ;;  %8725 = vmatmul.msk.bf16.gmra.mxu0 %vm2061_vm1, %v2304_v41 }
  0xa1   : > { %8749 = vmatmul.msk.bf16.gmra.mxu1 %vm2061_vm1, %v9648_v44 }
  0xa2   : > { %8774 = vmatmul.msk.bf16.gmra.mxu2 %vm2061_vm1, %v2787_v45  ;;  %v2101_v45 = vld [vmem:[%s9462_s21 + $0xb0] sm:$0xff] }
  0xa3   : > { %2149 = vst.msk [vmem:[#allocation2 + $0xd0] sm:$0xff] %vm2061_vm1, %v2101_v45  ;;  %v9709_v45 = vld [vmem:[#allocation2 + $0xb8] sm:$0xff] }
  0xa4   : > { %v2409_v58 = vpop.f32.mrf.mxu0  ;;  %14027 = vst [vmem:[#allocation13_spill] sm:$0xff] %v9709_v45 }
  0xa5   : > { %v2889_v59 = vpop.f32.mrf.mxu2 }
  0xa6   : > { %v9654_v60 = vadd.f32 %v2889_v59, %v2612_v47  ;;  %v2613_v62 = vpop.f32.mrf.mxu1  ;;  %v9681_v47 = vld [vmem:[#allocation2 + $0xa8] sm:$0xff] }
  0xa7   : > { %v2614_v3 = vadd.f32 %v2613_v62, %v2409_v58  ;;  %8761 = vmatmul.msk.bf16.gmra.mxu3 %vm2061_vm1, %v2243_v57  ;;  %v9684_v57 = vld [vmem:[#allocation2 + $0xa7] sm:$0xff]  ;;  %v2196_v58 = vld [vmem:[#allocation2 + $0xaf] sm:$0xff] }
  0xa8   : > { %14021 = vst [vmem:[#allocation7_spill] sm:$0xff] %v9654_v60  ;;  %v2751_v62 = vld [vmem:[#allocation2 + $0xa9] sm:$0xff]  ;;  %v9691_v11 = vpack.c.bf16 %v2196_v58, %v9684_v57  ;;  %v9713_v58 = vld [vmem:[#allocation2 + $0xb7] sm:$0xff] }
  0xa9   : > { %14024 = vst [vmem:[#allocation10_spill] sm:$0xff] %v9684_v57  ;;  %v2789_v16 = vpack.c.bf16 %v2752_v63, %v2751_v62  ;;  %v2198_v62 = vld [vmem:[#allocation2 + $0xbf] sm:$0xff] }
  0xaa   : > { %v9663_v15 = vpop.f32.mrf.mxu3  ;;  %14028 = vst [vmem:[#allocation14_spill] sm:$0xff] %v9713_v58 }
  0xac   : > { %v2412_v23 = vpop.f32.mrf.mxu0 }
  0xad   : > { %v2891_v24 = vpop.f32.mrf.mxu2 }
  0xae   : > { %v9668_v27 = vadd.f32 %v2891_v24, %v2614_v3  ;;  %v2616_v29 = vpop.f32.mrf.mxu1  ;;  %v2306_v3 = vpack.c.bf16 %v2269_v54, %v9681_v47  ;;  %v2220_v24 = vld [vmem:[#allocation2 + $0x16f] sm:$0xff] }
  0xaf   : > { %v2617_v30 = vadd.f32 %v2616_v29, %v2412_v23  ;;  %8726 = vmatmul.msk.bf16.gmra.mxu0 %vm2061_vm1, %v2305_v22  ;;  %v2219_v23 = vld [vmem:[#allocation2 + $0x167] sm:$0xff] }
  0xb0   : > { %14022 = vst [vmem:[#allocation8_spill] sm:$0xff] %v9668_v27  ;;  %v2245_v29 = vpack.c.bf16 %v2220_v24, %v2219_v23  ;;  %v2772_v27 = vld [vmem:[#allocation2 + $0x151] sm:$0xff] }
  0xb1   : > { %8750 = vmatmul.msk.bf16.gmra.mxu1 %vm2061_vm1, %v9666_v26 }
  0xb2   : > { %8775 = vmatmul.msk.bf16.gmra.mxu2 %vm2061_vm1, %v2788_v28  ;;  %v9674_v35 = vpop.f32.mrf.mxu3 }
  0xb4   : > { %v2414_v39 = vpop.f32.mrf.mxu0 }
  0xb5   : > { %v2894_v40 = vpop.f32.mrf.mxu2 }
  0xb6   : > { %v9676_v41 = vadd.f32 %v2894_v40, %v2617_v30  ;;  %v2618_v43 = vpop.f32.mrf.mxu1 }
  0xb7   : > { %v2619_v46 = vadd.f32 %v2618_v43, %v2414_v39  ;;  %8762 = vmatmul.msk.bf16.gmra.mxu3 %vm2061_vm1, %v2244_v38  ;;  %v2103_v39 = vld [vmem:[%s9462_s21 + $0xc0] sm:$0xff] }
  0xb8   : > { %14023 = vst [vmem:[#allocation9_spill] sm:$0xff] %v9676_v41  ;;  %v8790_v43 = vld [vmem:[%s13949_s1 + $0x6] sm:$0x3] }
  0xb9   : > { %2151 = vst.msk [vmem:[#allocation2 + $0xe0] sm:$0xff] %vm2061_vm1, %v2103_v39  ;;  %v3204_v54 = vsel %vm2394_vm0, %v8790_v43, 0  ;;  %v2770_v41 = vld [vmem:[#allocation2 + $0x141] sm:$0xff] }
  0xba   : > { %v9687_v59 = vpop.f32.mrf.mxu3  ;;  %3213 = vmatpush.bf16.msrb.mxu3 %v3204_v54 }
  0xbc   : > { %v2417_v7 = vpop.f32.mrf.mxu0 }
  0xbd   : > { %v2896_v8 = vpop.f32.mrf.mxu2 }
  0xbe   : > { %v9693_v14 = vadd.f32 %v2896_v8, %v2619_v46  ;;  %v2621_v18 = vpop.f32.mrf.mxu1  ;;  %v2271_v46 = vld [vmem:[#allocation2 + $0xc0] sm:$0xff] }
  0xbf   : > { %v2622_v22 = vadd.f32 %v2621_v18, %v2417_v7  ;;  %8727 = vmatmul.msk.bf16.gmra.mxu0 %vm2061_vm1, %v2306_v3  ;;  %v2753_v3 = vld [vmem:[#allocation2 + $0xb9] sm:$0xff]  ;;  %v2754_v7 = vld [vmem:[#allocation2 + $0xc1] sm:$0xff]  ;;  %v2307_v8 = vpack.c.bf16 %v2271_v46, %v9709_v45 }
  0xc0   : > { %14025 = vst [vmem:[#allocation11_spill] sm:$0xff] %v9693_v14  ;;  %v2790_v24 = vpack.c.bf16 %v2754_v7, %v2753_v3  ;;  %v9735_v7 = vld [vmem:[#allocation2 + $0xc8] sm:$0xff]  ;;  %v2773_v45 = vld [vmem:[#allocation2 + $0x159] sm:$0xff] }
  0xc1   : > { %8751 = vmatmul.msk.bf16.gmra.mxu1 %vm2061_vm1, %v9691_v11  ;;  %14032 = vst [vmem:[#allocation18_spill] sm:$0xff] %v9735_v7 }
  0xc2   : > { %8776 = vmatmul.msk.bf16.gmra.mxu2 %vm2061_vm1, %v2789_v16  ;;  %v9699_v28 = vpop.f32.mrf.mxu3 }
  0xc4   : > { %v2419_v30 = vpop.f32.mrf.mxu0 }
  0xc5   : > { %v2899_v31 = vpop.f32.mrf.mxu2 }
  0xc6   : > { %v9701_v34 = vadd.f32 %v2899_v31, %v2622_v22  ;;  %v2623_v38 = vpop.f32.mrf.mxu1  ;;  %v9720_v22 = vpack.c.bf16 %v2198_v62, %v9713_v58  ;;  %v2221_v31 = vld [vmem:[#allocation2 + $0x177] sm:$0xff] }
  0xc7   : > { %v2624_v40 = vadd.f32 %v2623_v38, %v2419_v30  ;;  %8763 = vmatmul.msk.bf16.gmra.mxu3 %vm2061_vm1, %v2245_v29  ;;  %v2222_v38 = vld [vmem:[#allocation2 + $0x17f] sm:$0xff]  ;;  %v2105_v62 = vld [vmem:[%s9462_s21 + $0xd0] sm:$0xff] }
  0xc8   : > { %14026 = vst [vmem:[#allocation12_spill] sm:$0xff] %v9701_v34  ;;  %v2246_v43 = vpack.c.bf16 %v2222_v38, %v2221_v31  ;;  %v2756_v31 = vld [vmem:[#allocation2 + $0xd1] sm:$0xff] }
  0xc9   : > { %14029 = vst [vmem:[#allocation15_spill] sm:$0xff] %v9720_v22 }
  0xca   : > { %v9716_v63 = vpop.f32.mrf.mxu3  ;;  %2153 = vst.msk [vmem:[#allocation2 + $0xf0] sm:$0xff] %vm2061_vm1, %v2105_v62 }
  0xcc   : > { %v2422_v16 = vpop.f32.mrf.mxu0 }
  0xcd   : > { %v2901_v18 = vpop.f32.mrf.mxu2 }
  0xce   : > { %v9722_v23 = vadd.f32 %v2901_v18, %v2624_v40  ;;  %v2626_v29 = vpop.f32.mrf.mxu1  ;;  %v9738_v18 = vld [vmem:[#allocation2 + $0xc7] sm:$0xff] }
  0xcf   : > { %v2627_v30 = vadd.f32 %v2626_v29, %v2422_v16  ;;  %8728 = vmatmul.msk.bf16.gmra.mxu0 %vm2061_vm1, %v2307_v8  ;;  %v2273_v8 = vld [vmem:[#allocation2 + $0xd0] sm:$0xff]  ;;  %v2106_v16 = vld [vmem:[%s9462_s21 + $0xd8] sm:$0xff]  ;;  %14033 = vst [vmem:[#allocation19_spill] sm:$0xff] %v9738_v18 }
  0xd0   : > { %14030 = vst [vmem:[#allocation16_spill] sm:$0xff] %v9722_v23  ;;  %v2308_v38 = vpack.c.bf16 %v2273_v8, %v9735_v7  ;;  %v2768_v23 = vld [vmem:[#allocation2 + $0x131] sm:$0xff] }
  0xd1   : > { %8752 = vmatmul.msk.bf16.gmra.mxu1 %vm2061_vm1, %v9720_v22  ;;  %2154 = vst.msk [vmem:[#allocation2 + $0xf8] sm:$0xff] %vm2061_vm1, %v2106_v16  ;;  %v2767_v16 = vld [vmem:[#allocation2 + $0x129] sm:$0xff] }
  0xd2   : > { %8777 = vmatmul.msk.bf16.gmra.mxu2 %vm2061_vm1, %v2790_v24  ;;  %v9728_v39 = vpop.f32.mrf.mxu3  ;;  %v2200_v24 = vld [vmem:[#allocation2 + $0xcf] sm:$0xff] }
  0xd4   : > { %v2424_v46 = vpop.f32.mrf.mxu0 }
  0xd5   : > { %v2904_v54 = vpop.f32.mrf.mxu2 }
  0xd6   : > { %v9730_v40 = vadd.f32 %v2904_v54, %v2627_v30  ;;  %v2628_v55 = vpop.f32.mrf.mxu1  ;;  %v2755_v30 = vld [vmem:[#allocation2 + $0xc9] sm:$0xff] }
  0xd7   : > { %v2629_v3 = vadd.f32 %v2628_v55, %v2424_v46  ;;  %8764 = vmatmul.msk.bf16.gmra.mxu3 %vm2061_vm1, %v2246_v43  ;;  %v9745_v55 = vpack.c.bf16 %v2200_v24, %v9738_v18  ;;  %v2791_v62 = vpack.c.bf16 %v2756_v31, %v2755_v30  ;;  %v2797_v24 = vpack.c.bf16 %v2768_v23, %v2767_v16  ;;  %v2107_v31 = vld [vmem:[%s9462_s21 + $0xe0] sm:$0xff] }
  0xd8   : > { %14031 = vst [vmem:[#allocation17_spill] sm:$0xff] %v9730_v40 }
  0xd9   : > { %14034 = vst [vmem:[#allocation20_spill] sm:$0xff] %v9745_v55 }
  0xda   : > { %v9741_v29 = vpop.f32.mrf.mxu3  ;;  %2155 = vst.msk [vmem:[#allocation2 + $0x100] sm:$0xff] %vm2061_vm1, %v2107_v31 }
  0xdc   : > { %v2427_v46 = vpop.f32.mrf.mxu0 }
  0xdd   : > { %v2906_v54 = vpop.f32.mrf.mxu2 }
  0xde   : > { %v9747_v43 = vadd.f32 %v2906_v54, %v2629_v3  ;;  %v2631_v2 = vpop.f32.mrf.mxu1  ;;  %v2108_v54 = vld [vmem:[%s9462_s21 + $0xe8] sm:$0xff] }
  0xdf   : > { %v2632_v40 = vadd.f32 %v2631_v2, %v2427_v46  ;;  %8729 = vmatmul.msk.bf16.gmra.mxu0 %vm2061_vm1, %v2308_v38  ;;  %v9760_v38 = vld [vmem:[#allocation2 + $0xd8] sm:$0xff]  ;;  %v2275_v46 = vld [vmem:[#allocation2 + $0xe0] sm:$0xff]  ;;  %2156 = vst.msk [vmem:[#allocation2 + $0x108] sm:$0xff] %vm2061_vm1, %v2108_v54 }
  0xe0   : > { %14035 = vst [vmem:[#allocation21_spill] sm:$0xff] %v9747_v43  ;;  %v9763_v43 = vld [vmem:[#allocation2 + $0xd7] sm:$0xff]  ;;  %v2309_v16 = vpack.c.bf16 %v2275_v46, %v9760_v38 }
  0xe1   : > { %8753 = vmatmul.msk.bf16.gmra.mxu1 %vm2061_vm1, %v9745_v55  ;;  %14037 = vst [vmem:[#allocation23_spill] sm:$0xff] %v9760_v38  ;;  %v2769_v54 = vld [vmem:[#allocation2 + $0x139] sm:$0xff] }
  0xe2   : > { %8778 = vmatmul.msk.bf16.gmra.mxu2 %vm2061_vm1, %v2791_v62  ;;  %v9753_v8 = vpop.f32.mrf.mxu3  ;;  %14038 = vst [vmem:[#allocation24_spill] sm:$0xff] %v9763_v43  ;;  %v2202_v62 = vld [vmem:[#allocation2 + $0xdf] sm:$0xff] }
  0xe3   : > { %v9770_v31 = vpack.c.bf16 %v2202_v62, %v9763_v43  ;;  %v2798_v62 = vpack.c.bf16 %v2770_v41, %v2769_v54 }
  0xe4   : > { %v2429_v34 = vpop.f32.mrf.mxu0 }
  0xe5   : > { %v2909_v18 = vpop.f32.mrf.mxu2  ;;  %14039 = vst [vmem:[#allocation25_spill] sm:$0xff] %v9770_v31 }
  0xe6   : > { %v9755_v3 = vadd.f32 %v2909_v18, %v2632_v40  ;;  %v2633_v30 = vpop.f32.mrf.mxu1  ;;  %v2757_v40 = vld [vmem:[#allocation2 + $0xd9] sm:$0xff]  ;;  %v2758_v18 = vld [vmem:[#allocation2 + $0xe1] sm:$0xff] }
  0xe7   : > { %v2634_v2 = vadd.f32 %v2633_v30, %v2429_v34  ;;  %8784 = vmatmul.msk.bf16.vlgmr.msra.gmra.mxu3 %vm2061_vm1, %v2797_v24 }
  0xe8   : > { %14036 = vst [vmem:[#allocation22_spill] sm:$0xff] %v9755_v3  ;;  %v2792_v3 = vpack.c.bf16 %v2758_v18, %v2757_v40  ;;  %v2109_v18 = vld [vmem:[%s9462_s21 + $0xf0] sm:$0xff] }
  0xe9   : > { %2157 = vst.msk [vmem:[#allocation2 + $0x110] sm:$0xff] %vm2061_vm1, %v2109_v18 }
  0xea   : > { %v9766_v23 = vpop.f32.mrf.mxu3 }
  0xec   : > { %v2432_v34 = vpop.f32.mrf.mxu0 }
  0xed   : > { %v2911_v30 = vpop.f32.mrf.mxu2 }
  0xee   : > { %v9772_v24 = vadd.f32 %v2911_v30, %v2634_v2  ;;  %v2636_v14 = vpop.f32.mrf.mxu1  ;;  %v2110_v30 = vld [vmem:[%s9462_s21 + $0xf8] sm:$0xff] }
  0xef   : > { %v2637_v7 = vadd.f32 %v2636_v14, %v2432_v34  ;;  %8730 = vmatmul.msk.bf16.gmra.mxu0 %vm2061_vm1, %v2309_v16  ;;  %v9785_v16 = vld [vmem:[#allocation2 + $0xe8] sm:$0xff]  ;;  %v2277_v34 = vld [vmem:[#allocation2 + $0xf0] sm:$0xff]  ;;  %2158 = vst.msk [vmem:[#allocation2 + $0x118] sm:$0xff] %vm2061_vm1, %v2110_v30 }
  0xf0   : > { %14040 = vst [vmem:[#allocation26_spill] sm:$0xff] %v9772_v24  ;;  %v9788_v24 = vld [vmem:[#allocation2 + $0xe7] sm:$0xff]  ;;  %v2310_v54 = vpack.c.bf16 %v2277_v34, %v9785_v16 }
  0xf1   : > { %8754 = vmatmul.msk.bf16.gmra.mxu1 %vm2061_vm1, %v9770_v31  ;;  %14042 = vst [vmem:[#allocation28_spill] sm:$0xff] %v9785_v16  ;;  %v2771_v30 = vld [vmem:[#allocation2 + $0x149] sm:$0xff] }
  0xf2   : > { %8779 = vmatmul.msk.bf16.gmra.mxu2 %vm2061_vm1, %v2792_v3  ;;  %v9778_v46 = vpop.f32.mrf.mxu3  ;;  %14043 = vst [vmem:[#allocation29_spill] sm:$0xff] %v9788_v24  ;;  %v2204_v3 = vld [vmem:[#allocation2 + $0xef] sm:$0xff]  ;;  %v2799_v16 = vpack.c.bf16 %v2772_v27, %v2771_v30 }
  0xf3   : > { %v9795_v18 = vpack.c.bf16 %v2204_v3, %v9788_v24  ;;  %v2762_v24 = vld [vmem:[#allocation2 + $0x101] sm:$0xff] }
  0xf4   : > { %v2434_v43 = vpop.f32.mrf.mxu0 }
  0xf5   : > { %v2914_v38 = vpop.f32.mrf.mxu2  ;;  %14044 = vst [vmem:[#allocation30_spill] sm:$0xff] %v9795_v18 }
  0xf6   : > { %v9780_v2 = vadd.f32 %v2914_v38, %v2637_v7  ;;  %v2638_v40 = vpop.f32.mrf.mxu1  ;;  %v2759_v7 = vld [vmem:[#allocation2 + $0xe9] sm:$0xff]  ;;  %v2760_v38 = vld [vmem:[#allocation2 + $0xf1] sm:$0xff] }
  0xf7   : > { %v2639_v14 = vadd.f32 %v2638_v40, %v2434_v43  ;;  %8785 = vmatmul.msk.bf16.gmra.mxu3 %vm2061_vm1, %v2798_v62 }
  0xf8   : > { %14041 = vst [vmem:[#allocation27_spill] sm:$0xff] %v9780_v2  ;;  %v2793_v2 = vpack.c.bf16 %v2760_v38, %v2759_v7 }
  0xfa   : > { %v9791_v41 = vpop.f32.mrf.mxu3 }
  0xfc   : > { %v2437_v43 = vpop.f32.mrf.mxu0 }
  0xfd   : > { %v2916_v40 = vpop.f32.mrf.mxu2 }
  0xfe   : > { %v9797_v62 = vadd.f32 %v2916_v40, %v2639_v14  ;;  %v2641_v31 = vpop.f32.mrf.mxu1  ;;  %v2206_v40 = vld [vmem:[#allocation2 + $0xff] sm:$0xff] }
  0xff   : > { %v2642_v58 = vadd.f32 %v2641_v31, %v2437_v43  ;;  %8731 = vmatmul.msk.bf16.gmra.mxu0 %vm2061_vm1, %v2310_v54  ;;  %v9808_v31 = vld [vmem:[#allocation2 + $0xf8] sm:$0xff]  ;;  %v2279_v54 = vld [vmem:[#allocation2 + $0x100] sm:$0xff] }
 0x100   : > { %14045 = vst [vmem:[#allocation31_spill] sm:$0xff] %v9797_v62  ;;  %v9810_v43 = vld [vmem:[#allocation2 + $0xf7] sm:$0xff]  ;;  %v2311_v27 = vpack.c.bf16 %v2279_v54, %v9808_v31  ;;  %v2774_v54 = vld [vmem:[#allocation2 + $0x161] sm:$0xff] }
 0x101   : > { %8755 = vmatmul.msk.bf16.gmra.mxu1 %vm2061_vm1, %v9795_v18  ;;  %14048 = vst [vmem:[#allocation34_spill] sm:$0xff] %v9808_v31 }
 0x102   : > { %8780 = vmatmul.msk.bf16.gmra.mxu2 %vm2061_vm1, %v2793_v2  ;;  %v9803_v34 = vpop.f32.mrf.mxu3  ;;  %14049 = vst [vmem:[#allocation35_spill] sm:$0xff] %v9810_v43  ;;  %v2761_v2 = vld [vmem:[#allocation2 + $0xf9] sm:$0xff] }
 0x103   : > { %14046 = vst [vmem:[#allocation32_spill] sm:$0xff] %v9803_v34 }
 0x104   : > { %v2439_v55 = vpop.f32.mrf.mxu0 }
 0x105   : > { %v2919_v3 = vpop.f32.mrf.mxu2 }
 0x106   : > { %v9805_v14 = vadd.f32 %v2919_v3, %v2642_v58  ;;  %v2643_v7 = vpop.f32.mrf.mxu1  ;;  %v9816_v58 = vpack.c.bf16 %v2206_v40, %v9810_v43  ;;  %v2800_v40 = vpack.c.bf16 %v2774_v54, %v2773_v45 }
 0x107   : > { %v2644_v38 = vadd.f32 %v2643_v7, %v2439_v55  ;;  %8786 = vmatmul.msk.bf16.gmra.mxu3 %vm2061_vm1, %v2799_v16  ;;  %v2124_v55 = vld [vmem:[%s9462_s21 + $0x168] sm:$0xff]  ;;  %v2794_v16 = vpack.c.bf16 %v2762_v24, %v2761_v2 }
 0x108   : > { %14047 = vst [vmem:[#allocation33_spill] sm:$0xff] %v9805_v14 }
 0x109   : > { %14050 = vst [vmem:[#allocation36_spill] sm:$0xff] %v9816_v58 }
 0x10a   : > { %v9812_v62 = vpop.f32.mrf.mxu3  ;;  %2172 = vst.msk [vmem:[#allocation2 + $0x188] sm:$0xff] %vm2061_vm1, %v2124_v55  ;;  %v9833_v55 = vld [vmem:[#allocation2 + $0x107] sm:$0xff] }
 0x10b   : > { %14054 = vst [vmem:[#allocation40_spill] sm:$0xff] %v9833_v55 }
 0x10c   : > { %v2442_v30 = vpop.f32.mrf.mxu0 }
 0x10d   : > { %v2921_v18 = vpop.f32.mrf.mxu2 }
 0x10e   : > { %v9819_v3 = vadd.f32 %v2921_v18, %v2644_v38  ;;  %v2646_v7 = vpop.f32.mrf.mxu1 }
 0x10f   : > { %v2647_v14 = vadd.f32 %v2646_v7, %v2442_v30  ;;  %8732 = vmatmul.msk.bf16.gmra.mxu0 %vm2061_vm1, %v2311_v27  ;;  %v9831_v30 = vld [vmem:[#allocation2 + $0x108] sm:$0xff]  ;;  %v2281_v27 = vld [vmem:[#allocation2 + $0x110] sm:$0xff] }
 0x110   : > { %14051 = vst [vmem:[#allocation37_spill] sm:$0xff] %v9819_v3  ;;  %v2208_v7 = vld [vmem:[#allocation2 + $0x10f] sm:$0xff]  ;;  %v2312_v45 = vpack.c.bf16 %v2281_v27, %v9831_v30 }
 0x111   : > { %8756 = vmatmul.msk.bf16.gmra.mxu1 %vm2061_vm1, %v9816_v58  ;;  %14053 = vst [vmem:[#allocation39_spill] sm:$0xff] %v9831_v30  ;;  %v2764_v58 = vld [vmem:[#allocation2 + $0x111] sm:$0xff]  ;;  %v2775_v27 = vld [vmem:[#allocation2 + $0x169] sm:$0xff] }
 0x112   : > { %8781 = vmatmul.msk.bf16.gmra.mxu2 %vm2061_vm1, %v2794_v16  ;;  %v9826_v31 = vpop.f32.mrf.mxu3  ;;  %v2763_v16 = vld [vmem:[#allocation2 + $0x109] sm:$0xff]  ;;  %v2776_v30 = vld [vmem:[#allocation2 + $0x171] sm:$0xff] }
 0x114   : > { %v2444_v43 = vpop.f32.mrf.mxu0 }
 0x115   : > { %v2924_v18 = vpop.f32.mrf.mxu2 }
 0x116   : > { %v9828_v38 = vadd.f32 %v2924_v18, %v2647_v14  ;;  %v2648_v24 = vpop.f32.mrf.mxu1  ;;  %v9839_v14 = vpack.c.bf16 %v2208_v7, %v9833_v55  ;;  %v9862_v55 = vld [vmem:[#allocation2 + $0x117] sm:$0xff] }
 0x117   : > { %v2649_v2 = vadd.f32 %v2648_v24, %v2444_v43  ;;  %8787 = vmatmul.msk.bf16.gmra.mxu3 %vm2061_vm1, %v2800_v40  ;;  %v2795_v40 = vpack.c.bf16 %v2764_v58, %v2763_v16  ;;  %v2801_v58 = vpack.c.bf16 %v2776_v30, %v2775_v27  ;;  %14059 = vst [vmem:[#allocation45_spill] sm:$0xff] %v9862_v55  ;;  %v2766_v27 = vld [vmem:[#allocation2 + $0x121] sm:$0xff] }
 0x118   : > { %14052 = vst [vmem:[#allocation38_spill] sm:$0xff] %v9828_v38  ;;  %v8865_v38 = vld [vmem:[%s13949_s1 + $0xc] sm:$0x3] }
 0x119   : > { %14055 = vst [vmem:[#allocation41_spill] sm:$0xff] %v9839_v14  ;;  %v4182_v57 = vsel %vm2394_vm0, %v8865_v38, 0  ;;  %v2283_v38 = vld [vmem:[#allocation2 + $0x120] sm:$0xff] }
 0x11a   : > { %v9835_v3 = vpop.f32.mrf.mxu3  ;;  %4191 = vmatpush.bf16.msrb.mxu2 %v4182_v57  ;;  %v2210_v57 = vld [vmem:[#allocation2 + $0x11f] sm:$0xff] }
 0x11c   : > { %v2447_v54 = vpop.f32.mrf.mxu0 }
 0x11d   : > { %v2926_v60 = vpop.f32.mrf.mxu2 }
 0x11e   : > { %v9841_v43 = vadd.f32 %v2926_v60, %v2649_v2  ;;  %v2651_v18 = vpop.f32.mrf.mxu1 }
 0x11f   : > { %v2652_v24 = vadd.f32 %v2651_v18, %v2447_v54  ;;  %8733 = vmatmul.msk.bf16.gmra.mxu0 %vm2061_vm1, %v2312_v45  ;;  %v8890_v18 = vld [vmem:[%s13949_s1 + $0xe] sm:$0x3] }
 0x120   : > { %14056 = vst [vmem:[#allocation42_spill] sm:$0xff] %v9841_v43  ;;  %v9859_v43 = vld [vmem:[#allocation2 + $0x118] sm:$0xff] }
 0x121   : > { %8757 = vmatmul.msk.bf16.gmra.mxu1 %vm2061_vm1, %v9839_v14  ;;  %14058 = vst [vmem:[#allocation44_spill] sm:$0xff] %v9859_v43 }
 0x122   : > { %8782 = vmatmul.msk.bf16.gmra.mxu2 %vm2061_vm1, %v2795_v40  ;;  %v9851_v60 = vpop.f32.mrf.mxu3  ;;  %v4508_v40 = vsel %vm2394_vm0, %v8890_v18, 0  ;;  %v8915_v18 = vld [vmem:[%s13949_s1 + $0x10] sm:$0x3] }
 0x123   : > { %4517 = vmatpush.bf16.msra.mxu3 %v4508_v40  ;;  %v4834_v34 = vsel %vm2394_vm0, %v8915_v18, 0 }
 0x124   : > { %v2449_v2 = vpop.f32.mrf.mxu0  ;;  %4843 = vmatpush.bf16.msra.mxu0 %v4834_v34 }
 0x125   : > { %v2929_v7 = vpop.f32.mrf.mxu2 }
 0x126   : > { %v9853_v16 = vadd.f32 %v2929_v7, %v2652_v24  ;;  %v2653_v45 = vpop.f32.mrf.mxu1  ;;  %v2765_v24 = vld [vmem:[#allocation2 + $0x119] sm:$0xff] }
 0x127   : > { %v2654_v54 = vadd.f32 %v2653_v45, %v2449_v2  ;;  %8788 = vmatmul.msk.bf16.gmra.mxu3 %vm2061_vm1, %v2801_v58  ;;  %v2313_v2 = vpack.c.bf16 %v2283_v38, %v9859_v43  ;;  %v9868_v45 = vpack.c.bf16 %v2210_v57, %v9862_v55  ;;  %v2796_v14 = vpack.c.bf16 %v2766_v27, %v2765_v24  ;;  %v2777_v38 = vld [vmem:[#allocation2 + $0x179] sm:$0xff]  ;;  %v2778_v43 = vld [vmem:[#allocation2 + $0x181] sm:$0xff] }
 0x128   : > { %14057 = vst [vmem:[#allocation43_spill] sm:$0xff] %v9853_v16  ;;  %v2802_v57 = vpack.c.bf16 %v2778_v43, %v2777_v38 }
 0x129   : > { %14060 = vst [vmem:[#allocation46_spill] sm:$0xff] %v9868_v45 }
 0x12a   : > { %v9864_v30 = vpop.f32.mrf.mxu3 }
 0x12c   : > { %v2452_v58 = vpop.f32.mrf.mxu0 }
 0x12d   : > { %v2931_v7 = vpop.f32.mrf.mxu2 }
 0x12e   : > { %v9870_v16 = vadd.f32 %v2931_v7, %v2654_v54  ;;  %v2656_v22 = vpop.f32.mrf.mxu1 }
 0x12f   : > { %v2657_v40 = vadd.f32 %v2656_v22, %v2452_v58  ;;  %8734 = vmatmul.msk.bf16.gmra.mxu0 %vm2061_vm1, %v2313_v2  ;;  %v3709_v2 = vld [vmem:[#allocation2 + $0x21] sm:$0xff] }
 0x130   : > { %14061 = vst [vmem:[#allocation47_spill] sm:$0xff] %v9870_v16  ;;  %v3431_v16 = vpack.c.bf16 %v9512_v48, %v9493_v33  ;;  %v3105_v33 = vpack.c.bf16 %v9517_v51, %v9497_v36 }
 0x131   : > { %8758 = vmatmul.msk.bf16.gmra.mxu1 %vm2061_vm1, %v9868_v45 }
 0x132   : > { %8783 = vmatmul.msk.bf16.gmra.mxu2 %vm2061_vm1, %v2796_v14  ;;  %v9880_v54 = vpop.f32.mrf.mxu3  ;;  %v3757_v14 = vpack.c.bf16 %v9522_v53, %v3709_v2 }
 0x134   : > { %v2454_v24 = vpop.f32.mrf.mxu0 }
 0x135   : > { %v2934_v27 = vpop.f32.mrf.mxu2 }
 0x136   : > { %v9882_v7 = vadd.f32 %v2934_v27, %v2657_v40  ;;  %v2658_v22 = vpop.f32.mrf.mxu1  ;;  %v3711_v27 = vld [vmem:[#allocation2 + $0x31] sm:$0xff] }
 0x137   : > { %v2659_v58 = vadd.f32 %v2658_v22, %v2454_v24  ;;  %8789 = vmatmul.msk.bf16.gmra.mxu3 %vm2061_vm1, %v2802_v57  ;;  %v3432_v22 = vpack.c.bf16 %v9539_v0, %v9514_v49  ;;  %v3758_v2 = vpack.c.bf16 %v9549_v6, %v3711_v27  ;;  %v3106_v49 = vpack.c.bf16 %v9544_v4, %v9519_v52 }
 0x13a   : > { %v9885_v18 = vpop.f32.mrf.mxu3 }
 0x13c   : > { %v2457_v34 = vpop.f32.mrf.mxu0 }
 0x13d   : > { %v2936_v55 = vpop.f32.mrf.mxu2 }
 0x13e   : > { %v9890_v45 = vadd.f32 %v2936_v55, %v2659_v58  ;;  %v2661_v43 = vpop.f32.mrf.mxu1 }
 0x13f   : > { %v2662_v38 = vadd.f32 %v2661_v43, %v2457_v34  ;;  %8816 = vmatmul.msk.bf16.vlgmr.msrb.gmra.mxu0 %vm2061_vm1, %v3431_v16 }
 0x141   : > { %8841 = vmatmul.msk.bf16.vlgmr.msrb.gmra.mxu1 %vm2061_vm1, %v3757_v14 }
 0x142   : > { %8866 = vmatmul.msk.bf16.vlgmr.msrb.gmra.mxu2 %vm2061_vm1, %v9555_v9  ;;  %v9896_v40 = vpop.f32.mrf.mxu3 }
 0x144   : > { %v2459_v48 = vpop.f32.mrf.mxu0 }
 0x145   : > { %v2939_v57 = vpop.f32.mrf.mxu2 }
 0x146   : > { %v9900_v24 = vadd.f32 %v2939_v57, %v2662_v38  ;;  %v2663_v53 = vpop.f32.mrf.mxu1  ;;  %v3714_v57 = vld [vmem:[#allocation2 + $0x49] sm:$0xff] }
 0x147   : > { %v2664_v55 = vadd.f32 %v2663_v53, %v2459_v48  ;;  %8791 = vmatmul.msk.bf16.vlgmr.msrb.gmra.mxu3 %vm2061_vm1, %v3105_v33  ;;  %v3713_v48 = vld [vmem:[#allocation2 + $0x41] sm:$0xff] }
 0x14a   : > { %v9903_v16 = vpop.f32.mrf.mxu3 }
 0x14c   : > { %v2462_v9 = vpop.f32.mrf.mxu0 }
 0x14d   : > { %v2941_v58 = vpop.f32.mrf.mxu2 }
 0x14e   : > { %v9908_v34 = vadd.f32 %v2941_v58, %v2664_v55  ;;  %v2666_v36 = vpop.f32.mrf.mxu1 }
 0x14f   : > { %v2667_v51 = vadd.f32 %v2666_v36, %v2462_v9  ;;  %8817 = vmatmul.msk.bf16.gmra.mxu0 %vm2061_vm1, %v3432_v22  ;;  %v3759_v22 = vpack.c.bf16 %v3714_v57, %v3713_v48 }
 0x151   : > { %8842 = vmatmul.msk.bf16.gmra.mxu1 %vm2061_vm1, %v3758_v2  ;;  %v3107_v2 = vpack.c.bf16 %v9572_v20, %v9546_v5 }
 0x152   : > { %8867 = vmatmul.msk.bf16.gmra.mxu2 %vm2061_vm1, %v9580_v25  ;;  %v9914_v14 = vpop.f32.mrf.mxu3  ;;  %v3433_v25 = vpack.c.bf16 %v9569_v17, %v9541_v1 }
 0x154   : > { %v2464_v0 = vpop.f32.mrf.mxu0 }
 0x155   : > { %v2944_v43 = vpop.f32.mrf.mxu2 }
 0x156   : > { %v9918_v38 = vadd.f32 %v2944_v43, %v2667_v51  ;;  %v2668_v6 = vpop.f32.mrf.mxu1  ;;  %v2702_v43 = vadd.f32 %v9812_v62, %v9663_v15  ;;  %v2704_v15 = vadd.f32 %v9826_v31, %v9674_v35  ;;  %v2707_v35 = vadd.f32 %v9835_v3, %v9687_v59  ;;  %v3717_v31 = vld [vmem:[#allocation2 + $0x61] sm:$0xff] }
 0x157   : > { %v2669_v33 = vadd.f32 %v2668_v6, %v2464_v0  ;;  %8792 = vmatmul.msk.bf16.gmra.mxu3 %vm2061_vm1, %v3106_v49  ;;  %v3389_v0 = vld [vmem:[#allocation2 + $0x50] sm:$0xff]  ;;  %v2709_v59 = vadd.f32 %v9851_v60, %v9699_v28  ;;  %v2712_v28 = vadd.f32 %v9864_v30, %v9716_v63  ;;  %v2714_v63 = vadd.f32 %v9880_v54, %v9728_v39  ;;  %v3721_v54 = vld [vmem:[#allocation2 + $0x81] sm:$0xff] }
 0x158   : > { %v3715_v6 = vld [vmem:[#allocation2 + $0x51] sm:$0xff]  ;;  %v3434_v57 = vpack.c.bf16 %v9591_v32, %v3389_v0  ;;  %v3108_v32 = vpack.c.bf16 %v9594_v37, %v9574_v21  ;;  %v2717_v39 = vadd.f32 %v9885_v18, %v9741_v29  ;;  %v2719_v29 = vadd.f32 %v9896_v40, %v9753_v8 }
 0x159   : > { %v3719_v60 = vld [vmem:[#allocation2 + $0x71] sm:$0xff]  ;;  %v2722_v8 = vadd.f32 %v9903_v16, %v9766_v23  ;;  %v2724_v23 = vadd.f32 %v9914_v14, %v9778_v46  ;;  %v8940_v16 = vld [vmem:[%s13952_s4 + $0x4] sm:$0xf] }
 0x15a   : > { %v9921_v53 = vpop.f32.mrf.mxu3  ;;  %v3723_v40 = vld [vmem:[#allocation2 + $0x91] sm:$0xff] }
 0x15c   : > { %v2467_v55 = vpop.f32.mrf.mxu0 }
 0x15d   : > { %v2946_v27 = vpop.f32.mrf.mxu2 }
 0x15e   : > { %v9925_v9 = vadd.f32 %v2946_v27, %v2669_v33  ;;  %v2671_v52 = vpop.f32.mrf.mxu1  ;;  %v3716_v33 = vld [vmem:[#allocation2 + $0x59] sm:$0xff] }
 0x15f   : > { %v2672_v4 = vadd.f32 %v2671_v52, %v2467_v55  ;;  %8818 = vmatmul.msk.bf16.gmra.mxu0 %vm2061_vm1, %v3433_v25  ;;  %v3760_v25 = vpack.c.bf16 %v3716_v33, %v3715_v6 }
 0x161   : > { %8843 = vmatmul.msk.bf16.gmra.mxu1 %vm2061_vm1, %v3759_v22 }
 0x162   : > { %8868 = vmatmul.msk.bf16.gmra.mxu2 %vm2061_vm1, %v9599_v42  ;;  %v9931_v58 = vpop.f32.mrf.mxu3 }
 0x164   : > { %v2469_v1 = vpop.f32.mrf.mxu0 }
 0x165   : > { %v2949_v17 = vpop.f32.mrf.mxu2 }
 0x166   : > { %v9935_v36 = vadd.f32 %v2949_v17, %v2672_v4  ;;  %v2673_v51 = vpop.f32.mrf.mxu1 }
 0x167   : > { %v2674_v49 = vadd.f32 %v2673_v51, %v2469_v1  ;;  %8793 = vmatmul.msk.bf16.gmra.mxu3 %vm2061_vm1, %v3107_v2 }
 0x16a   : > { %v2979_v42 = vpop.f32.mrf.mxu3 }
 0x16b   : > { %v9940_v48 = vadd.f32 %v2979_v42, %v2702_v43 }
 0x16c   : > { %v2472_v5 = vpop.f32.mrf.mxu0 }
 0x16d   : > { %v2951_v20 = vpop.f32.mrf.mxu2 }
 0x16e   : > { %v9943_v55 = vadd.f32 %v2951_v20, %v2674_v49  ;;  %v2676_v27 = vpop.f32.mrf.mxu1  ;;  %v3391_v49 = vld [vmem:[#allocation2 + $0x60] sm:$0xff] }
 0x16f   : > { %v2677_v22 = vadd.f32 %v2676_v27, %v2472_v5  ;;  %8819 = vmatmul.msk.bf16.gmra.mxu0 %vm2061_vm1, %v3434_v57  ;;  %v3435_v6 = vpack.c.bf16 %v9608_v50, %v3391_v49  ;;  %v3065_v20 = vld [vmem:[#allocation2 + $0x5f] sm:$0xff] }
 0x171   : > { %8844 = vmatmul.msk.bf16.gmra.mxu1 %vm2061_vm1, %v3760_v25  ;;  %v3109_v25 = vpack.c.bf16 %v9611_v56, %v3065_v20 }
 0x172   : > { %8869 = vmatmul.msk.bf16.gmra.mxu2 %vm2061_vm1, %v9616_v61  ;;  %v2981_v62 = vpop.f32.mrf.mxu3  ;;  %v3718_v61 = vld [vmem:[#allocation2 + $0x69] sm:$0xff] }
 0x173   : > { %v9951_v52 = vadd.f32 %v2981_v62, %v2704_v15  ;;  %v3761_v33 = vpack.c.bf16 %v3718_v61, %v3717_v31 }
 0x174   : > { %v2474_v4 = vpop.f32.mrf.mxu0 }
 0x175   : > { %v2954_v2 = vpop.f32.mrf.mxu2 }
 0x176   : > { %v9955_v1 = vadd.f32 %v2954_v2, %v2677_v22  ;;  %v2678_v17 = vpop.f32.mrf.mxu1  ;;  %v3720_v2 = vld [vmem:[#allocation2 + $0x79] sm:$0xff] }
 0x177   : > { %v2679_v51 = vadd.f32 %v2678_v17, %v2474_v4  ;;  %8794 = vmatmul.msk.bf16.gmra.mxu3 %vm2061_vm1, %v3108_v32  ;;  %v3393_v4 = vld [vmem:[#allocation2 + $0x70] sm:$0xff] }
 0x17a   : > { %v2984_v0 = vpop.f32.mrf.mxu3 }
 0x17b   : > { %v9960_v43 = vadd.f32 %v2984_v0, %v2707_v35  ;;  %v3762_v35 = vpack.c.bf16 %v3720_v2, %v3719_v60  ;;  %v3069_v2 = vld [vmem:[#allocation2 + $0x7f] sm:$0xff] }
 0x17c   : > { %v2477_v21 = vpop.f32.mrf.mxu0 }
 0x17d   : > { %v2956_v37 = vpop.f32.mrf.mxu2 }
 0x17e   : > { %v9963_v42 = vadd.f32 %v2956_v37, %v2679_v51  ;;  %v2681_v57 = vpop.f32.mrf.mxu1  ;;  %v3436_v51 = vpack.c.bf16 %v9625_v10, %v3393_v4 }
 0x17f   : > { %v2682_v5 = vadd.f32 %v2681_v57, %v2477_v21  ;;  %8820 = vmatmul.msk.bf16.gmra.mxu0 %vm2061_vm1, %v3435_v6  ;;  %v3067_v6 = vld [vmem:[#allocation2 + $0x6f] sm:$0xff] }
 0x180   : > { %v3110_v21 = vpack.c.bf16 %v9628_v13, %v3067_v6 }
 0x181   : > { %8845 = vmatmul.msk.bf16.gmra.mxu1 %vm2061_vm1, %v3761_v33 }
 0x182   : > { %8870 = vmatmul.msk.bf16.gmra.mxu2 %vm2061_vm1, %v9633_v19  ;;  %v2986_v3 = vpop.f32.mrf.mxu3 }
 0x183   : > { %v9971_v50 = vadd.f32 %v2986_v3, %v2709_v59  ;;  %v3395_v59 = vld [vmem:[#allocation2 + $0x80] sm:$0xff]  ;;  %v3396_v3 = vld [vmem:[#allocation2 + $0x88] sm:$0xff] }
 0x184   : > { %v2479_v27 = vpop.f32.mrf.mxu0 }
 0x185   : > { %v2959_v22 = vpop.f32.mrf.mxu2 }
 0x186   : > { %v9974_v15 = vadd.f32 %v2959_v22, %v2682_v5  ;;  %v2683_v62 = vpop.f32.mrf.mxu1  ;;  %v3437_v22 = vpack.c.bf16 %v3396_v3, %v3395_v59 }
 0x187   : > { %v2684_v32 = vadd.f32 %v2683_v62, %v2479_v27  ;;  %8795 = vmatmul.msk.bf16.gmra.mxu3 %vm2061_vm1, %v3109_v25 }
 0x18a   : > { %v2989_v19 = vpop.f32.mrf.mxu3 }
 0x18b   : > { %v9979_v17 = vadd.f32 %v2989_v19, %v2712_v28  ;;  %v3070_v19 = vld [vmem:[#allocation2 + $0x87] sm:$0xff] }
 0x18c   : > { %v2482_v56 = vpop.f32.mrf.mxu0 }
 0x18d   : > { %v2961_v49 = vpop.f32.mrf.mxu2 }
 0x18e   : > { %v9982_v31 = vadd.f32 %v2961_v49, %v2684_v32  ;;  %v2686_v61 = vpop.f32.mrf.mxu1 }
 0x18f   : > { %v2687_v0 = vadd.f32 %v2686_v61, %v2482_v56  ;;  %8821 = vmatmul.msk.bf16.gmra.mxu0 %vm2061_vm1, %v3436_v51  ;;  %v3111_v56 = vpack.c.bf16 %v3070_v19, %v3069_v2  ;;  %v2727_v2 = vadd.f32 %v9921_v53, %v9791_v41  ;;  %v3725_v19 = vld [vmem:[#allocation2 + $0xa1] sm:$0xff] }
 0x190   : > { %v14063_v53 = vld [vmem:[#allocation15_spill] sm:$0xff] }
 0x191   : > { %8846 = vmatmul.msk.bf16.gmra.mxu1 %vm2061_vm1, %v3762_v35 }
 0x192   : > { %8871 = vmatmul.msk.bf16.gmra.mxu2 %vm2061_vm1, %v9648_v44  ;;  %v2991_v30 = vpop.f32.mrf.mxu3  ;;  %v3722_v44 = vld [vmem:[#allocation2 + $0x89] sm:$0xff] }
 0x193   : > { %v9990_v10 = vadd.f32 %v2991_v30, %v2714_v63  ;;  %v3763_v32 = vpack.c.bf16 %v3722_v44, %v3721_v54  ;;  %v3397_v63 = vld [vmem:[#allocation2 + $0x90] sm:$0xff]  ;;  %v3398_v30 = vld [vmem:[#allocation2 + $0x98] sm:$0xff] }
 0x194   : > { %v2484_v37 = vpop.f32.mrf.mxu0  ;;  %v3071_v44 = vld [vmem:[#allocation2 + $0x8f] sm:$0xff] }
 0x195   : > { %v2964_v33 = vpop.f32.mrf.mxu2 }
 0x196   : > { %v9993_v57 = vadd.f32 %v2964_v33, %v2687_v0  ;;  %v2688_v5 = vpop.f32.mrf.mxu1  ;;  %v3438_v33 = vpack.c.bf16 %v3398_v30, %v3397_v63  ;;  %v3073_v30 = vld [vmem:[#allocation2 + $0x9f] sm:$0xff] }
 0x197   : > { %v2689_v20 = vadd.f32 %v2688_v5, %v2484_v37  ;;  %8796 = vmatmul.msk.bf16.gmra.mxu3 %vm2061_vm1, %v3110_v21  ;;  %v3724_v21 = vld [vmem:[#allocation2 + $0x99] sm:$0xff] }
 0x198   : > { %v3764_v59 = vpack.c.bf16 %v3724_v21, %v3723_v40 }
 0x19a   : > { %v2994_v25 = vpop.f32.mrf.mxu3 }
 0x19b   : > { %v9998_v27 = vadd.f32 %v2994_v25, %v2717_v39 }
 0x19c   : > { %v2487_v13 = vpop.f32.mrf.mxu0 }
 0x19d   : > { %v2966_v62 = vpop.f32.mrf.mxu2 }
 0x19e   : > { %v10000_v4 = vadd.f32 %v2966_v62, %v2689_v20  ;;  %v2691_v28 = vpop.f32.mrf.mxu1  ;;  %v3112_v62 = vpack.c.bf16 %v9660_v12, %v3071_v44 }
 0x19f   : > { %v2692_v60 = vadd.f32 %v2691_v28, %v2487_v13  ;;  %8822 = vmatmul.msk.bf16.gmra.mxu0 %vm2061_vm1, %v3437_v22  ;;  %v5578_v22 = vsel %vm5576_vm2, %v8940_v16, 0 }
 0x1a0   : > { %5587 = vmatpush.bf16.msra.mxu1 %v5578_v22 }
 0x1a1   : > { %8847 = vmatmul.msk.bf16.gmra.mxu1 %vm2061_vm1, %v3763_v32 }
 0x1a2   : > { %8872 = vmatmul.msk.bf16.gmra.mxu2 %vm2061_vm1, %v9666_v26  ;;  %v2996_v18 = vpop.f32.mrf.mxu3 }
 0x1a3   : > { %v10008_v51 = vadd.f32 %v2996_v18, %v2719_v29  ;;  %v3726_v29 = vld [vmem:[#allocation2 + $0xa9] sm:$0xff] }
 0x1a4   : > { %v2489_v49 = vpop.f32.mrf.mxu0 }
 0x1a5   : > { %v2969_v35 = vpop.f32.mrf.mxu2 }
 0x1a6   : > { %v10010_v61 = vadd.f32 %v2969_v35, %v2692_v60  ;;  %v2693_v0 = vpop.f32.mrf.mxu1 }
 0x1a7   : > { %v2694_v6 = vadd.f32 %v2693_v0, %v2489_v49  ;;  %8797 = vmatmul.msk.bf16.gmra.mxu3 %vm2061_vm1, %v3111_v56  ;;  %v3765_v0 = vpack.c.bf16 %v3726_v29, %v3725_v19  ;;  %v14067_v19 = vld [vmem:[#allocation20_spill] sm:$0xff] }
 0x1aa   : > { %v2999_v26 = vpop.f32.mrf.mxu3 }
 0x1ab   : > { %v10015_v37 = vadd.f32 %v2999_v26, %v2722_v8  ;;  %v14062_v8 = vld [vmem:[#allocation32_spill] sm:$0xff] }
 0x1ac   : > { %v2492_v5 = vpop.f32.mrf.mxu0  ;;  %v2729_v41 = vadd.f32 %v9931_v58, %v14062_v8  ;;  %v14066_v58 = vld [vmem:[#allocation13_spill] sm:$0xff] }
 0x1ad   : > { %v2971_v20 = vpop.f32.mrf.mxu2 }
 0x1ae   : > { %v10017_v3 = vadd.f32 %v2971_v20, %v2694_v6  ;;  %v2696_v39 = vpop.f32.mrf.mxu1 }
 0x1af   : > { %v2697_v54 = vadd.f32 %v2696_v39, %v2492_v5  ;;  %8823 = vmatmul.msk.bf16.gmra.mxu0 %vm2061_vm1, %v3438_v33  ;;  %v3727_v39 = vld [vmem:[#allocation2 + $0xb1] sm:$0xff] }
 0x1b1   : > { %8848 = vmatmul.msk.bf16.gmra.mxu1 %vm2061_vm1, %v3764_v59  ;;  %v3401_v59 = vld [vmem:[#allocation2 + $0xb0] sm:$0xff] }
 0x1b2   : > { %8873 = vmatmul.msk.bf16.gmra.mxu2 %vm2061_vm1, %v9691_v11  ;;  %v3001_v25 = vpop.f32.mrf.mxu3  ;;  %v3399_v11 = vld [vmem:[#allocation2 + $0xa0] sm:$0xff] }
 0x1b3   : > { %v10029_v13 = vadd.f32 %v3001_v25, %v2724_v23  ;;  %v3439_v12 = vpack.c.bf16 %v9681_v47, %v3399_v11  ;;  %v14064_v47 = vld [vmem:[#allocation10_spill] sm:$0xff]  ;;  %v14065_v23 = vld [vmem:[#allocation7_spill] sm:$0xff]  ;;  %v3440_v25 = vpack.c.bf16 %v14066_v58, %v3401_v59  ;;  %v3075_v11 = vld [vmem:[#allocation2 + $0xaf] sm:$0xff] }
 0x1b4   : > { %v2494_v32 = vpop.f32.mrf.mxu0  ;;  %v3113_v26 = vpack.c.bf16 %v14064_v47, %v3073_v30  ;;  %v3729_v47 = vld [vmem:[#allocation2 + $0xc1] sm:$0xff]  ;;  %v14070_v59 = vld [vmem:[#allocation9_spill] sm:$0xff] }
 0x1b5   : > { %v2974_v28 = vpop.f32.mrf.mxu2 }
 0x1b6   : > { %v10032_v60 = vadd.f32 %v2974_v28, %v2697_v54  ;;  %v2698_v46 = vpop.f32.mrf.mxu1  ;;  %v3728_v54 = vld [vmem:[#allocation2 + $0xb9] sm:$0xff] }
 0x1b7   : > { %v2699_v14 = vadd.f32 %v2698_v46, %v2494_v32  ;;  %8798 = vmatmul.msk.bf16.gmra.mxu3 %vm2061_vm1, %v3112_v62  ;;  %v3766_v32 = vpack.c.bf16 %v3728_v54, %v3727_v39  ;;  %v14071_v54 = vld [vmem:[#allocation18_spill] sm:$0xff] }
 0x1ba   : > { %v3004_v18 = vpop.f32.mrf.mxu3 }
 0x1bb   : > { %v10037_v56 = vadd.f32 %v3004_v18, %v2727_v2  ;;  %v14068_v18 = vld [vmem:[#allocation8_spill] sm:$0xff] }
 0x1bc   : > { %v3541_v49 = vpop.f32.mrf.mxu0 }
 0x1bd   : > { %v2976_v35 = vpop.f32.mrf.mxu2 }
 0x1be   : > { %v10040_v6 = vadd.f32 %v2976_v35, %v2699_v14  ;;  %v3867_v63 = vpop.f32.mrf.mxu1  ;;  %v14069_v35 = vld [vmem:[#allocation14_spill] sm:$0xff] }
 0x1bf   : > { %8824 = vmatmul.msk.bf16.gmra.mxu0 %vm2061_vm1, %v3439_v12 }
 0x1c1   : > { %8849 = vmatmul.msk.bf16.gmra.mxu1 %vm2061_vm1, %v3765_v0  ;;  %v3114_v0 = vpack.c.bf16 %v14069_v35, %v3075_v11  ;;  %v14073_v11 = vld [vmem:[#allocation11_spill] sm:$0xff] }
 0x1c2   : > { %8874 = vmatmul.msk.bf16.gmra.mxu2 %vm2061_vm1, %v14063_v53  ;;  %v3006_v40 = vpop.f32.mrf.mxu3  ;;  %v3403_v53 = vld [vmem:[#allocation2 + $0xc0] sm:$0xff] }
 0x1c3   : > { %v10048_v21 = vadd.f32 %v3006_v40, %v2729_v41 }
 0x1c4   : > { %v3543_v33 = vpop.f32.mrf.mxu0 }
 0x1c5   : > { %v4193_v5 = vpop.f32.mrf.mxu2 }
 0x1c6   : > { %v3869_v20 = vpop.f32.mrf.mxu1 }
 0x1c7   : > { %8799 = vmatmul.msk.bf16.gmra.mxu3 %vm2061_vm1, %v3113_v26  ;;  %v3730_v26 = vld [vmem:[#allocation2 + $0xc9] sm:$0xff] }
 0x1c8   : > { %v3767_v58 = vpack.c.bf16 %v3730_v26, %v3729_v47  ;;  %v14075_v26 = vld [vmem:[#allocation12_spill] sm:$0xff] }
 0x1ca   : > { %v3215_v44 = vpop.f32.mrf.mxu3 }
 0x1cb   : > { %v3335_v16 = vadd.f32 %v3215_v44, %v14065_v23  ;;  %v3441_v44 = vpack.c.bf16 %v14071_v54, %v3403_v53  ;;  %v3732_v53 = vld [vmem:[#allocation2 + $0xd9] sm:$0xff] }
 0x1cc   : > { %v3546_v22 = vpop.f32.mrf.mxu0 }
 0x1cd   : > { %v4195_v62 = vpop.f32.mrf.mxu2  ;;  %v3661_v28 = vadd.f32 %v3541_v49, %v3335_v16 }
 0x1ce   : > { %v3872_v46 = vpop.f32.mrf.mxu1 }
 0x1cf   : > { %v3987_v14 = vadd.f32 %v3867_v63, %v3661_v28  ;;  %8825 = vmatmul.msk.bf16.gmra.mxu0 %vm2061_vm1, %v3440_v25  ;;  %v14072_v28 = vld [vmem:[#allocation25_spill] sm:$0xff] }
 0x1d1   : > { %8850 = vmatmul.msk.bf16.gmra.mxu1 %vm2061_vm1, %v3766_v32  ;;  %v10056_v2 = vadd.f32 %v4193_v5, %v3987_v14 }
 0x1d2   : > { %8875 = vmatmul.msk.bf16.gmra.mxu2 %vm2061_vm1, %v14067_v19  ;;  %v3217_v29 = vpop.f32.mrf.mxu3 }
 0x1d3   : > { %v3336_v12 = vadd.f32 %v3217_v29, %v14068_v18  ;;  %v14074_v29 = vld [vmem:[#allocation19_spill] sm:$0xff] }
 0x1d4   : > { %v3548_v30 = vpop.f32.mrf.mxu0 }
 0x1d5   : > { %v4198_v8 = vpop.f32.mrf.mxu2  ;;  %v3662_v49 = vadd.f32 %v3543_v33, %v3336_v12 }
 0x1d6   : > { %v3874_v41 = vpop.f32.mrf.mxu1 }
 0x1d7   : > { %v3988_v63 = vadd.f32 %v3869_v20, %v3662_v49  ;;  %8800 = vmatmul.msk.bf16.gmra.mxu3 %vm2061_vm1, %v3114_v0  ;;  %v3077_v20 = vld [vmem:[#allocation2 + $0xbf] sm:$0xff]  ;;  %v3405_v49 = vld [vmem:[#allocation2 + $0xd0] sm:$0xff] }
 0x1d8   : > { %v3115_v18 = vpack.c.bf16 %v14074_v29, %v3077_v20  ;;  %v14077_v20 = vld [vmem:[#allocation30_spill] sm:$0xff] }
 0x1d9   : > { %v10063_v40 = vadd.f32 %v4195_v62, %v3988_v63 }
 0x1da   : > { %v3220_v5 = vpop.f32.mrf.mxu3 }
 0x1db   : > { %v3337_v39 = vadd.f32 %v3220_v5, %v14070_v59  ;;  %v14076_v59 = vld [vmem:[#allocation23_spill] sm:$0xff] }
 0x1dc   : > { %v3551_v23 = vpop.f32.mrf.mxu0 }
 0x1dd   : > { %v4200_v16 = vpop.f32.mrf.mxu2  ;;  %v3663_v25 = vadd.f32 %v3546_v22, %v3337_v39  ;;  %v3442_v39 = vpack.c.bf16 %v14076_v59, %v3405_v49  ;;  %v3407_v49 = vld [vmem:[#allocation2 + $0xe0] sm:$0xff]  ;;  %v14081_v59 = vld [vmem:[#allocation28_spill] sm:$0xff] }
 0x1de   : > { %v3877_v32 = vpop.f32.mrf.mxu1 }
 0x1df   : > { %v3989_v33 = vadd.f32 %v3872_v46, %v3663_v25  ;;  %8826 = vmatmul.msk.bf16.gmra.mxu0 %vm2061_vm1, %v3441_v44 }
 0x1e1   : > { %8851 = vmatmul.msk.bf16.gmra.mxu1 %vm2061_vm1, %v3767_v58  ;;  %v10069_v62 = vadd.f32 %v4198_v8, %v3989_v33  ;;  %v3731_v8 = vld [vmem:[#allocation2 + $0xd1] sm:$0xff] }
 0x1e2   : > { %8876 = vmatmul.msk.bf16.gmra.mxu2 %vm2061_vm1, %v14072_v28  ;;  %v3222_v14 = vpop.f32.mrf.mxu3  ;;  %v3768_v58 = vpack.c.bf16 %v3732_v53, %v3731_v8  ;;  %v3734_v53 = vld [vmem:[#allocation2 + $0xe9] sm:$0xff] }
 0x1e3   : > { %v3338_v19 = vadd.f32 %v3222_v14, %v14073_v11  ;;  %v14078_v14 = vld [vmem:[#allocation16_spill] sm:$0xff] }
 0x1e4   : > { %v3553_v12 = vpop.f32.mrf.mxu0 }
 0x1e5   : > { %v4203_v35 = vpop.f32.mrf.mxu2  ;;  %v3664_v22 = vadd.f32 %v3548_v30, %v3338_v19  ;;  %v14079_v19 = vld [vmem:[#allocation24_spill] sm:$0xff] }
 0x1e6   : > { %v3879_v0 = vpop.f32.mrf.mxu1 }
 0x1e7   : > { %v3990_v46 = vadd.f32 %v3874_v41, %v3664_v22  ;;  %8801 = vmatmul.msk.bf16.gmra.mxu3 %vm2061_vm1, %v3115_v18  ;;  %v3079_v41 = vld [vmem:[#allocation2 + $0xcf] sm:$0xff] }
 0x1e8   : > { %v3116_v29 = vpack.c.bf16 %v14079_v19, %v3079_v41 }
 0x1e9   : > { %v10076_v63 = vadd.f32 %v4200_v16, %v3990_v46 }
 0x1ea   : > { %v3225_v47 = vpop.f32.mrf.mxu3 }
 0x1eb   : > { %v3339_v5 = vadd.f32 %v3225_v47, %v14075_v26  ;;  %v14080_v26 = vld [vmem:[#allocation17_spill] sm:$0xff] }
 0x1ec   : > { %v3556_v54 = vpop.f32.mrf.mxu0 }
 0x1ed   : > { %v4205_v44 = vpop.f32.mrf.mxu2  ;;  %v3665_v25 = vadd.f32 %v3551_v23, %v3339_v5 }
 0x1ee   : > { %v3882_v33 = vpop.f32.mrf.mxu1 }
 0x1ef   : > { %v3991_v30 = vadd.f32 %v3877_v32, %v3665_v25  ;;  %8827 = vmatmul.msk.bf16.gmra.mxu0 %vm2061_vm1, %v3442_v39  ;;  %v3443_v39 = vpack.c.bf16 %v14081_v59, %v3407_v49  ;;  %v14087_v59 = vld [vmem:[#allocation22_spill] sm:$0xff] }
 0x1f1   : > { %8852 = vmatmul.msk.bf16.gmra.mxu1 %vm2061_vm1, %v3768_v58  ;;  %v10082_v16 = vadd.f32 %v4203_v35, %v3991_v30  ;;  %v3733_v35 = vld [vmem:[#allocation2 + $0xe1] sm:$0xff] }
 0x1f2   : > { %8877 = vmatmul.msk.bf16.gmra.mxu2 %vm2061_vm1, %v14077_v20  ;;  %v3227_v28 = vpop.f32.mrf.mxu3  ;;  %v3769_v30 = vpack.c.bf16 %v3734_v53, %v3733_v35  ;;  %v3409_v53 = vld [vmem:[#allocation2 + $0xf0] sm:$0xff] }
 0x1f3   : > { %v3340_v11 = vadd.f32 %v3227_v28, %v14078_v14  ;;  %v14083_v28 = vld [vmem:[#allocation36_spill] sm:$0xff] }
 0x1f4   : > { %v3558_v18 = vpop.f32.mrf.mxu0 }
 0x1f5   : > { %v4208_v22 = vpop.f32.mrf.mxu2  ;;  %v3666_v23 = vadd.f32 %v3553_v12, %v3340_v11  ;;  %v14084_v11 = vld [vmem:[#allocation21_spill] sm:$0xff] }
 0x1f6   : > { %v3884_v46 = vpop.f32.mrf.mxu1 }
 0x1f7   : > { %v3992_v32 = vadd.f32 %v3879_v0, %v3666_v23  ;;  %8802 = vmatmul.msk.bf16.gmra.mxu3 %vm2061_vm1, %v3116_v29  ;;  %v3081_v0 = vld [vmem:[#allocation2 + $0xdf] sm:$0xff]  ;;  %v14085_v29 = vld [vmem:[#allocation29_spill] sm:$0xff] }
 0x1f8   : > { %v3117_v23 = vpack.c.bf16 %v14085_v29, %v3081_v0 }
 0x1f9   : > { %v10089_v8 = vadd.f32 %v4205_v44, %v3992_v32 }
 0x1fa   : > { %v3230_v47 = vpop.f32.mrf.mxu3 }
 0x1fb   : > { %v3341_v5 = vadd.f32 %v3230_v47, %v14080_v26  ;;  %v3736_v26 = vld [vmem:[#allocation2 + $0xf9] sm:$0xff] }
 0x1fc   : > { %v3561_v58 = vpop.f32.mrf.mxu0 }
 0x1fd   : > { %v4210_v25 = vpop.f32.mrf.mxu2  ;;  %v3667_v41 = vadd.f32 %v3556_v54, %v3341_v5 }
 0x1fe   : > { %v3887_v20 = vpop.f32.mrf.mxu1 }
 0x1ff   : > { %v3993_v12 = vadd.f32 %v3882_v33, %v3667_v41  ;;  %8828 = vmatmul.msk.bf16.gmra.mxu0 %vm2061_vm1, %v3443_v39 }
 0x201   : > { %8853 = vmatmul.msk.bf16.gmra.mxu1 %vm2061_vm1, %v3769_v30  ;;  %v10095_v44 = vadd.f32 %v4208_v22, %v3993_v12  ;;  %v3735_v22 = vld [vmem:[#allocation2 + $0xf1] sm:$0xff] }
 0x202   : > { %8878 = vmatmul.msk.bf16.gmra.mxu2 %vm2061_vm1, %v14083_v28  ;;  %v3232_v14 = vpop.f32.mrf.mxu3  ;;  %v14088_v30 = vld [vmem:[#allocation34_spill] sm:$0xff]  ;;  %v3770_v0 = vpack.c.bf16 %v3736_v26, %v3735_v22 }
 0x203   : > { %14082 = vst [vmem:[#allocation32_spill] sm:$0xff] %v10095_v44  ;;  %v3342_v19 = vadd.f32 %v3232_v14, %v14084_v11  ;;  %v3444_v41 = vpack.c.bf16 %v14088_v30, %v3409_v53  ;;  %v3738_v30 = vld [vmem:[#allocation2 + $0x109] sm:$0xff] }
 0x204   : > { %v3563_v32 = vpop.f32.mrf.mxu0  ;;  %v4069_v44 = vld [vmem:[#allocation2 + $0x147] sm:$0xff] }
 0x205   : > { %v4213_v49 = vpop.f32.mrf.mxu2  ;;  %v3668_v54 = vadd.f32 %v3558_v18, %v3342_v19  ;;  %v14090_v19 = vld [vmem:[#allocation41_spill] sm:$0xff] }
 0x206   : > { %v3889_v35 = vpop.f32.mrf.mxu1 }
 0x207   : > { %v3994_v33 = vadd.f32 %v3884_v46, %v3668_v54  ;;  %8803 = vmatmul.msk.bf16.gmra.mxu3 %vm2061_vm1, %v3117_v23  ;;  %v3083_v46 = vld [vmem:[#allocation2 + $0xef] sm:$0xff]  ;;  %v14091_v23 = vld [vmem:[#allocation26_spill] sm:$0xff] }
 0x209   : > { %v10102_v47 = vadd.f32 %v4210_v25, %v3994_v33  ;;  %v14092_v33 = vld [vmem:[#allocation35_spill] sm:$0xff] }
 0x20a   : > { %v3235_v5 = vpop.f32.mrf.mxu3  ;;  %v3118_v53 = vpack.c.bf16 %v14092_v33, %v3083_v46 }
 0x20b   : > { %14086 = vst [vmem:[#allocation15_spill] sm:$0xff] %v10102_v47  ;;  %v3343_v39 = vadd.f32 %v3235_v5, %v14087_v59  ;;  %v3411_v59 = vld [vmem:[#allocation2 + $0x100] sm:$0xff] }
 0x20c   : > { %v3566_v12 = vpop.f32.mrf.mxu0 }
 0x20d   : > { %v4215_v28 = vpop.f32.mrf.mxu2  ;;  %v3669_v14 = vadd.f32 %v3561_v58, %v3343_v39 }
 0x20e   : > { %v3892_v11 = vpop.f32.mrf.mxu1 }
 0x20f   : > { %v3995_v18 = vadd.f32 %v3887_v20, %v3669_v14  ;;  %8829 = vmatmul.msk.bf16.gmra.mxu0 %vm2061_vm1, %v3444_v41 }
 0x211   : > { %8854 = vmatmul.msk.bf16.gmra.mxu1 %vm2061_vm1, %v3770_v0  ;;  %v10108_v25 = vadd.f32 %v4213_v49, %v3995_v18  ;;  %v3737_v49 = vld [vmem:[#allocation2 + $0x101] sm:$0xff] }
 0x212   : > { %8879 = vmatmul.msk.bf16.gmra.mxu2 %vm2061_vm1, %v14090_v19  ;;  %v3237_v29 = vpop.f32.mrf.mxu3  ;;  %v14094_v0 = vld [vmem:[#allocation27_spill] sm:$0xff]  ;;  %v3771_v46 = vpack.c.bf16 %v3738_v30, %v3737_v49 }
 0x213   : > { %14089 = vst [vmem:[#allocation10_spill] sm:$0xff] %v10108_v25  ;;  %v3344_v54 = vadd.f32 %v3237_v29, %v14091_v23  ;;  %v14095_v18 = vld [vmem:[#allocation39_spill] sm:$0xff] }
 0x214   : > { %v3568_v5 = vpop.f32.mrf.mxu0  ;;  %v3445_v19 = vpack.c.bf16 %v14095_v18, %v3411_v59  ;;  %v14099_v59 = vld [vmem:[#allocation40_spill] sm:$0xff] }
 0x215   : > { %v4218_v22 = vpop.f32.mrf.mxu2  ;;  %v3670_v58 = vadd.f32 %v3563_v32, %v3344_v54  ;;  %v14097_v54 = vld [vmem:[#allocation46_spill] sm:$0xff] }
 0x216   : > { %v3894_v26 = vpop.f32.mrf.mxu1 }
 0x217   : > { %v3996_v20 = vadd.f32 %v3889_v35, %v3670_v58  ;;  %8804 = vmatmul.msk.bf16.gmra.mxu3 %vm2061_vm1, %v3118_v53  ;;  %v3085_v35 = vld [vmem:[#allocation2 + $0xff] sm:$0xff] }
 0x218   : > { %v14098_v58 = vld [vmem:[#allocation31_spill] sm:$0xff] }
 0x219   : > { %v10115_v39 = vadd.f32 %v4215_v28, %v3996_v20 }
 0x21a   : > { %v3240_v41 = vpop.f32.mrf.mxu3 }
 0x21b   : > { %14093 = vst [vmem:[#allocation7_spill] sm:$0xff] %v10115_v39  ;;  %v3345_v14 = vadd.f32 %v3240_v41, %v14094_v0  ;;  %v3119_v41 = vpack.c.bf16 %v14099_v59, %v3085_v35 }
 0x21c   : > { %v3571_v29 = vpop.f32.mrf.mxu0 }
 0x21d   : > { %v4220_v23 = vpop.f32.mrf.mxu2  ;;  %v3671_v33 = vadd.f32 %v3566_v12, %v3345_v14  ;;  %v3413_v14 = vld [vmem:[#allocation2 + $0x110] sm:$0xff] }
 0x21e   : > { %v3897_v25 = vpop.f32.mrf.mxu1 }
 0x21f   : > { %v3997_v32 = vadd.f32 %v3892_v11, %v3671_v33  ;;  %8830 = vmatmul.msk.bf16.gmra.mxu0 %vm2061_vm1, %v3445_v19  ;;  %v3740_v19 = vld [vmem:[#allocation2 + $0x119] sm:$0xff]  ;;  %v4065_v33 = vld [vmem:[#allocation2 + $0x127] sm:$0xff] }
 0x221   : > { %8855 = vmatmul.msk.bf16.gmra.mxu1 %vm2061_vm1, %v3771_v46  ;;  %v10121_v28 = vadd.f32 %v4218_v22, %v3997_v32  ;;  %v3739_v22 = vld [vmem:[#allocation2 + $0x111] sm:$0xff] }
 0x222   : > { %8880 = vmatmul.msk.bf16.gmra.mxu2 %vm2061_vm1, %v14097_v54  ;;  %v3242_v53 = vpop.f32.mrf.mxu3  ;;  %v10130_v32 = vld [vmem:[#allocation2 + $0x12f] sm:$0xff] }
 0x223   : > { %14096 = vst [vmem:[#allocation13_spill] sm:$0xff] %v10121_v28  ;;  %v3346_v20 = vadd.f32 %v3242_v53, %v14098_v58  ;;  %v14101_v54 = vld [vmem:[#allocation33_spill] sm:$0xff]  ;;  %v14102_v58 = vld [vmem:[#allocation44_spill] sm:$0xff] }
 0x224   : > { %v3573_v0 = vpop.f32.mrf.mxu0  ;;  %v3446_v35 = vpack.c.bf16 %v14102_v58, %v3413_v14  ;;  %v14105_v58 = vld [vmem:[#allocation45_spill] sm:$0xff] }
 0x225   : > { %v4223_v49 = vpop.f32.mrf.mxu2  ;;  %v3672_v12 = vadd.f32 %v3568_v5, %v3346_v20  ;;  %v3772_v5 = vpack.c.bf16 %v3740_v19, %v3739_v22 }
 0x226   : > { %v3899_v30 = vpop.f32.mrf.mxu1 }
 0x227   : > { %v3998_v11 = vadd.f32 %v3894_v26, %v3672_v12  ;;  %8805 = vmatmul.msk.bf16.gmra.mxu3 %vm2061_vm1, %v3119_v41  ;;  %v4098_v26 = vpack.c.bf16 %v10130_v32, %v4065_v33 }
 0x229   : > { %v10128_v18 = vadd.f32 %v4220_v23, %v3998_v11  ;;  %v3087_v23 = vld [vmem:[#allocation2 + $0x10f] sm:$0xff] }
 0x22a   : > { %v3245_v46 = vpop.f32.mrf.mxu3 }
 0x22b   : > { %14100 = vst [vmem:[#allocation20_spill] sm:$0xff] %v10128_v18  ;;  %v3347_v53 = vadd.f32 %v3245_v46, %v14101_v54  ;;  %v14104_v54 = vld [vmem:[#allocation37_spill] sm:$0xff]  ;;  %v3120_v18 = vpack.c.bf16 %v14105_v58, %v3087_v23 }
 0x22c   : > { %v3576_v59 = vpop.f32.mrf.mxu0 }
 0x22d   : > { %v4225_v28 = vpop.f32.mrf.mxu2  ;;  %v3673_v20 = vadd.f32 %v3571_v29, %v3347_v53 }
 0x22e   : > { %v3902_v41 = vpop.f32.mrf.mxu1 }
 0x22f   : > { %v3999_v12 = vadd.f32 %v3897_v25, %v3673_v20  ;;  %8831 = vmatmul.msk.bf16.gmra.mxu0 %vm2061_vm1, %v3446_v35  ;;  %v3415_v25 = vld [vmem:[#allocation2 + $0x120] sm:$0xff]  ;;  %v3416_v35 = vld [vmem:[#allocation2 + $0x128] sm:$0xff] }
 0x230   : > { %v3447_v23 = vpack.c.bf16 %v3416_v35, %v3415_v25  ;;  %v5429_v25 = vld [vmem:[%s13952_s4] sm:$0xf] }
 0x231   : > { %8856 = vmatmul.msk.bf16.gmra.mxu1 %vm2061_vm1, %v3772_v5  ;;  %v10137_v11 = vadd.f32 %v4223_v49, %v3999_v12  ;;  %v3741_v49 = vld [vmem:[#allocation2 + $0x121] sm:$0xff]  ;;  %v3742_v5 = vld [vmem:[#allocation2 + $0x129] sm:$0xff] }
 0x232   : > { %8881 = vmatmul.msk.bf16.gmra.mxu2 %vm2061_vm1, %v4098_v26  ;;  %v3247_v46 = vpop.f32.mrf.mxu3  ;;  %v4067_v26 = vld [vmem:[#allocation2 + $0x137] sm:$0xff] }
 0x233   : > { %14103 = vst [vmem:[#allocation8_spill] sm:$0xff] %v10137_v11  ;;  %v3348_v14 = vadd.f32 %v3247_v46, %v14104_v54  ;;  %v10145_v11 = vld [vmem:[#allocation2 + $0x13f] sm:$0xff] }
 0x234   : > { %v3578_v22 = vpop.f32.mrf.mxu0  ;;  %v14107_v46 = vld [vmem:[#allocation38_spill] sm:$0xff] }
 0x235   : > { %v4228_v29 = vpop.f32.mrf.mxu2  ;;  %v3674_v19 = vadd.f32 %v3573_v0, %v3348_v14  ;;  %v3773_v0 = vpack.c.bf16 %v3742_v5, %v3741_v49  ;;  %v14109_v49 = vld [vmem:[#allocation42_spill] sm:$0xff] }
 0x236   : > { %v3904_v53 = vpop.f32.mrf.mxu1 }
 0x237   : > { %v4000_v39 = vadd.f32 %v3899_v30, %v3674_v19  ;;  %8806 = vmatmul.msk.bf16.gmra.mxu3 %vm2061_vm1, %v3120_v18  ;;  %v4099_v30 = vpack.c.bf16 %v10145_v11, %v4067_v26 }
 0x239   : > { %v10143_v20 = vadd.f32 %v4225_v28, %v4000_v39  ;;  %v3089_v39 = vld [vmem:[#allocation2 + $0x11f] sm:$0xff] }
 0x23a   : > { %v3250_v12 = vpop.f32.mrf.mxu3 }
 0x23b   : > { %14106 = vst [vmem:[#allocation14_spill] sm:$0xff] %v10143_v20  ;;  %v3349_v54 = vadd.f32 %v3250_v12, %v14107_v46  ;;  %v3121_v12 = vpack.c.bf16 %v4065_v33, %v3089_v39 }
 0x23c   : > { %v3581_v58 = vpop.f32.mrf.mxu0 }
 0x23d   : > { %v4230_v47 = vpop.f32.mrf.mxu2  ;;  %v3675_v14 = vadd.f32 %v3576_v59, %v3349_v54  ;;  %v5782_v59 = vsel %vm5576_vm2, %v5429_v25, 0  ;;  %v10162_v25 = vld [vmem:[#allocation2 + $0x14f] sm:$0xff] }
 0x23e   : > { %v3907_v18 = vpop.f32.mrf.mxu1  ;;  %5791 = vmatpush.bf16.msra.mxu2 %v5782_v59 }
 0x23f   : > { %v4001_v19 = vadd.f32 %v3902_v41, %v3675_v14  ;;  %8832 = vmatmul.msk.bf16.gmra.mxu0 %vm2061_vm1, %v3447_v23  ;;  %v3418_v14 = vld [vmem:[#allocation2 + $0x138] sm:$0xff] }
 0x241   : > { %8857 = vmatmul.msk.bf16.gmra.mxu1 %vm2061_vm1, %v3773_v0  ;;  %v10151_v28 = vadd.f32 %v4228_v29, %v4001_v19  ;;  %v3417_v29 = vld [vmem:[#allocation2 + $0x130] sm:$0xff] }
 0x242   : > { %8882 = vmatmul.msk.bf16.gmra.mxu2 %vm2061_vm1, %v4099_v30  ;;  %v3252_v35 = vpop.f32.mrf.mxu3  ;;  %v3743_v19 = vld [vmem:[#allocation2 + $0x131] sm:$0xff]  ;;  %v3448_v39 = vpack.c.bf16 %v3418_v14, %v3417_v29  ;;  %v3122_v29 = vpack.c.bf16 %v4067_v26, %v10130_v32 }
 0x243   : > { %14108 = vst [vmem:[#allocation9_spill] sm:$0xff] %v10151_v28  ;;  %v3350_v5 = vadd.f32 %v3252_v35, %v14109_v49  ;;  %v3744_v28 = vld [vmem:[#allocation2 + $0x139] sm:$0xff] }
 0x244   : > { %v3583_v41 = vpop.f32.mrf.mxu0  ;;  %v14111_v35 = vld [vmem:[#allocation43_spill] sm:$0xff] }
 0x245   : > { %v4233_v46 = vpop.f32.mrf.mxu2  ;;  %v3676_v54 = vadd.f32 %v3578_v22, %v3350_v5  ;;  %v3774_v22 = vpack.c.bf16 %v3744_v28, %v3743_v19 }
 0x246   : > { %v3909_v23 = vpop.f32.mrf.mxu1 }
 0x247   : > { %v4002_v0 = vadd.f32 %v3904_v53, %v3676_v54  ;;  %8807 = vmatmul.msk.bf16.gmra.mxu3 %vm2061_vm1, %v3121_v12  ;;  %v4100_v53 = vpack.c.bf16 %v10162_v25, %v4069_v44 }
 0x249   : > { %v10160_v30 = vadd.f32 %v4230_v47, %v4002_v0 }
 0x24a   : > { %v3255_v20 = vpop.f32.mrf.mxu3 }
 0x24b   : > { %14110 = vst [vmem:[#allocation18_spill] sm:$0xff] %v10160_v30  ;;  %v3351_v33 = vadd.f32 %v3255_v20, %v14111_v35  ;;  %v14112_v30 = vld [vmem:[#allocation47_spill] sm:$0xff] }
 0x24c   : > { %v3586_v59 = vpop.f32.mrf.mxu0 }
 0x24d   : > { %v4235_v49 = vpop.f32.mrf.mxu2  ;;  %v3677_v5 = vadd.f32 %v3581_v58, %v3351_v33  ;;  %v3420_v33 = vld [vmem:[#allocation2 + $0x148] sm:$0xff] }
 0x24e   : > { %v3912_v12 = vpop.f32.mrf.mxu1 }
 0x24f   : > { %v4003_v54 = vadd.f32 %v3907_v18, %v3677_v5  ;;  %8833 = vmatmul.msk.bf16.gmra.mxu0 %vm2061_vm1, %v3448_v39  ;;  %v3419_v18 = vld [vmem:[#allocation2 + $0x140] sm:$0xff] }
 0x250   : > { %v3449_v32 = vpack.c.bf16 %v3420_v33, %v3419_v18  ;;  %v3123_v18 = vpack.c.bf16 %v4069_v44, %v10145_v11 }
 0x251   : > { %8858 = vmatmul.msk.bf16.gmra.mxu1 %vm2061_vm1, %v3774_v22  ;;  %v10168_v47 = vadd.f32 %v4233_v46, %v4003_v54  ;;  %v3745_v46 = vld [vmem:[#allocation2 + $0x141] sm:$0xff]  ;;  %v3746_v22 = vld [vmem:[#allocation2 + $0x149] sm:$0xff] }
 0x252   : > { %8883 = vmatmul.msk.bf16.gmra.mxu2 %vm2061_vm1, %v4100_v53  ;;  %v3257_v0 = vpop.f32.mrf.mxu3  ;;  %v4071_v53 = vld [vmem:[#allocation2 + $0x157] sm:$0xff]  ;;  %v10176_v54 = vld [vmem:[#allocation2 + $0x15f] sm:$0xff] }
 0x253   : > { %v3352_v20 = vadd.f32 %v3257_v0, %v14112_v30 }
 0x254   : > { %v3588_v14 = vpop.f32.mrf.mxu0 }
 0x255   : > { %v4238_v28 = vpop.f32.mrf.mxu2  ;;  %v3678_v58 = vadd.f32 %v3583_v41, %v3352_v20  ;;  %v3775_v41 = vpack.c.bf16 %v3746_v22, %v3745_v46 }
 0x256   : > { %v3914_v19 = vpop.f32.mrf.mxu1 }
 0x257   : > { %v4004_v35 = vadd.f32 %v3909_v23, %v3678_v58  ;;  %8808 = vmatmul.msk.bf16.gmra.mxu3 %vm2061_vm1, %v3122_v29  ;;  %v4101_v23 = vpack.c.bf16 %v10176_v54, %v4071_v53 }
 0x259   : > { %v10174_v39 = vadd.f32 %v4235_v49, %v4004_v35 }
 0x25a   : > { %v3260_v5 = vpop.f32.mrf.mxu3 }
 0x25b   : > { %v3353_v30 = vadd.f32 %v3260_v5, %v9882_v7 }
 0x25c   : > { %v3591_v26 = vpop.f32.mrf.mxu0 }
 0x25d   : > { %v4240_v0 = vpop.f32.mrf.mxu2  ;;  %v3679_v20 = vadd.f32 %v3586_v59, %v3353_v30  ;;  %v3422_v30 = vld [vmem:[#allocation2 + $0x158] sm:$0xff] }
 0x25e   : > { %v3917_v29 = vpop.f32.mrf.mxu1 }
 0x25f   : > { %v4005_v58 = vadd.f32 %v3912_v12, %v3679_v20  ;;  %8834 = vmatmul.msk.bf16.gmra.mxu0 %vm2061_vm1, %v3449_v32  ;;  %v3421_v12 = vld [vmem:[#allocation2 + $0x150] sm:$0xff] }
 0x260   : > { %v3450_v44 = vpack.c.bf16 %v3422_v30, %v3421_v12  ;;  %v3124_v12 = vpack.c.bf16 %v4071_v53, %v10162_v25 }
 0x261   : > { %8859 = vmatmul.msk.bf16.gmra.mxu1 %vm2061_vm1, %v3775_v41  ;;  %v10182_v49 = vadd.f32 %v4238_v28, %v4005_v58  ;;  %v3747_v28 = vld [vmem:[#allocation2 + $0x151] sm:$0xff]  ;;  %v3748_v41 = vld [vmem:[#allocation2 + $0x159] sm:$0xff] }
 0x262   : > { %8884 = vmatmul.msk.bf16.gmra.mxu2 %vm2061_vm1, %v4101_v23  ;;  %v3262_v35 = vpop.f32.mrf.mxu3  ;;  %v4073_v23 = vld [vmem:[#allocation2 + $0x167] sm:$0xff]  ;;  %v10190_v58 = vld [vmem:[#allocation2 + $0x16f] sm:$0xff] }
 0x263   : > { %v3354_v7 = vadd.f32 %v3262_v35, %v9890_v45  ;;  %v3776_v35 = vpack.c.bf16 %v3748_v41, %v3747_v28 }
 0x264   : > { %v3593_v33 = vpop.f32.mrf.mxu0 }
 0x265   : > { %v4243_v46 = vpop.f32.mrf.mxu2  ;;  %v3680_v59 = vadd.f32 %v3588_v14, %v3354_v7  ;;  %v4102_v7 = vpack.c.bf16 %v10190_v58, %v4073_v23 }
 0x266   : > { %v3919_v22 = vpop.f32.mrf.mxu1 }
 0x267   : > { %v4006_v5 = vadd.f32 %v3914_v19, %v3680_v59  ;;  %8809 = vmatmul.msk.bf16.gmra.mxu3 %vm2061_vm1, %v3123_v18 }
 0x269   : > { %v10188_v32 = vadd.f32 %v4240_v0, %v4006_v5 }
 0x26a   : > { %v3265_v20 = vpop.f32.mrf.mxu3 }
 0x26b   : > { %14113 = vst [vmem:[#allocation25_spill] sm:$0xff] %v10188_v32  ;;  %v3355_v45 = vadd.f32 %v3265_v20, %v9900_v24  ;;  %v2125_v32 = vld [vmem:[%s9462_s21 + $0x170] sm:$0xff]  ;;  %v3423_v20 = vld [vmem:[#allocation2 + $0x160] sm:$0xff] }
 0x26c   : > { %v3596_v11 = vpop.f32.mrf.mxu0  ;;  %2173 = vst.msk [vmem:[#allocation2 + $0x190] sm:$0xff] %vm2061_vm1, %v2125_v32 }
 0x26d   : > { %v4245_v14 = vpop.f32.mrf.mxu2  ;;  %v3681_v19 = vadd.f32 %v3591_v26, %v3355_v45 }
 0x26e   : > { %v3922_v18 = vpop.f32.mrf.mxu1 }
 0x26f   : > { %v4007_v59 = vadd.f32 %v3917_v29, %v3681_v19  ;;  %8835 = vmatmul.msk.bf16.gmra.mxu0 %vm2061_vm1, %v3450_v44  ;;  %v3749_v44 = vld [vmem:[#allocation2 + $0x161] sm:$0xff] }
 0x271   : > { %8860 = vmatmul.msk.bf16.gmra.mxu1 %vm2061_vm1, %v3776_v35  ;;  %v10196_v0 = vadd.f32 %v4243_v46, %v4007_v59  ;;  %v3424_v46 = vld [vmem:[#allocation2 + $0x168] sm:$0xff] }
 0x272   : > { %8885 = vmatmul.msk.bf16.gmra.mxu2 %vm2061_vm1, %v4102_v7  ;;  %v3267_v5 = vpop.f32.mrf.mxu3  ;;  %v3750_v35 = vld [vmem:[#allocation2 + $0x169] sm:$0xff]  ;;  %v4075_v7 = vld [vmem:[#allocation2 + $0x177] sm:$0xff]  ;;  %v3451_v53 = vpack.c.bf16 %v3424_v46, %v3423_v20  ;;  %v3125_v20 = vpack.c.bf16 %v4073_v23, %v10176_v54 }
 0x273   : > { %14114 = vst [vmem:[#allocation11_spill] sm:$0xff] %v10196_v0  ;;  %v3356_v24 = vadd.f32 %v3267_v5, %v9908_v34  ;;  %v10206_v34 = vld [vmem:[#allocation2 + $0x17f] sm:$0xff]  ;;  %v3777_v59 = vpack.c.bf16 %v3750_v35, %v3749_v44 }
 0x274   : > { %v3598_v26 = vpop.f32.mrf.mxu0  ;;  %v4103_v5 = vpack.c.bf16 %v10206_v34, %v4075_v7 }
 0x275   : > { %v4248_v30 = vpop.f32.mrf.mxu2  ;;  %v3682_v28 = vadd.f32 %v3593_v33, %v3356_v24 }
 0x276   : > { %v3924_v29 = vpop.f32.mrf.mxu1 }
 0x277   : > { %v4008_v41 = vadd.f32 %v3919_v22, %v3682_v28  ;;  %8810 = vmatmul.msk.bf16.gmra.mxu3 %vm2061_vm1, %v3124_v12 }
 0x279   : > { %v10204_v45 = vadd.f32 %v4245_v14, %v4008_v41  ;;  %v2126_v41 = vld [vmem:[%s9462_s21 + $0x178] sm:$0xff] }
 0x27a   : > { %v3270_v19 = vpop.f32.mrf.mxu3  ;;  %2174 = vst.msk [vmem:[#allocation2 + $0x198] sm:$0xff] %vm2061_vm1, %v2126_v41 }
 0x27b   : > { %14115 = vst [vmem:[#allocation19_spill] sm:$0xff] %v10204_v45  ;;  %v3357_v25 = vadd.f32 %v3270_v19, %v9918_v38  ;;  %v3426_v19 = vld [vmem:[#allocation2 + $0x178] sm:$0xff] }
 0x27c   : > { %v3601_v32 = vpop.f32.mrf.mxu0 }
 0x27d   : > { %v4250_v33 = vpop.f32.mrf.mxu2  ;;  %v3683_v22 = vadd.f32 %v3596_v11, %v3357_v25 }
 0x27e   : > { %v3927_v24 = vpop.f32.mrf.mxu1 }
 0x27f   : > { %v4009_v12 = vadd.f32 %v3922_v18, %v3683_v22  ;;  %8836 = vmatmul.msk.bf16.gmra.mxu0 %vm2061_vm1, %v3451_v53  ;;  %v3751_v53 = vld [vmem:[#allocation2 + $0x171] sm:$0xff] }
 0x281   : > { %8861 = vmatmul.msk.bf16.gmra.mxu1 %vm2061_vm1, %v3777_v59  ;;  %v10212_v14 = vadd.f32 %v4248_v30, %v4009_v12  ;;  %v3425_v30 = vld [vmem:[#allocation2 + $0x170] sm:$0xff]  ;;  %v3752_v59 = vld [vmem:[#allocation2 + $0x179] sm:$0xff] }
 0x282   : > { %8886 = vmatmul.msk.bf16.gmra.mxu2 %vm2061_vm1, %v4103_v5  ;;  %v3272_v28 = vpop.f32.mrf.mxu3  ;;  %v10224_v5 = vld [vmem:[#allocation2 + $0x18f] sm:$0xff]  ;;  %v3452_v23 = vpack.c.bf16 %v3426_v19, %v3425_v30 }
 0x283   : > { %14116 = vst [vmem:[#allocation12_spill] sm:$0xff] %v10212_v14  ;;  %v3358_v38 = vadd.f32 %v3272_v28, %v9925_v9  ;;  %v4077_v9 = vld [vmem:[#allocation2 + $0x187] sm:$0xff]  ;;  %v3778_v28 = vpack.c.bf16 %v3752_v59, %v3751_v53 }
 0x284   : > { %v3603_v11 = vpop.f32.mrf.mxu0  ;;  %v4104_v41 = vpack.c.bf16 %v10224_v5, %v4077_v9  ;;  %v3428_v59 = vld [vmem:[#allocation2 + $0x188] sm:$0xff] }
 0x285   : > { %v4253_v46 = vpop.f32.mrf.mxu2  ;;  %v3684_v44 = vadd.f32 %v3598_v26, %v3358_v38 }
 0x286   : > { %v10219_v18 = vpop.f32.mrf.mxu1 }
 0x287   : > { %v4010_v35 = vadd.f32 %v3924_v29, %v3684_v44  ;;  %8811 = vmatmul.msk.bf16.gmra.mxu3 %vm2061_vm1, %v3125_v20 }
 0x289   : > { %v10222_v25 = vadd.f32 %v4250_v33, %v4010_v35  ;;  %v3126_v35 = vpack.c.bf16 %v4075_v7, %v10190_v58 }
 0x28a   : > { %v3275_v22 = vpop.f32.mrf.mxu3 }
 0x28b   : > { %14117 = vst [vmem:[#allocation23_spill] sm:$0xff] %v10222_v25  ;;  %v3359_v54 = vadd.f32 %v3275_v22, %v9935_v36  ;;  %v3753_v22 = vld [vmem:[#allocation2 + $0x181] sm:$0xff] }
 0x28c   : > { %v3606_v12 = vpop.f32.mrf.mxu0 }
 0x28d   : > { %v10227_v26 = vpop.f32.mrf.mxu2  ;;  %v3685_v29 = vadd.f32 %v3601_v32, %v3359_v54 }
 0x28e   : > { %v3932_v38 = vpop.f32.mrf.mxu1 }
 0x28f   : > { %v4011_v20 = vadd.f32 %v3927_v24, %v3685_v29  ;;  %8837 = vmatmul.msk.bf16.gmra.mxu0 %vm2061_vm1, %v3452_v23  ;;  %v3427_v24 = vld [vmem:[#allocation2 + $0x180] sm:$0xff]  ;;  %v4079_v23 = vld [vmem:[#allocation2 + $0x197] sm:$0xff] }
 0x291   : > { %8862 = vmatmul.msk.bf16.gmra.mxu1 %vm2061_vm1, %v3778_v28  ;;  %v10232_v33 = vadd.f32 %v4253_v46, %v4011_v20  ;;  %v3754_v46 = vld [vmem:[#allocation2 + $0x189] sm:$0xff]  ;;  %v4080_v28 = vld [vmem:[#allocation2 + $0x19f] sm:$0xff] }
 0x292   : > { %8887 = vmatmul.msk.bf16.gmra.mxu2 %vm2061_vm1, %v4104_v41  ;;  %v3277_v44 = vpop.f32.mrf.mxu3  ;;  %v3779_v7 = vpack.c.bf16 %v3754_v46, %v3753_v22  ;;  %v4105_v20 = vpack.c.bf16 %v4080_v28, %v4079_v23  ;;  %v3430_v46 = vld [vmem:[#allocation2 + $0x198] sm:$0xff] }
 0x293   : > { %14118 = vst [vmem:[#allocation30_spill] sm:$0xff] %v10232_v33  ;;  %v3360_v36 = vadd.f32 %v3277_v44, %v9943_v55  ;;  %v3453_v55 = vpack.c.bf16 %v3428_v59, %v3427_v24  ;;  %v3127_v24 = vpack.c.bf16 %v4077_v9, %v10206_v34  ;;  %v3755_v28 = vld [vmem:[#allocation2 + $0x191] sm:$0xff] }
 0x294   : > { %v3608_v30 = vpop.f32.mrf.mxu0 }
 0x295   : > { %v4258_v19 = vpop.f32.mrf.mxu2  ;;  %v10237_v32 = vadd.f32 %v3603_v11, %v3360_v36 }
 0x296   : > { %v10239_v53 = vpop.f32.mrf.mxu1 }
 0x297   : > { %8812 = vmatmul.msk.bf16.gmra.mxu3 %vm2061_vm1, %v3126_v35 }
 0x29a   : > { %v3280_v54 = vpop.f32.mrf.mxu3 }
 0x29b   : > { %v3361_v29 = vadd.f32 %v3280_v54, %v9955_v1 }
 0x29c   : > { %v3611_v41 = vpop.f32.mrf.mxu0 }
 0x29d   : > { %v10243_v58 = vpop.f32.mrf.mxu2  ;;  %v3687_v11 = vadd.f32 %v3606_v12, %v3361_v29 }
 0x29e   : > { %v3937_v44 = vpop.f32.mrf.mxu1 }
 0x29f   : > { %v4013_v36 = vadd.f32 %v3932_v38, %v3687_v11  ;;  %8838 = vmatmul.msk.bf16.gmra.mxu0 %vm2061_vm1, %v3453_v55  ;;  %v3429_v38 = vld [vmem:[#allocation2 + $0x190] sm:$0xff]  ;;  %v4081_v55 = vld [vmem:[#allocation2 + $0x1a7] sm:$0xff] }
 0x2a1   : > { %8863 = vmatmul.msk.bf16.gmra.mxu1 %vm2061_vm1, %v3779_v7  ;;  %v10247_v35 = vadd.f32 %v4258_v19, %v4013_v36  ;;  %v3756_v19 = vld [vmem:[#allocation2 + $0x199] sm:$0xff]  ;;  %v4082_v7 = vld [vmem:[#allocation2 + $0x1af] sm:$0xff] }
 0x2a2   : > { %8888 = vmatmul.msk.bf16.gmra.mxu2 %vm2061_vm1, %v4105_v20  ;;  %v3282_v33 = vpop.f32.mrf.mxu3  ;;  %v3780_v9 = vpack.c.bf16 %v3756_v19, %v3755_v28  ;;  %v4106_v20 = vpack.c.bf16 %v4082_v7, %v4081_v55  ;;  %v4688_v19 = vld [vmem:[#allocation2 + $0x41] sm:$0xff] }
 0x2a3   : > { %14119 = vst [vmem:[#allocation16_spill] sm:$0xff] %v10247_v35  ;;  %v3362_v1 = vadd.f32 %v3282_v33, %v9963_v42  ;;  %v3454_v42 = vpack.c.bf16 %v3430_v46, %v3429_v38  ;;  %v3128_v38 = vpack.c.bf16 %v4079_v23, %v10224_v5  ;;  %v4361_v23 = vld [vmem:[#allocation2 + $0x38] sm:$0xff] }
 0x2a4   : > { %v3613_v59 = vpop.f32.mrf.mxu0 }
 0x2a5   : > { %v4263_v54 = vpop.f32.mrf.mxu2  ;;  %v10252_v22 = vadd.f32 %v3608_v30, %v3362_v1 }
 0x2a6   : > { %v10254_v12 = vpop.f32.mrf.mxu1 }
 0x2a7   : > { %8813 = vmatmul.msk.bf16.gmra.mxu3 %vm2061_vm1, %v3127_v24 }
 0x2aa   : > { %v3285_v29 = vpop.f32.mrf.mxu3 }
 0x2ab   : > { %v3363_v11 = vadd.f32 %v3285_v29, %v9974_v15 }
 0x2ac   : > { %v3616_v33 = vpop.f32.mrf.mxu0 }
 0x2ad   : > { %v10258_v34 = vpop.f32.mrf.mxu2  ;;  %v3689_v30 = vadd.f32 %v3611_v41, %v3363_v11 }
 0x2ae   : > { %v3942_v36 = vpop.f32.mrf.mxu1 }
 0x2af   : > { %v4015_v1 = vadd.f32 %v3937_v44, %v3689_v30  ;;  %8839 = vmatmul.msk.bf16.gmra.mxu0 %vm2061_vm1, %v3454_v42  ;;  %v4687_v44 = vld [vmem:[#allocation2 + $0x39] sm:$0xff] }
 0x2b0   : > { %v4735_v7 = vpack.c.bf16 %v4688_v19, %v4687_v44 }
 0x2b1   : > { %8864 = vmatmul.msk.bf16.gmra.mxu1 %vm2061_vm1, %v3780_v9  ;;  %v10262_v24 = vadd.f32 %v4263_v54, %v4015_v1 }
 0x2b2   : > { %8889 = vmatmul.msk.bf16.gmra.mxu2 %vm2061_vm1, %v4106_v20  ;;  %v3287_v35 = vpop.f32.mrf.mxu3 }
 0x2b3   : > { %14120 = vst [vmem:[#allocation24_spill] sm:$0xff] %v10262_v24  ;;  %v3364_v15 = vadd.f32 %v3287_v35, %v9982_v31 }
 0x2b4   : > { %v3618_v46 = vpop.f32.mrf.mxu0 }
 0x2b5   : > { %v4268_v29 = vpop.f32.mrf.mxu2  ;;  %v10267_v28 = vadd.f32 %v3613_v59, %v3364_v15  ;;  %v4362_v59 = vld [vmem:[#allocation2 + $0x40] sm:$0xff] }
 0x2b6   : > { %v10269_v41 = vpop.f32.mrf.mxu1  ;;  %v4409_v1 = vpack.c.bf16 %v4362_v59, %v4361_v23  ;;  %v4364_v23 = vld [vmem:[#allocation2 + $0x50] sm:$0xff] }
 0x2b7   : > { %8814 = vmatmul.msk.bf16.gmra.mxu3 %vm2061_vm1, %v3128_v38 }
 0x2ba   : > { %v3290_v55 = vpop.f32.mrf.mxu3 }
 0x2bb   : > { %v3365_v54 = vadd.f32 %v3290_v55, %v9993_v57 }
 0x2bc   : > { %v3621_v11 = vpop.f32.mrf.mxu0 }
 0x2bd   : > { %v10273_v42 = vpop.f32.mrf.mxu2  ;;  %v3691_v31 = vadd.f32 %v3616_v33, %v3365_v54  ;;  %v4689_v33 = vld [vmem:[#allocation2 + $0x49] sm:$0xff] }
 0x2be   : > { %v3947_v35 = vpop.f32.mrf.mxu1 }
 0x2bf   : > { %v4017_v5 = vadd.f32 %v3942_v36, %v3691_v31  ;;  %8916 = vmatmul.msk.bf16.vlgmr.msra.gmra.mxu0 %vm2061_vm1, %v4735_v7  ;;  %v4690_v36 = vld [vmem:[#allocation2 + $0x51] sm:$0xff] }
 0x2c0   : > { %v4736_v54 = vpack.c.bf16 %v4690_v36, %v4689_v33 }
 0x2c1   : > { %v10276_v9 = vadd.f32 %v4268_v29, %v4017_v5 }
 0x2c2   : > { %v3292_v30 = vpop.f32.mrf.mxu3 }
 0x2c3   : > { %14121 = vst [vmem:[#allocation17_spill] sm:$0xff] %v10276_v9  ;;  %v3366_v20 = vadd.f32 %v3292_v30, %v10000_v4 }
 0x2c4   : > { %v3623_v15 = vpop.f32.mrf.mxu0 }
 0x2c5   : > { %v4273_v38 = vpop.f32.mrf.mxu2  ;;  %v10279_v57 = vadd.f32 %v3618_v46, %v3366_v20  ;;  %v4363_v46 = vld [vmem:[#allocation2 + $0x48] sm:$0xff] }
 0x2c6   : > { %v10281_v44 = vpop.f32.mrf.mxu1 }
 0x2c7   : > { %8891 = vmatmul.msk.bf16.vlgmr.msra.gmra.mxu3 %vm2061_vm1, %v4409_v1  ;;  %v4410_v1 = vpack.c.bf16 %v4364_v23, %v4363_v46  ;;  %v4366_v46 = vld [vmem:[#allocation2 + $0x60] sm:$0xff] }
 0x2ca   : > { %v3295_v19 = vpop.f32.mrf.mxu3 }
 0x2cb   : > { %v3367_v55 = vadd.f32 %v3295_v19, %v10010_v61 }
 0x2cc   : > { %v3626_v29 = vpop.f32.mrf.mxu0 }
 0x2cd   : > { %v10285_v7 = vpop.f32.mrf.mxu2  ;;  %v3693_v31 = vadd.f32 %v3621_v11, %v3367_v55  ;;  %v4691_v11 = vld [vmem:[#allocation2 + $0x59] sm:$0xff] }
 0x2ce   : > { %v3952_v4 = vpop.f32.mrf.mxu1 }
 0x2cf   : > { %v4019_v5 = vadd.f32 %v3947_v35, %v3693_v31  ;;  %8917 = vmatmul.msk.bf16.gmra.mxu0 %vm2061_vm1, %v4736_v54  ;;  %v4692_v35 = vld [vmem:[#allocation2 + $0x61] sm:$0xff] }
 0x2d0   : > { %v4737_v55 = vpack.c.bf16 %v4692_v35, %v4691_v11 }
 0x2d1   : > { %v10288_v59 = vadd.f32 %v4273_v38, %v4019_v5 }
 0x2d2   : > { %v3297_v30 = vpop.f32.mrf.mxu3 }
 0x2d3   : > { %14122 = vst [vmem:[#allocation28_spill] sm:$0xff] %v10288_v59  ;;  %v3368_v20 = vadd.f32 %v3297_v30, %v10017_v3 }
 0x2d4   : > { %v3628_v9 = vpop.f32.mrf.mxu0 }
 0x2d5   : > { %v4278_v24 = vpop.f32.mrf.mxu2  ;;  %v10291_v61 = vadd.f32 %v3623_v15, %v3368_v20  ;;  %v4365_v15 = vld [vmem:[#allocation2 + $0x58] sm:$0xff] }
 0x2d6   : > { %v10293_v33 = vpop.f32.mrf.mxu1 }
 0x2d7   : > { %8892 = vmatmul.msk.bf16.gmra.mxu3 %vm2061_vm1, %v4410_v1  ;;  %v4411_v1 = vpack.c.bf16 %v4366_v46, %v4365_v15  ;;  %v4368_v15 = vld [vmem:[#allocation2 + $0x70] sm:$0xff] }
 0x2da   : > { %v3300_v36 = vpop.f32.mrf.mxu3 }
 0x2db   : > { %v3369_v19 = vadd.f32 %v3300_v36, %v10032_v60 }
 0x2dc   : > { %v3631_v38 = vpop.f32.mrf.mxu0 }
 0x2dd   : > { %v10297_v54 = vpop.f32.mrf.mxu2  ;;  %v3695_v31 = vadd.f32 %v3626_v29, %v3369_v19  ;;  %v4693_v29 = vld [vmem:[#allocation2 + $0x69] sm:$0xff] }
 0x2de   : > { %v3957_v3 = vpop.f32.mrf.mxu1 }
 0x2df   : > { %v4021_v5 = vadd.f32 %v3952_v4, %v3695_v31  ;;  %8918 = vmatmul.msk.bf16.gmra.mxu0 %vm2061_vm1, %v4737_v55  ;;  %v4694_v4 = vld [vmem:[#allocation2 + $0x71] sm:$0xff] }
 0x2e0   : > { %v4738_v19 = vpack.c.bf16 %v4694_v4, %v4693_v29 }
 0x2e1   : > { %v10300_v23 = vadd.f32 %v4278_v24, %v4021_v5 }
 0x2e2   : > { %v3302_v30 = vpop.f32.mrf.mxu3 }
 0x2e3   : > { %14123 = vst [vmem:[#allocation36_spill] sm:$0xff] %v10300_v23  ;;  %v3370_v20 = vadd.f32 %v3302_v30, %v10040_v6 }
 0x2e4   : > { %v3633_v59 = vpop.f32.mrf.mxu0 }
 0x2e5   : > { %v4283_v25 = vpop.f32.mrf.mxu2  ;;  %v10303_v60 = vadd.f32 %v3628_v9, %v3370_v20  ;;  %v4367_v9 = vld [vmem:[#allocation2 + $0x68] sm:$0xff] }
 0x2e6   : > { %v10305_v11 = vpop.f32.mrf.mxu1 }
 0x2e7   : > { %8893 = vmatmul.msk.bf16.gmra.mxu3 %vm2061_vm1, %v4411_v1  ;;  %v4412_v1 = vpack.c.bf16 %v4368_v15, %v4367_v9 }
 0x2ea   : > { %v3305_v35 = vpop.f32.mrf.mxu3 }
 0x2eb   : > { %v3371_v36 = vadd.f32 %v3305_v35, %v9940_v48 }
 0x2ec   : > { %v3636_v24 = vpop.f32.mrf.mxu0 }
 0x2ed   : > { %v10309_v55 = vpop.f32.mrf.mxu2  ;;  %v3697_v31 = vadd.f32 %v3631_v38, %v3371_v36  ;;  %v4695_v38 = vld [vmem:[#allocation2 + $0x79] sm:$0xff] }
 0x2ee   : > { %14124 = vst [vmem:[#allocation21_spill] sm:$0xff] %v10309_v55  ;;  %v3962_v6 = vpop.f32.mrf.mxu1 }
 0x2ef   : > { %v4023_v5 = vadd.f32 %v3957_v3, %v3697_v31  ;;  %8919 = vmatmul.msk.bf16.gmra.mxu0 %vm2061_vm1, %v4738_v19  ;;  %v4696_v3 = vld [vmem:[#allocation2 + $0x81] sm:$0xff] }
 0x2f0   : > { %v4739_v36 = vpack.c.bf16 %v4696_v3, %v4695_v38  ;;  %v4697_v38 = vld [vmem:[#allocation2 + $0x89] sm:$0xff] }
 0x2f1   : > { %v10312_v46 = vadd.f32 %v4283_v25, %v4023_v5  ;;  %v4369_v5 = vld [vmem:[#allocation2 + $0x78] sm:$0xff] }
 0x2f2   : > { %v3307_v30 = vpop.f32.mrf.mxu3 }
 0x2f3   : > { %14125 = vst [vmem:[#allocation29_spill] sm:$0xff] %v10312_v46  ;;  %v3372_v20 = vadd.f32 %v3307_v30, %v9951_v52 }
 0x2f4   : > { %v3638_v23 = vpop.f32.mrf.mxu0 }
 0x2f5   : > { %v4288_v14 = vpop.f32.mrf.mxu2  ;;  %v10315_v48 = vadd.f32 %v3633_v59, %v3372_v20  ;;  %v4370_v59 = vld [vmem:[#allocation2 + $0x80] sm:$0xff] }
 0x2f6   : > { %v10317_v29 = vpop.f32.mrf.mxu1 }
 0x2f7   : > { %14126 = vst [vmem:[#allocation22_spill] sm:$0xff] %v10317_v29  ;;  %8894 = vmatmul.msk.bf16.gmra.mxu3 %vm2061_vm1, %v4412_v1  ;;  %v4413_v1 = vpack.c.bf16 %v4370_v59, %v4369_v5 }
 0x2fa   : > { %v3310_v4 = vpop.f32.mrf.mxu3 }
 0x2fb   : > { %v3373_v35 = vadd.f32 %v3310_v4, %v9960_v43 }
 0x2fc   : > { %v3641_v25 = vpop.f32.mrf.mxu0 }
 0x2fd   : > { %v10321_v19 = vpop.f32.mrf.mxu2  ;;  %v3699_v31 = vadd.f32 %v3636_v24, %v3373_v35  ;;  %v4698_v24 = vld [vmem:[#allocation2 + $0x91] sm:$0xff] }
 0x2fe   : > { %14127 = vst [vmem:[#allocation34_spill] sm:$0xff] %v10321_v19  ;;  %v3967_v9 = vpop.f32.mrf.mxu1  ;;  %v4740_v35 = vpack.c.bf16 %v4698_v24, %v4697_v38  ;;  %v4700_v38 = vld [vmem:[#allocation2 + $0xa1] sm:$0xff]  ;;  %v14134_v24 = vmov 0.0  }
 0x2ff   : > { %v4025_v52 = vadd.f32 %v3962_v6, %v3699_v31  ;;  %8920 = vmatmul.msk.bf16.gmra.mxu0 %vm2061_vm1, %v4739_v36  ;;  %2071 = vst.msk [vmem:[#allocation3] sm:$0xff] %vm2070_vm3, %v14134_v24 }
 0x300   : > { %2072 = vst.msk [vmem:[#allocation3 + $0x8] sm:$0xff] %vm2070_vm3, %v14134_v24 }
 0x301   : > { %v10324_v15 = vadd.f32 %v4288_v14, %v4025_v52  ;;  %v4371_v52 = vld [vmem:[#allocation2 + $0x88] sm:$0xff]  ;;  %2073 = vst.msk [vmem:[#allocation3 + $0x10] sm:$0xff] %vm2070_vm3, %v14134_v24 }
 0x302   : > { %v3312_v30 = vpop.f32.mrf.mxu3  ;;  %2074 = vst.msk [vmem:[#allocation3 + $0x18] sm:$0xff] %vm2070_vm3, %v14134_v24 }
 0x303   : > { %14128 = vst [vmem:[#allocation41_spill] sm:$0xff] %v10324_v15  ;;  %v3374_v20 = vadd.f32 %v3312_v30, %v9971_v50 }
 0x304   : > { %v3643_v46 = vpop.f32.mrf.mxu0  ;;  %2075 = vst.msk [vmem:[#allocation3 + $0x1a0] sm:$0xff] %vm2070_vm3, %v14134_v24 }
 0x305   : > { %v4293_v29 = vpop.f32.mrf.mxu2  ;;  %v10327_v43 = vadd.f32 %v3638_v23, %v3374_v20  ;;  %v4372_v23 = vld [vmem:[#allocation2 + $0x90] sm:$0xff]  ;;  %2076 = vst.msk [vmem:[#allocation3 + $0x1a8] sm:$0xff] %vm2070_vm3, %v14134_v24 }
 0x306   : > { %v10330_v3 = vpop.f32.mrf.mxu1  ;;  %v4414_v20 = vpack.c.bf16 %v4372_v23, %v4371_v52  ;;  %2077 = vst.msk [vmem:[#allocation3 + $0x1b0] sm:$0xff] %vm2070_vm3, %v14134_v24 }
 0x307   : > { %14129 = vst [vmem:[#allocation26_spill] sm:$0xff] %v10327_v43  ;;  %8895 = vmatmul.msk.bf16.gmra.mxu3 %vm2061_vm1, %v4413_v1  ;;  %v14139_v43 = vmov 0  }
 0x308   : > { %14130 = vst [vmem:[#allocation35_spill] sm:$0xff] %v10330_v3 }
 0x309   : > { %2078 = vst.msk [vmem:[#allocation3 + $0x1b8] sm:$0xff] %vm2070_vm3, %v14134_v24 }
 0x30a   : > { %v3315_v6 = vpop.f32.mrf.mxu3 }
 0x30b   : > { %v3375_v4 = vadd.f32 %v3315_v6, %v9979_v17 }
 0x30c   : > { %v3646_v14 = vpop.f32.mrf.mxu0 }
 0x30d   : > { %v10333_v36 = vpop.f32.mrf.mxu2  ;;  %v3701_v31 = vadd.f32 %v3641_v25, %v3375_v4  ;;  %v332_v25 = vlaneseq }
 0x30e   : > { %14131 = vst [vmem:[#allocation27_spill] sm:$0xff] %v10333_v36  ;;  %v3972_v15 = vpop.f32.mrf.mxu1 }
 0x30f   : > { %v4027_v50 = vadd.f32 %v3967_v9, %v3701_v31  ;;  %8921 = vmatmul.msk.bf16.gmra.mxu0 %vm2061_vm1, %v4740_v35  ;;  %v4699_v9 = vld [vmem:[#allocation2 + $0x99] sm:$0xff] }
 0x310   : > { %v4741_v6 = vpack.c.bf16 %v4700_v38, %v4699_v9  ;;  %v5357_v38 = vld [vmem:[#allocation3 + $0x7] sm:$0xff] }
 0x311   : > { %v10336_v5 = vadd.f32 %v4293_v29, %v4027_v50  ;;  %v10346_v29 = vshrl.u32 %v332_v25, 7  ;;  %v4374_v25 = vld [vmem:[#allocation2 + $0xa0] sm:$0xff] }
 0x312   : > { %v3317_v59 = vpop.f32.mrf.mxu3 }
 0x313   : > { %14132 = vst [vmem:[#allocation39_spill] sm:$0xff] %v10336_v5  ;;  %v3376_v30 = vadd.f32 %v3317_v59, %v9990_v10  ;;  %v384_v4 = vand.u32 65535, %v10346_v29  ;;  %v385_v50 = vshrl.u32 %v10346_v29, 16  ;;  %v10373_v36 = vadd.s32 8, %v10346_v29 }
 0x314   : > { %v3648_v1 = vpop.f32.mrf.mxu0 }
 0x315   : > { %v10339_v3 = vadd.f32 %v3643_v46, %v3376_v30  ;;  %v4298_v17 = vpop.f32.mrf.mxu2  ;;  %v388_v52 = vmul.u32 43690, %v384_v4  ;;  %v387_v59 = vmul.u32 43691, %v384_v4  ;;  %v389_v30 = vmul.u32 43691, %v385_v50 }
 0x316   : > { %v10361_v23 = vpop.f32.mrf.mxu1  ;;  %v390_v5 = vmul.u32 43690, %v385_v50  ;;  %v413_v50 = vand.u32 65535, %v10373_v36 }
 0x317   : > { %14133 = vst [vmem:[#allocation46_spill] sm:$0xff] %v10339_v3  ;;  %8896 = vmatmul.msk.bf16.gmra.mxu3 %vm2061_vm1, %v4414_v20  ;;  %v4373_v20 = vld [vmem:[#allocation2 + $0x98] sm:$0xff]  ;;  %v13982_v3 = vmov 0  }
 0x318   : > { %14135 = vst [vmem:[#allocation31_spill] sm:$0xff] %v10361_v23  ;;  %v393_v23 = vshll.u32 %v389_v30, 16  ;;  %v4415_v4 = vpack.c.bf16 %v4374_v25, %v4373_v20  ;;  %v414_v25 = vshrl.u32 %v10373_v36, 16 }
 0x31a   : > { %v3320_v10 = vpop.f32.mrf.mxu3 }
 0x31b   : > { %v3377_v46 = vadd.f32 %v3320_v10, %v9998_v27 }
 0x31c   : > { %v10354_v35 = vpop.f32.mrf.mxu0 }
 0x31d   : > { %v3703_v31 = vadd.f32 %v3646_v14, %v3377_v46  ;;  %v391_v14 = vshll.u32 %v388_v52, 16  ;;  %v10368_v9 = vpop.f32.mrf.mxu2  ;;  %v5358_v46 = vld [vmem:[#allocation3 + $0xf] sm:$0xff] }
 0x31e   : > { %14136 = vst [vmem:[#allocation40_spill] sm:$0xff] %v10368_v9 }
 0x31f   : > { %v4029_v27 = vadd.f32 %v3972_v15, %v3703_v31  ;;  %8922 = vmatmul.msk.bf16.gmra.mxu0 %vm2061_vm1, %v4741_v6  ;;  %vm395_vm4 = vc.u32 %v387_v59, %v391_v14  ;;  %v5405_v31 = vpack.c.bf16 %v5358_v46, %v5357_v38  ;;  %v397_v6 = vadd.s32 %v391_v14, %v387_v59  ;;  %v5430_v59 = vld [vmem:[#allocation3 + $0x8] sm:$0xff]  ;;  %v5431_v14 = vld [vmem:[#allocation3 + $0x10] sm:$0xff] }
 0x320   : > { %v396_v19 = vsel %vm395_vm4, 1, %v13982_v3  ;;  %v392_v38 = vshrl.u32 %v388_v52, 16 }
 0x321   : > { %v10370_v10 = vadd.f32 %v4298_v17, %v4029_v27  ;;  %8965 = vmatmul.msk.bf16.vlgmr.msra.gmra.mxu2 %vm2070_vm3, %v5405_v31  ;;  %v398_v17 = vadd.s32 %v396_v19, %v390_v5  ;;  %vm399_vm5 = vc.u32 %v397_v6, %v393_v23  ;;  %v8989_v19 = vld [vmem:[%s13952_s4 + $0x8] sm:$0xf]  ;;  %v394_v5 = vshrl.u32 %v389_v30, 16  ;;  %v4702_v6 = vld [vmem:[#allocation2 + $0xb1] sm:$0xff] }
 0x322   : > { %v3322_v15 = vpop.f32.mrf.mxu3  ;;  %v400_v46 = vsel %vm399_vm5, 1, %v13982_v3  ;;  %v416_v23 = vmul.u32 43691, %v413_v50  ;;  %v4701_v31 = vld [vmem:[#allocation2 + $0xa9] sm:$0xff]  ;;  %v6060_v52 = vsel %vm5576_vm2, %v8989_v19, 0 }
 0x323   : > { %14137 = vst [vmem:[#allocation33_spill] sm:$0xff] %v10370_v10  ;;  %v3378_v24 = vadd.f32 %v3322_v15, %v10008_v51  ;;  %v5478_v51 = vpack.c.bf16 %v5431_v14, %v5430_v59  ;;  %v402_v20 = vadd.s32 %v400_v46, %v398_v17  ;;  %v417_v15 = vmul.u32 43690, %v413_v50  ;;  %6069 = vmatpush.bf16.msrb.mxu3 %v6060_v52 }
 0x324   : > { %v10377_v9 = vpop.f32.mrf.mxu0  ;;  %v418_v17 = vmul.u32 43691, %v414_v25  ;;  %v419_v14 = vmul.u32 43690, %v414_v25 }
 0x325   : > { %v10381_v27 = vadd.f32 %v3648_v1, %v3378_v24  ;;  %v3977_v1 = vpop.f32.mrf.mxu1  ;;  %8941 = vmatmul.msk.bf16.vlgmr.msra.gmra.mxu1 %vm2070_vm3, %v5478_v51  ;;  %v403_v24 = vadd.s32 %v402_v20, %v392_v38  ;;  %v420_v59 = vshll.u32 %v417_v15, 16  ;;  %v4303_v3 = vpop.f32.mrf.mxu2  ;;  %v421_v55 = vshrl.u32 %v417_v15, 16 }
 0x326   : > { %v422_v10 = vshll.u32 %v418_v17, 16 }
 0x327   : > { %14138 = vst [vmem:[#allocation44_spill] sm:$0xff] %v10381_v27  ;;  %8897 = vmatmul.msk.bf16.gmra.mxu3 %vm2061_vm1, %v4415_v4  ;;  %v10392_v4 = vadd.s32 16, %v10346_v29  ;;  %vm424_vm6 = vc.u32 %v416_v23, %v420_v59  ;;  %v426_v30 = vadd.s32 %v420_v59, %v416_v23  ;;  %v4742_v27 = vpack.c.bf16 %v4702_v6, %v4701_v31  ;;  %v4376_v31 = vld [vmem:[#allocation2 + $0xb0] sm:$0xff] }
 0x328   : > { %v425_v19 = vsel %vm424_vm6, 1, %v14139_v43  ;;  %v404_v20 = vadd.s32 %v403_v24, %v394_v5  ;;  %v4012_v5 = vadd.f32 %v10219_v18, %v10237_v32 }
 0x329   : > { %v442_v51 = vand.u32 65535, %v10392_v4  ;;  %v427_v52 = vadd.s32 %v425_v19, %v419_v14  ;;  %vm428_vm7 = vc.u32 %v426_v30, %v422_v10  ;;  %v443_v23 = vshrl.u32 %v10392_v4, 16 }
 0x32a   : > { %v3325_v46 = vpop.f32.mrf.mxu3  ;;  %v429_v45 = vsel %vm428_vm7, 1, %v14139_v43  ;;  %v405_v24 = vshrl.u32 %v404_v20, 4  ;;  %v423_v10 = vshrl.u32 %v418_v17, 16  ;;  %v10410_v30 = vadd.s32 24, %v10346_v29 }
 0x32b   : > { %v3379_v50 = vadd.f32 %v3325_v46, %v10015_v37  ;;  %v431_v0 = vadd.s32 %v429_v45, %v427_v52  ;;  %v4375_v37 = vld [vmem:[#allocation2 + $0xa8] sm:$0xff]  ;;  %v445_v6 = vmul.u32 43691, %v442_v51  ;;  %v446_v46 = vmul.u32 43690, %v442_v51 }
 0x32c   : > { %v10397_v38 = vpop.f32.mrf.mxu0  ;;  %v10405_v14 = vmul.u32 43691, %v443_v23  ;;  %v4416_v18 = vpack.c.bf16 %v4376_v31, %v4375_v37  ;;  %v448_v32 = vmul.u32 43690, %v443_v23  ;;  %v406_v20 = vmul.u32 24, %v405_v24  ;;  %v9039_v23 = vld [vmem:[%s13952_s4 + $0x10] sm:$0xf]  ;;  %v4703_v37 = vld [vmem:[#allocation2 + $0xb9] sm:$0xff] }
 0x32d   : > { %v3705_v25 = vadd.f32 %v10354_v35, %v3379_v50  ;;  %v432_v15 = vadd.s32 %v431_v0, %v421_v55  ;;  %v449_v45 = vshll.u32 %v446_v46, 16  ;;  %v10416_v19 = vpop.f32.mrf.mxu1  ;;  %v10422_v51 = vpop.f32.mrf.mxu2  ;;  %v4018_v24 = vadd.f32 %v10269_v41, %v10279_v57 }
 0x32e   : > { %v452_v41 = vshrl.u32 %v10405_v14, 16 }
 0x32f   : > { %v4031_v59 = vadd.f32 %v3977_v1, %v3705_v25  ;;  %8923 = vmatmul.msk.bf16.gmra.mxu0 %vm2061_vm1, %v4742_v27  ;;  %v4014_v27 = vadd.f32 %v10239_v53, %v10252_v22  ;;  %v4016_v1 = vadd.f32 %v10254_v12, %v10267_v28  ;;  %vm453_vm8 = vc.u32 %v445_v6, %v449_v45  ;;  %v9014_v25 = vld [vmem:[%s13952_s4 + $0xc] sm:$0xf] }
 0x330   : > { %v455_v0 = vadd.s32 %v449_v45, %v445_v6  ;;  %v454_v53 = vsel %vm453_vm8, 1, %v14139_v43  ;;  %v471_v22 = vand.u32 65535, %v10410_v30  ;;  %v10427_v12 = vadd.f32 %v10227_v26, %v4012_v5 }
 0x331   : > { %v10407_v35 = vadd.f32 %v4303_v3, %v4031_v59  ;;  %v451_v3 = vshll.u32 %v10405_v14, 16  ;;  %v10433_v52 = vadd.f32 %v10243_v58, %v4014_v27  ;;  %v456_v59 = vadd.s32 %v454_v53, %v448_v32  ;;  %v4704_v58 = vld [vmem:[#allocation2 + $0xc1] sm:$0xff] }
 0x332   : > { %v3327_v50 = vpop.f32.mrf.mxu3  ;;  %v472_v26 = vshrl.u32 %v10410_v30, 16  ;;  %v6386_v31 = vsel %vm5576_vm2, %v9014_v25, 0  ;;  %v6712_v6 = vsel %vm5576_vm2, %v9039_v23, 0  ;;  %v450_v5 = vshrl.u32 %v446_v46, 16  ;;  %v4378_v46 = vld [vmem:[#allocation2 + $0xc0] sm:$0xff] }
 0x333   : > { %v3380_v17 = vadd.f32 %v3327_v50, %v10029_v13  ;;  %v433_v13 = vadd.s32 %v432_v15, %v423_v10  ;;  %vm457_vm9 = vc.u32 %v455_v0, %v451_v3  ;;  %6395 = vmatpush.bf16.msrb.mxu0 %v6386_v31  ;;  %6721 = vmatpush.bf16.msrb.mxu1 %v6712_v6  ;;  %v474_v15 = vmul.u32 43691, %v471_v22 }
 0x334   : > { %v10420_v55 = vpop.f32.mrf.mxu0  ;;  %v458_v10 = vsel %vm457_vm9, 1, %v14139_v43  ;;  %v475_v45 = vmul.u32 43690, %v471_v22  ;;  %v10454_v50 = vmul.u32 43691, %v472_v26  ;;  %v4743_v32 = vpack.c.bf16 %v4704_v58, %v4703_v37 }
 0x335   : > { %v10430_v28 = vadd.f32 %v10377_v9, %v3380_v17  ;;  %v10443_v9 = vadd.f32 %v10258_v34, %v4016_v1  ;;  %v10452_v34 = vsub.s32 %v10346_v29, %v406_v20  ;;  %v434_v27 = vshrl.u32 %v433_v13, 4  ;;  %v10456_v17 = vld [vmem:[#allocation2 + $0xb8] sm:$0xff]  ;;  %v4308_v58 = vpop.f32.mrf.mxu2 }
 0x336   : > { %v460_v1 = vadd.s32 %v458_v10, %v456_v59  ;;  %v477_v57 = vmul.u32 43690, %v472_v26  ;;  %v478_v3 = vshll.u32 %v475_v45, 16  ;;  %v480_v22 = vshll.u32 %v10454_v50, 16  ;;  %v3982_v59 = vpop.f32.mrf.mxu1 }
 0x337   : > { %8898 = vmatmul.msk.bf16.gmra.mxu3 %vm2061_vm1, %v4416_v18  ;;  %v10462_v20 = vadd.s32 32, %v10346_v29  ;;  %v4020_v13 = vadd.f32 %v10281_v44, %v10291_v61  ;;  %v4022_v25 = vadd.f32 %v10293_v33, %v10303_v60  ;;  %vm1773_vm11 = vcmp.ne.s32.totalorder %v10452_v34, 0 }
 0x338   : > { %v461_v53 = vadd.s32 %v460_v1, %v450_v5  ;;  %vm482_vm10 = vc.u32 %v474_v15, %v478_v3  ;;  %v484_v14 = vadd.s32 %v478_v3, %v474_v15  ;;  %v435_v37 = vmul.u32 24, %v434_v27 }
 0x339   : > { %v483_v6 = vsel %vm482_vm10, 1, %v14139_v43  ;;  %v500_v44 = vand.u32 65535, %v10462_v20  ;;  %vm1821_vm13 = vcmp.lt.s32.totalorder %v10452_v34, 0  ;;  %v479_v33 = vshrl.u32 %v475_v45, 16 }
 0x33a   : > { %v3330_v18 = vpop.f32.mrf.mxu3  ;;  %v462_v31 = vadd.s32 %v461_v53, %v452_v41  ;;  %vm486_vm12 = vc.u32 %v484_v14, %v480_v22  ;;  %v485_v60 = vadd.s32 %v483_v6, %v477_v57  ;;  %v501_v5 = vshrl.u32 %v10462_v20, 16  ;;  %v4706_v53 = vld [vmem:[#allocation2 + $0xd1] sm:$0xff]  ;;  %vm10503_vm14 = vmand %vm1821_vm13, %vm1773_vm11 }
 0x33b   : > { %v3381_v0 = vadd.f32 %v3330_v18, %v10037_v56  ;;  %v4417_v56 = vpack.c.bf16 %v4378_v46, %v10456_v17  ;;  %v503_v10 = vmul.u32 43691, %v500_v44  ;;  %v504_v15 = vmul.u32 43690, %v500_v44 }
 0x33c   : > { %v10468_v23 = vpop.f32.mrf.mxu0  ;;  %v1917_v1 = vadd.s32 24, %v10452_v34  ;;  %v10483_v17 = vadd.s32 40, %v10346_v29  ;;  %v463_v45 = vshrl.u32 %v462_v31, 4  ;;  %v10488_v41 = vmul.u32 43691, %v501_v5 }
 0x33d   : > { %v3707_v26 = vadd.f32 %v10397_v38, %v3381_v0  ;;  %v487_v38 = vsel %vm486_vm12, 1, %v14139_v43  ;;  %v507_v57 = vshll.u32 %v504_v15, 16  ;;  %v10491_v0 = vld [vmem:[#allocation2 + $0xc9] sm:$0xff]  ;;  %v481_v22 = vshrl.u32 %v10454_v50, 16 }
 0x33e   : > { %v489_v18 = vadd.s32 %v487_v38, %v485_v60  ;;  %v506_v14 = vmul.u32 43690, %v501_v5  ;;  %v10509_v50 = vadd.f32 %v10285_v7, %v4020_v13  ;;  %v529_v31 = vand.u32 65535, %v10483_v17  ;;  %v10534_v60 = vld [vmem:[#allocation2 + $0xd0] sm:$0xff] }
 0x33f   : > { %v4033_v61 = vadd.f32 %v3982_v59, %v3707_v26  ;;  %8924 = vmatmul.msk.bf16.gmra.mxu0 %vm2061_vm1, %v4743_v32  ;;  %v10486_v32 = vsub.s32 %v10373_v36, %v435_v37  ;;  %v10495_v26 = vadd.f32 %v10273_v42, %v4018_v24  ;;  %vm511_vm15 = vc.u32 %v503_v10, %v507_v57 }
 0x340   : > { %v490_v59 = vadd.s32 %v489_v18, %v479_v33  ;;  %v513_v37 = vadd.s32 %v507_v57, %v503_v10  ;;  %v10512_v42 = vadd.f32 %v10297_v54, %v4022_v25  ;;  %v10520_v6 = vadd.f32 %v10305_v11, %v10315_v48  ;;  %v10532_v25 = vld [vmem:[#allocation2 + $0xc8] sm:$0xff]  ;;  %v10540_v10 = vld [vmem:[%s13950_s2] ss:$0 sm:$0xff] }
 0x341   : > { %v10479_v27 = vadd.f32 %v4308_v58, %v4033_v61  ;;  %v4744_v44 = vpack.c.bf16 %v4706_v53, %v10491_v0  ;;  %v464_v61 = vmul.u32 24, %v463_v45  ;;  %v512_v33 = vsel %vm511_vm15, 1, %v14139_v43  ;;  %v10561_v0 = vld [vmem:[#allocation2 + $0xe1] sm:$0xff] }
 0x342   : > { %v3332_v46 = vpop.f32.mrf.mxu3  ;;  %v1965_v7 = vsel %vm10503_vm14, %v1917_v1, %v10452_v34  ;;  %vm1774_vm0 = vcmp.ne.s32.totalorder %v10486_v32, 0  ;;  %v491_v54 = vadd.s32 %v490_v59, %v481_v22  ;;  %vm1822_vm4 = vcmp.lt.s32.totalorder %v10486_v32, 0 }
 0x343   : > { %v3382_v3 = vadd.f32 %v3332_v46, %v10048_v21  ;;  %v509_v21 = vshll.u32 %v10488_v41, 16  ;;  %v508_v13 = vshrl.u32 %v504_v15, 16  ;;  %v530_v11 = vshrl.u32 %v10483_v17, 16  ;;  %vm10555_vm7 = vmand %vm1822_vm4, %vm1774_vm0 }
 0x344   : > { %v10497_v58 = vpop.f32.mrf.mxu0  ;;  %v1918_v48 = vadd.s32 24, %v10486_v32  ;;  %v532_v38 = vmul.u32 43691, %v529_v31  ;;  %v533_v34 = vmul.u32 43690, %v529_v31  ;;  %v10543_v15 = vsub.s32 %v10392_v4, %v464_v61  ;;  %v10559_v4 = vld [vmem:[#allocation2 + $0xd9] sm:$0xff] }
 0x345   : > { %v10515_v24 = vadd.f32 %v10420_v55, %v3382_v3  ;;  %v514_v55 = vadd.s32 %v512_v33, %v506_v14  ;;  %vm515_vm5 = vc.u32 %v513_v37, %v509_v21  ;;  %v510_v1 = vshrl.u32 %v10488_v41, 16  ;;  %v10571_v37 = vld [vmem:[%s13951_s3] ss:$0 sm:$0xff] }
 0x346   : > { %v534_v46 = vmul.u32 43691, %v530_v11  ;;  %vm10546_vm6 = vcmp.lt.s32.totalorder %v1965_v7, 16  ;;  %v492_v41 = vshrl.u32 %v491_v54, 4  ;;  %v536_v53 = vshll.u32 %v533_v34, 16 }
 0x347   : > { %8899 = vmatmul.msk.bf16.gmra.mxu3 %vm2061_vm1, %v4417_v56  ;;  %v516_v56 = vsel %vm515_vm5, 1, %v14139_v43  ;;  %v4418_v59 = vpack.c.bf16 %v10534_v60, %v10532_v25  ;;  %v535_v14 = vmul.u32 43690, %v530_v11  ;;  %v10574_v61 = vadd.s32 48, %v10346_v29 }
 0x348   : > { %v518_v18 = vadd.s32 %v516_v56, %v514_v55  ;;  %v538_v36 = vshll.u32 %v534_v46, 16  ;;  %vm540_vm8 = vc.u32 %v532_v38, %v536_v53  ;;  %v542_v31 = vadd.s32 %v536_v53, %v532_v38  ;;  %v5359_v53 = vld [vmem:[#allocation3 + $0x17] sm:$0xff] }
 0x349   : > { %v1966_v33 = vsel %vm10555_vm7, %v1918_v48, %v10486_v32  ;;  %vm1775_vm9 = vcmp.ne.s32.totalorder %v10543_v15, 0  ;;  %v4745_v7 = vpack.c.bf16 %v10561_v0, %v10559_v4  ;;  %vm1823_vm10 = vcmp.lt.s32.totalorder %v10543_v15, 0 }
 0x34a   : > { %v4519_v5 = vpop.f32.mrf.mxu3  ;;  %v493_v55 = vmul.u32 24, %v492_v41  ;;  %v537_v25 = vshrl.u32 %v533_v34, 16  ;;  %vm544_vm11 = vc.u32 %v542_v31, %v538_v36  ;;  %v10588_v48 = vadd.s32 24, %v10543_v15  ;;  %vm10602_vm13 = vmand %vm1823_vm10, %vm1775_vm9 }
 0x34b   : > { %v4639_v57 = vadd.f32 %v4519_v5, %v10056_v2  ;;  %v519_v2 = vadd.s32 %v518_v18, %v508_v13  ;;  %v541_v13 = vsel %vm540_vm8, 1, %v14139_v43  ;;  %v545_v56 = vsel %vm544_vm11, 1, %v14139_v43 }
 0x34c   : > { %v10563_v22 = vpop.f32.mrf.mxu0  ;;  %v543_v60 = vadd.s32 %v541_v13, %v535_v14  ;;  %v558_v38 = vand.u32 65535, %v10574_v61  ;;  %vm10592_vm12 = vcmp.lt.s32.totalorder %v1966_v33, 16  ;;  %v539_v18 = vshrl.u32 %v534_v46, 16  ;;  %v10609_v14 = vld [vmem:[#allocation2 + $0xd8] sm:$0xff]  ;;  %v10611_v46 = vld [vmem:[#allocation2 + $0xe0] sm:$0xff] }
 0x34d   : > { %v4965_v21 = vadd.f32 %v10468_v23, %v4639_v57  ;;  %v520_v23 = vadd.s32 %v519_v2, %v510_v1  ;;  %v559_v34 = vshrl.u32 %v10574_v61, 16  ;;  %v10607_v2 = vsub.s32 %v10410_v30, %v493_v55 }
 0x34e   : > { %v547_v57 = vadd.s32 %v545_v56, %v543_v60  ;;  %v10613_v36 = vmul.u32 43690, %v558_v38  ;;  %v561_v31 = vmul.u32 43691, %v558_v38 }
 0x34f   : > { %v5017_v54 = vmul.f32 %v10540_v10, %v4965_v21  ;;  %8925 = vmatmul.msk.bf16.gmra.mxu0 %vm2061_vm1, %v4744_v44  ;;  %v521_v11 = vshrl.u32 %v520_v23, 4  ;;  %v10617_v33 = vmul.u32 43691, %v559_v34  ;;  %v10620_v23 = vadd.s32 56, %v10346_v29  ;;  %v10678_v44 = vld [vmem:[#allocation2 + $0xf1] sm:$0xff] }
 0x350   : > { %v565_v13 = vshll.u32 %v10613_v36, 16  ;;  %v564_v45 = vmul.u32 43690, %v559_v34  ;;  %vm1776_vm14 = vcmp.ne.s32.totalorder %v10607_v2, 0  ;;  %vm1824_vm15 = vcmp.lt.s32.totalorder %v10607_v2, 0 }
 0x351   : > { %v5069_v32 = vadd.f32 %v10571_v37, %v5017_v54  ;;  %v522_v1 = vmul.u32 24, %v521_v11  ;;  %v1967_v11 = vsel %vm10602_vm13, %v10588_v48, %v10543_v15 }
 0x352   : > { %v4521_v5 = vpop.f32.mrf.mxu3  ;;  %vm569_vm0 = vc.u32 %v561_v31, %v565_v13  ;;  %v571_v15 = vadd.s32 %v565_v13, %v561_v31  ;;  %vm10699_vm9 = vcmp.lt.s32.totalorder %v1967_v11, 16 }
 0x353   : > { %v5117_v3 = vmax.f32 %v5069_v32, 0.0  ;;  %v4640_v41 = vadd.f32 %v4521_v5, %v10063_v40  ;;  %v548_v40 = vadd.s32 %v547_v57, %v537_v25  ;;  %v10626_v55 = vsub.s32 %v10462_v20, %v522_v1 }
 0x354   : > { %v10615_v21 = vpop.f32.mrf.mxu0  ;;  %v4419_v25 = vpack.c.bf16 %v10611_v46, %v10609_v14  ;;  %v567_v20 = vshll.u32 %v10617_v33, 16  ;;  %v570_v38 = vsel %vm569_vm0, 1, %v14139_v43  ;;  %v587_v5 = vand.u32 65535, %v10620_v23 }
 0x355   : > { %v5261_v54 = vsel %vm10546_vm6, %v5117_v3, 0.0  ;;  %v4966_v30 = vadd.f32 %v10497_v58, %v4640_v41  ;;  %v549_v60 = vadd.s32 %v548_v40, %v539_v18  ;;  %v1920_v58 = vadd.s32 24, %v10607_v2  ;;  %v5432_v41 = vld [vmem:[#allocation3 + $0x18] sm:$0xff]  ;;  %vm10656_vm6 = vmand %vm1824_vm15, %vm1776_vm14 }
 0x356   : > { %5309 = vst.msk [vmem:[#allocation3 + $0x20] sm:$0xff] %vm2070_vm3, %v5261_v54  ;;  %vm1777_vm4 = vcmp.ne.s32.totalorder %v10626_v55, 0  ;;  %v566_v1 = vshrl.u32 %v10613_v36, 16  ;;  %v572_v18 = vadd.s32 %v570_v38, %v564_v45  ;;  %vm573_vm5 = vc.u32 %v571_v15, %v567_v20 }
 0x357   : > { %v5018_v32 = vmul.f32 %v10540_v10, %v4966_v30  ;;  %8900 = vmatmul.msk.bf16.gmra.mxu3 %vm2061_vm1, %v4418_v59  ;;  %v550_v56 = vshrl.u32 %v549_v60, 4  ;;  %v588_v57 = vshrl.u32 %v10620_v23, 16  ;;  %v574_v31 = vsel %vm573_vm5, 1, %v14139_v43 }
 0x358   : > { %vm1825_vm7 = vcmp.lt.s32.totalorder %v10626_v55, 0  ;;  %v576_v30 = vadd.s32 %v574_v31, %v572_v18  ;;  %v10661_v13 = vmul.u32 43690, %v587_v5  ;;  %v10670_v15 = vadd.s32 64, %v10346_v29  ;;  %v10676_v18 = vld [vmem:[#allocation2 + $0xe9] sm:$0xff] }
 0x359   : > { %v5070_v48 = vadd.f32 %v10571_v37, %v5018_v32  ;;  %v551_v40 = vmul.u32 24, %v550_v56  ;;  %v568_v56 = vshrl.u32 %v10617_v33, 16  ;;  %v1968_v33 = vsel %vm10656_vm6, %v1920_v58, %v10607_v2  ;;  %vm10692_vm8 = vmand %vm1825_vm7, %vm1777_vm4 }
 0x35a   : > { %v4524_v59 = vpop.f32.mrf.mxu3  ;;  %v593_v0 = vmul.u32 43690, %v588_v57  ;;  %v616_v11 = vand.u32 65535, %v10670_v15  ;;  %vm10711_vm10 = vcmp.lt.s32.totalorder %v1968_v33, 16  ;;  %v617_v36 = vshrl.u32 %v10670_v15, 16 }
 0x35b   : > { %v5118_v34 = vmax.f32 %v5070_v48, 0.0  ;;  %v4641_v3 = vadd.f32 %v4524_v59, %v10069_v62  ;;  %v10663_v62 = vmul.u32 43691, %v588_v57  ;;  %v10674_v59 = vadd.s32 24, %v10626_v55 }
 0x35c   : > { %v10650_v54 = vpop.f32.mrf.mxu0 }
 0x35d   : > { %v5262_v60 = vsel %vm10592_vm12, %v5118_v34, 0.0  ;;  %v4967_v45 = vadd.f32 %v10563_v22, %v4641_v3  ;;  %v5433_v32 = vld [vmem:[#allocation3 + $0x20] sm:$0xff]  ;;  %v590_v34 = vmul.u32 43691, %v587_v5  ;;  %v10697_v5 = vsub.s32 %v10483_v17, %v551_v40 }
 0x35e   : > { %v5360_v20 = vld [vmem:[#allocation3 + $0x1f] sm:$0xff]  ;;  %5310 = vst.msk [vmem:[#allocation3 + $0x28] sm:$0xff] %vm2070_vm3, %v5262_v60  ;;  %v5479_v48 = vpack.c.bf16 %v5433_v32, %v5432_v41  ;;  %v577_v41 = vadd.s32 %v576_v30, %v566_v1  ;;  %v596_v2 = vshll.u32 %v10663_v62, 16  ;;  %v4746_v17 = vpack.c.bf16 %v10678_v44, %v10676_v18 }
 0x35f   : > { %v5406_v38 = vpack.c.bf16 %v5360_v20, %v5359_v53  ;;  %v5019_v22 = vmul.f32 %v10540_v10, %v4967_v45  ;;  %8926 = vmatmul.msk.bf16.gmra.mxu0 %vm2061_vm1, %v4745_v7  ;;  %v594_v7 = vshll.u32 %v10661_v13, 16  ;;  %v1969_v57 = vsel %vm10692_vm8, %v10674_v59, %v10626_v55 }
 0x360   : > { %8942 = vmatmul.msk.bf16.gmra.mxu1 %vm2070_vm3, %v5479_v48  ;;  %v578_v53 = vadd.s32 %v577_v41, %v568_v56  ;;  %vm1778_vm12 = vcmp.ne.s32.totalorder %v10697_v5, 0  ;;  %vm1826_vm13 = vcmp.lt.s32.totalorder %v10697_v5, 0  ;;  %v595_v56 = vshrl.u32 %v10661_v13, 16 }
 0x361   : > { %8966 = vmatmul.msk.bf16.gmra.mxu2 %vm2070_vm3, %v5406_v38  ;;  %v5071_v58 = vadd.f32 %v10571_v37, %v5019_v22  ;;  %vm598_vm11 = vc.u32 %v590_v34, %v594_v7  ;;  %v600_v31 = vadd.s32 %v594_v7, %v590_v34  ;;  %v10727_v38 = vmul.u32 43690, %v616_v11  ;;  %vm10780_vm6 = vmand %vm1826_vm13, %vm1778_vm12 }
 0x362   : > { %v4526_v40 = vpop.f32.mrf.mxu3  ;;  %v579_v45 = vshrl.u32 %v578_v53, 4  ;;  %v599_v32 = vsel %vm598_vm11, 1, %v14139_v43  ;;  %v597_v41 = vshrl.u32 %v10663_v62, 16  ;;  %v10735_v53 = vmul.u32 43691, %v617_v36 }
 0x363   : > { %v5119_v30 = vmax.f32 %v5071_v58, 0.0  ;;  %v4642_v60 = vadd.f32 %v4526_v40, %v10076_v63  ;;  %v601_v48 = vadd.s32 %v599_v32, %v593_v0  ;;  %vm602_vm14 = vc.u32 %v600_v31, %v596_v2 }
 0x364   : > { %v10724_v20 = vpop.f32.mrf.mxu0  ;;  %v580_v22 = vmul.u32 24, %v579_v45  ;;  %v603_v33 = vsel %vm602_vm14, 1, %v14139_v43  ;;  %v619_v58 = vmul.u32 43691, %v616_v11  ;;  %v623_v0 = vshll.u32 %v10727_v38, 16 }
 0x365   : > { %v5263_v34 = vsel %vm10699_vm9, %v5119_v30, 0.0  ;;  %v4968_v63 = vadd.f32 %v10615_v21, %v4642_v60  ;;  %v605_v7 = vadd.s32 %v603_v33, %v601_v48  ;;  %v10743_v21 = vadd.s32 24, %v10697_v5  ;;  %v5434_v48 = vld [vmem:[#allocation3 + $0x28] sm:$0xff] }
 0x366   : > { %5311 = vst.msk [vmem:[#allocation3 + $0x30] sm:$0xff] %vm2070_vm3, %v5263_v34  ;;  %v10746_v4 = vsub.s32 %v10574_v61, %v580_v22  ;;  %v622_v2 = vmul.u32 43690, %v617_v36  ;;  %v625_v11 = vshll.u32 %v10735_v53, 16  ;;  %v10751_v40 = vadd.s32 72, %v10346_v29  ;;  %v10763_v34 = vld [vmem:[#allocation2 + $0xe8] sm:$0xff] }
 0x367   : > { %v5020_v13 = vmul.f32 %v10540_v10, %v4968_v63  ;;  %8901 = vmatmul.msk.bf16.gmra.mxu3 %vm2061_vm1, %v4419_v25  ;;  %v606_v62 = vadd.s32 %v605_v7, %v595_v56  ;;  %v624_v14 = vshrl.u32 %v10727_v38, 16  ;;  %v626_v46 = vshrl.u32 %v10735_v53, 16  ;;  %v10765_v38 = vld [vmem:[#allocation2 + $0xf0] sm:$0xff] }
 0x368   : > { %vm1779_vm15 = vcmp.ne.s32.totalorder %v10746_v4, 0  ;;  %vm1827_vm0 = vcmp.lt.s32.totalorder %v10746_v4, 0  ;;  %vm627_vm4 = vc.u32 %v619_v58, %v623_v0  ;;  %v629_v30 = vadd.s32 %v623_v0, %v619_v58  ;;  %v5361_v58 = vld [vmem:[#allocation3 + $0x27] sm:$0xff] }
 0x369   : > { %v5072_v31 = vadd.f32 %v10571_v37, %v5020_v13  ;;  %v607_v61 = vadd.s32 %v606_v62, %v597_v41  ;;  %v628_v45 = vsel %vm627_vm4, 1, %v14139_v43  ;;  %v645_v32 = vand.u32 65535, %v10751_v40  ;;  %vm10808_vm9 = vmand %vm1827_vm0, %vm1779_vm15 }
 0x36a   : > { %v4529_v25 = vpop.f32.mrf.mxu3  ;;  %v10768_v63 = vadd.s32 24, %v10746_v4  ;;  %v630_v33 = vadd.s32 %v628_v45, %v622_v2  ;;  %vm631_vm5 = vc.u32 %v629_v30, %v625_v11  ;;  %v646_v0 = vshrl.u32 %v10751_v40, 16  ;;  %v10786_v2 = vld [vmem:[#allocation2 + $0x101] sm:$0xff] }
 0x36b   : > { %v5120_v36 = vmax.f32 %v5072_v31, 0.0  ;;  %v4643_v60 = vadd.f32 %v4529_v25, %v10082_v16  ;;  %v608_v22 = vshrl.u32 %v607_v61, 4  ;;  %v632_v13 = vsel %vm631_vm5, 1, %v14139_v43 }
 0x36c   : > { %v10761_v56 = vpop.f32.mrf.mxu0  ;;  %v634_v25 = vadd.s32 %v632_v13, %v630_v33  ;;  %vm10793_vm7 = vcmp.lt.s32.totalorder %v1969_v57, 16  ;;  %v649_v59 = vmul.u32 43690, %v645_v32  ;;  %v648_v3 = vmul.u32 43691, %v645_v32 }
 0x36d   : > { %v5264_v16 = vsel %vm10711_vm10, %v5120_v36, 0.0  ;;  %v4969_v41 = vadd.f32 %v10650_v54, %v4643_v60  ;;  %v5435_v7 = vld [vmem:[#allocation3 + $0x30] sm:$0xff]  ;;  %v10784_v54 = vld [vmem:[#allocation2 + $0xf9] sm:$0xff]  ;;  %v609_v11 = vmul.u32 24, %v608_v22  ;;  %v4420_v36 = vpack.c.bf16 %v10765_v38, %v10763_v34 }
 0x36e   : > { %v5362_v53 = vld [vmem:[#allocation3 + $0x2f] sm:$0xff]  ;;  %5312 = vst.msk [vmem:[#allocation3 + $0x38] sm:$0xff] %vm2070_vm3, %v5264_v16  ;;  %v5480_v62 = vpack.c.bf16 %v5435_v7, %v5434_v48  ;;  %v635_v44 = vadd.s32 %v634_v25, %v624_v14  ;;  %v1970_v60 = vsel %vm10780_vm6, %v10743_v21, %v10697_v5  ;;  %v4747_v45 = vpack.c.bf16 %v10786_v2, %v10784_v54 }
 0x36f   : > { %v5407_v31 = vpack.c.bf16 %v5362_v53, %v5361_v58  ;;  %v5021_v30 = vmul.f32 %v10540_v10, %v4969_v41  ;;  %8927 = vmatmul.msk.bf16.gmra.mxu0 %vm2061_vm1, %v4746_v17  ;;  %v10815_v18 = vsub.s32 %v10620_v23, %v609_v11  ;;  %v650_v17 = vmul.u32 43691, %v646_v0  ;;  %v10844_v58 = vld [vmem:[#allocation2 + $0xf8] sm:$0xff]  ;;  %v10846_v53 = vld [vmem:[#allocation2 + $0x100] sm:$0xff]  ;;  %v10915_v54 = vld [vmem:[#allocation2 + $0x108] sm:$0xff] }
 0x370   : > { %8943 = vmatmul.msk.bf16.gmra.mxu1 %vm2070_vm3, %v5480_v62  ;;  %v652_v48 = vshll.u32 %v649_v59, 16  ;;  %v1971_v23 = vsel %vm10808_vm9, %v10768_v63, %v10746_v4  ;;  %v636_v14 = vadd.s32 %v635_v44, %v626_v46  ;;  %v651_v32 = vmul.u32 43690, %v646_v0  ;;  %v10917_v2 = vld [vmem:[#allocation2 + $0x110] sm:$0xff] }
 0x371   : > { %8967 = vmatmul.msk.bf16.gmra.mxu2 %vm2070_vm3, %v5407_v31  ;;  %v5073_v57 = vadd.f32 %v10571_v37, %v5021_v30  ;;  %v653_v38 = vshrl.u32 %v649_v59, 16  ;;  %v654_v16 = vshll.u32 %v650_v17, 16  ;;  %v10830_v41 = vadd.s32 80, %v10346_v29  ;;  %v10852_v31 = vld [vmem:[#allocation2 + $0x111] sm:$0xff] }
 0x372   : > { %v4531_v34 = vpop.f32.mrf.mxu3  ;;  %vm1780_vm8 = vcmp.ne.s32.totalorder %v10815_v18, 0  ;;  %v637_v21 = vshrl.u32 %v636_v14, 4  ;;  %vm656_vm10 = vc.u32 %v648_v3, %v652_v48  ;;  %v658_v7 = vadd.s32 %v652_v48, %v648_v3 }
 0x373   : > { %v5121_v22 = vmax.f32 %v5073_v57, 0.0  ;;  %v4644_v33 = vadd.f32 %v4531_v34, %v10089_v8  ;;  %vm1828_vm11 = vcmp.lt.s32.totalorder %v10815_v18, 0  ;;  %v657_v8 = vsel %vm656_vm10, 1, %v14139_v43 }
 0x374   : > { %v10832_v5 = vpop.f32.mrf.mxu0  ;;  %v10842_v63 = vadd.s32 24, %v10815_v18  ;;  %v638_v13 = vmul.u32 24, %v637_v21  ;;  %v659_v0 = vadd.s32 %v657_v8, %v651_v32  ;;  %vm660_vm12 = vc.u32 %v658_v7, %v654_v16  ;;  %vm10865_vm14 = vmand %vm1828_vm11, %vm1780_vm8 }
 0x375   : > { %v5265_v4 = vsel %vm10793_vm7, %v5121_v22, 0.0  ;;  %v4970_v46 = vadd.f32 %v10724_v20, %v4644_v33  ;;  %v10850_v20 = vld [vmem:[#allocation2 + $0x109] sm:$0xff]  ;;  %v661_v1 = vsel %vm660_vm12, 1, %v14139_v43  ;;  %v674_v11 = vand.u32 65535, %v10830_v41  ;;  %v5436_v7 = vld [vmem:[#allocation3 + $0x38] sm:$0xff] }
 0x376   : > { %5313 = vst.msk [vmem:[#allocation3 + $0x40] sm:$0xff] %vm2070_vm3, %v5265_v4  ;;  %v675_v25 = vshrl.u32 %v10830_v41, 16  ;;  %vm10857_vm13 = vcmp.lt.s32.totalorder %v1970_v60, 16  ;;  %v655_v55 = vshrl.u32 %v650_v17, 16  ;;  %v663_v59 = vadd.s32 %v661_v1, %v659_v0  ;;  %v14170_v22 = vld [vmem:[#allocation32_spill] sm:$0xff] }
 0x377   : > { %v5022_v62 = vmul.f32 %v10540_v10, %v4970_v46  ;;  %8902 = vmatmul.msk.bf16.gmra.mxu3 %vm2061_vm1, %v4420_v36  ;;  %v10870_v36 = vsub.s32 %v10670_v15, %v638_v13  ;;  %v4421_v3 = vpack.c.bf16 %v10846_v53, %v10844_v58  ;;  %v10875_v57 = vmul.u32 43690, %v674_v11 }
 0x378   : > { %v10877_v60 = vmul.u32 43691, %v675_v25  ;;  %vm10879_vm15 = vcmp.lt.s32.totalorder %v1971_v23, 16  ;;  %v4748_v15 = vpack.c.bf16 %v10852_v31, %v10850_v20  ;;  %v664_v14 = vadd.s32 %v663_v59, %v653_v38 }
 0x379   : > { %v5074_v44 = vadd.f32 %v10571_v37, %v5022_v62  ;;  %v677_v17 = vmul.u32 43691, %v674_v11  ;;  %v1972_v16 = vsel %vm10865_vm14, %v10842_v63, %v10815_v18  ;;  %v681_v21 = vshll.u32 %v10875_v57, 16  ;;  %v5363_v62 = vld [vmem:[#allocation3 + $0x37] sm:$0xff] }
 0x37a   : > { %v4534_v34 = vpop.f32.mrf.mxu3  ;;  %vm1781_vm0 = vcmp.ne.s32.totalorder %v10870_v36, 0  ;;  %v665_v4 = vadd.s32 %v664_v14, %v655_v55  ;;  %v680_v46 = vmul.u32 43690, %v675_v25  ;;  %v10895_v38 = vadd.s32 88, %v10346_v29 }
 0x37b   : > { %v5122_v32 = vmax.f32 %v5074_v44, 0.0  ;;  %v4645_v33 = vadd.f32 %v4534_v34, %v14170_v22  ;;  %vm1829_vm4 = vcmp.lt.s32.totalorder %v10870_v36, 0  ;;  %v683_v63 = vshll.u32 %v10877_v60, 16 }
 0x37c   : > { %v10891_v23 = vpop.f32.mrf.mxu0  ;;  %v666_v25 = vshrl.u32 %v665_v4, 4  ;;  %vm685_vm5 = vc.u32 %v677_v17, %v681_v21  ;;  %v687_v55 = vadd.s32 %v681_v21, %v677_v17  ;;  %v703_v34 = vand.u32 65535, %v10895_v38  ;;  %vm10932_vm7 = vmand %vm1829_vm4, %vm1781_vm0 }
 0x37d   : > { %v5266_v8 = vsel %vm10857_vm13, %v5122_v32, 0.0  ;;  %v4971_v13 = vadd.f32 %v10761_v56, %v4645_v33  ;;  %v5437_v0 = vld [vmem:[#allocation3 + $0x40] sm:$0xff]  ;;  %v1925_v56 = vadd.s32 24, %v10870_v36  ;;  %v686_v61 = vsel %vm685_vm5, 1, %v14139_v43 }
 0x37e   : > { %v5364_v18 = vld [vmem:[#allocation3 + $0x3f] sm:$0xff]  ;;  %5314 = vst.msk [vmem:[#allocation3 + $0x48] sm:$0xff] %vm2070_vm3, %v5266_v8  ;;  %v5481_v1 = vpack.c.bf16 %v5437_v0, %v5436_v7  ;;  %v667_v59 = vmul.u32 24, %v666_v25  ;;  %v688_v44 = vadd.s32 %v686_v61, %v680_v46  ;;  %v704_v14 = vshrl.u32 %v10895_v38, 16 }
 0x37f   : > { %v5408_v11 = vpack.c.bf16 %v5364_v18, %v5363_v62  ;;  %v5023_v30 = vmul.f32 %v10540_v10, %v4971_v13  ;;  %8928 = vmatmul.msk.bf16.gmra.mxu0 %vm2061_vm1, %v4747_v45  ;;  %v682_v45 = vshrl.u32 %v10875_v57, 16  ;;  %v684_v17 = vshrl.u32 %v10877_v60, 16  ;;  %v14171_v8 = vld [vmem:[#allocation15_spill] sm:$0xff] }
 0x380   : > { %8944 = vmatmul.msk.bf16.gmra.mxu1 %vm2070_vm3, %v5481_v1  ;;  %vm689_vm6 = vc.u32 %v687_v55, %v683_v63  ;;  %v10922_v33 = vsub.s32 %v10751_v40, %v667_v59  ;;  %v706_v7 = vmul.u32 43691, %v703_v34  ;;  %v10925_v4 = vmul.u32 43690, %v703_v34  ;;  %v10982_v57 = vld [vmem:[#allocation2 + $0x119] sm:$0xff] }
 0x381   : > { %8968 = vmatmul.msk.bf16.gmra.mxu2 %vm2070_vm3, %v5408_v11  ;;  %v5075_v32 = vadd.f32 %v10571_v37, %v5023_v30  ;;  %v690_v21 = vsel %vm689_vm6, 1, %v14139_v43  ;;  %v10936_v0 = vmul.u32 43691, %v704_v14  ;;  %vm10938_vm9 = vcmp.lt.s32.totalorder %v1972_v16, 16 }
 0x382   : > { %v4536_v22 = vpop.f32.mrf.mxu3  ;;  %v692_v60 = vadd.s32 %v690_v21, %v688_v44  ;;  %v4422_v18 = vpack.c.bf16 %v10917_v2, %v10915_v54  ;;  %v709_v63 = vmul.u32 43690, %v704_v14  ;;  %v10947_v1 = vadd.s32 96, %v10346_v29 }
 0x383   : > { %v5123_v46 = vmax.f32 %v5075_v32, 0.0  ;;  %v4646_v13 = vadd.f32 %v4536_v22, %v14171_v8  ;;  %v710_v16 = vshll.u32 %v10925_v4, 16  ;;  %v1973_v61 = vsel %vm10932_vm7, %v1925_v56, %v10870_v36 }
 0x384   : > { %v10942_v62 = vpop.f32.mrf.mxu0  ;;  %v693_v30 = vadd.s32 %v692_v60, %v682_v45  ;;  %vm1782_vm8 = vcmp.ne.s32.totalorder %v10922_v33, 0  ;;  %v712_v55 = vshll.u32 %v10936_v0, 16  ;;  %v10960_v59 = vadd.s32 104, %v10346_v29 }
 0x385   : > { %v5267_v11 = vsel %vm10879_vm15, %v5123_v46, 0.0  ;;  %v4972_v25 = vadd.f32 %v10832_v5, %v4646_v13  ;;  %vm1830_vm10 = vcmp.lt.s32.totalorder %v10922_v33, 0  ;;  %vm714_vm11 = vc.u32 %v706_v7, %v710_v16  ;;  %v14178_v46 = vld [vmem:[#allocation10_spill] sm:$0xff] }
 0x386   : > { %5315 = vst.msk [vmem:[#allocation3 + $0x50] sm:$0xff] %vm2070_vm3, %v5267_v11  ;;  %v694_v5 = vadd.s32 %v693_v30, %v684_v17  ;;  %v1926_v36 = vadd.s32 24, %v10922_v33  ;;  %v715_v56 = vsel %vm714_vm11, 1, %v14139_v43  ;;  %v716_v44 = vadd.s32 %v710_v16, %v706_v7  ;;  %v5438_v11 = vld [vmem:[#allocation3 + $0x48] sm:$0xff]  ;;  %vm10991_vm14 = vmand %vm1830_vm10, %vm1782_vm8 }
 0x387   : > { %v5024_v48 = vmul.f32 %v10540_v10, %v4972_v25  ;;  %8903 = vmatmul.msk.bf16.gmra.mxu3 %vm2061_vm1, %v4421_v3  ;;  %v732_v34 = vand.u32 65535, %v10947_v1  ;;  %v717_v45 = vadd.s32 %v715_v56, %v709_v63  ;;  %v733_v22 = vshrl.u32 %v10947_v1, 16  ;;  %v5365_v56 = vld [vmem:[#allocation3 + $0x47] sm:$0xff] }
 0x388   : > { %v695_v32 = vshrl.u32 %v694_v5, 4  ;;  %vm10973_vm12 = vcmp.lt.s32.totalorder %v1973_v61, 16  ;;  %v711_v3 = vshrl.u32 %v10925_v4, 16  ;;  %v713_v17 = vshrl.u32 %v10936_v0, 16  ;;  %v10995_v0 = vld [vmem:[#allocation2 + $0x121] sm:$0xff]  ;;  %v11034_v4 = vld [vmem:[#allocation2 + $0x118] sm:$0xff] }
 0x389   : > { %v5076_v14 = vadd.f32 %v10571_v37, %v5024_v48  ;;  %vm718_vm13 = vc.u32 %v716_v44, %v712_v55  ;;  %v10979_v21 = vmul.u32 43690, %v732_v34  ;;  %v735_v30 = vmul.u32 43691, %v732_v34 }
 0x38a   : > { %v4539_v53 = vpop.f32.mrf.mxu3  ;;  %v696_v13 = vmul.u32 24, %v695_v32  ;;  %v719_v60 = vsel %vm718_vm13, 1, %v14139_v43  ;;  %v10997_v16 = vmul.u32 43691, %v733_v22  ;;  %v738_v32 = vmul.u32 43690, %v733_v22 }
 0x38b   : > { %v5124_v7 = vmax.f32 %v5076_v14, 0.0  ;;  %v4647_v8 = vadd.f32 %v4539_v53, %v14178_v46  ;;  %v721_v25 = vadd.s32 %v719_v60, %v717_v45  ;;  %v739_v61 = vshll.u32 %v10979_v21, 16 }
 0x38c   : > { %v10985_v63 = vpop.f32.mrf.mxu0  ;;  %v11004_v14 = vsub.s32 %v10830_v41, %v696_v13  ;;  %v741_v46 = vshll.u32 %v10997_v16, 16  ;;  %v1974_v41 = vsel %vm10991_vm14, %v1926_v36, %v10922_v33  ;;  %v761_v40 = vand.u32 65535, %v10960_v59  ;;  %v14183_v13 = vld [vmem:[#allocation7_spill] sm:$0xff]  ;;  %v11109_v33 = vld [vmem:[#allocation2 + $0x130] sm:$0xff] }
 0x38d   : > { %v5268_v55 = vsel %vm10938_vm9, %v5124_v7, 0.0  ;;  %v4973_v48 = vadd.f32 %v10891_v23, %v4647_v8  ;;  %v5439_v5 = vld [vmem:[#allocation3 + $0x50] sm:$0xff]  ;;  %v722_v53 = vadd.s32 %v721_v25, %v711_v3  ;;  %v4749_v23 = vpack.c.bf16 %v10995_v0, %v10982_v57  ;;  %v11036_v25 = vld [vmem:[#allocation2 + $0x120] sm:$0xff] }
 0x38e   : > { %v5366_v44 = vld [vmem:[#allocation3 + $0x4f] sm:$0xff]  ;;  %5316 = vst.msk [vmem:[#allocation3 + $0x58] sm:$0xff] %vm2070_vm3, %v5268_v55  ;;  %v5482_v45 = vpack.c.bf16 %v5439_v5, %v5438_v11  ;;  %v740_v3 = vshrl.u32 %v10979_v21, 16  ;;  %vm743_vm15 = vc.u32 %v735_v30, %v739_v61  ;;  %v745_v20 = vadd.s32 %v739_v61, %v735_v30 }
 0x38f   : > { %v5409_v34 = vpack.c.bf16 %v5366_v44, %v5365_v56  ;;  %v5025_v60 = vmul.f32 %v10540_v10, %v4973_v48  ;;  %8929 = vmatmul.msk.bf16.gmra.mxu0 %vm2061_vm1, %v4748_v15  ;;  %v723_v22 = vadd.s32 %v722_v53, %v713_v17  ;;  %vm1783_vm0 = vcmp.ne.s32.totalorder %v11004_v14, 0 }
 0x390   : > { %8945 = vmatmul.msk.bf16.gmra.mxu1 %vm2070_vm3, %v5482_v45  ;;  %vm1831_vm4 = vcmp.lt.s32.totalorder %v11004_v14, 0  ;;  %v744_v15 = vsel %vm743_vm15, 1, %v14139_v43  ;;  %vm11026_vm5 = vcmp.lt.s32.totalorder %v1974_v41, 16  ;;  %v11031_v7 = vadd.s32 24, %v11004_v14  ;;  %v11053_v45 = vld [vmem:[#allocation2 + $0x131] sm:$0xff] }
 0x391   : > { %8969 = vmatmul.msk.bf16.gmra.mxu2 %vm2070_vm3, %v5409_v34  ;;  %v5077_v31 = vadd.f32 %v10571_v37, %v5025_v60  ;;  %v724_v17 = vshrl.u32 %v723_v22, 4  ;;  %v746_v21 = vadd.s32 %v744_v15, %v738_v32  ;;  %vm747_vm6 = vc.u32 %v745_v20, %v741_v46  ;;  %vm11046_vm7 = vmand %vm1831_vm4, %vm1783_vm0  ;;  %v11051_v32 = vld [vmem:[#allocation2 + $0x129] sm:$0xff] }
 0x392   : > { %v4541_v36 = vpop.f32.mrf.mxu3  ;;  %v748_v30 = vsel %vm747_vm6, 1, %v14139_v43  ;;  %v762_v61 = vshrl.u32 %v10960_v59, 16  ;;  %v742_v56 = vshrl.u32 %v10997_v16, 16  ;;  %v11055_v34 = vmul.u32 43690, %v761_v40 }
 0x393   : > { %v5125_v8 = vmax.f32 %v5077_v31, 0.0  ;;  %v4648_v11 = vadd.f32 %v4541_v36, %v14183_v13  ;;  %v725_v5 = vmul.u32 24, %v724_v17  ;;  %v750_v44 = vadd.s32 %v748_v30, %v746_v21  ;;  %v14186_v13 = vld [vmem:[#allocation13_spill] sm:$0xff] }
 0x394   : > { %v11040_v55 = vpop.f32.mrf.mxu0  ;;  %v764_v60 = vmul.u32 43691, %v761_v40  ;;  %v11060_v41 = vmul.u32 43691, %v762_v61  ;;  %v4423_v16 = vpack.c.bf16 %v11036_v25, %v11034_v4  ;;  %v768_v31 = vshll.u32 %v11055_v34, 16 }
 0x395   : > { %v5269_v53 = vsel %vm10973_vm12, %v5125_v8, 0.0  ;;  %v4974_v46 = vadd.f32 %v10942_v62, %v4648_v11  ;;  %v11064_v22 = vsub.s32 %v10895_v38, %v725_v5  ;;  %v751_v20 = vadd.s32 %v750_v44, %v740_v3  ;;  %v5440_v5 = vld [vmem:[#allocation3 + $0x58] sm:$0xff] }
 0x396   : > { %5317 = vst.msk [vmem:[#allocation3 + $0x60] sm:$0xff] %vm2070_vm3, %v5269_v53  ;;  %v1975_v62 = vsel %vm11046_vm7, %v11031_v7, %v11004_v14  ;;  %v4750_v38 = vpack.c.bf16 %v11053_v45, %v11051_v32  ;;  %v767_v58 = vmul.u32 43690, %v762_v61  ;;  %v769_v3 = vshrl.u32 %v11055_v34, 16  ;;  %v11231_v32 = vld [vmem:[%s13951_s3] ss:$0 sm:$0xff] }
 0x397   : > { %v5026_v15 = vmul.f32 %v10540_v10, %v4974_v46  ;;  %8904 = vmatmul.msk.bf16.gmra.mxu3 %vm2061_vm1, %v4422_v18  ;;  %v752_v40 = vadd.s32 %v751_v20, %v742_v56  ;;  %v770_v36 = vshll.u32 %v11060_v41, 16  ;;  %v771_v17 = vshrl.u32 %v11060_v41, 16  ;;  %v5367_v41 = vld [vmem:[#allocation3 + $0x57] sm:$0xff] }
 0x398   : > { %vm772_vm9 = vc.u32 %v764_v60, %v768_v31  ;;  %v774_v2 = vadd.s32 %v768_v31, %v764_v60  ;;  %v11085_v18 = vadd.s32 112, %v10346_v29  ;;  %vm1784_vm8 = vcmp.ne.s32.totalorder %v11064_v22, 0 }
 0x399   : > { %v5078_v54 = vadd.f32 %v10571_v37, %v5026_v15  ;;  %vm1832_vm10 = vcmp.lt.s32.totalorder %v11064_v22, 0  ;;  %v753_v14 = vshrl.u32 %v752_v40, 4  ;;  %v773_v7 = vsel %vm772_vm9, 1, %v14139_v43 }
 0x39a   : > { %v4544_v21 = vpop.f32.mrf.mxu3  ;;  %v11092_v30 = vadd.s32 24, %v11064_v22  ;;  %v775_v61 = vadd.s32 %v773_v7, %v767_v58  ;;  %vm776_vm11 = vc.u32 %v774_v2, %v770_v36  ;;  %v790_v44 = vand.u32 65535, %v11085_v18  ;;  %v11107_v2 = vld [vmem:[#allocation2 + $0x128] sm:$0xff]  ;;  %vm11128_vm13 = vmand %vm1832_vm10, %vm1784_vm8 }
 0x39b   : > { %v5126_v8 = vmax.f32 %v5078_v54, 0.0  ;;  %v4649_v11 = vadd.f32 %v4544_v21, %v14186_v13  ;;  %v754_v56 = vmul.u32 24, %v753_v14  ;;  %v791_v34 = vshrl.u32 %v11085_v18, 16 }
 0x39c   : > { %v11094_v48 = vpop.f32.mrf.mxu0  ;;  %v777_v31 = vsel %vm776_vm11, 1, %v14139_v43  ;;  %v11103_v15 = vadd.s32 120, %v10346_v29  ;;  %v793_v21 = vmul.u32 43691, %v790_v44  ;;  %v794_v14 = vmul.u32 43690, %v790_v44 }
 0x39d   : > { %v5270_v53 = vsel %vm11026_vm5, %v5126_v8, 0.0  ;;  %v4975_v46 = vadd.f32 %v10985_v63, %v4649_v11  ;;  %v5441_v60 = vld [vmem:[#allocation3 + $0x60] sm:$0xff]  ;;  %v755_v36 = vsub.s32 %v10947_v1, %v754_v56  ;;  %v779_v54 = vadd.s32 %v777_v31, %v775_v61  ;;  %v11156_v1 = vpop.f32.mrf.mxu2 }
 0x39e   : > { %v5368_v20 = vld [vmem:[#allocation3 + $0x5f] sm:$0xff]  ;;  %5318 = vst.msk [vmem:[#allocation3 + $0x68] sm:$0xff] %vm2070_vm3, %v5270_v53  ;;  %v5483_v58 = vpack.c.bf16 %v5441_v60, %v5440_v5  ;;  %v11116_v7 = vmul.u32 43691, %v791_v34  ;;  %vm11118_vm12 = vcmp.lt.s32.totalorder %v1975_v62, 16  ;;  %v796_v62 = vmul.u32 43690, %v791_v34 }
 0x39f   : > { %v5410_v40 = vpack.c.bf16 %v5368_v20, %v5367_v41  ;;  %v5027_v63 = vmul.f32 %v10540_v10, %v4975_v46  ;;  %8930 = vmatmul.msk.bf16.gmra.mxu0 %vm2061_vm1, %v4749_v23  ;;  %vm1785_vm14 = vcmp.ne.s32.totalorder %v755_v36, 0  ;;  %vm1833_vm15 = vcmp.lt.s32.totalorder %v755_v36, 0  ;;  %v14191_v46 = vld [vmem:[#allocation20_spill] sm:$0xff] }
 0x3a0   : > { %8946 = vmatmul.msk.bf16.gmra.mxu1 %vm2070_vm3, %v5483_v58  ;;  %v780_v57 = vadd.s32 %v779_v54, %v769_v3  ;;  %v4424_v23 = vpack.c.bf16 %v11109_v33, %v11107_v2  ;;  %v797_v13 = vshll.u32 %v794_v14, 16  ;;  %v1929_v61 = vadd.s32 24, %v755_v36  ;;  %vm11143_vm0 = vmand %vm1833_vm15, %vm1785_vm14 }
 0x3a1   : > { %8970 = vmatmul.msk.bf16.gmra.mxu2 %vm2070_vm3, %v5410_v40  ;;  %v5079_v0 = vadd.f32 %v10571_v37, %v5027_v63  ;;  %v799_v56 = vshll.u32 %v11116_v7, 16  ;;  %v819_v44 = vand.u32 65535, %v11103_v15  ;;  %v1976_v3 = vsel %vm11128_vm13, %v11092_v30, %v11064_v22  ;;  %v11154_v63 = vpop.f32.mrf.mxu1 }
 0x3a2   : > { %v4546_v11 = vpop.f32.mrf.mxu3  ;;  %v781_v5 = vadd.s32 %v780_v57, %v771_v17  ;;  %vm801_vm4 = vc.u32 %v793_v21, %v797_v13  ;;  %v798_v20 = vshrl.u32 %v794_v14, 16  ;;  %v803_v58 = vadd.s32 %v797_v13, %v793_v21 }
 0x3a3   : > { %v5127_v53 = vmax.f32 %v5079_v0, 0.0  ;;  %v4650_v60 = vadd.f32 %v4546_v11, %v14191_v46  ;;  %v802_v31 = vsel %vm801_vm4, 1, %v14139_v43  ;;  %v820_v54 = vshrl.u32 %v11103_v15, 16 }
 0x3a4   : > { %v11147_v34 = vpop.f32.mrf.mxu0  ;;  %v782_v17 = vshrl.u32 %v781_v5, 4  ;;  %v804_v30 = vadd.s32 %v802_v31, %v796_v62  ;;  %v1977_v14 = vsel %vm11143_vm0, %v1929_v61, %v755_v36  ;;  %vm805_vm5 = vc.u32 %v803_v58, %v799_v56  ;;  %v11191_v31 = vld [vmem:[#allocation2 + $0x139] sm:$0xff] }
 0x3a5   : > { %v5271_v40 = vsel %vm11118_vm12, %v5127_v53, 0.0  ;;  %v4976_v22 = vadd.f32 %v11040_v55, %v4650_v60  ;;  %v11161_v21 = vmul.u32 43690, %v819_v44  ;;  %v806_v55 = vsel %vm805_vm5, 1, %v14139_v43  ;;  %v14198_v53 = vld [vmem:[#allocation8_spill] sm:$0xff]  ;;  %v5793_v5 = vpop.f32.mrf.mxu2 }
 0x3a6   : > { %5319 = vst.msk [vmem:[#allocation3 + $0x70] sm:$0xff] %vm2070_vm3, %v5271_v40  ;;  %v783_v57 = vmul.u32 24, %v782_v17  ;;  %v822_v0 = vmul.u32 43691, %v819_v44  ;;  %v11169_v62 = vmul.u32 43691, %v820_v54  ;;  %v800_v36 = vshrl.u32 %v11116_v7, 16  ;;  %v5442_v41 = vld [vmem:[#allocation3 + $0x68] sm:$0xff] }
 0x3a7   : > { %v5028_v8 = vmul.f32 %v10540_v10, %v4976_v22  ;;  %8905 = vmatmul.msk.bf16.gmra.mxu3 %vm2061_vm1, %v4423_v16  ;;  %v808_v11 = vadd.s32 %v806_v55, %v804_v30  ;;  %v826_v61 = vshll.u32 %v11161_v21, 16  ;;  %vm11174_vm6 = vcmp.lt.s32.totalorder %v1976_v3, 16 }
 0x3a8   : > { %v784_v13 = vsub.s32 %v10960_v59, %v783_v57  ;;  %v825_v4 = vmul.u32 43690, %v820_v54  ;;  %v828_v25 = vshll.u32 %v11169_v62, 16  ;;  %vm11180_vm7 = vcmp.lt.s32.totalorder %v1977_v14, 16  ;;  %v5369_v14 = vld [vmem:[#allocation3 + $0x67] sm:$0xff] }
 0x3a9   : > { %v5080_v10 = vadd.f32 %v10571_v37, %v5028_v8  ;;  %v809_v7 = vadd.s32 %v808_v11, %v798_v20  ;;  %vm830_vm11 = vc.u32 %v822_v0, %v826_v61  ;;  %v832_v37 = vadd.s32 %v826_v61, %v822_v0  ;;  %v11204_v11 = vld [vmem:[#allocation2 + $0x141] sm:$0xff]  ;;  %v5589_v61 = vpop.f32.mrf.mxu1 }
 0x3aa   : > { %v4549_v56 = vpop.f32.mrf.mxu3  ;;  %vm1786_vm9 = vcmp.ne.s32.totalorder %v784_v13, 0  ;;  %vm1834_vm8 = vcmp.lt.s32.totalorder %v784_v13, 0  ;;  %v1930_v59 = vadd.s32 24, %v784_v13  ;;  %v827_v58 = vshrl.u32 %v11161_v21, 16 }
 0x3ab   : > { %v5128_v44 = vmax.f32 %v5080_v10, 0.0  ;;  %v4651_v3 = vadd.f32 %v4549_v56, %v14198_v53  ;;  %vm11185_vm10 = vmand %vm1834_vm8, %vm1786_vm9  ;;  %v810_v17 = vadd.s32 %v809_v7, %v800_v36  ;;  %v831_v40 = vsel %vm830_vm11, 1, %v14139_v43  ;;  %v11206_v10 = vld [vmem:[#allocation2 + $0x138] sm:$0xff]  ;;  %v11213_v56 = vld [vmem:[%s13950_s2] ss:$0 sm:$0xff] }
 0x3ac   : > { %v11189_v60 = vpop.f32.mrf.mxu0  ;;  %v11196_v20 = vadd.s32 128, %v10346_v29  ;;  %v1978_v8 = vsel %vm11185_vm10, %v1930_v59, %v784_v13  ;;  %v833_v55 = vadd.s32 %v831_v40, %v825_v4  ;;  %vm834_vm12 = vc.u32 %v832_v37, %v828_v25 }
 0x3ad   : > { %v5272_v22 = vsel %vm11174_vm6, %v5128_v44, 0.0  ;;  %v4977_v30 = vadd.f32 %v11094_v48, %v4651_v3  ;;  %v5443_v54 = vld [vmem:[#allocation3 + $0x70] sm:$0xff]  ;;  %v811_v36 = vshrl.u32 %v810_v17, 4  ;;  %v11208_v48 = vld [vmem:[#allocation2 + $0x140] sm:$0xff]  ;;  %v835_v4 = vsel %vm834_vm12, 1, %v14139_v43 }
 0x3ae   : > { %v5370_v57 = vld [vmem:[#allocation3 + $0x6f] sm:$0xff]  ;;  %5320 = vst.msk [vmem:[#allocation3 + $0x78] sm:$0xff] %vm2070_vm3, %v5272_v22  ;;  %v5484_v21 = vpack.c.bf16 %v5443_v54, %v5442_v41  ;;  %v11221_v25 = vadd.f32 %v5793_v5, %v5589_v61  ;;  %v848_v59 = vand.u32 65535, %v11196_v20  ;;  %v829_v44 = vshrl.u32 %v11169_v62, 16 }
 0x3af   : > { %v5411_v0 = vpack.c.bf16 %v5370_v57, %v5369_v14  ;;  %v5029_v13 = vmul.f32 %v11213_v56, %v4977_v30  ;;  %8931 = vmatmul.msk.bf16.gmra.mxu0 %vm2061_vm1, %v4750_v38  ;;  %v812_v7 = vmul.u32 24, %v811_v36  ;;  %v837_v53 = vadd.s32 %v835_v4, %v833_v55  ;;  %v11245_v54 = vld [vmem:[#allocation2 + $0x149] sm:$0xff]  ;;  %v11247_v14 = vld [vmem:[#allocation2 + $0x151] sm:$0xff] }
 0x3b0   : > { %8947 = vmatmul.msk.bf16.gmra.mxu1 %vm2070_vm3, %v5484_v21  ;;  %v849_v3 = vshrl.u32 %v11196_v20, 16  ;;  %v4751_v38 = vpack.c.bf16 %v11204_v11, %v11191_v31  ;;  %v4425_v46 = vpack.c.bf16 %v11208_v48, %v11206_v10  ;;  %v852_v37 = vmul.u32 43690, %v848_v59  ;;  %v14203_v55 = vld [vmem:[#allocation14_spill] sm:$0xff] }
 0x3b1   : > { %8971 = vmatmul.msk.bf16.gmra.mxu2 %vm2070_vm3, %v5411_v0  ;;  %v5081_v45 = vadd.f32 %v11231_v32, %v5029_v13  ;;  %vm11238_vm13 = vcmp.lt.s32.totalorder %v1978_v8, 16  ;;  %v813_v17 = vsub.s32 %v11085_v18, %v812_v7  ;;  %v838_v40 = vadd.s32 %v837_v53, %v827_v58 }
 0x3b2   : > { %v4551_v62 = vpop.f32.mrf.mxu3  ;;  %v851_v22 = vmul.u32 43691, %v848_v59  ;;  %v11243_v30 = vmul.u32 43691, %v849_v3  ;;  %v854_v0 = vmul.u32 43690, %v849_v3  ;;  %v855_v36 = vshll.u32 %v852_v37, 16 }
 0x3b3   : > { %v5129_v57 = vmax.f32 %v5081_v45, 0.0  ;;  %v4652_v21 = vadd.f32 %v4551_v62, %v14203_v55  ;;  %vm1787_vm14 = vcmp.ne.s32.totalorder %v813_v17, 0  ;;  %vm1835_vm15 = vcmp.lt.s32.totalorder %v813_v17, 0  ;;  %v11274_v62 = vld [vmem:[#allocation2 + $0x148] sm:$0xff] }
 0x3b4   : > { %v11250_v8 = vpop.f32.mrf.mxu0  ;;  %v1931_v61 = vadd.s32 24, %v813_v17  ;;  %v839_v5 = vadd.s32 %v838_v40, %v829_v44  ;;  %vm11255_vm0 = vmand %vm1835_vm15, %vm1787_vm14  ;;  %v857_v4 = vshll.u32 %v11243_v30, 16  ;;  %v856_v53 = vshrl.u32 %v852_v37, 16  ;;  %v11276_v37 = vld [vmem:[#allocation2 + $0x150] sm:$0xff] }
 0x3b5   : > { %v5273_v18 = vsel %vm11180_vm7, %v5129_v57, 0.0  ;;  %v4978_v58 = vadd.f32 %v11147_v34, %v4652_v21  ;;  %vm859_vm4 = vc.u32 %v851_v22, %v855_v36  ;;  %v861_v44 = vadd.s32 %v855_v36, %v851_v22 }
 0x3b6   : > { %5321 = vst.msk [vmem:[#allocation3 + $0x80] sm:$0xff] %vm2070_vm3, %v5273_v18  ;;  %v840_v7 = vshrl.u32 %v839_v5, 4  ;;  %v1979_v34 = vsel %vm11255_vm0, %v1931_v61, %v813_v17  ;;  %v860_v3 = vsel %vm859_vm4, 1, %v14139_v43  ;;  %v11272_v45 = vadd.s32 136, %v10346_v29  ;;  %v14208_v5 = vld [vmem:[#allocation9_spill] sm:$0xff] }
 0x3b7   : > { %v5030_v16 = vmul.f32 %v11213_v56, %v4978_v58  ;;  %8906 = vmatmul.msk.bf16.gmra.mxu3 %vm2061_vm1, %v4424_v23  ;;  %v858_v22 = vshrl.u32 %v11243_v30, 16  ;;  %v862_v57 = vadd.s32 %v860_v3, %v854_v0  ;;  %vm863_vm5 = vc.u32 %v861_v44, %v857_v4  ;;  %v5371_v44 = vld [vmem:[#allocation3 + $0x77] sm:$0xff] }
 0x3b8   : > { %v841_v40 = vmul.u32 24, %v840_v7  ;;  %v864_v33 = vsel %vm863_vm5, 1, %v14139_v43  ;;  %v877_v23 = vand.u32 65535, %v11272_v45  ;;  %v878_v17 = vshrl.u32 %v11272_v45, 16  ;;  %v5444_v7 = vld [vmem:[#allocation3 + $0x78] sm:$0xff] }
 0x3b9   : > { %v5082_v2 = vadd.f32 %v11231_v32, %v5030_v16  ;;  %vm11283_vm6 = vcmp.lt.s32.totalorder %v1979_v34, 16  ;;  %v866_v61 = vadd.s32 %v864_v33, %v862_v57  ;;  %v11294_v13 = vadd.s32 144, %v10346_v29 }
 0x3ba   : > { %v4554_v21 = vpop.f32.mrf.mxu3  ;;  %v842_v36 = vsub.s32 %v11103_v15, %v841_v40  ;;  %v11291_v58 = vmul.u32 43690, %v877_v23  ;;  %v880_v33 = vmul.u32 43691, %v877_v23  ;;  %v883_v23 = vmul.u32 43690, %v878_v17 }
 0x3bb   : > { %v5130_v0 = vmax.f32 %v5082_v2, 0.0  ;;  %v4653_v18 = vadd.f32 %v4554_v21, %v14208_v5  ;;  %v867_v15 = vadd.s32 %v866_v61, %v856_v53  ;;  %v882_v21 = vmul.u32 43691, %v878_v17 }
 0x3bc   : > { %v11296_v4 = vpop.f32.mrf.mxu0  ;;  %vm1788_vm7 = vcmp.ne.s32.totalorder %v842_v36, 0  ;;  %vm1836_vm9 = vcmp.lt.s32.totalorder %v842_v36, 0  ;;  %v1932_v16 = vadd.s32 24, %v842_v36  ;;  %v11307_v53 = vadd.s32 152, %v10346_v29 }
 0x3bd   : > { %v5274_v34 = vsel %vm11238_vm13, %v5130_v0, 0.0  ;;  %v4979_v3 = vadd.f32 %v11189_v60, %v4653_v18  ;;  %v5445_v40 = vld [vmem:[#allocation3 + $0x80] sm:$0xff]  ;;  %vm11301_vm8 = vmand %vm1836_vm9, %vm1788_vm7  ;;  %v868_v59 = vadd.s32 %v867_v15, %v858_v22  ;;  %v884_v61 = vshll.u32 %v11291_v58, 16  ;;  %v14213_v15 = vld [vmem:[#allocation18_spill] sm:$0xff] }
 0x3be   : > { %v5372_v57 = vld [vmem:[#allocation3 + $0x7f] sm:$0xff]  ;;  %5322 = vst.msk [vmem:[#allocation3 + $0x88] sm:$0xff] %vm2070_vm3, %v5274_v34  ;;  %v5485_v5 = vpack.c.bf16 %v5445_v40, %v5444_v7  ;;  %v1980_v60 = vsel %vm11301_vm8, %v1932_v16, %v842_v36  ;;  %v885_v0 = vshrl.u32 %v11291_v58, 16  ;;  %v886_v18 = vshll.u32 %v882_v21, 16 }
 0x3bf   : > { %v5412_v30 = vpack.c.bf16 %v5372_v57, %v5371_v44  ;;  %v5031_v41 = vmul.f32 %v11213_v56, %v4979_v3  ;;  %8932 = vmatmul.msk.bf16.gmra.mxu0 %vm2061_vm1, %v4751_v38  ;;  %v869_v22 = vshrl.u32 %v868_v59, 4  ;;  %v906_v7 = vand.u32 65535, %v11294_v13 }
 0x3c0   : > { %8948 = vmatmul.msk.bf16.gmra.mxu1 %vm2070_vm3, %v5485_v5  ;;  %vm888_vm10 = vc.u32 %v880_v33, %v884_v61  ;;  %v890_v11 = vadd.s32 %v884_v61, %v880_v33  ;;  %v907_v38 = vshrl.u32 %v11294_v13, 16  ;;  %vm11323_vm11 = vcmp.lt.s32.totalorder %v1980_v60, 16 }
 0x3c1   : > { %8972 = vmatmul.msk.bf16.gmra.mxu2 %vm2070_vm3, %v5412_v30  ;;  %v5083_v31 = vadd.f32 %v11231_v32, %v5031_v41  ;;  %v870_v44 = vmul.u32 24, %v869_v22  ;;  %v887_v16 = vshrl.u32 %v882_v21, 16  ;;  %v889_v59 = vsel %vm888_vm10, 1, %v14139_v43  ;;  %v11341_v22 = vld [vmem:[#allocation2 + $0x159] sm:$0xff] }
 0x3c2   : > { %v4556_v36 = vpop.f32.mrf.mxu3  ;;  %v11328_v30 = vmul.u32 43690, %v906_v7  ;;  %v891_v3 = vadd.s32 %v889_v59, %v883_v23  ;;  %vm892_vm12 = vc.u32 %v890_v11, %v886_v18  ;;  %v909_v33 = vmul.u32 43691, %v906_v7  ;;  %v11344_v18 = vld [vmem:[#allocation2 + $0x161] sm:$0xff]  ;;  %v9064_v11 = vld [vmem:[%s13952_s4 + $0x14] sm:$0xf] }
 0x3c3   : > { %v5131_v58 = vmax.f32 %v5083_v31, 0.0  ;;  %v4654_v34 = vadd.f32 %v4556_v36, %v14213_v15  ;;  %v871_v57 = vsub.s32 %v11196_v20, %v870_v44  ;;  %v893_v2 = vsel %vm892_vm12, 1, %v14139_v43 }
 0x3c4   : > { %v11331_v40 = vpop.f32.mrf.mxu0  ;;  %v11335_v5 = vmul.u32 43691, %v907_v38  ;;  %v895_v60 = vadd.s32 %v893_v2, %v891_v3  ;;  %v913_v61 = vshll.u32 %v11328_v30, 16  ;;  %v912_v23 = vmul.u32 43690, %v907_v38  ;;  %v11367_v3 = vld [vmem:[#allocation2 + $0x158] sm:$0xff] }
 0x3c5   : > { %v5275_v21 = vsel %vm11283_vm6, %v5131_v58, 0.0  ;;  %v4980_v41 = vadd.f32 %v11250_v8, %v4654_v34  ;;  %vm1789_vm13 = vcmp.ne.s32.totalorder %v871_v57, 0  ;;  %vm1837_vm14 = vcmp.lt.s32.totalorder %v871_v57, 0 }
 0x3c6   : > { %5323 = vst.msk [vmem:[#allocation3 + $0x90] sm:$0xff] %vm2070_vm3, %v5275_v21  ;;  %v1933_v20 = vadd.s32 24, %v871_v57  ;;  %vm1885_vm15 = vmand %vm1837_vm14, %vm1789_vm13  ;;  %v896_v8 = vadd.s32 %v895_v60, %v885_v0  ;;  %v914_v55 = vshrl.u32 %v11328_v30, 16  ;;  %v915_v31 = vshll.u32 %v11335_v5, 16 }
 0x3c7   : > { %v5032_v7 = vmul.f32 %v11213_v56, %v4980_v41  ;;  %8907 = vmatmul.msk.bf16.gmra.mxu3 %vm2061_vm1, %v4425_v46  ;;  %v916_v36 = vshrl.u32 %v11335_v5, 16  ;;  %vm917_vm0 = vc.u32 %v909_v33, %v913_v61  ;;  %v919_v44 = vadd.s32 %v913_v61, %v909_v33  ;;  %v5446_v41 = vld [vmem:[#allocation3 + $0x88] sm:$0xff] }
 0x3c8   : > { %v1981_v38 = vsel %vm1885_vm15, %v1933_v20, %v871_v57  ;;  %v897_v10 = vadd.s32 %v896_v8, %v887_v16  ;;  %v918_v48 = vsel %vm917_vm0, 1, %v14139_v43  ;;  %v4753_v46 = vpack.c.bf16 %v11344_v18, %v11341_v22  ;;  %v11369_v57 = vld [vmem:[#allocation2 + $0x160] sm:$0xff] }
 0x3c9   : > { %v5084_v59 = vadd.f32 %v11231_v32, %v5032_v7  ;;  %vm11361_vm4 = vcmp.lt.s32.totalorder %v1981_v38, 16  ;;  %v920_v58 = vadd.s32 %v918_v48, %v912_v23  ;;  %vm921_vm5 = vc.u32 %v919_v44, %v915_v31 }
 0x3ca   : > { %v4559_v30 = vpop.f32.mrf.mxu3  ;;  %v7038_v15 = vsel %vm5576_vm2, %v9064_v11, 0  ;;  %v935_v34 = vand.u32 65535, %v11307_v53  ;;  %v898_v33 = vshrl.u32 %v897_v10, 4  ;;  %v922_v5 = vsel %vm921_vm5, 1, %v14139_v43 }
 0x3cb   : > { %v5132_v16 = vmax.f32 %v5084_v59, 0.0  ;;  %v4655_v2 = vadd.f32 %v4559_v30, %v10168_v47  ;;  %7047 = vmatpush.bf16.msrb.mxu2 %v7038_v15  ;;  %v924_v60 = vadd.s32 %v922_v5, %v920_v58  ;;  %v936_v61 = vshrl.u32 %v11307_v53, 16  ;;  %v5373_v47 = vld [vmem:[#allocation3 + $0x87] sm:$0xff] }
 0x3cc   : > { %v11373_v21 = vpop.f32.mrf.mxu0  ;;  %v938_v20 = vmul.u32 43691, %v935_v34  ;;  %v11376_v23 = vmul.u32 43690, %v935_v34  ;;  %v899_v38 = vmul.u32 24, %v898_v33  ;;  %v4427_v44 = vpack.c.bf16 %v11369_v57, %v11367_v3 }
 0x3cd   : > { %v5276_v7 = vsel %vm11323_vm11, %v5132_v16, 0.0  ;;  %v4981_v8 = vadd.f32 %v11296_v4, %v4655_v2  ;;  %v5447_v31 = vld [vmem:[#allocation3 + $0x90] sm:$0xff]  ;;  %v925_v48 = vadd.s32 %v924_v60, %v914_v55  ;;  %v940_v30 = vmul.u32 43691, %v936_v61 }
 0x3ce   : > { %v5374_v11 = vld [vmem:[#allocation3 + $0x8f] sm:$0xff]  ;;  %5324 = vst.msk [vmem:[#allocation3 + $0x98] sm:$0xff] %vm2070_vm3, %v5276_v7  ;;  %v5486_v59 = vpack.c.bf16 %v5447_v31, %v5446_v41  ;;  %v14216_v17 = vpack.c.bf16 %v11247_v14, %v11245_v54  ;;  %v900_v4 = vsub.s32 %v11272_v45, %v899_v38  ;;  %v941_v15 = vmul.u32 43690, %v936_v61 }
 0x3cf   : > { %v5413_v10 = vpack.c.bf16 %v5374_v11, %v5373_v47  ;;  %v5033_v58 = vmul.f32 %v11213_v56, %v4981_v8  ;;  %v942_v34 = vshll.u32 %v11376_v23, 16  ;;  %v926_v16 = vadd.s32 %v925_v48, %v916_v36  ;;  %v11400_v8 = vld [vmem:[#allocation2 + $0x169] sm:$0xff]  ;;  %v11402_v31 = vld [vmem:[#allocation2 + $0x171] sm:$0xff] }
 0x3d0   : > { %8933 = vmatmul.msk.bf16.gmra.mxu0 %vm2061_vm1, %v14216_v17  ;;  %8949 = vmatmul.msk.bf16.gmra.mxu1 %vm2070_vm3, %v5486_v59  ;;  %v943_v55 = vshrl.u32 %v11376_v23, 16  ;;  %v944_v2 = vshll.u32 %v940_v30, 16  ;;  %v945_v33 = vshrl.u32 %v940_v30, 16  ;;  %vm1790_vm6 = vcmp.ne.s32.totalorder %v900_v4, 0 }
 0x3d1   : > { %8973 = vmatmul.msk.bf16.gmra.mxu2 %vm2070_vm3, %v5413_v10  ;;  %v5085_v5 = vadd.f32 %v11231_v32, %v5033_v58  ;;  %vm1838_vm7 = vcmp.lt.s32.totalorder %v900_v4, 0  ;;  %v1934_v54 = vadd.s32 24, %v900_v4  ;;  %v927_v45 = vshrl.u32 %v926_v16, 4  ;;  %v11412_v10 = vpop.f32.mrf.mxu1 }
 0x3d2   : > { %vm1886_vm9 = vmand %vm1838_vm7, %vm1790_vm6  ;;  %v4561_v14 = vpop.f32.mrf.mxu3  ;;  %vm946_vm8 = vc.u32 %v938_v20, %v942_v34  ;;  %v948_v41 = vadd.s32 %v942_v34, %v938_v20  ;;  %v11396_v60 = vadd.s32 160, %v10346_v29  ;;  %14219 = vst [vmem:[#allocation37_spill] sm:$0xff] %v11412_v10  ;;  %v14220_v34 = vpack.c.bf16 %v11276_v37, %v11274_v62 }
 0x3d3   : > { %v5133_v61 = vmax.f32 %v5085_v5, 0.0  ;;  %v1982_v7 = vsel %vm1886_vm9, %v1934_v54, %v900_v4  ;;  %v4656_v36 = vadd.f32 %v4561_v14, %v10174_v39  ;;  %v947_v23 = vsel %vm946_vm8, 1, %v14139_v43 }
 0x3d4   : > { %vm11404_vm10 = vcmp.lt.s32.totalorder %v1982_v7, 16  ;;  %v11408_v11 = vpop.f32.mrf.mxu0  ;;  %v928_v20 = vmul.u32 24, %v927_v45  ;;  %v949_v38 = vadd.s32 %v947_v23, %v941_v15  ;;  %vm950_vm11 = vc.u32 %v948_v41, %v944_v2  ;;  %v11438_v23 = vpop.f32.mrf.mxu2 }
 0x3d5   : > { %v5277_v59 = vsel %vm11361_vm4, %v5133_v61, 0.0  ;;  %v4982_v39 = vadd.f32 %v11331_v40, %v4656_v36  ;;  %v951_v48 = vsel %vm950_vm11, 1, %v14139_v43  ;;  %v964_v30 = vand.u32 65535, %v11396_v60  ;;  %14221 = vst [vmem:[#allocation45_spill] sm:$0xff] %v11438_v23 }
 0x3d6   : > { %5325 = vst.msk [vmem:[#allocation3 + $0xa0] sm:$0xff] %vm2070_vm3, %v5277_v59  ;;  %v929_v58 = vsub.s32 %v11294_v13, %v928_v20  ;;  %v953_v17 = vadd.s32 %v951_v48, %v949_v38  ;;  %v965_v4 = vshrl.u32 %v11396_v60, 16  ;;  %v11430_v2 = vadd.s32 168, %v10346_v29  ;;  %v5448_v48 = vld [vmem:[#allocation3 + $0x98] sm:$0xff] }
 0x3d7   : > { %v5034_v0 = vmul.f32 %v11213_v56, %v4982_v39  ;;  %8908 = vmatmul.msk.bf16.gmra.mxu3 %vm2061_vm1, %v14220_v34  ;;  %v967_v40 = vmul.u32 43691, %v964_v30  ;;  %v11427_v16 = vmul.u32 43690, %v964_v30 }
 0x3d8   : > { %vm1791_vm12 = vcmp.ne.s32.totalorder %v929_v58, 0  ;;  %vm1839_vm13 = vcmp.lt.s32.totalorder %v929_v58, 0  ;;  %v1935_v13 = vadd.s32 24, %v929_v58  ;;  %v954_v5 = vadd.s32 %v953_v17, %v943_v55 }
 0x3d9   : > { %v5086_v54 = vadd.f32 %v11231_v32, %v5034_v0  ;;  %vm1887_vm14 = vmand %vm1839_vm13, %vm1791_vm12  ;;  %v11433_v14 = vmul.u32 43691, %v965_v4  ;;  %v970_v45 = vmul.u32 43690, %v965_v4  ;;  %v971_v62 = vshll.u32 %v11427_v16, 16 }
 0x3da   : > { %v1983_v37 = vsel %vm1887_vm14, %v1935_v13, %v929_v58  ;;  %v4564_v41 = vpop.f32.mrf.mxu3  ;;  %v955_v61 = vadd.s32 %v954_v5, %v945_v33  ;;  %v972_v7 = vshrl.u32 %v11427_v16, 16  ;;  %v993_v36 = vand.u32 65535, %v11430_v2  ;;  %v5375_v16 = vld [vmem:[#allocation3 + $0x97] sm:$0xff] }
 0x3db   : > { %v5134_v20 = vmax.f32 %v5086_v54, 0.0  ;;  %vm11440_vm15 = vcmp.lt.s32.totalorder %v1983_v37, 16  ;;  %v4657_v38 = vadd.f32 %v4564_v41, %v10182_v49  ;;  %v973_v59 = vshll.u32 %v11433_v14, 16 }
 0x3dc   : > { %v11446_v39 = vpop.f32.mrf.mxu0  ;;  %v956_v30 = vshrl.u32 %v955_v61, 4  ;;  %v974_v33 = vshrl.u32 %v11433_v14, 16  ;;  %vm975_vm0 = vc.u32 %v967_v40, %v971_v62  ;;  %v977_v58 = vadd.s32 %v971_v62, %v967_v40 }
 0x3dd   : > { %v5278_v17 = vsel %vm11404_vm10, %v5134_v20, 0.0  ;;  %v4983_v4 = vadd.f32 %v11373_v21, %v4657_v38  ;;  %v5594_v0 = vpop.f32.mrf.mxu1  ;;  %v5449_v34 = vld [vmem:[#allocation3 + $0xa0] sm:$0xff]  ;;  %v976_v49 = vsel %vm975_vm0, 1, %v14139_v43  ;;  %v994_v5 = vshrl.u32 %v11430_v2, 16 }
 0x3de   : > { %v5376_v13 = vld [vmem:[#allocation3 + $0x9f] sm:$0xff]  ;;  %5326 = vst.msk [vmem:[#allocation3 + $0xa8] sm:$0xff] %vm2070_vm3, %v5278_v17  ;;  %v5487_v54 = vpack.c.bf16 %v5449_v34, %v5448_v48  ;;  %v957_v14 = vmul.u32 24, %v956_v30  ;;  %v978_v41 = vadd.s32 %v976_v49, %v970_v45  ;;  %vm979_vm4 = vc.u32 %v977_v58, %v973_v59 }
 0x3df   : > { %v5414_v37 = vpack.c.bf16 %v5376_v13, %v5375_v16  ;;  %v5035_v40 = vmul.f32 %v11213_v56, %v4983_v4  ;;  %v996_v21 = vmul.u32 43691, %v993_v36  ;;  %v11460_v47 = vmul.u32 43690, %v993_v36  ;;  %v11474_v16 = vld [vmem:[#allocation2 + $0x168] sm:$0xff]  ;;  %v11476_v13 = vld [vmem:[#allocation2 + $0x170] sm:$0xff] }
 0x3e0   : > { %8934 = vmatmul.msk.bf16.gmra.mxu0 %vm2061_vm1, %v4753_v46  ;;  %8950 = vmatmul.msk.bf16.gmra.mxu1 %vm2070_vm3, %v5487_v54  ;;  %v958_v62 = vsub.s32 %v11307_v53, %v957_v14  ;;  %v980_v61 = vsel %vm979_vm4, 1, %v14139_v43  ;;  %v11466_v45 = vmul.u32 43691, %v994_v5  ;;  %v999_v20 = vmul.u32 43690, %v994_v5  ;;  %v14224_v53 = vld [vmem:[#allocation25_spill] sm:$0xff] }
 0x3e1   : > { %8974 = vmatmul.msk.bf16.gmra.mxu2 %vm2070_vm3, %v5414_v37  ;;  %v5087_v38 = vadd.f32 %v11231_v32, %v5035_v40  ;;  %v982_v22 = vadd.s32 %v980_v61, %v978_v41  ;;  %v1000_v18 = vshll.u32 %v11460_v47, 16  ;;  %v1001_v46 = vshrl.u32 %v11460_v47, 16  ;;  %v11489_v61 = vld [vmem:[#allocation2 + $0x179] sm:$0xff] }
 0x3e2   : > { %vm1792_vm5 = vcmp.ne.s32.totalorder %v958_v62, 0  ;;  %vm1840_vm6 = vcmp.lt.s32.totalorder %v958_v62, 0  ;;  %v1936_v36 = vadd.s32 24, %v958_v62  ;;  %v4566_v59 = vpop.f32.mrf.mxu3  ;;  %v1002_v48 = vshll.u32 %v11466_v45, 16 }
 0x3e3   : > { %v5135_v30 = vmax.f32 %v5087_v38, 0.0  ;;  %vm1888_vm7 = vmand %vm1840_vm6, %vm1792_vm5  ;;  %v4658_v58 = vadd.f32 %v4566_v59, %v14224_v53  ;;  %v983_v4 = vadd.s32 %v982_v22, %v972_v7  ;;  %v1003_v34 = vshrl.u32 %v11466_v45, 16  ;;  %v11500_v38 = vld [vmem:[#allocation2 + $0x178] sm:$0xff] }
 0x3e4   : > { %v5798_v17 = vpop.f32.mrf.mxu2  ;;  %v1984_v49 = vsel %vm1888_vm7, %v1936_v36, %v958_v62  ;;  %v11480_v54 = vpop.f32.mrf.mxu0  ;;  %vm1004_vm9 = vc.u32 %v996_v21, %v1000_v18  ;;  %v1006_v37 = vadd.s32 %v1000_v18, %v996_v21  ;;  %v11491_v62 = vld [vmem:[#allocation2 + $0x181] sm:$0xff]  ;;  %v11498_v21 = vadd.s32 176, %v10346_v29 }
 0x3e5   : > { %v11478_v5 = vadd.f32 %v5798_v17, %v5594_v0  ;;  %v5279_v14 = vsel %vm11440_vm15, %v5135_v30, 0.0  ;;  %vm11484_vm8 = vcmp.lt.s32.totalorder %v1984_v49, 16  ;;  %v4984_v7 = vadd.f32 %v11408_v11, %v4658_v58  ;;  %v5596_v40 = vpop.f32.mrf.mxu1  ;;  %v11502_v11 = vld [vmem:[#allocation2 + $0x180] sm:$0xff] }
 0x3e6   : > { %v984_v47 = vadd.s32 %v983_v4, %v974_v33  ;;  %5327 = vst.msk [vmem:[#allocation3 + $0xb0] sm:$0xff] %vm2070_vm3, %v5279_v14  ;;  %v1005_v0 = vsel %vm1004_vm9, 1, %v14139_v43  ;;  %vm1008_vm10 = vc.u32 %v1006_v37, %v1002_v48  ;;  %v1022_v59 = vand.u32 65535, %v11498_v21 }
 0x3e7   : > { %v5036_v33 = vmul.f32 %v11213_v56, %v4984_v7  ;;  %8909 = vmatmul.msk.bf16.gmra.mxu3 %vm2061_vm1, %v4427_v44  ;;  %v1007_v18 = vadd.s32 %v1005_v0, %v999_v20  ;;  %v1009_v36 = vsel %vm1008_vm10, 1, %v14139_v43  ;;  %v1023_v48 = vshrl.u32 %v11498_v21, 16 }
 0x3e8   : > { %v985_v22 = vshrl.u32 %v984_v47, 4  ;;  %v11515_v53 = vadd.s32 184, %v10346_v29  ;;  %v1025_v20 = vmul.u32 43691, %v1022_v59  ;;  %v1026_v4 = vmul.u32 43690, %v1022_v59  ;;  %v14227_v47 = vld [vmem:[#allocation11_spill] sm:$0xff] }
 0x3e9   : > { %v5088_v58 = vadd.f32 %v11231_v32, %v5036_v33  ;;  %v1011_v3 = vadd.s32 %v1009_v36, %v1007_v18  ;;  %v11520_v49 = vmul.u32 43691, %v1023_v48  ;;  %v1028_v37 = vmul.u32 43690, %v1023_v48  ;;  %v5377_v18 = vld [vmem:[#allocation3 + $0xa7] sm:$0xff] }
 0x3ea   : > { %v986_v17 = vmul.u32 24, %v985_v22  ;;  %v4569_v44 = vpop.f32.mrf.mxu3  ;;  %v5450_v22 = vld [vmem:[#allocation3 + $0xa8] sm:$0xff]  ;;  %v1029_v36 = vshll.u32 %v1026_v4, 16  ;;  %v1030_v57 = vshrl.u32 %v1026_v4, 16  ;;  %v14228_v41 = vpack.c.bf16 %v11402_v31, %v11400_v8 }
 0x3eb   : > { %v5136_v14 = vmax.f32 %v5088_v58, 0.0  ;;  %v4659_v0 = vadd.f32 %v4569_v44, %v14227_v47  ;;  %v1012_v55 = vadd.s32 %v1011_v3, %v1001_v46  ;;  %v1031_v59 = vshll.u32 %v11520_v49, 16 }
 0x3ec   : > { %v987_v7 = vsub.s32 %v11396_v60, %v986_v17  ;;  %v5800_v30 = vpop.f32.mrf.mxu2  ;;  %v11526_v33 = vpop.f32.mrf.mxu0  ;;  %vm1033_vm14 = vc.u32 %v1025_v20, %v1029_v36  ;;  %v1035_v47 = vadd.s32 %v1029_v36, %v1025_v20  ;;  %v1051_v31 = vand.u32 65535, %v11515_v53 }
 0x3ed   : > { %v11524_v15 = vadd.f32 %v5800_v30, %v5596_v40  ;;  %v5280_v48 = vsel %vm11484_vm8, %v5136_v14, 0.0  ;;  %v5599_v58 = vpop.f32.mrf.mxu1  ;;  %v5451_v17 = vld [vmem:[#allocation3 + $0xb0] sm:$0xff]  ;;  %v4985_v46 = vadd.f32 %v11446_v39, %v4659_v0  ;;  %v1013_v3 = vadd.s32 %v1012_v55, %v1003_v34 }
 0x3ee   : > { %vm1793_vm11 = vcmp.ne.s32.totalorder %v987_v7, 0  ;;  %vm1841_vm12 = vcmp.lt.s32.totalorder %v987_v7, 0  ;;  %v1937_v60 = vadd.s32 24, %v987_v7  ;;  %v5378_v44 = vld [vmem:[#allocation3 + $0xaf] sm:$0xff]  ;;  %5328 = vst.msk [vmem:[#allocation3 + $0xb8] sm:$0xff] %vm2070_vm3, %v5280_v48  ;;  %v5488_v40 = vpack.c.bf16 %v5451_v17, %v5450_v22 }
 0x3ef   : > { %vm1889_vm13 = vmand %vm1841_vm12, %vm1793_vm11  ;;  %v5415_v30 = vpack.c.bf16 %v5378_v44, %v5377_v18  ;;  %v1032_v14 = vshrl.u32 %v11520_v49, 16  ;;  %v5037_v39 = vmul.f32 %v11213_v56, %v4985_v46  ;;  %v1014_v45 = vshrl.u32 %v1013_v3, 4  ;;  %v14231_v18 = vld [vmem:[#allocation19_spill] sm:$0xff] }
 0x3f0   : > { %v1985_v4 = vsel %vm1889_vm13, %v1937_v60, %v987_v7  ;;  %8935 = vmatmul.msk.bf16.gmra.mxu0 %vm2061_vm1, %v14228_v41  ;;  %8951 = vmatmul.msk.bf16.gmra.mxu1 %vm2070_vm3, %v5488_v40  ;;  %v1034_v34 = vsel %vm1033_vm14, 1, %v14139_v43  ;;  %vm1037_vm0 = vc.u32 %v1035_v47, %v1031_v59  ;;  %v1052_v55 = vshrl.u32 %v11515_v53, 16 }
 0x3f1   : > { %vm11540_vm15 = vcmp.lt.s32.totalorder %v1985_v4, 16  ;;  %8975 = vmatmul.msk.bf16.gmra.mxu2 %vm2070_vm3, %v5415_v30  ;;  %v1036_v8 = vadd.s32 %v1034_v34, %v1028_v37  ;;  %v5089_v20 = vadd.f32 %v11231_v32, %v5037_v39  ;;  %v1015_v49 = vmul.u32 24, %v1014_v45 }
 0x3f2   : > { %v4571_v7 = vpop.f32.mrf.mxu3  ;;  %v1038_v0 = vsel %vm1037_vm0, 1, %v14139_v43  ;;  %v11553_v22 = vadd.s32 192, %v10346_v29  ;;  %v1054_v44 = vmul.u32 43691, %v1051_v31  ;;  %v1055_v37 = vmul.u32 43690, %v1051_v31 }
 0x3f3   : > { %v4660_v36 = vadd.f32 %v4571_v7, %v14231_v18  ;;  %v1040_v17 = vadd.s32 %v1038_v0, %v1036_v8  ;;  %v5137_v59 = vmax.f32 %v5089_v20, 0.0  ;;  %v1016_v46 = vsub.s32 %v11430_v2, %v1015_v49 }
 0x3f4   : > { %v5803_v60 = vpop.f32.mrf.mxu2  ;;  %v11559_v30 = vpop.f32.mrf.mxu0  ;;  %v11561_v3 = vmul.u32 43691, %v1052_v55  ;;  %v1057_v39 = vmul.u32 43690, %v1052_v55  ;;  %v1058_v45 = vshll.u32 %v1055_v37, 16 }
 0x3f5   : > { %v11557_v40 = vadd.f32 %v5803_v60, %v5599_v58  ;;  %v4986_v4 = vadd.f32 %v11480_v54, %v4660_v36  ;;  %v5601_v41 = vpop.f32.mrf.mxu1  ;;  %v1041_v47 = vadd.s32 %v1040_v17, %v1030_v57  ;;  %v5281_v34 = vsel %vm11540_vm15, %v5137_v59, 0.0 }
 0x3f6   : > { %vm1794_vm4 = vcmp.ne.s32.totalorder %v1016_v46, 0  ;;  %vm1842_vm5 = vcmp.lt.s32.totalorder %v1016_v46, 0  ;;  %v1938_v8 = vadd.s32 24, %v1016_v46  ;;  %5329 = vst.msk [vmem:[#allocation3 + $0xc0] sm:$0xff] %vm2070_vm3, %v5281_v34  ;;  %v14232_v58 = vpack.c.bf16 %v11476_v13, %v11474_v16 }
 0x3f7   : > { %vm1890_vm6 = vmand %vm1842_vm5, %vm1794_vm4  ;;  %v5038_v2 = vmul.f32 %v11213_v56, %v4986_v4  ;;  %v1042_v54 = vadd.s32 %v1041_v47, %v1032_v14  ;;  %v1059_v57 = vshrl.u32 %v1055_v37, 16  ;;  %v1060_v31 = vshll.u32 %v11561_v3, 16  ;;  %v14235_v37 = vld [vmem:[#allocation12_spill] sm:$0xff] }
 0x3f8   : > { %8910 = vmatmul.msk.bf16.gmra.mxu3 %vm2061_vm1, %v14232_v58  ;;  %v1986_v55 = vsel %vm1890_vm6, %v1938_v8, %v1016_v46  ;;  %v1061_v48 = vshrl.u32 %v11561_v3, 16  ;;  %vm1062_vm7 = vc.u32 %v1054_v44, %v1058_v45  ;;  %v1064_v20 = vadd.s32 %v1058_v45, %v1054_v44 }
 0x3f9   : > { %vm11574_vm9 = vcmp.lt.s32.totalorder %v1986_v55, 16  ;;  %v5090_v7 = vadd.f32 %v11231_v32, %v5038_v2  ;;  %v1043_v0 = vshrl.u32 %v1042_v54, 4  ;;  %v1063_v16 = vsel %vm1062_vm7, 1, %v14139_v43 }
 0x3fa   : > { %v4574_v13 = vpop.f32.mrf.mxu3  ;;  %v1065_v18 = vadd.s32 %v1063_v16, %v1057_v39  ;;  %vm1066_vm8 = vc.u32 %v1064_v20, %v1060_v31  ;;  %v1080_v14 = vand.u32 65535, %v11553_v22  ;;  %v1081_v36 = vshrl.u32 %v11553_v22, 16  ;;  %v5452_v16 = vld [vmem:[#allocation3 + $0xb8] sm:$0xff] }
 0x3fb   : > { %v5138_v60 = vmax.f32 %v5090_v7, 0.0  ;;  %v1044_v17 = vmul.u32 24, %v1043_v0  ;;  %v4661_v44 = vadd.f32 %v4574_v13, %v14235_v37  ;;  %v1067_v46 = vsel %vm1066_vm8, 1, %v14139_v43  ;;  %v5379_v13 = vld [vmem:[#allocation3 + $0xb7] sm:$0xff] }
 0x3fc   : > { %v5805_v59 = vpop.f32.mrf.mxu2  ;;  %v11586_v4 = vpop.f32.mrf.mxu0  ;;  %v1069_v47 = vadd.s32 %v1067_v46, %v1065_v18  ;;  %v1083_v45 = vmul.u32 43691, %v1080_v14  ;;  %v11588_v34 = vmul.u32 43690, %v1080_v14  ;;  %v11594_v54 = vmul.u32 43691, %v1081_v36 }
 0x3fd   : > { %v11584_v3 = vadd.f32 %v5805_v59, %v5601_v41  ;;  %v5282_v39 = vsel %vm11574_vm9, %v5138_v60, 0.0  ;;  %v1045_v8 = vsub.s32 %v11498_v21, %v1044_v17  ;;  %v4987_v2 = vadd.f32 %v11526_v33, %v4661_v44  ;;  %v5604_v58 = vpop.f32.mrf.mxu1  ;;  %v5453_v41 = vld [vmem:[#allocation3 + $0xc0] sm:$0xff]  ;;  %v11605_v60 = vld [vmem:[#allocation2 + $0x189] sm:$0xff]  ;;  %v11607_v17 = vld [vmem:[#allocation2 + $0x191] sm:$0xff] }
 0x3fe   : > { %5330 = vst.msk [vmem:[#allocation3 + $0xc8] sm:$0xff] %vm2070_vm3, %v5282_v39  ;;  %v5380_v31 = vld [vmem:[#allocation3 + $0xbf] sm:$0xff]  ;;  %v1070_v55 = vadd.s32 %v1069_v47, %v1059_v57  ;;  %v1086_v20 = vmul.u32 43690, %v1081_v36  ;;  %v1087_v7 = vshll.u32 %v11588_v34, 16  ;;  %v1088_v0 = vshrl.u32 %v11588_v34, 16  ;;  %v11618_v34 = vld [vmem:[#allocation2 + $0x188] sm:$0xff] }
 0x3ff   : > { %vm1795_vm10 = vcmp.ne.s32.totalorder %v1045_v8, 0  ;;  %vm1843_vm11 = vcmp.lt.s32.totalorder %v1045_v8, 0  ;;  %v1939_v49 = vadd.s32 24, %v1045_v8  ;;  %v5039_v21 = vmul.f32 %v11213_v56, %v4987_v2  ;;  %v11620_v39 = vld [vmem:[#allocation2 + $0x190] sm:$0xff]  ;;  %v14239_v2 = vld [vmem:[#allocation23_spill] sm:$0xff] }
 0x400   : > { %v14236_v33 = vpack.c.bf16 %v11491_v62, %v11489_v61  ;;  %vm1891_vm12 = vmand %vm1843_vm11, %vm1795_vm10  ;;  %v5489_v18 = vpack.c.bf16 %v5453_v41, %v5452_v16  ;;  %v5416_v57 = vpack.c.bf16 %v5380_v31, %v5379_v13  ;;  %v1071_v14 = vadd.s32 %v1070_v55, %v1061_v48  ;;  %v11634_v16 = vld [vmem:[#allocation2 + $0x1a1] sm:$0xff] }
 0x401   : > { %v1089_v36 = vshll.u32 %v11594_v54, 16  ;;  %v1987_v37 = vsel %vm1891_vm12, %v1939_v49, %v1045_v8  ;;  %v5091_v44 = vadd.f32 %v11231_v32, %v5039_v21  ;;  %v1090_v59 = vshrl.u32 %v11594_v54, 16 }
 0x402   : > { %8936 = vmatmul.msk.bf16.gmra.mxu0 %vm2061_vm1, %v14236_v33  ;;  %vm1091_vm13 = vc.u32 %v1083_v45, %v1087_v7  ;;  %vm11611_vm14 = vcmp.lt.s32.totalorder %v1987_v37, 16  ;;  %8952 = vmatmul.msk.bf16.gmra.mxu1 %vm2070_vm3, %v5489_v18  ;;  %v1072_v62 = vshrl.u32 %v1071_v14, 4  ;;  %v4576_v48 = vpop.f32.mrf.mxu3  ;;  %v1093_v47 = vadd.s32 %v1087_v7, %v1083_v45  ;;  %v11632_v7 = vld [vmem:[#allocation2 + $0x199] sm:$0xff] }
 0x403   : > { %8976 = vmatmul.msk.bf16.gmra.mxu2 %vm2070_vm3, %v5416_v57  ;;  %v1092_v46 = vsel %vm1091_vm13, 1, %v14139_v43  ;;  %v5139_v8 = vmax.f32 %v5091_v44, 0.0  ;;  %v4662_v54 = vadd.f32 %v4576_v48, %v14239_v2  ;;  %v4756_v55 = vpack.c.bf16 %v11607_v17, %v11605_v60 }
 0x404   : > { %v5808_v41 = vpop.f32.mrf.mxu2  ;;  %v1094_v31 = vadd.s32 %v1092_v46, %v1086_v20  ;;  %v1073_v49 = vmul.u32 24, %v1072_v62  ;;  %v11627_v33 = vpop.f32.mrf.mxu0  ;;  %vm1095_vm15 = vc.u32 %v1093_v47, %v1089_v36  ;;  %v11630_v45 = vadd.s32 200, %v10346_v29 }
 0x405   : > { %v11625_v21 = vadd.f32 %v5808_v41, %v5604_v58  ;;  %v5283_v13 = vsel %vm11611_vm14, %v5139_v8, 0.0  ;;  %v4988_v20 = vadd.f32 %v11559_v30, %v4662_v54  ;;  %v5606_v18 = vpop.f32.mrf.mxu1  ;;  %v1096_v57 = vsel %vm1095_vm15, 1, %v14139_v43 }
 0x406   : > { %5331 = vst.msk [vmem:[#allocation3 + $0xd0] sm:$0xff] %vm2070_vm3, %v5283_v13  ;;  %v1074_v14 = vsub.s32 %v11515_v53, %v1073_v49  ;;  %v1098_v36 = vadd.s32 %v1096_v57, %v1094_v31  ;;  %v1109_v37 = vand.u32 65535, %v11630_v45  ;;  %v1110_v44 = vshrl.u32 %v11630_v45, 16 }
 0x407   : > { %v5040_v61 = vmul.f32 %v11213_v56, %v4988_v20  ;;  %v14240_v30 = vpack.c.bf16 %v11502_v11, %v11500_v38  ;;  %v11652_v62 = vadd.s32 208, %v10346_v29  ;;  %v11657_v53 = vadd.s32 216, %v10346_v29  ;;  %v14241_v20 = vld [vmem:[#allocation30_spill] sm:$0xff] }
 0x408   : > { %vm1796_vm0 = vcmp.ne.s32.totalorder %v1074_v14, 0  ;;  %vm1844_vm4 = vcmp.lt.s32.totalorder %v1074_v14, 0  ;;  %v1940_v46 = vadd.s32 24, %v1074_v14  ;;  %v1099_v47 = vadd.s32 %v1098_v36, %v1088_v0 }
 0x409   : > { %8911 = vmatmul.msk.bf16.gmra.mxu3 %vm2061_vm1, %v14240_v30  ;;  %vm1892_vm5 = vmand %vm1844_vm4, %vm1796_vm0  ;;  %v5092_v56 = vadd.f32 %v11231_v32, %v5040_v61  ;;  %v1112_v8 = vmul.u32 43691, %v1109_v37  ;;  %v11660_v38 = vmul.u32 43690, %v1109_v37  ;;  %v11662_v11 = vmul.u32 43691, %v1110_v44  ;;  %v5454_v61 = vld [vmem:[#allocation3 + $0xc8] sm:$0xff] }
 0x40a   : > { %v1988_v2 = vsel %vm1892_vm5, %v1940_v46, %v1074_v14  ;;  %v1100_v54 = vadd.s32 %v1099_v47, %v1090_v59  ;;  %v4579_v41 = vpop.f32.mrf.mxu3  ;;  %v1115_v31 = vmul.u32 43690, %v1110_v44  ;;  %v1138_v49 = vand.u32 65535, %v11652_v62 }
 0x40b   : > { %vm2036_vm6 = vcmp.lt.s32.totalorder %v1988_v2, 16  ;;  %v5140_v13 = vmax.f32 %v5092_v56, 0.0  ;;  %v4663_v57 = vadd.f32 %v4579_v41, %v14241_v20  ;;  %v1116_v0 = vshll.u32 %v11660_v38, 16  ;;  %v5381_v2 = vld [vmem:[#allocation3 + $0xc7] sm:$0xff] }
 0x40c   : > { %v5810_v30 = vpop.f32.mrf.mxu2  ;;  %v1101_v36 = vshrl.u32 %v1100_v54, 4  ;;  %v11669_v37 = vpop.f32.mrf.mxu0  ;;  %v1117_v14 = vshrl.u32 %v11660_v38, 16  ;;  %v1118_v59 = vshll.u32 %v11662_v11, 16  ;;  %v1119_v20 = vshrl.u32 %v11662_v11, 16  ;;  %v11680_v38 = vld [vmem:[%s13950_s2] ss:$0 sm:$0xff] }
 0x40d   : > { %v11667_v32 = vadd.f32 %v5810_v30, %v5606_v18  ;;  %v5284_v44 = vsel %vm2036_vm6, %v5140_v13, 0.0  ;;  %v4989_v46 = vadd.f32 %v11586_v4, %v4663_v57  ;;  %v5609_v47 = vpop.f32.mrf.mxu1  ;;  %v5455_v56 = vld [vmem:[#allocation3 + $0xd0] sm:$0xff]  ;;  %vm1120_vm7 = vc.u32 %v1112_v8, %v1116_v0 }
 0x40e   : > { %v5382_v41 = vld [vmem:[#allocation3 + $0xcf] sm:$0xff]  ;;  %5332 = vst.msk [vmem:[#allocation3 + $0xd8] sm:$0xff] %vm2070_vm3, %v5284_v44  ;;  %v1102_v18 = vmul.u32 24, %v1101_v36  ;;  %v5490_v54 = vpack.c.bf16 %v5455_v56, %v5454_v61  ;;  %v1121_v48 = vsel %vm1120_vm7, 1, %v14139_v43  ;;  %v1122_v11 = vadd.s32 %v1116_v0, %v1112_v8 }
 0x40f   : > { %v5417_v30 = vpack.c.bf16 %v5382_v41, %v5381_v2  ;;  %v5041_v4 = vmul.f32 %v11680_v38, %v4989_v46  ;;  %v1123_v13 = vadd.s32 %v1121_v48, %v1115_v31  ;;  %v1139_v57 = vshrl.u32 %v11652_v62, 16  ;;  %v11693_v2 = vld [vmem:[%s13951_s3] ss:$0 sm:$0xff] }
 0x410   : > { %v1103_v36 = vsub.s32 %v11553_v22, %v1102_v18  ;;  %v1141_v61 = vmul.u32 43691, %v1138_v49  ;;  %v1142_v44 = vmul.u32 43690, %v1138_v49  ;;  %v1167_v56 = vand.u32 65535, %v11657_v53 }
 0x411   : > { %v5093_v46 = vadd.f32 %v11693_v2, %v5041_v4  ;;  %vm1124_vm9 = vc.u32 %v1122_v11, %v1118_v59  ;;  %v11696_v60 = vmul.u32 43691, %v1139_v57  ;;  %v1144_v17 = vmul.u32 43690, %v1139_v57 }
 0x412   : > { %8937 = vmatmul.msk.bf16.gmra.mxu0 %vm2061_vm1, %v4756_v55  ;;  %vm1797_vm8 = vcmp.ne.s32.totalorder %v1103_v36, 0  ;;  %vm1845_vm10 = vcmp.lt.s32.totalorder %v1103_v36, 0  ;;  %v1941_v55 = vadd.s32 24, %v1103_v36  ;;  %8953 = vmatmul.msk.bf16.gmra.mxu1 %vm2070_vm3, %v5490_v54  ;;  %v1125_v22 = vsel %vm1124_vm9, 1, %v14139_v43  ;;  %v4581_v48 = vpop.f32.mrf.mxu3 }
 0x413   : > { %8977 = vmatmul.msk.bf16.gmra.mxu2 %vm2070_vm3, %v5417_v30  ;;  %vm1893_vm11 = vmand %vm1845_vm10, %vm1797_vm8  ;;  %v5141_v8 = vmax.f32 %v5093_v46, 0.0  ;;  %v1127_v31 = vadd.s32 %v1125_v22, %v1123_v13  ;;  %v4664_v49 = vadd.f32 %v4581_v48, %v10427_v12  ;;  %v1145_v59 = vshll.u32 %v1142_v44, 16 }
 0x414   : > { %v5813_v0 = vpop.f32.mrf.mxu2  ;;  %v1989_v41 = vsel %vm1893_vm11, %v1941_v55, %v1103_v36  ;;  %v11704_v4 = vpop.f32.mrf.mxu0  ;;  %v1146_v11 = vshrl.u32 %v1142_v44, 16  ;;  %v1147_v54 = vshll.u32 %v11696_v60, 16  ;;  %v1148_v46 = vshrl.u32 %v11696_v60, 16 }
 0x415   : > { %v11702_v18 = vadd.f32 %v5813_v0, %v5609_v47  ;;  %vm2037_vm12 = vcmp.lt.s32.totalorder %v1989_v41, 16  ;;  %v1128_v30 = vadd.s32 %v1127_v31, %v1117_v14  ;;  %v4990_v57 = vadd.f32 %v11627_v33, %v4664_v49  ;;  %v5611_v58 = vpop.f32.mrf.mxu1  ;;  %v11722_v41 = vld [vmem:[#allocation2 + $0x198] sm:$0xff] }
 0x416   : > { %v5285_v13 = vsel %vm2037_vm12, %v5141_v8, 0.0  ;;  %vm1149_vm13 = vc.u32 %v1141_v61, %v1145_v59  ;;  %v1151_v12 = vadd.s32 %v1145_v59, %v1141_v61  ;;  %v1168_v22 = vshrl.u32 %v11657_v53, 16 }
 0x417   : > { %5333 = vst.msk [vmem:[#allocation3 + $0xe0] sm:$0xff] %vm2070_vm3, %v5285_v13  ;;  %v1129_v47 = vadd.s32 %v1128_v30, %v1119_v20  ;;  %v5042_v36 = vmul.f32 %v11680_v38, %v4990_v57  ;;  %v14242_v44 = vpack.c.bf16 %v11620_v39, %v11618_v34  ;;  %v1150_v33 = vsel %vm1149_vm13, 1, %v14139_v43  ;;  %v11724_v30 = vld [vmem:[#allocation2 + $0x1a0] sm:$0xff] }
 0x418   : > { %v1170_v14 = vmul.u32 43691, %v1167_v56  ;;  %v1152_v55 = vadd.s32 %v1150_v33, %v1144_v17  ;;  %vm1153_vm14 = vc.u32 %v1151_v12, %v1147_v54  ;;  %v1171_v60 = vmul.u32 43690, %v1167_v56  ;;  %v14243_v54 = vld [vmem:[#allocation16_spill] sm:$0xff] }
 0x419   : > { %8912 = vmatmul.msk.bf16.gmra.mxu3 %vm2061_vm1, %v14242_v44  ;;  %v11717_v48 = vmul.u32 43691, %v1168_v22  ;;  %v1130_v61 = vshrl.u32 %v1129_v47, 4  ;;  %v5094_v8 = vadd.f32 %v11693_v2, %v5042_v36  ;;  %v1154_v20 = vsel %vm1153_vm14, 1, %v14139_v43 }
 0x41a   : > { %v1173_v31 = vmul.u32 43690, %v1168_v22  ;;  %v1156_v49 = vadd.s32 %v1154_v20, %v1152_v55  ;;  %v4584_v0 = vpop.f32.mrf.mxu3  ;;  %v1174_v59 = vshll.u32 %v1171_v60, 16  ;;  %v1175_v34 = vshrl.u32 %v1171_v60, 16 }
 0x41b   : > { %v1176_v39 = vshll.u32 %v11717_v48, 16  ;;  %v1131_v17 = vmul.u32 24, %v1130_v61  ;;  %v5142_v56 = vmax.f32 %v5094_v8, 0.0  ;;  %v4665_v57 = vadd.f32 %v4584_v0, %v14243_v54 }
 0x41c   : > { %v5815_v13 = vpop.f32.mrf.mxu2  ;;  %v1177_v12 = vshrl.u32 %v11717_v48, 16  ;;  %v1157_v47 = vadd.s32 %v1156_v49, %v1146_v11  ;;  %v11730_v22 = vpop.f32.mrf.mxu0  ;;  %vm1178_vm15 = vc.u32 %v1170_v14, %v1174_v59  ;;  %v1180_v44 = vadd.s32 %v1174_v59, %v1170_v14  ;;  %v11740_v49 = vld [vmem:[#allocation2 + $0x1a9] sm:$0xff]  ;;  %v5383_v59 = vld [vmem:[#allocation3 + $0xd7] sm:$0xff] }
 0x41d   : > { %v11728_v36 = vadd.f32 %v5815_v13, %v5611_v58  ;;  %v1132_v33 = vsub.s32 %v11630_v45, %v1131_v17  ;;  %v4991_v55 = vadd.f32 %v11669_v37, %v4665_v57  ;;  %v5614_v60 = vpop.f32.mrf.mxu1  ;;  %v1179_v61 = vsel %vm1178_vm15, 1, %v14139_v43 }
 0x41e   : > { %v4431_v8 = vpack.c.bf16 %v11724_v30, %v11722_v41  ;;  %v1158_v20 = vadd.s32 %v1157_v47, %v1148_v46  ;;  %v5457_v0 = vld [vmem:[#allocation3 + $0xe0] sm:$0xff]  ;;  %v1181_v11 = vadd.s32 %v1179_v61, %v1173_v31  ;;  %vm1182_vm0 = vc.u32 %v1180_v44, %v1176_v39  ;;  %v5456_v46 = vld [vmem:[#allocation3 + $0xd8] sm:$0xff] }
 0x41f   : > { %v5384_v48 = vld [vmem:[#allocation3 + $0xdf] sm:$0xff]  ;;  %v11738_v58 = vadd.s32 224, %v10346_v29  ;;  %vm1798_vm4 = vcmp.ne.s32.totalorder %v1132_v33, 0  ;;  %vm1846_vm5 = vcmp.lt.s32.totalorder %v1132_v33, 0  ;;  %v1942_v45 = vadd.s32 24, %v1132_v33  ;;  %v11747_v41 = vld [vmem:[#allocation2 + $0x1b1] sm:$0xff] }
 0x420   : > { %v5043_v37 = vmul.f32 %v11680_v38, %v4991_v55  ;;  %v14244_v14 = vpack.c.bf16 %v11634_v16, %v11632_v7  ;;  %vm1894_vm6 = vmand %vm1846_vm5, %vm1798_vm4  ;;  %v1159_v31 = vshrl.u32 %v1158_v20, 4  ;;  %v5491_v39 = vpack.c.bf16 %v5457_v0, %v5456_v46 }
 0x421   : > { %v5418_v30 = vpack.c.bf16 %v5384_v48, %v5383_v59  ;;  %v1183_v17 = vsel %vm1182_vm0, 1, %v14139_v43  ;;  %v1990_v54 = vsel %vm1894_vm6, %v1942_v45, %v1132_v33  ;;  %v1196_v47 = vand.u32 65535, %v11738_v58 }
 0x422   : > { %8938 = vmatmul.msk.bf16.gmra.mxu0 %vm2061_vm1, %v14244_v14  ;;  %v5095_v57 = vadd.f32 %v11693_v2, %v5043_v37  ;;  %v1185_v13 = vadd.s32 %v1183_v17, %v1181_v11  ;;  %vm2038_vm7 = vcmp.lt.s32.totalorder %v1990_v54, 16  ;;  %v1160_v7 = vmul.u32 24, %v1159_v31  ;;  %8954 = vmatmul.msk.bf16.gmra.mxu1 %vm2070_vm3, %v5491_v39  ;;  %v4586_v16 = vpop.f32.mrf.mxu3 }
 0x423   : > { %8978 = vmatmul.msk.bf16.gmra.mxu2 %vm2070_vm3, %v5418_v30  ;;  %v1197_v44 = vshrl.u32 %v11738_v58, 16  ;;  %v4758_v55 = vpack.c.bf16 %v11747_v41, %v11740_v49  ;;  %v5286_v61 = vsel %vm2038_vm7, %v5142_v56, 0.0  ;;  %v4666_v0 = vadd.f32 %v4586_v16, %v10433_v52 }
 0x424   : > { %v5143_v20 = vmax.f32 %v5095_v57, 0.0  ;;  %v1186_v33 = vadd.s32 %v1185_v13, %v1175_v34  ;;  %v5818_v48 = vpop.f32.mrf.mxu2  ;;  %5334 = vst.msk [vmem:[#allocation3 + $0xe8] sm:$0xff] %vm2070_vm3, %v5286_v61  ;;  %v1161_v11 = vsub.s32 %v11652_v62, %v1160_v7  ;;  %v11762_v37 = vpop.f32.mrf.mxu0  ;;  %v1199_v14 = vmul.u32 43691, %v1196_v47 }
 0x425   : > { %v11760_v45 = vadd.f32 %v5818_v48, %v5614_v60  ;;  %v1200_v46 = vmul.u32 43690, %v1196_v47  ;;  %v4992_v31 = vadd.f32 %v11704_v4, %v4666_v0  ;;  %v5616_v39 = vpop.f32.mrf.mxu1  ;;  %v1201_v56 = vmul.u32 43691, %v1197_v44 }
 0x426   : > { %v1187_v59 = vadd.s32 %v1186_v33, %v1177_v12  ;;  %v1202_v30 = vmul.u32 43690, %v1197_v44  ;;  %vm1799_vm9 = vcmp.ne.s32.totalorder %v1161_v11, 0  ;;  %vm1847_vm8 = vcmp.lt.s32.totalorder %v1161_v11, 0 }
 0x427   : > { %v1943_v52 = vadd.s32 24, %v1161_v11  ;;  %v1203_v34 = vshll.u32 %v1200_v46, 16  ;;  %vm1895_vm10 = vmand %vm1847_vm8, %vm1799_vm9  ;;  %v5044_v62 = vmul.f32 %v11680_v38, %v4992_v31  ;;  %v1204_v60 = vshrl.u32 %v1200_v46, 16 }
 0x428   : > { %v1188_v17 = vshrl.u32 %v1187_v59, 4  ;;  %v1205_v54 = vshll.u32 %v1201_v56, 16  ;;  %v1206_v13 = vshrl.u32 %v1201_v56, 16  ;;  %v11770_v33 = vadd.s32 232, %v10346_v29 }
 0x429   : > { %8913 = vmatmul.msk.bf16.gmra.mxu3 %vm2061_vm1, %v4431_v8  ;;  %v1991_v57 = vsel %vm1895_vm10, %v1943_v52, %v1161_v11  ;;  %vm1207_vm11 = vc.u32 %v1199_v14, %v1203_v34  ;;  %v1209_v12 = vadd.s32 %v1203_v34, %v1199_v14  ;;  %v5096_v47 = vadd.f32 %v11693_v2, %v5044_v62  ;;  %v14245_v11 = vld [vmem:[#allocation24_spill] sm:$0xff]  ;;  %v4408_v62 = vld [vmem:[#allocation2 + $0x1b0] sm:$0xff] }
 0x42a   : > { %vm2039_vm12 = vcmp.lt.s32.totalorder %v1991_v57, 16  ;;  %v1189_v4 = vmul.u32 24, %v1188_v17  ;;  %v1208_v7 = vsel %vm1207_vm11, 1, %v14139_v43  ;;  %v4589_v61 = vpop.f32.mrf.mxu3  ;;  %v1225_v56 = vand.u32 65535, %v11770_v33  ;;  %v4407_v17 = vld [vmem:[#allocation2 + $0x1a8] sm:$0xff] }
 0x42b   : > { %v5287_v16 = vsel %vm2039_vm12, %v5143_v20, 0.0  ;;  %v1210_v44 = vadd.s32 %v1208_v7, %v1202_v30  ;;  %vm1211_vm13 = vc.u32 %v1209_v12, %v1205_v54  ;;  %v5144_v0 = vmax.f32 %v5096_v47, 0.0 }
 0x42c   : > { %5335 = vst.msk [vmem:[#allocation3 + $0xf0] sm:$0xff] %vm2070_vm3, %v5287_v16  ;;  %v1190_v8 = vsub.s32 %v11657_v53, %v1189_v4  ;;  %v1212_v48 = vsel %vm1211_vm13, 1, %v14139_v43  ;;  %v4667_v14 = vadd.f32 %v4589_v61, %v14245_v11  ;;  %v5820_v46 = vpop.f32.mrf.mxu2  ;;  %v11778_v20 = vpop.f32.mrf.mxu0  ;;  %v1226_v30 = vshrl.u32 %v11770_v33, 16  ;;  %v14246_v4 = vld [vmem:[#allocation21_spill] sm:$0xff] }
 0x42d   : > { %v1214_v59 = vadd.s32 %v1212_v48, %v1210_v44  ;;  %v11776_v31 = vadd.f32 %v5820_v46, %v5616_v39  ;;  %v5619_v34 = vpop.f32.mrf.mxu1  ;;  %v1228_v57 = vmul.u32 43691, %v1225_v56  ;;  %v1229_v12 = vmul.u32 43690, %v1225_v56  ;;  %v5385_v56 = vld [vmem:[#allocation3 + $0xe7] sm:$0xff] }
 0x42e   : > { %vm1800_vm14 = vcmp.ne.s32.totalorder %v1190_v8, 0  ;;  %vm1848_vm15 = vcmp.lt.s32.totalorder %v1190_v8, 0  ;;  %v1944_v52 = vadd.s32 24, %v1190_v8  ;;  %v4993_v53 = vadd.f32 %v11730_v22, %v4667_v14  ;;  %v5458_v14 = vld [vmem:[#allocation3 + $0xe8] sm:$0xff] }
 0x42f   : > { %vm1896_vm0 = vmand %vm1848_vm15, %vm1800_vm14  ;;  %v1215_v54 = vadd.s32 %v1214_v59, %v1204_v60  ;;  %v1230_v39 = vmul.u32 43691, %v1226_v30  ;;  %v11785_v47 = vadd.f32 %v14246_v4, %v10520_v6  ;;  %v1231_v22 = vmul.u32 43690, %v1226_v30 }
 0x430   : > { %v1992_v7 = vsel %vm1896_vm0, %v1944_v52, %v1190_v8  ;;  %v5045_v16 = vmul.f32 %v11680_v38, %v4993_v53  ;;  %v1232_v61 = vshll.u32 %v1229_v12, 16  ;;  %v4432_v60 = vpack.c.bf16 %v4408_v62, %v4407_v17 }
 0x431   : > { %vm2040_vm4 = vcmp.lt.s32.totalorder %v1992_v7, 16  ;;  %v1216_v44 = vadd.s32 %v1215_v54, %v1206_v13  ;;  %v1233_v46 = vshrl.u32 %v1229_v12, 16  ;;  %v1234_v6 = vshll.u32 %v1230_v39, 16 }
 0x432   : > { %8939 = vmatmul.msk.bf16.gmra.mxu0 %vm2061_vm1, %v4758_v55  ;;  %v5288_v48 = vsel %vm2040_vm4, %v5144_v0, 0.0  ;;  %v5097_v11 = vadd.f32 %v11693_v2, %v5045_v16  ;;  %vm1236_vm5 = vc.u32 %v1228_v57, %v1232_v61  ;;  %v1238_v49 = vadd.s32 %v1232_v61, %v1228_v57  ;;  %v4591_v41 = vpop.f32.mrf.mxu3 }
 0x433   : > { %5336 = vst.msk [vmem:[#allocation3 + $0xf8] sm:$0xff] %vm2070_vm3, %v5288_v48  ;;  %v1217_v8 = vshrl.u32 %v1216_v44, 4  ;;  %v5459_v59 = vld [vmem:[#allocation3 + $0xf0] sm:$0xff]  ;;  %v11795_v55 = vadd.s32 240, %v10346_v29  ;;  %v1235_v0 = vshrl.u32 %v1230_v39, 16  ;;  %v1237_v53 = vsel %vm1236_vm5, 1, %v14139_v43 }
 0x434   : > { %v5386_v52 = vld [vmem:[#allocation3 + $0xef] sm:$0xff]  ;;  %v5492_v13 = vpack.c.bf16 %v5459_v59, %v5458_v14  ;;  %v5823_v17 = vpop.f32.mrf.mxu2  ;;  %v1239_v54 = vadd.s32 %v1237_v53, %v1231_v22  ;;  %vm1240_vm6 = vc.u32 %v1238_v49, %v1234_v6  ;;  %v4668_v12 = vadd.f32 %v4591_v41, %v10443_v9  ;;  %v11799_v4 = vpop.f32.mrf.mxu0 }
 0x435   : > { %v5419_v30 = vpack.c.bf16 %v5386_v52, %v5385_v56  ;;  %v1218_v62 = vmul.u32 24, %v1217_v8  ;;  %v1241_v57 = vsel %vm1240_vm6, 1, %v14139_v43  ;;  %v11804_v7 = vadd.f32 %v5823_v17, %v5619_v34  ;;  %v11806_v16 = vpop.f32.mrf.mxu1  ;;  %v6240_v17 = vld [vmem:[#allocation3 + $0x27] sm:$0xff] }
 0x436   : > { %8955 = vmatmul.msk.bf16.gmra.mxu1 %vm2070_vm3, %v5492_v13  ;;  %14247 = vst [vmem:[#allocation38_spill] sm:$0xff] %v11806_v16  ;;  %v1254_v39 = vand.u32 65535, %v11795_v55  ;;  %v1255_v44 = vshrl.u32 %v11795_v55, 16  ;;  %v1243_v61 = vadd.s32 %v1241_v57, %v1239_v54  ;;  %v4994_v9 = vadd.f32 %v11762_v37, %v4668_v12  ;;  %v14248_v37 = vld [vmem:[#allocation26_spill] sm:$0xff] }
 0x437   : > { %8979 = vmatmul.msk.bf16.gmra.mxu2 %vm2070_vm3, %v5419_v30  ;;  %v1219_v22 = vsub.s32 %v11738_v58, %v1218_v62  ;;  %v11813_v48 = vadd.s32 248, %v10346_v29  ;;  %v5145_v14 = vmax.f32 %v5097_v11, 0.0  ;;  %v14249_v13 = vld [vmem:[#allocation22_spill] sm:$0xff] }
 0x438   : > { %v1257_v6 = vmul.u32 43691, %v1254_v39  ;;  %v1258_v34 = vmul.u32 43690, %v1254_v39  ;;  %v1259_v8 = vmul.u32 43691, %v1255_v44  ;;  %v1244_v56 = vadd.s32 %v1243_v61, %v1233_v46  ;;  %v14251_v61 = vld [vmem:[#allocation17_spill] sm:$0xff] }
 0x439   : > { %8914 = vmatmul.msk.bf16.gmra.mxu3 %vm2061_vm1, %v4432_v60  ;;  %vm1801_vm7 = vcmp.ne.s32.totalorder %v1219_v22, 0  ;;  %vm1849_vm9 = vcmp.lt.s32.totalorder %v1219_v22, 0  ;;  %v1945_v59 = vadd.s32 24, %v1219_v22  ;;  %v5046_v52 = vmul.f32 %v11680_v38, %v4994_v9 }
 0x43a   : > { %vm1897_vm8 = vmand %vm1849_vm9, %vm1801_vm7  ;;  %v1260_v58 = vmul.u32 43690, %v1255_v44  ;;  %v1261_v49 = vshll.u32 %v1258_v34, 16  ;;  %v1263_v41 = vshll.u32 %v1259_v8, 16  ;;  %v11819_v30 = vadd.f32 %v14249_v13, %v14248_v37  ;;  %v4594_v60 = vpop.f32.mrf.mxu3 }
 0x43b   : > { %v1993_v11 = vsel %vm1897_vm8, %v1945_v59, %v1219_v22  ;;  %v1245_v53 = vadd.s32 %v1244_v56, %v1235_v0  ;;  %v1283_v62 = vand.u32 65535, %v11813_v48  ;;  %v5098_v54 = vadd.f32 %v11693_v2, %v5046_v52  ;;  %v6239_v0 = vld [vmem:[#allocation3 + $0x1f] sm:$0xff] }
 0x43c   : > { %vm2041_vm1 = vcmp.lt.s32.totalorder %v1993_v11, 16  ;;  %vm1265_vm10 = vc.u32 %v1257_v6, %v1261_v49  ;;  %v1267_v46 = vadd.s32 %v1261_v49, %v1257_v6  ;;  %v11823_v12 = vpop.f32.mrf.mxu2  ;;  %v4669_v9 = vadd.f32 %v4594_v60, %v14251_v61  ;;  %v11827_v37 = vpop.f32.mrf.mxu0  ;;  %v5913_v11 = vld [vmem:[#allocation3 + $0x9] sm:$0xff] }
 0x43d   : > { %14250 = vst [vmem:[#allocation42_spill] sm:$0xff] %v11823_v12  ;;  %v5289_v57 = vsel %vm2041_vm1, %v5145_v14, 0.0  ;;  %v1246_v39 = vshrl.u32 %v1245_v53, 4  ;;  %v1266_v44 = vsel %vm1265_vm10, 1, %v14139_v43  ;;  %v1262_v22 = vshrl.u32 %v1258_v34, 16  ;;  %v5624_v56 = vpop.f32.mrf.mxu1  ;;  %v5914_v53 = vld [vmem:[#allocation3 + $0x11] sm:$0xff] }
 0x43e   : > { %5337 = vst.msk [vmem:[#allocation3 + $0x100] sm:$0xff] %vm2070_vm3, %v5289_v57  ;;  %v1268_v59 = vadd.s32 %v1266_v44, %v1260_v58  ;;  %vm1269_vm11 = vc.u32 %v1267_v46, %v1263_v41  ;;  %v6287_v52 = vpack.c.bf16 %v6240_v17, %v6239_v0  ;;  %v4995_v14 = vadd.f32 %v11778_v20, %v4669_v9 }
 0x43f   : > { %v1247_v13 = vmul.u32 24, %v1246_v39  ;;  %v1270_v6 = vsel %vm1269_vm11, 1, %v14139_v43  ;;  %v1284_v49 = vshrl.u32 %v11813_v48, 16  ;;  %v1264_v60 = vshrl.u32 %v1259_v8, 16 }
 0x440   : > { %v1272_v61 = vadd.s32 %v1270_v6, %v1268_v59  ;;  %v1286_v12 = vmul.u32 43691, %v1283_v62  ;;  %v1287_v57 = vmul.u32 43690, %v1283_v62  ;;  %v5146_v58 = vmax.f32 %v5098_v54, 0.0 }
 0x441   : > { %v1248_v34 = vsub.s32 %v11770_v33, %v1247_v13  ;;  %v5047_v41 = vmul.f32 %v11680_v38, %v4995_v14  ;;  %v11836_v17 = vmul.u32 43691, %v1284_v49  ;;  %v1289_v39 = vmul.u32 43690, %v1284_v49  ;;  %v5387_v14 = vld [vmem:[#allocation3 + $0xf7] sm:$0xff] }
 0x442   : > { %9015 = vmatmul.msk.bf16.vlgmr.msrb.gmra.mxu0 %vm2070_vm3, %v6287_v52  ;;  %v1273_v46 = vadd.s32 %v1272_v61, %v1262_v22  ;;  %v1290_v20 = vshll.u32 %v1287_v57, 16  ;;  %v5961_v44 = vpack.c.bf16 %v5914_v53, %v5913_v11  ;;  %v1291_v8 = vshrl.u32 %v1287_v57, 16  ;;  %v4596_v0 = vpop.f32.mrf.mxu3  ;;  %v5460_v52 = vld [vmem:[#allocation3 + $0xf8] sm:$0xff] }
 0x443   : > { %vm1802_vm12 = vcmp.ne.s32.totalorder %v1248_v34, 0  ;;  %vm1850_vm13 = vcmp.lt.s32.totalorder %v1248_v34, 0  ;;  %v1946_v9 = vadd.s32 24, %v1248_v34  ;;  %v1292_v62 = vshll.u32 %v11836_v17, 16 }
 0x444   : > { %vm1898_vm14 = vmand %vm1850_vm13, %vm1802_vm12  ;;  %v1274_v59 = vadd.s32 %v1273_v46, %v1264_v60  ;;  %vm1294_vm15 = vc.u32 %v1286_v12, %v1290_v20  ;;  %v5828_v33 = vpop.f32.mrf.mxu2  ;;  %v11840_v54 = vadd.s32 256, %v10346_v29  ;;  %v5099_v22 = vadd.f32 %v11693_v2, %v5047_v41  ;;  %v11844_v61 = vpop.f32.mrf.mxu0 }
 0x445   : > { %v1994_v13 = vsel %vm1898_vm14, %v1946_v9, %v1248_v34  ;;  %v5461_v6 = vld [vmem:[#allocation3 + $0x100] sm:$0xff]  ;;  %v1295_v11 = vsel %vm1294_vm15, 1, %v14139_v43  ;;  %v1296_v53 = vadd.s32 %v1290_v20, %v1286_v12  ;;  %v11846_v16 = vpop.f32.mrf.mxu1  ;;  %v4670_v34 = vadd.f32 %v4596_v0, %v10495_v26 }
 0x446   : > { %v5388_v49 = vld [vmem:[#allocation3 + $0xff] sm:$0xff]  ;;  %vm2042_vm0 = vcmp.lt.s32.totalorder %v1994_v13, 16  ;;  %v1275_v60 = vshrl.u32 %v1274_v59, 4  ;;  %v5493_v57 = vpack.c.bf16 %v5461_v6, %v5460_v52  ;;  %14252 = vst [vmem:[#allocation43_spill] sm:$0xff] %v11846_v16  ;;  %v1297_v10 = vadd.s32 %v1295_v11, %v1289_v39  ;;  %v6242_v13 = vld [vmem:[#allocation3 + $0x37] sm:$0xff] }
 0x447   : > { %v5420_v46 = vpack.c.bf16 %v5388_v49, %v5387_v14  ;;  %v5290_v23 = vsel %vm2042_vm0, %v5146_v58, 0.0  ;;  %vm1298_vm4 = vc.u32 %v1296_v53, %v1292_v62  ;;  %v11853_v20 = vadd.f32 %v5828_v33, %v5624_v56 }
 0x448   : > { %5338 = vst.msk [vmem:[#allocation3 + $0x108] sm:$0xff] %vm2070_vm3, %v5290_v23  ;;  %v1276_v41 = vmul.u32 24, %v1275_v60  ;;  %8956 = vmatmul.msk.bf16.gmra.mxu1 %vm2070_vm3, %v5493_v57  ;;  %v1299_v12 = vsel %vm1298_vm4, 1, %v14139_v43  ;;  %v1312_v9 = vand.u32 65535, %v11840_v54  ;;  %v1293_v59 = vshrl.u32 %v11836_v17, 16 }
 0x449   : > { %8980 = vmatmul.msk.bf16.gmra.mxu2 %vm2070_vm3, %v5420_v46  ;;  %v1301_v58 = vadd.s32 %v1299_v12, %v1297_v10  ;;  %v4996_v39 = vadd.f32 %v11799_v4, %v4670_v34  ;;  %8990 = vmatmul.msk.bf16.vlgmr.msrb.gmra.mxu3 %vm2070_vm3, %v5961_v44  ;;  %v1313_v26 = vshrl.u32 %v11840_v54, 16  ;;  %v5147_v0 = vmax.f32 %v5099_v22, 0.0  ;;  %v6241_v44 = vld [vmem:[#allocation3 + $0x2f] sm:$0xff] }
 0x44a   : > { %v1277_v23 = vsub.s32 %v11795_v55, %v1276_v41  ;;  %v1315_v52 = vmul.u32 43691, %v1312_v9  ;;  %v1316_v62 = vmul.u32 43690, %v1312_v9  ;;  %v4599_v49 = vpop.f32.mrf.mxu3  ;;  %v6288_v53 = vpack.c.bf16 %v6242_v13, %v6241_v44  ;;  %v5916_v13 = vld [vmem:[#allocation3 + $0x21] sm:$0xff] }
 0x44b   : > { %v1302_v6 = vadd.s32 %v1301_v58, %v1291_v8  ;;  %v5048_v56 = vmul.f32 %v11680_v38, %v4996_v39  ;;  %v1317_v33 = vmul.u32 43691, %v1313_v26  ;;  %v1318_v14 = vmul.u32 43690, %v1313_v26  ;;  %v14254_v39 = vld [vmem:[#allocation28_spill] sm:$0xff] }
 0x44c   : > { %vm1803_vm5 = vcmp.ne.s32.totalorder %v1277_v23, 0  ;;  %vm1851_vm6 = vcmp.lt.s32.totalorder %v1277_v23, 0  ;;  %v1947_v10 = vadd.s32 24, %v1277_v23  ;;  %v1319_v4 = vshll.u32 %v1316_v62, 16  ;;  %v11862_v17 = vpop.f32.mrf.mxu2 }
 0x44d   : > { %14253 = vst [vmem:[#allocation47_spill] sm:$0xff] %v11862_v17  ;;  %vm1899_vm7 = vmand %vm1851_vm6, %vm1803_vm5  ;;  %v1303_v11 = vadd.s32 %v1302_v6, %v1293_v59  ;;  %v1321_v55 = vshll.u32 %v1317_v33, 16  ;;  %v11864_v22 = vpop.f32.mrf.mxu0  ;;  %v11867_v8 = vadd.s32 264, %v10346_v29  ;;  %v5100_v57 = vadd.f32 %v11693_v2, %v5048_v56  ;;  %v11870_v34 = vpop.f32.mrf.mxu1 }
 0x44e   : > { %v1995_v60 = vsel %vm1899_vm7, %v1947_v10, %v1277_v23  ;;  %vm1323_vm9 = vc.u32 %v1315_v52, %v1319_v4  ;;  %v1325_v46 = vadd.s32 %v1319_v4, %v1315_v52  ;;  %v1320_v12 = vshrl.u32 %v1316_v62, 16 }
 0x44f   : > { %vm2043_vm8 = vcmp.lt.s32.totalorder %v1995_v60, 16  ;;  %v1304_v41 = vshrl.u32 %v1303_v11, 4  ;;  %v1324_v9 = vsel %vm1323_vm9, 1, %v14139_v43  ;;  %v4671_v26 = vadd.f32 %v4599_v49, %v14254_v39 }
 0x450   : > { %v5291_v59 = vsel %vm2043_vm8, %v5147_v0, 0.0  ;;  %v1326_v58 = vadd.s32 %v1324_v9, %v1318_v14  ;;  %vm1327_vm1 = vc.u32 %v1325_v46, %v1321_v55  ;;  %v1322_v6 = vshrl.u32 %v1317_v33, 16  ;;  %v5915_v14 = vld [vmem:[#allocation3 + $0x19] sm:$0xff] }
 0x451   : > { %5339 = vst.msk [vmem:[#allocation3 + $0x110] sm:$0xff] %vm2070_vm3, %v5291_v59  ;;  %v1305_v23 = vmul.u32 24, %v1304_v41  ;;  %v1328_v52 = vsel %vm1327_vm1, 1, %v14139_v43  ;;  %v1341_v56 = vand.u32 65535, %v11867_v8  ;;  %v5148_v10 = vmax.f32 %v5100_v57, 0.0 }
 0x452   : > { %9016 = vmatmul.msk.bf16.gmra.mxu0 %vm2070_vm3, %v6288_v53  ;;  %v1330_v62 = vadd.s32 %v1328_v52, %v1326_v58  ;;  %v4997_v4 = vadd.f32 %v11827_v37, %v4671_v26  ;;  %v1342_v0 = vshrl.u32 %v11867_v8, 16  ;;  %v4601_v55 = vpop.f32.mrf.mxu3  ;;  %v5962_v53 = vpack.c.bf16 %v5916_v13, %v5915_v14  ;;  %v5389_v52 = vld [vmem:[#allocation3 + $0x107] sm:$0xff] }
 0x453   : > { %v1306_v49 = vsub.s32 %v11813_v48, %v1305_v23  ;;  %v1344_v44 = vmul.u32 43691, %v1341_v56  ;;  %v11881_v11 = vmul.u32 43690, %v1341_v56  ;;  %v11896_v26 = vadd.s32 272, %v10346_v29  ;;  %v5462_v23 = vld [vmem:[#allocation3 + $0x108] sm:$0xff] }
 0x454   : > { %v1331_v60 = vadd.s32 %v1330_v62, %v1320_v12  ;;  %v5049_v33 = vmul.f32 %v11680_v38, %v4997_v4  ;;  %v11884_v46 = vmul.u32 43691, %v1342_v0  ;;  %v1347_v41 = vmul.u32 43690, %v1342_v0  ;;  %v5833_v57 = vpop.f32.mrf.mxu2 }
 0x455   : > { %vm1804_vm10 = vcmp.ne.s32.totalorder %v1306_v49, 0  ;;  %vm1852_vm11 = vcmp.lt.s32.totalorder %v1306_v49, 0  ;;  %v1948_v37 = vadd.s32 24, %v1306_v49  ;;  %v1348_v9 = vshll.u32 %v11881_v11, 16  ;;  %v11887_v59 = vpop.f32.mrf.mxu0  ;;  %v11893_v39 = vpop.f32.mrf.mxu1 }
 0x456   : > { %vm1900_vm12 = vmand %vm1852_vm11, %vm1804_vm10  ;;  %v1332_v48 = vadd.s32 %v1331_v60, %v1322_v6  ;;  %v11890_v58 = vadd.f32 %v11693_v2, %v5049_v33  ;;  %v1350_v12 = vshll.u32 %v11884_v46, 16  ;;  %14255 = vst [vmem:[#allocation32_spill] sm:$0xff] %v11893_v39  ;;  %v1349_v56 = vshrl.u32 %v11881_v11, 16 }
 0x457   : > { %v1996_v13 = vsel %vm1900_vm12, %v1948_v37, %v1306_v49  ;;  %vm1352_vm13 = vc.u32 %v1344_v44, %v1348_v9  ;;  %v1354_v62 = vadd.s32 %v1348_v9, %v1344_v44  ;;  %v1351_v14 = vshrl.u32 %v11884_v46, 16  ;;  %v6244_v37 = vld [vmem:[#allocation3 + $0x47] sm:$0xff] }
 0x458   : > { %vm2044_vm14 = vcmp.lt.s32.totalorder %v1996_v13, 16  ;;  %v1333_v4 = vshrl.u32 %v1332_v48, 4  ;;  %v5463_v6 = vld [vmem:[#allocation3 + $0x110] sm:$0xff]  ;;  %v1353_v60 = vsel %vm1352_vm13, 1, %v14139_v43  ;;  %v4672_v44 = vadd.f32 %v4601_v55, %v10509_v50  ;;  %v14257_v55 = vld [vmem:[#allocation36_spill] sm:$0xff] }
 0x459   : > { %v5390_v0 = vld [vmem:[#allocation3 + $0x10f] sm:$0xff]  ;;  %v5292_v33 = vsel %vm2044_vm14, %v5148_v10, 0.0  ;;  %v5494_v39 = vpack.c.bf16 %v5463_v6, %v5462_v23  ;;  %v1355_v16 = vadd.s32 %v1353_v60, %v1347_v41  ;;  %8991 = vmatmul.msk.bf16.gmra.mxu3 %vm2070_vm3, %v5962_v53  ;;  %vm1356_vm15 = vc.u32 %v1354_v62, %v1350_v12  ;;  %v14259_v60 = vld [vmem:[#allocation34_spill] sm:$0xff] }
 0x45a   : > { %v5421_v17 = vpack.c.bf16 %v5390_v0, %v5389_v52  ;;  %5340 = vst.msk [vmem:[#allocation3 + $0x118] sm:$0xff] %vm2070_vm3, %v5292_v33  ;;  %v1334_v49 = vmul.u32 24, %v1333_v4  ;;  %v11905_v11 = vadd.f32 %v5833_v57, %v11870_v34  ;;  %v5149_v46 = vmax.f32 %v11890_v58, 0.0  ;;  %v4604_v9 = vpop.f32.mrf.mxu3  ;;  %v6243_v58 = vld [vmem:[#allocation3 + $0x3f] sm:$0xff] }
 0x45b   : > { %8957 = vmatmul.msk.bf16.gmra.mxu1 %vm2070_vm3, %v5494_v39  ;;  %v1357_v10 = vsel %vm1356_vm15, 1, %v14139_v43  ;;  %v1370_v53 = vand.u32 65535, %v11896_v26  ;;  %v1371_v41 = vshrl.u32 %v11896_v26, 16  ;;  %v4998_v34 = vadd.f32 %v11844_v61, %v4672_v44 }
 0x45c   : > { %14256 = vst [vmem:[#allocation15_spill] sm:$0xff] %v11905_v11  ;;  %8981 = vmatmul.msk.bf16.gmra.mxu2 %vm2070_vm3, %v5421_v17  ;;  %v1335_v48 = vsub.s32 %v11840_v54, %v1334_v49  ;;  %v1359_v50 = vadd.s32 %v1357_v10, %v1355_v16  ;;  %v4673_v57 = vadd.f32 %v4604_v9, %v14257_v55  ;;  %v11916_v12 = vpop.f32.mrf.mxu2 }
 0x45d   : > { %14258 = vst [vmem:[#allocation10_spill] sm:$0xff] %v11916_v12  ;;  %v1373_v39 = vmul.u32 43691, %v1370_v53  ;;  %v1374_v13 = vmul.u32 43690, %v1370_v53  ;;  %v1375_v17 = vmul.u32 43691, %v1371_v41  ;;  %v11918_v23 = vpop.f32.mrf.mxu0  ;;  %v6289_v52 = vpack.c.bf16 %v6244_v37, %v6243_v58  ;;  %v5634_v6 = vpop.f32.mrf.mxu1 }
 0x45e   : > { %vm1805_vm0 = vcmp.ne.s32.totalorder %v1335_v48, 0  ;;  %vm1853_vm4 = vcmp.lt.s32.totalorder %v1335_v48, 0  ;;  %v1949_v62 = vadd.s32 24, %v1335_v48  ;;  %v1360_v4 = vadd.s32 %v1359_v50, %v1349_v56 }
 0x45f   : > { %vm1901_vm5 = vmand %vm1853_vm4, %vm1805_vm0  ;;  %v5050_v16 = vmul.f32 %v11680_v38, %v4998_v34  ;;  %v1376_v54 = vmul.u32 43690, %v1371_v41  ;;  %v1377_v61 = vshll.u32 %v1374_v13, 16  ;;  %v1379_v0 = vshll.u32 %v1375_v17, 16  ;;  %v14260_v34 = vld [vmem:[#allocation46_spill] sm:$0xff] }
 0x460   : > { %v11923_v33 = vadd.f32 %v14259_v60, %v11819_v30  ;;  %v1997_v49 = vsel %vm1901_vm5, %v1949_v62, %v1335_v48  ;;  %v1361_v44 = vadd.s32 %v1360_v4, %v1351_v14  ;;  %v4999_v10 = vadd.f32 %v11864_v22, %v4673_v57  ;;  %v14261_v30 = vld [vmem:[#allocation35_spill] sm:$0xff]  ;;  %v5918_v62 = vld [vmem:[#allocation3 + $0x31] sm:$0xff] }
 0x461   : > { %vm2045_vm6 = vcmp.lt.s32.totalorder %v1997_v49, 16  ;;  %v5102_v56 = vadd.f32 %v11693_v2, %v5050_v16  ;;  %vm1381_vm7 = vc.u32 %v1373_v39, %v1377_v61  ;;  %v1383_v37 = vadd.s32 %v1377_v61, %v1373_v39 }
 0x462   : > { %9017 = vmatmul.msk.bf16.gmra.mxu0 %vm2070_vm3, %v6289_v52  ;;  %v5293_v53 = vsel %vm2045_vm6, %v5149_v46, 0.0  ;;  %v1362_v9 = vshrl.u32 %v1361_v44, 4  ;;  %v1382_v41 = vsel %vm1381_vm7, 1, %v14139_v43  ;;  %v5051_v50 = vmul.f32 %v11680_v38, %v4999_v10  ;;  %v4606_v48 = vpop.f32.mrf.mxu3 }
 0x463   : > { %v11932_v55 = vadd.f32 %v14261_v30, %v14260_v34  ;;  %5341 = vst.msk [vmem:[#allocation3 + $0x120] sm:$0xff] %vm2070_vm3, %v5293_v53  ;;  %v1378_v22 = vshrl.u32 %v1374_v13, 16  ;;  %v1384_v14 = vadd.s32 %v1382_v41, %v1376_v54  ;;  %vm1385_vm9 = vc.u32 %v1383_v37, %v1379_v0  ;;  %v5917_v37 = vld [vmem:[#allocation3 + $0x29] sm:$0xff]  ;;  %v5464_v41 = vld [vmem:[#allocation3 + $0x118] sm:$0xff] }
 0x464   : > { %v1363_v57 = vmul.u32 24, %v1362_v9  ;;  %v1386_v58 = vsel %vm1385_vm9, 1, %v14139_v43  ;;  %v11937_v46 = vadd.f32 %v11693_v2, %v5051_v50  ;;  %v11940_v39 = vadd.s32 280, %v10346_v29  ;;  %v5838_v52 = vpop.f32.mrf.mxu2  ;;  %v5391_v50 = vld [vmem:[#allocation3 + $0x117] sm:$0xff] }
 0x465   : > { %v1380_v4 = vshrl.u32 %v1375_v17, 16  ;;  %v1388_v16 = vadd.s32 %v1386_v58, %v1384_v14  ;;  %v4674_v61 = vadd.f32 %v4606_v48, %v10512_v42  ;;  %v11943_v60 = vadd.f32 %v5838_v52, %v5634_v6  ;;  %v11945_v13 = vpop.f32.mrf.mxu0  ;;  %v11950_v10 = vpop.f32.mrf.mxu1 }
 0x466   : > { %v1364_v54 = vsub.s32 %v11867_v8, %v1363_v57  ;;  %v5150_v0 = vmax.f32 %v5102_v56, 0.0  ;;  %v1399_v49 = vand.u32 65535, %v11940_v39  ;;  %v1400_v44 = vshrl.u32 %v11940_v39, 16  ;;  %14263 = vst [vmem:[#allocation13_spill] sm:$0xff] %v11950_v10 }
 0x467   : > { %14262 = vst [vmem:[#allocation7_spill] sm:$0xff] %v11943_v60  ;;  %v1389_v53 = vadd.s32 %v1388_v16, %v1378_v22  ;;  %v5000_v17 = vadd.f32 %v11887_v59, %v4674_v61  ;;  %v5963_v9 = vpack.c.bf16 %v5918_v62, %v5917_v37  ;;  %v11954_v42 = vadd.s32 288, %v10346_v29  ;;  %v6246_v62 = vld [vmem:[#allocation3 + $0x57] sm:$0xff] }
 0x468   : > { %vm1806_vm8 = vcmp.ne.s32.totalorder %v1364_v54, 0  ;;  %vm1854_vm1 = vcmp.lt.s32.totalorder %v1364_v54, 0  ;;  %v1950_v6 = vadd.s32 24, %v1364_v54  ;;  %v1402_v34 = vmul.u32 43691, %v1399_v49 }
 0x469   : > { %vm1902_vm10 = vmand %vm1854_vm1, %vm1806_vm8  ;;  %v1390_v56 = vadd.s32 %v1389_v53, %v1380_v4  ;;  %v1403_v30 = vmul.u32 43690, %v1399_v49  ;;  %v11957_v14 = vmul.u32 43691, %v1400_v44  ;;  %8992 = vmatmul.msk.bf16.gmra.mxu3 %vm2070_vm3, %v5963_v9  ;;  %v5052_v57 = vmul.f32 %v11680_v38, %v5000_v17 }
 0x46a   : > { %v1998_v59 = vsel %vm1902_vm10, %v1950_v6, %v1364_v54  ;;  %v5465_v22 = vld [vmem:[#allocation3 + $0x120] sm:$0xff]  ;;  %v1428_v58 = vand.u32 65535, %v11954_v42  ;;  %v1429_v52 = vshrl.u32 %v11954_v42, 16  ;;  %v4609_v37 = vpop.f32.mrf.mxu3  ;;  %v1405_v53 = vmul.u32 43690, %v1400_v44  ;;  %v6245_v6 = vld [vmem:[#allocation3 + $0x4f] sm:$0xff] }
 0x46b   : > { %v5392_v48 = vld [vmem:[#allocation3 + $0x11f] sm:$0xff]  ;;  %vm2046_vm11 = vcmp.lt.s32.totalorder %v1998_v59, 16  ;;  %v1391_v4 = vshrl.u32 %v1390_v56, 4  ;;  %v5495_v16 = vpack.c.bf16 %v5465_v22, %v5464_v41  ;;  %v1406_v8 = vshll.u32 %v1403_v30, 16 }
 0x46c   : > { %v5422_v61 = vpack.c.bf16 %v5392_v48, %v5391_v50  ;;  %v5294_v49 = vsel %vm2046_vm11, %v5150_v0, 0.0  ;;  %v1408_v9 = vshll.u32 %v11957_v14, 16  ;;  %v11964_v54 = vpop.f32.mrf.mxu2  ;;  %v1407_v17 = vshrl.u32 %v1403_v30, 16 }
 0x46d   : > { %14264 = vst [vmem:[#allocation20_spill] sm:$0xff] %v11964_v54  ;;  %v1392_v38 = vmul.u32 24, %v1391_v4  ;;  %8958 = vmatmul.msk.bf16.gmra.mxu1 %vm2070_vm3, %v5495_v16  ;;  %v1431_v56 = vmul.u32 43691, %v1428_v58  ;;  %v11969_v41 = vpop.f32.mrf.mxu0  ;;  %v6290_v50 = vpack.c.bf16 %v6246_v62, %v6245_v6  ;;  %vm1410_vm12 = vc.u32 %v1402_v34, %v1406_v8  ;;  %v5639_v22 = vpop.f32.mrf.mxu1 }
 0x46e   : > { %5342 = vst.msk [vmem:[#allocation3 + $0x128] sm:$0xff] %vm2070_vm3, %v5294_v49  ;;  %8982 = vmatmul.msk.bf16.gmra.mxu2 %vm2070_vm3, %v5422_v61  ;;  %v1412_v0 = vadd.s32 %v1406_v8, %v1402_v34  ;;  %v1432_v44 = vmul.u32 43690, %v1428_v58  ;;  %v11971_v59 = vmul.u32 43691, %v1429_v52  ;;  %v1409_v49 = vshrl.u32 %v11957_v14, 16 }
 0x46f   : > { %v1393_v48 = vsub.s32 %v11896_v26, %v1392_v38  ;;  %v1411_v4 = vsel %vm1410_vm12, 1, %v14139_v43  ;;  %v11977_v16 = vadd.f32 %v11693_v2, %v5052_v57  ;;  %v1434_v61 = vmul.u32 43690, %v1429_v52 }
 0x470   : > { %v1413_v30 = vadd.s32 %v1411_v4, %v1405_v53  ;;  %vm1414_vm13 = vc.u32 %v1412_v0, %v1408_v9  ;;  %v1435_v54 = vshll.u32 %v1432_v44, 16  ;;  %v1436_v58 = vshrl.u32 %v1432_v44, 16  ;;  %v14265_v53 = vld [vmem:[#allocation29_spill] sm:$0xff] }
 0x471   : > { %vm1807_vm14 = vcmp.ne.s32.totalorder %v1393_v48, 0  ;;  %vm1855_vm15 = vcmp.lt.s32.totalorder %v1393_v48, 0  ;;  %v1951_v8 = vadd.s32 24, %v1393_v48  ;;  %v1415_v34 = vsel %vm1414_vm13, 1, %v14139_v43 }
 0x472   : > { %9018 = vmatmul.msk.bf16.gmra.mxu0 %vm2070_vm3, %v6290_v50  ;;  %vm1903_vm0 = vmand %vm1855_vm15, %vm1807_vm14  ;;  %v1417_v26 = vadd.s32 %v1415_v34, %v1413_v30  ;;  %v1437_v14 = vshll.u32 %v11971_v59, 16  ;;  %vm1439_vm4 = vc.u32 %v1431_v56, %v1435_v54  ;;  %v1441_v57 = vadd.s32 %v1435_v54, %v1431_v56  ;;  %v4611_v9 = vpop.f32.mrf.mxu3  ;;  %v5920_v54 = vld [vmem:[#allocation3 + $0x41] sm:$0xff] }
 0x473   : > { %v1999_v62 = vsel %vm1903_vm0, %v1951_v8, %v1393_v48  ;;  %v1440_v2 = vsel %vm1439_vm4, 1, %v14139_v43  ;;  %v4675_v52 = vadd.f32 %v4609_v37, %v14265_v53  ;;  %v1438_v38 = vshrl.u32 %v11971_v59, 16  ;;  %v12015_v53 = vld [vmem:[%s13951_s3] ss:$0 sm:$0xff] }
 0x474   : > { %vm2047_vm5 = vcmp.lt.s32.totalorder %v1999_v62, 16  ;;  %v1418_v6 = vadd.s32 %v1417_v26, %v1407_v17  ;;  %v1442_v50 = vadd.s32 %v1440_v2, %v1434_v61  ;;  %v5843_v0 = vpop.f32.mrf.mxu2  ;;  %v14266_v4 = vmax.f32 %v11937_v46, 0.0 }
 0x475   : > { %vm1443_vm6 = vc.u32 %v1441_v57, %v1437_v14  ;;  %v5001_v44 = vadd.f32 %v11918_v23, %v4675_v52  ;;  %v11989_v48 = vadd.s32 296, %v10346_v29  ;;  %v11991_v8 = vpop.f32.mrf.mxu0  ;;  %v4676_v56 = vadd.f32 %v4611_v9, %v11785_v47  ;;  %v11998_v46 = vpop.f32.mrf.mxu1  ;;  %v12003_v23 = vld [vmem:[%s13950_s2] ss:$0 sm:$0xff] }
 0x476   : > { %v5295_v30 = vsel %vm2047_vm5, %v14266_v4, 0.0  ;;  %v1419_v37 = vadd.s32 %v1418_v6, %v1409_v49  ;;  %v1444_v17 = vsel %vm1443_vm6, 1, %v14139_v43  ;;  %v11996_v59 = vadd.f32 %v5843_v0, %v5639_v22  ;;  %14268 = vst [vmem:[#allocation14_spill] sm:$0xff] %v11998_v46  ;;  %v5919_v14 = vld [vmem:[#allocation3 + $0x39] sm:$0xff] }
 0x477   : > { %5343 = vst.msk [vmem:[#allocation3 + $0x130] sm:$0xff] %vm2070_vm3, %v5295_v30  ;;  %v1446_v61 = vadd.s32 %v1444_v17, %v1442_v50  ;;  %v5053_v34 = vmul.f32 %v12003_v23, %v5001_v44  ;;  %v1457_v26 = vand.u32 65535, %v11989_v48  ;;  %v1458_v49 = vshrl.u32 %v11989_v48, 16  ;;  %v14269_v50 = vld [vmem:[#allocation27_spill] sm:$0xff] }
 0x478   : > { %14267 = vst [vmem:[#allocation8_spill] sm:$0xff] %v11996_v59  ;;  %v1420_v62 = vshrl.u32 %v1419_v37, 4  ;;  %v5002_v47 = vadd.f32 %v11945_v13, %v4676_v56  ;;  %v5964_v22 = vpack.c.bf16 %v5920_v54, %v5919_v14  ;;  %v12010_v2 = vadd.s32 304, %v10346_v29  ;;  %v5466_v14 = vld [vmem:[#allocation3 + $0x128] sm:$0xff] }
 0x479   : > { %v1447_v57 = vadd.s32 %v1446_v61, %v1436_v58  ;;  %v12018_v52 = vadd.f32 %v12015_v53, %v5053_v34  ;;  %v1460_v9 = vmul.u32 43691, %v1457_v26  ;;  %v1461_v6 = vmul.u32 43690, %v1457_v26 }
 0x47a   : > { %v12022_v0 = vadd.f32 %v14269_v50, %v11932_v55  ;;  %v1421_v13 = vmul.u32 24, %v1420_v62  ;;  %v5152_v4 = vmax.f32 %v11977_v16, 0.0  ;;  %v12025_v30 = vmul.u32 43691, %v1458_v49  ;;  %8993 = vmatmul.msk.bf16.gmra.mxu3 %vm2070_vm3, %v5964_v22 }
 0x47b   : > { %v1448_v58 = vadd.s32 %v1447_v57, %v1438_v38  ;;  %v1463_v44 = vmul.u32 43690, %v1458_v49  ;;  %v1464_v54 = vshll.u32 %v1461_v6, 16  ;;  %v5054_v37 = vmul.f32 %v12003_v23, %v5002_v47  ;;  %v4614_v17 = vpop.f32.mrf.mxu3  ;;  %v5393_v57 = vld [vmem:[#allocation3 + $0x127] sm:$0xff] }
 0x47c   : > { %v1422_v56 = vsub.s32 %v11940_v39, %v1421_v13  ;;  %v5153_v61 = vmax.f32 %v12018_v52, 0.0  ;;  %v1465_v34 = vshrl.u32 %v1461_v6, 16  ;;  %v1466_v55 = vshll.u32 %v12025_v30, 16  ;;  %v12032_v26 = vpop.f32.mrf.mxu2 }
 0x47d   : > { %14270 = vst [vmem:[#allocation9_spill] sm:$0xff] %v12032_v26  ;;  %v1449_v16 = vshrl.u32 %v1448_v58, 4  ;;  %vm1468_vm7 = vc.u32 %v1460_v9, %v1464_v54  ;;  %v1470_v38 = vadd.s32 %v1464_v54, %v1460_v9  ;;  %v1486_v49 = vand.u32 65535, %v12010_v2 }
 0x47e   : > { %v5467_v62 = vld [vmem:[#allocation3 + $0x130] sm:$0xff]  ;;  %vm1808_vm9 = vcmp.ne.s32.totalorder %v1422_v56, 0  ;;  %vm1856_vm8 = vcmp.lt.s32.totalorder %v1422_v56, 0  ;;  %v1952_v39 = vadd.s32 24, %v1422_v56  ;;  %v1469_v13 = vsel %vm1468_vm7, 1, %v14139_v43 }
 0x47f   : > { %v5394_v50 = vld [vmem:[#allocation3 + $0x12f] sm:$0xff]  ;;  %v12035_v22 = vpop.f32.mrf.mxu0  ;;  %v5496_v47 = vpack.c.bf16 %v5467_v62, %v5466_v14  ;;  %vm1904_vm1 = vmand %vm1856_vm8, %vm1808_vm9  ;;  %v1450_v52 = vmul.u32 24, %v1449_v16  ;;  %vm1472_vm10 = vc.u32 %v1470_v38, %v1466_v55  ;;  %v1467_v9 = vshrl.u32 %v12025_v30, 16  ;;  %v5644_v46 = vpop.f32.mrf.mxu1 }
 0x480   : > { %v5423_v6 = vpack.c.bf16 %v5394_v50, %v5393_v57  ;;  %v2000_v58 = vsel %vm1904_vm1, %v1952_v39, %v1422_v56  ;;  %v1471_v54 = vadd.s32 %v1469_v13, %v1463_v44  ;;  %v1473_v26 = vsel %vm1472_vm10, 1, %v14139_v43  ;;  %v14271_v56 = vld [vmem:[#allocation41_spill] sm:$0xff] }
 0x481   : > { %8959 = vmatmul.msk.bf16.gmra.mxu1 %vm2070_vm3, %v5496_v47  ;;  %vm2048_vm11 = vcmp.lt.s32.totalorder %v2000_v58, 16  ;;  %v1451_v10 = vsub.s32 %v11954_v42, %v1450_v52  ;;  %v1487_v16 = vshrl.u32 %v12010_v2, 16  ;;  %v1489_v14 = vmul.u32 43691, %v1486_v49 }
 0x482   : > { %8983 = vmatmul.msk.bf16.gmra.mxu2 %vm2070_vm3, %v5423_v6  ;;  %v5296_v62 = vsel %vm2048_vm11, %v5152_v4, 0.0  ;;  %v1475_v50 = vadd.s32 %v1473_v26, %v1471_v54  ;;  %v1490_v55 = vmul.u32 43690, %v1486_v49  ;;  %v4677_v38 = vadd.f32 %v4614_v17, %v14271_v56  ;;  %v6248_v17 = vld [vmem:[#allocation3 + $0x67] sm:$0xff]  ;;  %v6247_v56 = vld [vmem:[#allocation3 + $0x5f] sm:$0xff] }
 0x483   : > { %5344 = vst.msk [vmem:[#allocation3 + $0x138] sm:$0xff] %vm2070_vm3, %v5296_v62  ;;  %vm1809_vm12 = vcmp.ne.s32.totalorder %v1451_v10, 0  ;;  %vm1857_vm13 = vcmp.lt.s32.totalorder %v1451_v10, 0  ;;  %v1953_v30 = vadd.s32 24, %v1451_v10  ;;  %v1491_v44 = vmul.u32 43691, %v1487_v16  ;;  %v4616_v52 = vpop.f32.mrf.mxu3 }
 0x484   : > { %vm1905_vm14 = vmand %vm1857_vm13, %vm1809_vm12  ;;  %v1476_v39 = vadd.s32 %v1475_v50, %v1465_v34  ;;  %v12047_v42 = vadd.f32 %v12015_v53, %v5054_v37  ;;  %v1492_v47 = vmul.u32 43690, %v1487_v16  ;;  %v1493_v57 = vshll.u32 %v1490_v55, 16 }
 0x485   : > { %v2001_v6 = vsel %vm1905_vm14, %v1953_v30, %v1451_v10  ;;  %v1494_v4 = vshrl.u32 %v1490_v55, 16  ;;  %v1495_v26 = vshll.u32 %v1491_v44, 16  ;;  %v5003_v49 = vadd.f32 %v11969_v41, %v4677_v38  ;;  %v5922_v10 = vld [vmem:[#allocation3 + $0x51] sm:$0xff] }
 0x486   : > { %vm2049_vm15 = vcmp.lt.s32.totalorder %v2001_v6, 16  ;;  %v1477_v13 = vadd.s32 %v1476_v39, %v1467_v9  ;;  %vm1497_vm0 = vc.u32 %v1489_v14, %v1493_v57  ;;  %v1499_v58 = vadd.s32 %v1493_v57, %v1489_v14  ;;  %v5848_v54 = vpop.f32.mrf.mxu2  ;;  %v5921_v39 = vld [vmem:[#allocation3 + $0x49] sm:$0xff] }
 0x487   : > { %v12050_v62 = vpop.f32.mrf.mxu0  ;;  %v5297_v34 = vsel %vm2049_vm15, %v5153_v61, 0.0  ;;  %v1496_v50 = vshrl.u32 %v1491_v44, 16  ;;  %v1498_v37 = vsel %vm1497_vm0, 1, %v14139_v43  ;;  %v5055_v16 = vmul.f32 %v12003_v23, %v5003_v49  ;;  %v12055_v9 = vpop.f32.mrf.mxu1  ;;  %v14274_v49 = vld [vmem:[#allocation44_spill] sm:$0xff] }
 0x488   : > { %5345 = vst.msk [vmem:[#allocation3 + $0x140] sm:$0xff] %vm2070_vm3, %v5297_v34  ;;  %v1478_v55 = vshrl.u32 %v1477_v13, 4  ;;  %v1500_v41 = vadd.s32 %v1498_v37, %v1492_v47  ;;  %vm1501_vm4 = vc.u32 %v1499_v58, %v1495_v26  ;;  %v6291_v38 = vpack.c.bf16 %v6248_v17, %v6247_v56  ;;  %v14275_v17 = vld [vmem:[#allocation31_spill] sm:$0xff] }
 0x489   : > { %14272 = vst [vmem:[#allocation18_spill] sm:$0xff] %v12055_v9  ;;  %v1502_v14 = vsel %vm1501_vm4, 1, %v14139_v43  ;;  %v12059_v30 = vadd.f32 %v12015_v53, %v5055_v16  ;;  %v12062_v61 = vadd.s32 312, %v10346_v29  ;;  %v4678_v44 = vadd.f32 %v4616_v52, %v11923_v33 }
 0x48a   : > { %v1479_v57 = vmul.u32 24, %v1478_v55  ;;  %v1504_v6 = vadd.s32 %v1502_v14, %v1500_v41  ;;  %9019 = vmatmul.msk.bf16.gmra.mxu0 %vm2070_vm3, %v6291_v38  ;;  %v12066_v47 = vadd.f32 %v5848_v54, %v5644_v46  ;;  %v5965_v26 = vpack.c.bf16 %v5922_v10, %v5921_v39  ;;  %v12079_v46 = vld [vmem:[#allocation3 + $0x77] sm:$0xff]  ;;  %v12086_v39 = vld [vmem:[#allocation3 + $0x6f] sm:$0xff] }
 0x48b   : > { %v12070_v13 = vadd.f32 %v14275_v17, %v14274_v49  ;;  %v5154_v58 = vmax.f32 %v12047_v42, 0.0  ;;  %v1515_v34 = vand.u32 65535, %v12062_v61  ;;  %v1516_v37 = vshrl.u32 %v12062_v61, 16  ;;  %v5468_v38 = vld [vmem:[#allocation3 + $0x138] sm:$0xff] }
 0x48c   : > { %14273 = vst [vmem:[#allocation25_spill] sm:$0xff] %v12066_v47  ;;  %v1480_v33 = vsub.s32 %v11989_v48, %v1479_v57  ;;  %v1505_v52 = vadd.s32 %v1504_v6, %v1494_v4  ;;  %v5004_v56 = vadd.f32 %v11991_v8, %v4678_v44  ;;  %8994 = vmatmul.msk.bf16.gmra.mxu3 %vm2070_vm3, %v5965_v26  ;;  %v12084_v42 = vadd.s32 320, %v10346_v29  ;;  %v4619_v41 = vpop.f32.mrf.mxu3  ;;  %v5395_v14 = vld [vmem:[#allocation3 + $0x137] sm:$0xff] }
 0x48d   : > { %v1518_v54 = vmul.u32 43691, %v1515_v34  ;;  %v1519_v10 = vmul.u32 43690, %v1515_v34  ;;  %v12081_v55 = vmul.u32 43691, %v1516_v37  ;;  %v1521_v57 = vmul.u32 43690, %v1516_v37 }
 0x48e   : > { %vm1810_vm5 = vcmp.ne.s32.totalorder %v1480_v33, 0  ;;  %vm1858_vm6 = vcmp.lt.s32.totalorder %v1480_v33, 0  ;;  %v1954_v48 = vadd.s32 24, %v1480_v33  ;;  %v1506_v4 = vadd.s32 %v1505_v52, %v1496_v50  ;;  %v12089_v49 = vpop.f32.mrf.mxu2 }
 0x48f   : > { %vm1906_vm7 = vmand %vm1858_vm6, %vm1810_vm5  ;;  %v5469_v8 = vld [vmem:[#allocation3 + $0x140] sm:$0xff]  ;;  %v1522_v6 = vshll.u32 %v1519_v10, 16  ;;  %v1524_v26 = vshll.u32 %v12081_v55, 16  ;;  %14276 = vst [vmem:[#allocation11_spill] sm:$0xff] %v12089_v49  ;;  %v12091_v17 = vpop.f32.mrf.mxu0  ;;  %v6292_v34 = vpack.c.bf16 %v12079_v46, %v12086_v39  ;;  %v5649_v12 = vpop.f32.mrf.mxu1  ;;  %v1523_v47 = vshrl.u32 %v1519_v10, 16 }
 0x490   : > { %v5396_v44 = vld [vmem:[#allocation3 + $0x13f] sm:$0xff]  ;;  %v2002_v16 = vsel %vm1906_vm7, %v1954_v48, %v1480_v33  ;;  %v1507_v50 = vshrl.u32 %v1506_v4, 4  ;;  %v5497_v52 = vpack.c.bf16 %v5469_v8, %v5468_v38  ;;  %v1544_v11 = vand.u32 65535, %v12084_v42 }
 0x491   : > { %v5424_v9 = vpack.c.bf16 %v5396_v44, %v5395_v14  ;;  %vm2050_vm9 = vcmp.lt.s32.totalorder %v2002_v16, 16  ;;  %vm1526_vm8 = vc.u32 %v1518_v54, %v1522_v6  ;;  %v1528_v59 = vadd.s32 %v1522_v6, %v1518_v54  ;;  %v14277_v6 = vld [vmem:[#allocation39_spill] sm:$0xff] }
 0x492   : > { %v5298_v37 = vsel %vm2050_vm9, %v5154_v58, 0.0  ;;  %v1508_v60 = vmul.u32 24, %v1507_v50  ;;  %8960 = vmatmul.msk.bf16.gmra.mxu1 %vm2070_vm3, %v5497_v52  ;;  %v1527_v49 = vsel %vm1526_vm8, 1, %v14139_v43  ;;  %v5056_v46 = vmul.f32 %v12003_v23, %v5004_v56 }
 0x493   : > { %8984 = vmatmul.msk.bf16.gmra.mxu2 %vm2070_vm3, %v5424_v9  ;;  %5346 = vst.msk [vmem:[#allocation3 + $0x148] sm:$0xff] %vm2070_vm3, %v5298_v37  ;;  %v1529_v33 = vadd.s32 %v1527_v49, %v1521_v57  ;;  %vm1530_vm1 = vc.u32 %v1528_v59, %v1524_v26  ;;  %v1545_v16 = vshrl.u32 %v12084_v42, 16  ;;  %v1547_v10 = vmul.u32 43691, %v1544_v11 }
 0x494   : > { %v1509_v54 = vsub.s32 %v12010_v2, %v1508_v60  ;;  %v1531_v58 = vsel %vm1530_vm1, 1, %v14139_v43  ;;  %v1548_v48 = vmul.u32 43690, %v1544_v11  ;;  %v1525_v9 = vshrl.u32 %v12081_v55, 16  ;;  %v4621_v2 = vpop.f32.mrf.mxu3 }
 0x495   : > { %v1533_v4 = vadd.s32 %v1531_v58, %v1529_v33  ;;  %v1549_v38 = vmul.u32 43691, %v1545_v16  ;;  %v1550_v14 = vmul.u32 43690, %v1545_v16  ;;  %v12106_v56 = vadd.f32 %v12015_v53, %v5056_v46 }
 0x496   : > { %vm1811_vm10 = vcmp.ne.s32.totalorder %v1509_v54, 0  ;;  %vm1859_vm11 = vcmp.lt.s32.totalorder %v1509_v54, 0  ;;  %v1955_v39 = vadd.s32 24, %v1509_v54  ;;  %v1551_v8 = vshll.u32 %v1548_v48, 16  ;;  %v5853_v52 = vpop.f32.mrf.mxu2 }
 0x497   : > { %vm1907_vm12 = vmand %vm1859_vm11, %vm1811_vm10  ;;  %v1534_v59 = vadd.s32 %v1533_v4, %v1523_v47  ;;  %v1552_v44 = vshrl.u32 %v1548_v48, 16  ;;  %v1553_v60 = vshll.u32 %v1549_v38, 16  ;;  %v4679_v55 = vadd.f32 %v4619_v41, %v14277_v6  ;;  %v12110_v37 = vpop.f32.mrf.mxu0  ;;  %v5924_v47 = vld [vmem:[#allocation3 + $0x61] sm:$0xff]  ;;  %v12116_v58 = vpop.f32.mrf.mxu1 }
 0x498   : > { %v2003_v57 = vsel %vm1907_vm12, %v1955_v39, %v1509_v54  ;;  %vm1555_vm13 = vc.u32 %v1547_v10, %v1551_v8  ;;  %v1557_v11 = vadd.s32 %v1551_v8, %v1547_v10  ;;  %v1554_v49 = vshrl.u32 %v1549_v38, 16  ;;  %14279 = vst [vmem:[#allocation19_spill] sm:$0xff] %v12116_v58 }
 0x499   : > { %vm2051_vm14 = vcmp.lt.s32.totalorder %v2003_v57, 16  ;;  %v1535_v26 = vadd.s32 %v1534_v59, %v1525_v9  ;;  %v1556_v50 = vsel %vm1555_vm13, 1, %v14139_v43  ;;  %v14278_v33 = vmax.f32 %v12059_v30, 0.0  ;;  %v12124_v30 = vld [vmem:[#allocation3 + $0x59] sm:$0xff]  ;;  %v12136_v57 = vld [vmem:[#allocation3 + $0x87] sm:$0xff] }
 0x49a   : > { %v1558_v16 = vadd.s32 %v1556_v50, %v1550_v14  ;;  %vm1559_vm15 = vc.u32 %v1557_v11, %v1553_v60  ;;  %v5005_v54 = vadd.f32 %v12035_v22, %v4679_v55  ;;  %9020 = vmatmul.msk.bf16.gmra.mxu0 %vm2070_vm3, %v6292_v34  ;;  %v12121_v48 = vadd.s32 328, %v10346_v29  ;;  %v14280_v14 = vld [vmem:[#allocation40_spill] sm:$0xff] }
 0x49b   : > { %v5299_v46 = vsel %vm2051_vm14, %v14278_v33, 0.0  ;;  %v1536_v41 = vshrl.u32 %v1535_v26, 4  ;;  %v1560_v10 = vsel %vm1559_vm15, 1, %v14139_v43  ;;  %v4680_v9 = vadd.f32 %v4621_v2, %v12022_v0 }
 0x49c   : > { %5347 = vst.msk [vmem:[#allocation3 + $0x150] sm:$0xff] %vm2070_vm3, %v5299_v46  ;;  %v1562_v4 = vadd.s32 %v1560_v10, %v1558_v16  ;;  %v5057_v38 = vmul.f32 %v12003_v23, %v5005_v54  ;;  %v12127_v22 = vadd.f32 %v5853_v52, %v5649_v12  ;;  %v5966_v34 = vpack.c.bf16 %v5924_v47, %v12124_v30  ;;  %v4624_v50 = vpop.f32.mrf.mxu3  ;;  %v6251_v52 = vld [vmem:[#allocation3 + $0x7f] sm:$0xff]  ;;  %v5470_v46 = vld [vmem:[#allocation3 + $0x148] sm:$0xff] }
 0x49d   : > { %v12132_v39 = vadd.f32 %v14280_v14, %v12070_v13  ;;  %v1537_v8 = vmul.u32 24, %v1536_v41  ;;  %v1573_v59 = vand.u32 65535, %v12121_v48  ;;  %v1574_v60 = vshrl.u32 %v12121_v48, 16  ;;  %v5397_v16 = vld [vmem:[#allocation3 + $0x147] sm:$0xff] }
 0x49e   : > { %v5156_v0 = vmax.f32 %v12106_v56, 0.0  ;;  %v1563_v2 = vadd.s32 %v1562_v4, %v1552_v44  ;;  %v12140_v11 = vadd.f32 %v12015_v53, %v5057_v38  ;;  %v5006_v12 = vadd.f32 %v12050_v62, %v4680_v9  ;;  %8995 = vmatmul.msk.bf16.gmra.mxu3 %vm2070_vm3, %v5966_v34 }
 0x49f   : > { %v1538_v13 = vsub.s32 %v12062_v61, %v1537_v8  ;;  %v1576_v6 = vmul.u32 43691, %v1573_v59  ;;  %v1577_v55 = vmul.u32 43690, %v1573_v59  ;;  %v12145_v26 = vmul.u32 43691, %v1574_v60  ;;  %v12151_v61 = vpop.f32.mrf.mxu2  ;;  %v12153_v41 = vpop.f32.mrf.mxu0 }
 0x4a0   : > { %v1564_v47 = vadd.s32 %v1563_v2, %v1554_v49  ;;  %v1579_v33 = vmul.u32 43690, %v1574_v60  ;;  %v12148_v56 = vadd.s32 336, %v10346_v29  ;;  %v6293_v44 = vpack.c.bf16 %v12136_v57, %v6251_v52  ;;  %14281 = vst [vmem:[#allocation12_spill] sm:$0xff] %v12151_v61  ;;  %v5654_v14 = vpop.f32.mrf.mxu1 }
 0x4a1   : > { %vm1812_vm0 = vcmp.ne.s32.totalorder %v1538_v13, 0  ;;  %vm1860_vm4 = vcmp.lt.s32.totalorder %v1538_v13, 0  ;;  %v1956_v62 = vadd.s32 24, %v1538_v13  ;;  %v1580_v54 = vshll.u32 %v1577_v55, 16 }
 0x4a2   : > { %vm1908_vm5 = vmand %vm1860_vm4, %vm1812_vm0  ;;  %v1565_v10 = vshrl.u32 %v1564_v47, 4  ;;  %v5157_v49 = vmax.f32 %v12140_v11, 0.0  ;;  %v1582_v38 = vshll.u32 %v12145_v26, 16  ;;  %v5058_v34 = vmul.f32 %v12003_v23, %v5006_v12 }
 0x4a3   : > { %v5471_v9 = vld [vmem:[#allocation3 + $0x150] sm:$0xff]  ;;  %v2004_v8 = vsel %vm1908_vm5, %v1956_v62, %v1538_v13  ;;  %vm1584_vm6 = vc.u32 %v1576_v6, %v1580_v54  ;;  %v1586_v52 = vadd.s32 %v1580_v54, %v1576_v6  ;;  %v1581_v11 = vshrl.u32 %v1577_v55, 16 }
 0x4a4   : > { %v5398_v4 = vld [vmem:[#allocation3 + $0x14f] sm:$0xff]  ;;  %v5498_v59 = vpack.c.bf16 %v5471_v9, %v5470_v46  ;;  %vm2052_vm7 = vcmp.lt.s32.totalorder %v2004_v8, 16  ;;  %v1566_v57 = vmul.u32 24, %v1565_v10  ;;  %v1585_v2 = vsel %vm1584_vm6, 1, %v14139_v43  ;;  %v4626_v10 = vpop.f32.mrf.mxu3 }
 0x4a5   : > { %v5425_v60 = vpack.c.bf16 %v5398_v4, %v5397_v16  ;;  %v5300_v61 = vsel %vm2052_vm7, %v5156_v0, 0.0  ;;  %v1587_v47 = vadd.s32 %v1585_v2, %v1579_v33  ;;  %v1602_v58 = vand.u32 65535, %v12148_v56  ;;  %v14282_v62 = vld [vmem:[#allocation33_spill] sm:$0xff] }
 0x4a6   : > { %8961 = vmatmul.msk.bf16.gmra.mxu1 %vm2070_vm3, %v5498_v59  ;;  %5348 = vst.msk [vmem:[#allocation3 + $0x158] sm:$0xff] %vm2070_vm3, %v5300_v61  ;;  %v1567_v12 = vsub.s32 %v12084_v42, %v1566_v57  ;;  %vm1588_vm9 = vc.u32 %v1586_v52, %v1582_v38  ;;  %v1603_v13 = vshrl.u32 %v12148_v56, 16  ;;  %v4681_v46 = vadd.f32 %v4624_v50, %v14282_v62 }
 0x4a7   : > { %8985 = vmatmul.msk.bf16.gmra.mxu2 %vm2070_vm3, %v5425_v60  ;;  %v1583_v6 = vshrl.u32 %v12145_v26, 16  ;;  %v1589_v0 = vsel %vm1588_vm9, 1, %v14139_v43  ;;  %v1605_v16 = vmul.u32 43691, %v1602_v58  ;;  %v1606_v54 = vmul.u32 43690, %v1602_v58  ;;  %v5858_v58 = vpop.f32.mrf.mxu2  ;;  %v12175_v57 = vpop.f32.mrf.mxu0 }
 0x4a8   : > { %vm1813_vm8 = vcmp.ne.s32.totalorder %v1567_v12, 0  ;;  %vm1861_vm1 = vcmp.lt.s32.totalorder %v1567_v12, 0  ;;  %v1957_v55 = vadd.s32 24, %v1567_v12  ;;  %v1591_v33 = vadd.s32 %v1589_v0, %v1587_v47 }
 0x4a9   : > { %v4032_v61 = vadd.f32 %v10416_v19, %v10430_v28  ;;  %vm1909_vm10 = vmand %vm1861_vm1, %vm1813_vm8  ;;  %v1607_v42 = vmul.u32 43691, %v1603_v13  ;;  %v1608_v9 = vmul.u32 43690, %v1603_v13  ;;  %v1609_v4 = vshll.u32 %v1606_v54, 16  ;;  %v12177_v19 = vpop.f32.mrf.mxu1  ;;  %v12179_v28 = vld [vmem:[#allocation3 + $0x71] sm:$0xff]  ;;  %v12188_v13 = vld [vmem:[#allocation3 + $0x69] sm:$0xff] }
 0x4aa   : > { %v2005_v38 = vsel %vm1909_vm10, %v1957_v55, %v1567_v12  ;;  %v1592_v50 = vadd.s32 %v1591_v33, %v1581_v11  ;;  %v12171_v26 = vadd.f32 %v12015_v53, %v5058_v34  ;;  %v5007_v8 = vadd.f32 %v12091_v17, %v4681_v46  ;;  %9021 = vmatmul.msk.bf16.gmra.mxu0 %vm2070_vm3, %v6293_v44 }
 0x4ab   : > { %vm2053_vm11 = vcmp.lt.s32.totalorder %v2005_v38, 16  ;;  %v1610_v59 = vshrl.u32 %v1606_v54, 16  ;;  %v1611_v60 = vshll.u32 %v1607_v42, 16  ;;  %vm1613_vm12 = vc.u32 %v1605_v16, %v1609_v4  ;;  %14283 = vst [vmem:[#allocation23_spill] sm:$0xff] %v12177_v19 }
 0x4ac   : > { %v5301_v2 = vsel %vm2053_vm11, %v5157_v49, 0.0  ;;  %v1593_v52 = vadd.s32 %v1592_v50, %v1583_v6  ;;  %v1614_v34 = vsel %vm1613_vm12, 1, %v14139_v43  ;;  %v1615_v11 = vadd.s32 %v1609_v4, %v1605_v16 }
 0x4ad   : > { %5349 = vst.msk [vmem:[#allocation3 + $0x160] sm:$0xff] %vm2070_vm3, %v5301_v2  ;;  %v1616_v17 = vadd.s32 %v1614_v34, %v1608_v9  ;;  %v5059_v44 = vmul.f32 %v12003_v23, %v5007_v8  ;;  %v12185_v47 = vadd.s32 344, %v10346_v29  ;;  %v4682_v12 = vadd.f32 %v4626_v10, %v12132_v39 }
 0x4ae   : > { %v1594_v62 = vshrl.u32 %v1593_v52, 4  ;;  %vm1617_vm13 = vc.u32 %v1615_v11, %v1611_v60  ;;  %v12190_v46 = vadd.f32 %v5858_v58, %v5654_v14  ;;  %v5967_v49 = vpack.c.bf16 %v12179_v28, %v12188_v13  ;;  %v5472_v58 = vld [vmem:[#allocation3 + $0x158] sm:$0xff] }
 0x4af   : > { %v12195_v6 = vadd.f32 %v10422_v51, %v4032_v61  ;;  %v1618_v0 = vsel %vm1617_vm13, 1, %v14139_v43  ;;  %v1631_v16 = vand.u32 65535, %v12185_v47  ;;  %v1632_v54 = vshrl.u32 %v12185_v47, 16 }
 0x4b0   : > { %v1595_v55 = vmul.u32 24, %v1594_v62  ;;  %v1612_v39 = vshrl.u32 %v1607_v42, 16  ;;  %v1620_v33 = vadd.s32 %v1618_v0, %v1616_v17  ;;  %v5008_v10 = vadd.f32 %v12110_v37, %v4682_v12  ;;  %8996 = vmatmul.msk.bf16.gmra.mxu3 %vm2070_vm3, %v5967_v49  ;;  %v4629_v42 = vpop.f32.mrf.mxu3  ;;  %v12214_v17 = vpop.f32.mrf.mxu2 }
 0x4b1   : > { %v5158_v14 = vmax.f32 %v12171_v26, 0.0  ;;  %v1634_v9 = vmul.u32 43691, %v1631_v16  ;;  %v1635_v4 = vmul.u32 43690, %v1631_v16  ;;  %v12203_v38 = vmul.u32 43691, %v1632_v54  ;;  %14284 = vst [vmem:[#allocation30_spill] sm:$0xff] %v12214_v17  ;;  %v12218_v0 = vpop.f32.mrf.mxu0 }
 0x4b2   : > { %v1596_v51 = vsub.s32 %v12121_v48, %v1595_v55  ;;  %v1621_v61 = vadd.s32 %v1620_v33, %v1610_v59  ;;  %v12207_v50 = vadd.f32 %v12015_v53, %v5059_v44  ;;  %v12210_v8 = vadd.s32 352, %v10346_v29  ;;  %v5399_v59 = vld [vmem:[#allocation3 + $0x157] sm:$0xff] }
 0x4b3   : > { %v1637_v37 = vmul.u32 43690, %v1632_v54  ;;  %v1638_v60 = vshll.u32 %v1635_v4, 16  ;;  %v1640_v2 = vshll.u32 %v12203_v38, 16  ;;  %v5060_v26 = vmul.f32 %v12003_v23, %v5008_v10  ;;  %v12216_v44 = vpop.f32.mrf.mxu1 }
 0x4b4   : > { %vm1814_vm14 = vcmp.ne.s32.totalorder %v1596_v51, 0  ;;  %vm1862_vm15 = vcmp.lt.s32.totalorder %v1596_v51, 0  ;;  %v1958_v52 = vadd.s32 24, %v1596_v51  ;;  %v1622_v34 = vadd.s32 %v1621_v61, %v1612_v39  ;;  %v5473_v48 = vld [vmem:[#allocation3 + $0x160] sm:$0xff]  ;;  %v6254_v61 = vld [vmem:[#allocation3 + $0x97] sm:$0xff] }
 0x4b5   : > { %v5400_v11 = vld [vmem:[#allocation3 + $0x15f] sm:$0xff]  ;;  %vm1910_vm0 = vmand %vm1862_vm15, %vm1814_vm14  ;;  %v5499_v12 = vpack.c.bf16 %v5473_v48, %v5472_v58  ;;  %vm1642_vm4 = vc.u32 %v1634_v9, %v1638_v60  ;;  %v1644_v49 = vadd.s32 %v1638_v60, %v1634_v9  ;;  %v1639_v55 = vshrl.u32 %v1635_v4, 16 }
 0x4b6   : > { %v5426_v62 = vpack.c.bf16 %v5400_v11, %v5399_v59  ;;  %v2006_v16 = vsel %vm1910_vm0, %v1958_v52, %v1596_v51  ;;  %v1623_v54 = vshrl.u32 %v1622_v34, 4  ;;  %v1643_v33 = vsel %vm1642_vm4, 1, %v14139_v43  ;;  %v6253_v59 = vld [vmem:[#allocation3 + $0x8f] sm:$0xff] }
 0x4b7   : > { %vm2054_vm5 = vcmp.lt.s32.totalorder %v2006_v16, 16  ;;  %8962 = vmatmul.msk.bf16.gmra.mxu1 %vm2070_vm3, %v5499_v12  ;;  %v1645_v39 = vadd.s32 %v1643_v33, %v1637_v37  ;;  %vm1646_vm6 = vc.u32 %v1644_v49, %v1640_v2  ;;  %v1660_v10 = vand.u32 65535, %v12210_v8 }
 0x4b8   : > { %8986 = vmatmul.msk.bf16.gmra.mxu2 %vm2070_vm3, %v5426_v62  ;;  %v5302_v58 = vsel %vm2054_vm5, %v5158_v14, 0.0  ;;  %v1624_v48 = vmul.u32 24, %v1623_v54  ;;  %v1641_v9 = vshrl.u32 %v12203_v38, 16  ;;  %v1647_v51 = vsel %vm1646_vm6, 1, %v14139_v43  ;;  %v4631_v33 = vpop.f32.mrf.mxu3 }
 0x4b9   : > { %5350 = vst.msk [vmem:[#allocation3 + $0x168] sm:$0xff] %vm2070_vm3, %v5302_v58  ;;  %v1649_v4 = vadd.s32 %v1647_v51, %v1645_v39  ;;  %v1661_v60 = vshrl.u32 %v12210_v8, 16  ;;  %v1663_v52 = vmul.u32 43691, %v1660_v10  ;;  %v1664_v34 = vmul.u32 43690, %v1660_v10 }
 0x4ba   : > { %v1625_v37 = vsub.s32 %v12148_v56, %v1624_v48  ;;  %v5159_v2 = vmax.f32 %v12207_v50, 0.0  ;;  %v4683_v11 = vadd.f32 %v4629_v42, %v10407_v35  ;;  %v6294_v14 = vpack.c.bf16 %v6254_v61, %v6253_v59  ;;  %v5863_v61 = vpop.f32.mrf.mxu2 }
 0x4bb   : > { %v1650_v12 = vadd.s32 %v1649_v4, %v1639_v55  ;;  %v1665_v62 = vmul.u32 43691, %v1661_v60  ;;  %v1666_v38 = vmul.u32 43690, %v1661_v60  ;;  %v1667_v49 = vshll.u32 %v1664_v34, 16  ;;  %v12237_v58 = vpop.f32.mrf.mxu1  ;;  %v12242_v4 = vpop.f32.mrf.mxu0 }
 0x4bc   : > { %vm1815_vm7 = vcmp.ne.s32.totalorder %v1625_v37, 0  ;;  %vm1863_vm9 = vcmp.lt.s32.totalorder %v1625_v37, 0  ;;  %v1959_v16 = vadd.s32 24, %v1625_v37  ;;  %v12232_v54 = vadd.f32 %v12015_v53, %v5060_v26  ;;  %9022 = vmatmul.msk.bf16.gmra.mxu0 %vm2070_vm3, %v6294_v14  ;;  %14285 = vst [vmem:[#allocation16_spill] sm:$0xff] %v12237_v58 }
 0x4bd   : > { %vm1911_vm8 = vmand %vm1863_vm9, %vm1815_vm7  ;;  %v1651_v56 = vadd.s32 %v1650_v12, %v1641_v9  ;;  %v1668_v39 = vshrl.u32 %v1664_v34, 16  ;;  %v1669_v50 = vshll.u32 %v1665_v62, 16  ;;  %vm1671_vm1 = vc.u32 %v1663_v52, %v1667_v49 }
 0x4be   : > { %v2007_v35 = vsel %vm1911_vm8, %v1959_v16, %v1625_v37  ;;  %v1672_v42 = vsel %vm1671_vm1, 1, %v14139_v43  ;;  %v1673_v55 = vadd.s32 %v1667_v49, %v1663_v52  ;;  %v5009_v10 = vadd.f32 %v12153_v41, %v4683_v11 }
 0x4bf   : > { %vm2055_vm10 = vcmp.lt.s32.totalorder %v2007_v35, 16  ;;  %v1652_v26 = vshrl.u32 %v1651_v56, 4  ;;  %v1674_v48 = vadd.s32 %v1672_v42, %v1666_v38  ;;  %v12240_v51 = vadd.s32 360, %v10346_v29  ;;  %v12258_v42 = vld [vmem:[#allocation3 + $0x81] sm:$0xff] }
 0x4c0   : > { %v5303_v9 = vsel %vm2055_vm10, %v5159_v2, 0.0  ;;  %v1670_v60 = vshrl.u32 %v1665_v62, 16  ;;  %vm1675_vm11 = vc.u32 %v1673_v55, %v1669_v50  ;;  %v4684_v34 = vadd.f32 %v4631_v33, %v12195_v6  ;;  %v4634_v55 = vpop.f32.mrf.mxu3 }
 0x4c1   : > { %5351 = vst.msk [vmem:[#allocation3 + $0x170] sm:$0xff] %vm2070_vm3, %v5303_v9  ;;  %v1653_v52 = vmul.u32 24, %v1652_v26  ;;  %v1676_v41 = vsel %vm1675_vm11, 1, %v14139_v43  ;;  %v1689_v59 = vand.u32 65535, %v12240_v51  ;;  %v1690_v37 = vshrl.u32 %v12240_v51, 16  ;;  %v12264_v26 = vld [vmem:[#allocation3 + $0x167] sm:$0xff] }
 0x4c2   : > { %v1678_v11 = vadd.s32 %v1676_v41, %v1674_v48  ;;  %v5061_v14 = vmul.f32 %v12003_v23, %v5009_v10  ;;  %v5010_v12 = vadd.f32 %v12175_v57, %v4684_v34  ;;  %v12252_v2 = vadd.f32 %v5863_v61, %v12216_v44  ;;  %v5474_v61 = vld [vmem:[#allocation3 + $0x168] sm:$0xff]  ;;  %v12267_v48 = vld [vmem:[#allocation3 + $0x79] sm:$0xff] }
 0x4c3   : > { %v1654_v62 = vsub.s32 %v12185_v47, %v1653_v52  ;;  %v1692_v6 = vmul.u32 43691, %v1689_v59  ;;  %v1693_v38 = vmul.u32 43690, %v1689_v59  ;;  %v12255_v49 = vmul.u32 43691, %v1690_v37  ;;  %v12272_v59 = vpop.f32.mrf.mxu2 }
 0x4c4   : > { %14286 = vst [vmem:[#allocation24_spill] sm:$0xff] %v12252_v2  ;;  %v5160_v16 = vmax.f32 %v12232_v54, 0.0  ;;  %v1679_v33 = vadd.s32 %v1678_v11, %v1668_v39  ;;  %v1695_v56 = vmul.u32 43690, %v1690_v37  ;;  %v12261_v44 = vadd.f32 %v12015_v53, %v5061_v14  ;;  %v6256_v11 = vld [vmem:[#allocation3 + $0xa7] sm:$0xff] }
 0x4c5   : > { %vm1816_vm12 = vcmp.ne.s32.totalorder %v1654_v62, 0  ;;  %vm1864_vm13 = vcmp.lt.s32.totalorder %v1654_v62, 0  ;;  %v1960_v50 = vadd.s32 24, %v1654_v62  ;;  %v1696_v35 = vshll.u32 %v1693_v38, 16  ;;  %14287 = vst [vmem:[#allocation21_spill] sm:$0xff] %v12272_v59  ;;  %v12274_v37 = vpop.f32.mrf.mxu1 }
 0x4c6   : > { %vm1912_vm14 = vmand %vm1864_vm13, %vm1816_vm12  ;;  %v1680_v57 = vadd.s32 %v1679_v33, %v1670_v60  ;;  %v1698_v47 = vshll.u32 %v12255_v49, 16  ;;  %v5062_v39 = vmul.f32 %v12003_v23, %v5010_v12  ;;  %v5968_v41 = vpack.c.bf16 %v12258_v42, %v12267_v48  ;;  %v12277_v33 = vpop.f32.mrf.mxu0 }
 0x4c7   : > { %v2008_v10 = vsel %vm1912_vm14, %v1960_v50, %v1654_v62  ;;  %vm1700_vm15 = vc.u32 %v1692_v6, %v1696_v35  ;;  %v1702_v54 = vadd.s32 %v1696_v35, %v1692_v6  ;;  %v1697_v35 = vshrl.u32 %v1693_v38, 16 }
 0x4c8   : > { %vm2056_vm0 = vcmp.lt.s32.totalorder %v2008_v10, 16  ;;  %v1681_v9 = vshrl.u32 %v1680_v57, 4  ;;  %v5475_v34 = vld [vmem:[#allocation3 + $0x170] sm:$0xff]  ;;  %v1701_v52 = vsel %vm1700_vm15, 1, %v14139_v43  ;;  %8997 = vmatmul.msk.bf16.gmra.mxu3 %vm2070_vm3, %v5968_v41  ;;  %v12282_v57 = vadd.s32 368, %v10346_v29  ;;  %v6255_v10 = vld [vmem:[#allocation3 + $0x9f] sm:$0xff]  ;;  %v4636_v41 = vpop.f32.mrf.mxu3 }
 0x4c9   : > { %v5402_v60 = vld [vmem:[#allocation3 + $0x16f] sm:$0xff]  ;;  %v5304_v14 = vsel %vm2056_vm0, %v5160_v16, 0.0  ;;  %v5500_v62 = vpack.c.bf16 %v5475_v34, %v5474_v61  ;;  %v1703_v6 = vadd.s32 %v1701_v52, %v1695_v56  ;;  %vm1704_vm4 = vc.u32 %v1702_v54, %v1698_v47 }
 0x4ca   : > { %v5427_v12 = vpack.c.bf16 %v5402_v60, %v12264_v26  ;;  %5352 = vst.msk [vmem:[#allocation3 + $0x178] sm:$0xff] %vm2070_vm3, %v5304_v14  ;;  %v1682_v50 = vmul.u32 24, %v1681_v9  ;;  %v4034_v16 = vadd.f32 %v11154_v63, %v10515_v24  ;;  %v1699_v56 = vshrl.u32 %v12255_v49, 16 }
 0x4cb   : > { %8963 = vmatmul.msk.bf16.gmra.mxu1 %vm2070_vm3, %v5500_v62  ;;  %v1705_v61 = vsel %vm1704_vm4, 1, %v14139_v43  ;;  %v6295_v9 = vpack.c.bf16 %v6256_v11, %v6255_v10  ;;  %v1718_v54 = vand.u32 65535, %v12282_v57  ;;  %v1719_v34 = vshrl.u32 %v12282_v57, 16 }
 0x4cc   : > { %8987 = vmatmul.msk.bf16.gmra.mxu2 %vm2070_vm3, %v5427_v12  ;;  %v1683_v38 = vsub.s32 %v12210_v8, %v1682_v50  ;;  %v1707_v47 = vadd.s32 %v1705_v61, %v1703_v6  ;;  %v5161_v60 = vmax.f32 %v12261_v44, 0.0  ;;  %v12295_v24 = vadd.f32 %v12015_v53, %v5062_v39 }
 0x4cd   : > { %v4685_v63 = vadd.f32 %v4634_v55, %v10479_v27  ;;  %9023 = vmatmul.msk.bf16.gmra.mxu0 %vm2070_vm3, %v6295_v9  ;;  %v12300_v49 = vadd.s32 376, %v10346_v29  ;;  %v1721_v11 = vmul.u32 43691, %v1718_v54  ;;  %v1722_v14 = vmul.u32 43690, %v1718_v54  ;;  %v5868_v55 = vpop.f32.mrf.mxu2  ;;  %v12306_v12 = vpop.f32.mrf.mxu1  ;;  %v12308_v29 = vld [vmem:[#allocation3 + $0x91] sm:$0xff] }
 0x4ce   : > { %vm1817_vm5 = vcmp.ne.s32.totalorder %v1683_v38, 0  ;;  %vm1865_vm6 = vcmp.lt.s32.totalorder %v1683_v38, 0  ;;  %v1961_v8 = vadd.s32 24, %v1683_v38  ;;  %v1708_v52 = vadd.s32 %v1707_v47, %v1697_v35  ;;  %14288 = vst [vmem:[#allocation26_spill] sm:$0xff] %v12306_v12  ;;  %v12311_v10 = vpop.f32.mrf.mxu0 }
 0x4cf   : > { %vm1913_vm7 = vmand %vm1865_vm6, %vm1817_vm5  ;;  %v12302_v62 = vmul.u32 43691, %v1719_v34  ;;  %v4360_v53 = vadd.f32 %v11156_v1, %v4034_v16  ;;  %v1747_v27 = vand.u32 65535, %v12300_v49  ;;  %v1724_v6 = vmul.u32 43690, %v1719_v34 }
 0x4d0   : > { %v2009_v44 = vsel %vm1913_vm7, %v1961_v8, %v1683_v38  ;;  %v1709_v39 = vadd.s32 %v1708_v52, %v1699_v56  ;;  %v1725_v50 = vshll.u32 %v1722_v14, 16  ;;  %v5162_v1 = vmax.f32 %v12295_v24, 0.0  ;;  %v12315_v56 = vld [vmem:[#allocation3 + $0x89] sm:$0xff] }
 0x4d1   : > { %vm2057_vm9 = vcmp.lt.s32.totalorder %v2009_v44, 16  ;;  %v1727_v35 = vshll.u32 %v12302_v62, 16  ;;  %v5011_v16 = vadd.f32 %v12218_v0, %v4685_v63  ;;  %v1748_v47 = vshrl.u32 %v12300_v49, 16  ;;  %v12349_v19 = vld [vmem:[#allocation3 + $0x177] sm:$0xff] }
 0x4d2   : > { %v5305_v61 = vsel %vm2057_vm9, %v5161_v60, 0.0  ;;  %v1710_v9 = vshrl.u32 %v1709_v39, 4  ;;  %vm1729_vm8 = vc.u32 %v1721_v11, %v1725_v50  ;;  %v1731_v38 = vadd.s32 %v1725_v50, %v1721_v11 }
 0x4d3   : > { %5353 = vst.msk [vmem:[#allocation3 + $0x180] sm:$0xff] %vm2070_vm3, %v5305_v61  ;;  %v5969_v54 = vpack.c.bf16 %v12308_v29, %v12315_v56  ;;  %v1730_v8 = vsel %vm1729_vm8, 1, %v14139_v43  ;;  %v1750_v60 = vmul.u32 43691, %v1747_v27  ;;  %v12322_v52 = vmul.u32 43690, %v1747_v27  ;;  %v6071_v61 = vpop.f32.mrf.mxu3 }
 0x4d4   : > { %v1711_v34 = vmul.u32 24, %v1710_v9  ;;  %v1726_v24 = vshrl.u32 %v1722_v14, 16  ;;  %v1732_v44 = vadd.s32 %v1730_v8, %v1724_v6  ;;  %vm1733_vm1 = vc.u32 %v1731_v38, %v1727_v35  ;;  %v9089_v14 = vld [vmem:[%s13952_s4 + $0x18] sm:$0xf] }
 0x4d5   : > { %v12324_v0 = vmul.u32 43691, %v1748_v47  ;;  %v1734_v11 = vsel %vm1733_vm1, 1, %v14139_v43  ;;  %v1753_v39 = vmul.u32 43690, %v1748_v47  ;;  %v1754_v50 = vshll.u32 %v12322_v52, 16  ;;  %v12335_v6 = vpop.f32.mrf.mxu2  ;;  %v5476_v47 = vld [vmem:[#allocation3 + $0x178] sm:$0xff] }
 0x4d6   : > { %v1712_v63 = vsub.s32 %v12240_v51, %v1711_v34  ;;  %v1728_v9 = vshrl.u32 %v12302_v62, 16  ;;  %v1736_v59 = vadd.s32 %v1734_v11, %v1732_v44  ;;  %v5063_v58 = vmul.f32 %v12003_v23, %v5011_v16  ;;  %14289 = vst [vmem:[#allocation22_spill] sm:$0xff] %v12335_v6  ;;  %v12342_v8 = vpop.f32.mrf.mxu0  ;;  %v9114_v44 = vld [vmem:[%s13952_s4 + $0x1c] sm:$0xf] }
 0x4d7   : > { %v1756_v27 = vshll.u32 %v12324_v0, 16  ;;  %vm1758_vm12 = vc.u32 %v1750_v60, %v1754_v50  ;;  %v1760_v16 = vadd.s32 %v1754_v50, %v1750_v60  ;;  %v4686_v34 = vadd.f32 %v4636_v41, %v4360_v53 }
 0x4d8   : > { %vm1818_vm10 = vcmp.ne.s32.totalorder %v1712_v63, 0  ;;  %vm1866_vm11 = vcmp.lt.s32.totalorder %v1712_v63, 0  ;;  %v1962_v51 = vadd.s32 24, %v1712_v63  ;;  %v5669_v35 = vpop.f32.mrf.mxu1  ;;  %v1737_v62 = vadd.s32 %v1736_v59, %v1726_v24  ;;  %8998 = vmatmul.msk.bf16.gmra.mxu3 %vm2070_vm3, %v5969_v54 }
 0x4d9   : > { %vm12337_vm13 = vmand %vm1866_vm11, %vm1818_vm10  ;;  %v1759_v23 = vsel %vm1758_vm12, 1, %v14139_v43  ;;  %v12354_v24 = vadd.f32 %v5868_v55, %v12274_v37  ;;  %v7364_v41 = vsel %vm5576_vm2, %v9089_v14, 0  ;;  %v1755_v38 = vshrl.u32 %v12322_v52, 16  ;;  %v9139_v37 = vld [vmem:[%s13952_s4 + $0x20] sm:$0xf]  ;;  %v6257_v52 = vld [vmem:[#allocation3 + $0xaf] sm:$0xff] }
 0x4da   : > { %v2010_v11 = vsel %vm12337_vm13, %v1962_v51, %v1712_v63  ;;  %v5477_v17 = vld [vmem:[#allocation3 + $0x180] sm:$0xff]  ;;  %v1761_v59 = vadd.s32 %v1759_v23, %v1753_v39  ;;  %v1738_v53 = vadd.s32 %v1737_v62, %v1728_v9  ;;  %7373 = vmatpush.bf16.msra.mxu3 %v7364_v41  ;;  %v6258_v63 = vld [vmem:[#allocation3 + $0xb7] sm:$0xff]  ;;  %vm1762_vm15 = vc.u32 %v1760_v16, %v1756_v27 }
 0x4db   : > { %v12351_v6 = vld [vmem:[#allocation3 + $0x17f] sm:$0xff]  ;;  %14292 = vst [vmem:[#allocation17_spill] sm:$0xff] %v12354_v24  ;;  %vm2058_vm14 = vcmp.lt.s32.totalorder %v2010_v11, 16  ;;  %v5501_v60 = vpack.c.bf16 %v5477_v17, %v5476_v47  ;;  %v12362_v39 = vadd.f32 %v6071_v61, %v11221_v25  ;;  %v7690_v25 = vsel %vm5576_vm2, %v9114_v44, 0  ;;  %v12377_v62 = vpop.f32.mrf.mxu3 }
 0x4dc   : > { %v5428_v50 = vpack.c.bf16 %v12351_v6, %v12349_v19  ;;  %v5306_v51 = vsel %vm2058_vm14, %v5162_v1, 0.0  ;;  %v1739_v55 = vshrl.u32 %v1738_v53, 4  ;;  %v9256_v17 = vld [vmem:[%s13951_s3] ss:$0 sm:$0xff]  ;;  %v1763_v1 = vsel %vm1762_vm15, 1, %v14139_v43  ;;  %7699 = vmatpush.bf16.msra.mxu0 %v7690_v25 }
 0x4dd   : > { %5354 = vst.msk [vmem:[#allocation3 + $0x188] sm:$0xff] %vm2070_vm3, %v5306_v51  ;;  %v5115_v54 = vadd.f32 %v9256_v17, %v5063_v58  ;;  %8964 = vmatmul.msk.bf16.gmra.mxu1 %vm2070_vm3, %v5501_v60  ;;  %v1757_v61 = vshrl.u32 %v12324_v0, 16  ;;  %v1765_v9 = vadd.s32 %v1763_v1, %v1761_v59  ;;  %v5012_v27 = vadd.f32 %v12242_v4, %v4686_v34  ;;  %v12383_v44 = vld [vmem:[#allocation3 + $0x40] sm:$0xff]  ;;  %v12390_v34 = vld [vmem:[#allocation3 + $0x50] sm:$0xff]  ;;  %v12397_v51 = vld [vmem:[#allocation3 + $0x48] sm:$0xff] }
 0x4de   : > { %8988 = vmatmul.msk.bf16.gmra.mxu2 %vm2070_vm3, %v5428_v50  ;;  %v6296_v14 = vpack.c.bf16 %v6258_v63, %v6257_v52  ;;  %v1740_v47 = vmul.u32 24, %v1739_v55  ;;  %v8016_v58 = vsel %vm5576_vm2, %v9139_v37, 0  ;;  %14294 = vst [vmem:[#allocation36_spill] sm:$0xff] %v12383_v44  ;;  %v12388_v4 = vpop.f32.mrf.mxu0  ;;  %v9257_v53 = vld [vmem:[%s13950_s2] ss:$0 sm:$0xff]  ;;  %v12395_v50 = vld [vmem:[#allocation3 + $0x38] sm:$0xff] }
 0x4df   : > { %v1766_v23 = vadd.s32 %v1765_v9, %v1755_v38  ;;  %8025 = vmatpush.bf16.msra.mxu1 %v8016_v58  ;;  %v5873_v43 = vpop.f32.mrf.mxu2  ;;  %14296 = vst [vmem:[#allocation46_spill] sm:$0xff] %v12390_v34  ;;  %v5163_v59 = vmax.f32 %v5115_v54, 0.0  ;;  %v5064_v60 = vmul.f32 %v9257_v53, %v5012_v27  ;;  %v12403_v55 = vld [vmem:[#allocation3 + $0xa1] sm:$0xff]  ;;  %v12457_v38 = vld [vmem:[#allocation3 + $0x70] sm:$0xff]  ;;  %vm8383_vm1 = vcmask 130048  }
 0x4e0   : > { %9024 = vmatmul.msk.bf16.gmra.mxu0 %vm2070_vm3, %v6296_v14  ;;  %v12381_v16 = vpop.f32.mrf.mxu1  ;;  %v1741_v0 = vsub.s32 %v12282_v57, %v1740_v47  ;;  %v12386_v11 = vadd.f32 %v5873_v43, %v5669_v35  ;;  %14297 = vst [vmem:[#allocation35_spill] sm:$0xff] %v12395_v50  ;;  %v6566_v14 = vld [vmem:[#allocation3 + $0x28] sm:$0xff] }
 0x4e1   : > { %14293 = vst [vmem:[#allocation28_spill] sm:$0xff] %v12381_v16  ;;  %v1767_v41 = vadd.s32 %v1766_v23, %v1757_v61  ;;  %v5116_v1 = vadd.f32 %v9256_v17, %v5064_v60  ;;  %v12405_v61 = vld [vmem:[#allocation3 + $0x99] sm:$0xff]  ;;  %v6892_v47 = vld [vmem:[#allocation3 + $0x29] sm:$0xff] }
 0x4e2   : > { %14295 = vst [vmem:[#allocation34_spill] sm:$0xff] %v12386_v11  ;;  %vm1819_vm2 = vcmp.ne.s32.totalorder %v1741_v0, 0  ;;  %vm1867_vm0 = vcmp.lt.s32.totalorder %v1741_v0, 0  ;;  %v1963_v63 = vadd.s32 24, %v1741_v0  ;;  %v5970_v58 = vpack.c.bf16 %v12403_v55, %v12405_v61  ;;  %v6260_v60 = vld [vmem:[#allocation3 + $0xc7] sm:$0xff]  ;;  %v12471_v16 = vld [vmem:[#allocation3 + $0xb9] sm:$0xff] }
 0x4e3   : > { %14298 = vst [vmem:[#allocation29_spill] sm:$0xff] %v12397_v51  ;;  %vm1915_vm4 = vmand %vm1867_vm0, %vm1819_vm2  ;;  %v1768_v35 = vshrl.u32 %v1767_v41, 4  ;;  %v6076_v25 = vpop.f32.mrf.mxu3  ;;  %v12489_v11 = vld [vmem:[#allocation3 + $0x80] sm:$0xff] }
 0x4e4   : > { %v2011_v37 = vsel %vm1915_vm4, %v1963_v63, %v1741_v0  ;;  %v12408_v9 = vadd.f32 %v6076_v25, %v11478_v5  ;;  %v5164_v0 = vmax.f32 %v5116_v1, 0.0  ;;  %v6891_v5 = vld [vmem:[#allocation3 + $0x21] sm:$0xff]  ;;  %14306 = vst [vmem:[#allocation48_spill] sm:$0xff] %v12457_v38 }
 0x4e5   : > { %vm2059_vm5 = vcmp.lt.s32.totalorder %v2011_v37, 16  ;;  %v1769_v54 = vmul.u32 24, %v1768_v35  ;;  %v6939_v53 = vpack.c.bf16 %v6892_v47, %v6891_v5  ;;  %v6259_v35 = vld [vmem:[#allocation3 + $0xbf] sm:$0xff]  ;;  %14310 = vst [vmem:[#allocation52_spill] sm:$0xff] %v12489_v11 }
 0x4e6   : > { %v5307_v52 = vsel %vm2059_vm5, %v5163_v59, 0.0  ;;  %v12416_v43 = vpop.f32.mrf.mxu0  ;;  %v6565_v59 = vld [vmem:[#allocation3 + $0x20] sm:$0xff]  ;;  %v12421_v37 = vld [vmem:[#allocation3 + $0x58] sm:$0xff]  ;;  %v6297_v25 = vpack.c.bf16 %v6260_v60, %v6259_v35 }
 0x4e7   : > { %5355 = vst.msk [vmem:[#allocation3 + $0x190] sm:$0xff] %vm2070_vm3, %v5307_v52  ;;  %v1770_v27 = vsub.s32 %v12300_v49, %v1769_v54  ;;  %v12414_v23 = vpop.f32.mrf.mxu2  ;;  %v6613_v49 = vpack.c.bf16 %v6566_v14, %v6565_v59  ;;  %v12423_v54 = vld [vmem:[#allocation3 + $0x60] sm:$0xff]  ;;  %v6893_v35 = vld [vmem:[#allocation3 + $0x31] sm:$0xff] }
 0x4e8   : > { %14299 = vst [vmem:[#allocation27_spill] sm:$0xff] %v12414_v23  ;;  %8999 = vmatmul.msk.bf16.gmra.mxu3 %vm2070_vm3, %v5970_v58  ;;  %v6894_v60 = vld [vmem:[#allocation3 + $0x39] sm:$0xff]  ;;  %v12455_v58 = vld [vmem:[#allocation3 + $0x68] sm:$0xff] }
 0x4e9   : > { %vm1820_vm6 = vcmp.ne.s32.totalorder %v1770_v27, 0  ;;  %vm1868_vm7 = vcmp.lt.s32.totalorder %v1770_v27, 0  ;;  %v1964_v17 = vadd.s32 24, %v1770_v27  ;;  %14300 = vst [vmem:[#allocation41_spill] sm:$0xff] %v12421_v37 }
 0x4ea   : > { %v5674_v41 = vpop.f32.mrf.mxu1  ;;  %vm1916_vm9 = vmand %vm1868_vm7, %vm1820_vm6  ;;  %14301 = vst [vmem:[#allocation44_spill] sm:$0xff] %v12423_v54 }
 0x4eb   : > { %v2012_v63 = vsel %vm1916_vm9, %v1964_v17, %v1770_v27  ;;  %v6078_v52 = vpop.f32.mrf.mxu3  ;;  %14305 = vst [vmem:[#allocation33_spill] sm:$0xff] %v12455_v58 }
 0x4ec   : > { %vm2060_vm8 = vcmp.lt.s32.totalorder %v2012_v63, 16  ;;  %v12429_v27 = vadd.f32 %v6078_v52, %v11524_v15  ;;  %v6940_v52 = vpack.c.bf16 %v6894_v60, %v6893_v35 }
 0x4ed   : > { %9040 = vmatmul.msk.bf16.vlgmr.msrb.gmra.mxu1 %vm2070_vm3, %v6613_v49  ;;  %v5308_v1 = vsel %vm2060_vm8, %v5164_v0, 0.0  ;;  %v12438_v0 = vld [vmem:[#allocation3 + $0xb1] sm:$0xff]  ;;  %v12440_v49 = vld [vmem:[#allocation3 + $0xa9] sm:$0xff] }
 0x4ee   : > { %9065 = vmatmul.msk.bf16.vlgmr.msrb.gmra.mxu2 %vm2070_vm3, %v6939_v53  ;;  %5356 = vst.msk [vmem:[#allocation3 + $0x198] sm:$0xff] %vm2070_vm3, %v5308_v1  ;;  %v12434_v17 = vpop.f32.mrf.mxu0  ;;  %v5971_v15 = vpack.c.bf16 %v12438_v0, %v12440_v49 }
 0x4f0   : > { %9025 = vmatmul.msk.bf16.gmra.mxu0 %vm2070_vm3, %v6297_v25 }
 0x4f1   : > { %v5878_v14 = vpop.f32.mrf.mxu2 }
 0x4f2   : > { %v12432_v47 = vadd.f32 %v5878_v14, %v5674_v41  ;;  %v12436_v59 = vpop.f32.mrf.mxu1  ;;  %v6567_v41 = vld [vmem:[#allocation3 + $0x30] sm:$0xff] }
 0x4f3   : > { %14303 = vst [vmem:[#allocation39_spill] sm:$0xff] %v12436_v59  ;;  %v6081_v5 = vpop.f32.mrf.mxu3  ;;  %v6614_v25 = vpack.c.bf16 %v12395_v50, %v6567_v41  ;;  %v6262_v14 = vld [vmem:[#allocation3 + $0xd7] sm:$0xff] }
 0x4f4   : > { %14302 = vst [vmem:[#allocation31_spill] sm:$0xff] %v12432_v47  ;;  %v12443_v53 = vadd.f32 %v6081_v5, %v11557_v40  ;;  %v6261_v5 = vld [vmem:[#allocation3 + $0xcf] sm:$0xff]  ;;  %v12487_v47 = vld [vmem:[#allocation3 + $0x78] sm:$0xff] }
 0x4f5   : > { %v6298_v57 = vpack.c.bf16 %v6262_v14, %v6261_v5  ;;  %v9258_v5 = vld [vmem:[#allocation3 + $0x49] sm:$0xff]  ;;  %14309 = vst [vmem:[#allocation51_spill] sm:$0xff] %v12487_v47 }
 0x4f6   : > { %v12447_v63 = vpop.f32.mrf.mxu0 }
 0x4f8   : > { %9000 = vmatmul.msk.bf16.gmra.mxu3 %vm2070_vm3, %v5971_v15  ;;  %v6264_v15 = vld [vmem:[#allocation3 + $0xe7] sm:$0xff] }
 0x4f9   : > { %v12450_v1 = vpop.f32.mrf.mxu2 }
 0x4fa   : > { %14304 = vst [vmem:[#allocation40_spill] sm:$0xff] %v12450_v1 }
 0x4fb   : > { %v6083_v59 = vpop.f32.mrf.mxu3 }
 0x4fc   : > { %v12462_v1 = vadd.f32 %v6083_v59, %v11584_v3 }
 0x4fd   : > { %9041 = vmatmul.msk.bf16.gmra.mxu1 %vm2070_vm3, %v6614_v25 }
 0x4fe   : > { %9066 = vmatmul.msk.bf16.gmra.mxu2 %vm2070_vm3, %v6940_v52  ;;  %v5679_v40 = vpop.f32.mrf.mxu1  ;;  %v12465_v60 = vpop.f32.mrf.mxu0  ;;  %v12469_v52 = vld [vmem:[#allocation3 + $0xc1] sm:$0xff] }
 0x4ff   : > { %v5972_v3 = vpack.c.bf16 %v12469_v52, %v12471_v16 }
 0x500   : > { %9026 = vmatmul.msk.bf16.gmra.mxu0 %vm2070_vm3, %v6298_v57  ;;  %v6895_v57 = vld [vmem:[#allocation3 + $0x41] sm:$0xff] }
 0x503   : > { %v6086_v23 = vpop.f32.mrf.mxu3 }
 0x504   : > { %v12474_v14 = vadd.f32 %v6086_v23, %v11625_v21  ;;  %v6263_v23 = vld [vmem:[#allocation3 + $0xdf] sm:$0xff] }
 0x505   : > { %v5883_v41 = vpop.f32.mrf.mxu2  ;;  %v6299_v12 = vpack.c.bf16 %v6264_v15, %v6263_v23 }
 0x506   : > { %v12467_v35 = vadd.f32 %v5883_v41, %v5679_v40  ;;  %v5681_v25 = vpop.f32.mrf.mxu1  ;;  %v6615_v40 = vpack.c.bf16 %v12397_v51, %v12383_v44  ;;  %v6941_v41 = vpack.c.bf16 %v9258_v5, %v6895_v57  ;;  %v9259_v51 = vld [vmem:[#allocation3 + $0x51] sm:$0xff] }
 0x507   : > { %v12478_v59 = vpop.f32.mrf.mxu0  ;;  %v12520_v44 = vld [vmem:[#allocation3 + $0x90] sm:$0xff] }
 0x508   : > { %14307 = vst [vmem:[#allocation49_spill] sm:$0xff] %v12467_v35  ;;  %9001 = vmatmul.msk.bf16.gmra.mxu3 %vm2070_vm3, %v5972_v3 }
 0x509   : > { %14314 = vst [vmem:[#allocation56_spill] sm:$0xff] %v12520_v44 }
 0x50b   : > { %v6088_v3 = vpop.f32.mrf.mxu3 }
 0x50c   : > { %v12494_v57 = vadd.f32 %v6088_v3, %v11667_v32 }
 0x50d   : > { %v5885_v35 = vpop.f32.mrf.mxu2  ;;  %9042 = vmatmul.msk.bf16.gmra.mxu1 %vm2070_vm3, %v6615_v40 }
 0x50e   : > { %9067 = vmatmul.msk.bf16.gmra.mxu2 %vm2070_vm3, %v6941_v41  ;;  %v12485_v21 = vadd.f32 %v5885_v35, %v5681_v25  ;;  %v12499_v25 = vld [vmem:[#allocation3 + $0xd1] sm:$0xff] }
 0x50f   : > { %v5684_v50 = vpop.f32.mrf.mxu1  ;;  %v12497_v40 = vpop.f32.mrf.mxu0 }
 0x510   : > { %14308 = vst [vmem:[#allocation50_spill] sm:$0xff] %v12485_v21  ;;  %9027 = vmatmul.msk.bf16.gmra.mxu0 %vm2070_vm3, %v6299_v12  ;;  %v12503_v21 = vld [vmem:[#allocation3 + $0xc9] sm:$0xff]  ;;  %v6616_v12 = vpack.c.bf16 %v12421_v37, %v12390_v34  ;;  %v9260_v37 = vld [vmem:[#allocation3 + $0x61] sm:$0xff] }
 0x511   : > { %v5973_v32 = vpack.c.bf16 %v12499_v25, %v12503_v21 }
 0x513   : > { %v6091_v41 = vpop.f32.mrf.mxu3 }
 0x514   : > { %v12506_v15 = vadd.f32 %v6091_v41, %v11702_v18  ;;  %v6265_v41 = vld [vmem:[#allocation3 + $0xef] sm:$0xff] }
 0x516   : > { %v5888_v35 = vpop.f32.mrf.mxu2 }
 0x517   : > { %v12501_v5 = vadd.f32 %v5888_v35, %v5684_v50  ;;  %v5686_v23 = vpop.f32.mrf.mxu1  ;;  %v12510_v3 = vpop.f32.mrf.mxu0  ;;  %v6942_v50 = vpack.c.bf16 %v12124_v30, %v9259_v51  ;;  %v6266_v35 = vld [vmem:[#allocation3 + $0xf7] sm:$0xff] }
 0x518   : > { %14312 = vst [vmem:[#allocation54_spill] sm:$0xff] %v12510_v3  ;;  %9002 = vmatmul.msk.bf16.gmra.mxu3 %vm2070_vm3, %v5973_v32  ;;  %v6300_v32 = vpack.c.bf16 %v6266_v35, %v6265_v41  ;;  %v12534_v3 = vld [vmem:[#allocation3 + $0xd9] sm:$0xff] }
 0x519   : > { %14311 = vst [vmem:[#allocation53_spill] sm:$0xff] %v12501_v5  ;;  %v12518_v5 = vld [vmem:[#allocation3 + $0x88] sm:$0xff] }
 0x51a   : > { %14313 = vst [vmem:[#allocation55_spill] sm:$0xff] %v12518_v5 }
 0x51b   : > { %v6093_v2 = vpop.f32.mrf.mxu3 }
 0x51c   : > { %v12527_v30 = vadd.f32 %v6093_v2, %v11728_v36 }
 0x51d   : > { %9043 = vmatmul.msk.bf16.gmra.mxu1 %vm2070_vm3, %v6616_v12 }
 0x51e   : > { %9068 = vmatmul.msk.bf16.gmra.mxu2 %vm2070_vm3, %v6942_v50  ;;  %v5890_v18 = vpop.f32.mrf.mxu2  ;;  %v12532_v50 = vld [vmem:[#allocation3 + $0xe1] sm:$0xff] }
 0x51f   : > { %v12522_v24 = vadd.f32 %v5890_v18, %v5686_v23  ;;  %v12530_v51 = vpop.f32.mrf.mxu0  ;;  %v5974_v18 = vpack.c.bf16 %v12532_v50, %v12534_v3 }
 0x520   : > { %9028 = vmatmul.msk.bf16.gmra.mxu0 %vm2070_vm3, %v6300_v32  ;;  %14316 = vst [vmem:[#allocation58_spill] sm:$0xff] %v12530_v51  ;;  %v6617_v32 = vpack.c.bf16 %v12455_v58, %v12423_v54  ;;  %v6268_v51 = vld [vmem:[#allocation3 + $0x107] sm:$0xff] }
 0x521   : > { %14315 = vst [vmem:[#allocation57_spill] sm:$0xff] %v12522_v24  ;;  %v6943_v24 = vpack.c.bf16 %v12188_v13, %v9260_v37 }
 0x523   : > { %v5689_v12 = vpop.f32.mrf.mxu1  ;;  %v6096_v34 = vpop.f32.mrf.mxu3 }
 0x524   : > { %v12537_v23 = vadd.f32 %v6096_v34, %v11760_v45  ;;  %v6267_v45 = vld [vmem:[#allocation3 + $0xff] sm:$0xff] }
 0x525   : > { %v12551_v34 = vld [vmem:[#allocation3 + $0x98] sm:$0xff] }
 0x526   : > { %14317 = vst [vmem:[#allocation59_spill] sm:$0xff] %v12537_v23  ;;  %v12567_v23 = vld [vmem:[#allocation3 + $0xe9] sm:$0xff] }
 0x527   : > { %v12543_v36 = vpop.f32.mrf.mxu0  ;;  %14320 = vst [vmem:[#allocation62_spill] sm:$0xff] %v12551_v34 }
 0x528   : > { %14319 = vst [vmem:[#allocation61_spill] sm:$0xff] %v12543_v36  ;;  %9003 = vmatmul.msk.bf16.gmra.mxu3 %vm2070_vm3, %v5974_v18  ;;  %v6270_v18 = vld [vmem:[#allocation3 + $0x117] sm:$0xff] }
 0x52a   : > { %v5893_v35 = vpop.f32.mrf.mxu2 }
 0x52b   : > { %v12541_v41 = vadd.f32 %v5893_v35, %v5689_v12  ;;  %v5691_v2 = vpop.f32.mrf.mxu1  ;;  %v12553_v12 = vld [vmem:[#allocation3 + $0xa0] sm:$0xff]  ;;  %v6301_v35 = vpack.c.bf16 %v6268_v51, %v6267_v45 }
 0x52c   : > { %14321 = vst [vmem:[#allocation63_spill] sm:$0xff] %v12553_v12 }
 0x52d   : > { %14318 = vst [vmem:[#allocation60_spill] sm:$0xff] %v12541_v41  ;;  %9044 = vmatmul.msk.bf16.gmra.mxu1 %vm2070_vm3, %v6617_v32  ;;  %v6098_v41 = vpop.f32.mrf.mxu3  ;;  %v12565_v32 = vld [vmem:[#allocation3 + $0xf1] sm:$0xff] }
 0x52e   : > { %9069 = vmatmul.msk.bf16.gmra.mxu2 %vm2070_vm3, %v6943_v24  ;;  %v12558_v58 = vadd.f32 %v6098_v41, %v11776_v31  ;;  %v5975_v31 = vpack.c.bf16 %v12565_v32, %v12567_v23 }
 0x52f   : > { %v12563_v37 = vpop.f32.mrf.mxu0 }
 0x530   : > { %9029 = vmatmul.msk.bf16.gmra.mxu0 %vm2070_vm3, %v6301_v35  ;;  %14323 = vst [vmem:[#allocation65_spill] sm:$0xff] %v12563_v37 }
 0x532   : > { %v5895_v54 = vpop.f32.mrf.mxu2 }
 0x533   : > { %v12561_v13 = vadd.f32 %v5895_v54, %v5691_v2  ;;  %v6618_v54 = vpack.c.bf16 %v12487_v47, %v12457_v38  ;;  %v6944_v2 = vpack.c.bf16 %v12267_v48, %v12179_v28  ;;  %v12613_v38 = vld [vmem:[#allocation3 + $0xb8] sm:$0xff] }
 0x534   : > { %v5694_v24 = vpop.f32.mrf.mxu1  ;;  %14332 = vst [vmem:[#allocation74_spill] sm:$0xff] %v12613_v38 }
 0x535   : > { %14322 = vst [vmem:[#allocation64_spill] sm:$0xff] %v12561_v13  ;;  %v6101_v36 = vpop.f32.mrf.mxu3  ;;  %v12587_v13 = vld [vmem:[#allocation3 + $0xb0] sm:$0xff] }
 0x536   : > { %v12570_v51 = vadd.f32 %v6101_v36, %v11804_v7  ;;  %v6269_v7 = vld [vmem:[#allocation3 + $0x10f] sm:$0xff] }
 0x537   : > { %v12585_v36 = vld [vmem:[#allocation3 + $0xa8] sm:$0xff] }
 0x538   : > { %9004 = vmatmul.msk.bf16.gmra.mxu3 %vm2070_vm3, %v5975_v31  ;;  %14326 = vst [vmem:[#allocation68_spill] sm:$0xff] %v12585_v36  ;;  %v6302_v31 = vpack.c.bf16 %v6270_v18, %v6269_v7 }
 0x539   : > { %v12574_v41 = vpop.f32.mrf.mxu0 }
 0x53a   : > { %14324 = vst [vmem:[#allocation66_spill] sm:$0xff] %v12574_v41 }
 0x53b   : > { %v5898_v45 = vpop.f32.mrf.mxu2 }
 0x53c   : > { %v12581_v35 = vadd.f32 %v5898_v45, %v5694_v24  ;;  %v5696_v41 = vpop.f32.mrf.mxu1 }
 0x53d   : > { %9045 = vmatmul.msk.bf16.gmra.mxu1 %vm2070_vm3, %v6618_v54  ;;  %v12596_v45 = vpop.f32.mrf.mxu3  ;;  %v12598_v54 = vld [vmem:[#allocation3 + $0x101] sm:$0xff] }
 0x53e   : > { %14325 = vst [vmem:[#allocation67_spill] sm:$0xff] %v12581_v35  ;;  %9070 = vmatmul.msk.bf16.gmra.mxu2 %vm2070_vm3, %v6944_v2  ;;  %v12600_v2 = vld [vmem:[#allocation3 + $0xf9] sm:$0xff] }
 0x53f   : > { %14329 = vst [vmem:[#allocation71_spill] sm:$0xff] %v12596_v45  ;;  %v5976_v18 = vpack.c.bf16 %v12598_v54, %v12600_v2 }
 0x540   : > { %9030 = vmatmul.msk.bf16.gmra.mxu0 %vm2070_vm3, %v6302_v31  ;;  %14330 = vst [vmem:[#allocation72_spill] sm:$0xff] %v12598_v54  ;;  %v6619_v31 = vpack.c.bf16 %v12518_v5, %v12489_v11  ;;  %v12629_v11 = vld [vmem:[#allocation3 + $0x111] sm:$0xff]  ;;  %v9195_v5 = vld [vmem:[%s13955_s7] sm:$0xff] }
 0x541   : > { %v12592_v28 = vpop.f32.mrf.mxu0  ;;  %14337 = vst [vmem:[#allocation79_spill] sm:$0xff] %v12629_v11  ;;  %8463 = vmatpush.bf16.msra.mxu2 %v9195_v5  ;;  %v6517_v5 = vadd.f32 %v12277_v33, %v12362_v39 }
 0x542   : > { %14327 = vst [vmem:[#allocation69_spill] sm:$0xff] %v12592_v28  ;;  %v12615_v28 = vld [vmem:[#allocation3 + $0xc0] sm:$0xff] }
 0x543   : > { %v5900_v48 = vpop.f32.mrf.mxu2  ;;  %14333 = vst [vmem:[#allocation75_spill] sm:$0xff] %v12615_v28 }
 0x544   : > { %v12594_v24 = vadd.f32 %v5900_v48, %v5696_v41  ;;  %v6945_v41 = vpack.c.bf16 %v12315_v56, %v12258_v42  ;;  %v6272_v48 = vld [vmem:[#allocation3 + $0x127] sm:$0xff] }
 0x546   : > { %14328 = vst [vmem:[#allocation70_spill] sm:$0xff] %v12594_v24  ;;  %v6271_v24 = vld [vmem:[#allocation3 + $0x11f] sm:$0xff] }
 0x547   : > { %v6303_v37 = vpack.c.bf16 %v6272_v48, %v6271_v24  ;;  %v6274_v48 = vld [vmem:[#allocation3 + $0x137] sm:$0xff] }
 0x548   : > { %v5699_v35 = vpop.f32.mrf.mxu1  ;;  %9005 = vmatmul.msk.bf16.gmra.mxu3 %vm2070_vm3, %v5976_v18 }
 0x54a   : > { %v12605_v7 = vpop.f32.mrf.mxu0 }
 0x54b   : > { %14331 = vst [vmem:[#allocation73_spill] sm:$0xff] %v12605_v7  ;;  %v6106_v47 = vpop.f32.mrf.mxu3 }
 0x54c   : > { %v12618_v7 = vadd.f32 %v6106_v47, %v11853_v20  ;;  %v12633_v20 = vld [vmem:[#allocation3 + $0x109] sm:$0xff] }
 0x54d   : > { %9046 = vmatmul.msk.bf16.gmra.mxu1 %vm2070_vm3, %v6619_v31  ;;  %v5977_v47 = vpack.c.bf16 %v12629_v11, %v12633_v20  ;;  %v12667_v11 = vld [vmem:[#allocation3 + $0x119] sm:$0xff] }
 0x54e   : > { %9071 = vmatmul.msk.bf16.gmra.mxu2 %vm2070_vm3, %v6945_v41 }
 0x54f   : > { %v5903_v18 = vpop.f32.mrf.mxu2 }
 0x550   : > { %v12622_v42 = vadd.f32 %v5903_v18, %v5699_v35  ;;  %v5701_v56 = vpop.f32.mrf.mxu1  ;;  %9031 = vmatmul.msk.bf16.gmra.mxu0 %vm2070_vm3, %v6303_v37  ;;  %v6620_v37 = vpack.c.bf16 %v12551_v34, %v12520_v44  ;;  %v6946_v35 = vpack.c.bf16 %v12405_v61, %v12308_v29  ;;  %v6273_v18 = vld [vmem:[#allocation3 + $0x12f] sm:$0xff] }
 0x551   : > { %v6304_v29 = vpack.c.bf16 %v6274_v48, %v6273_v18 }
 0x552   : > { %14334 = vst [vmem:[#allocation76_spill] sm:$0xff] %v12622_v42  ;;  %v12625_v31 = vpop.f32.mrf.mxu0  ;;  %v14342_v42 = vld [vmem:[#allocation15_spill] sm:$0xff] }
 0x553   : > { %14335 = vst [vmem:[#allocation77_spill] sm:$0xff] %v12625_v31  ;;  %v12627_v41 = vpop.f32.mrf.mxu3 }
 0x554   : > { %14336 = vst [vmem:[#allocation78_spill] sm:$0xff] %v12627_v41  ;;  %v12665_v41 = vld [vmem:[#allocation3 + $0x121] sm:$0xff] }
 0x555   : > { %v5978_v48 = vpack.c.bf16 %v12665_v41, %v12667_v11 }
 0x557   : > { %v5905_v45 = vpop.f32.mrf.mxu2 }
 0x558   : > { %v12631_v54 = vadd.f32 %v5905_v45, %v5701_v56  ;;  %9006 = vmatmul.msk.bf16.gmra.mxu3 %vm2070_vm3, %v5977_v47  ;;  %v12649_v47 = vld [vmem:[#allocation3 + $0xc8] sm:$0xff] }
 0x559   : > { %14340 = vst [vmem:[#allocation82_spill] sm:$0xff] %v12649_v47 }
 0x55a   : > { %14338 = vst [vmem:[#allocation80_spill] sm:$0xff] %v12631_v54  ;;  %v5704_v24 = vpop.f32.mrf.mxu1  ;;  %v12651_v54 = vld [vmem:[#allocation3 + $0xd0] sm:$0xff] }
 0x55b   : > { %v6111_v45 = vpop.f32.mrf.mxu3  ;;  %14341 = vst [vmem:[#allocation83_spill] sm:$0xff] %v12651_v54 }
 0x55c   : > { %v12654_v34 = vadd.f32 %v6111_v45, %v14342_v42  ;;  %v14347_v45 = vld [vmem:[#allocation37_spill] sm:$0xff] }
 0x55d   : > { %9047 = vmatmul.msk.bf16.gmra.mxu1 %vm2070_vm3, %v6620_v37  ;;  %v12644_v56 = vpop.f32.mrf.mxu0 }
 0x55e   : > { %9072 = vmatmul.msk.bf16.gmra.mxu2 %vm2070_vm3, %v6946_v35  ;;  %14339 = vst [vmem:[#allocation81_spill] sm:$0xff] %v12644_v56 }
 0x560   : > { %9032 = vmatmul.msk.bf16.gmra.mxu0 %vm2070_vm3, %v6304_v29  ;;  %v14348_v29 = vld [vmem:[#allocation45_spill] sm:$0xff] }
 0x561   : > { %v5908_v37 = vpop.f32.mrf.mxu2 }
 0x562   : > { %v12659_v35 = vadd.f32 %v5908_v37, %v5704_v24  ;;  %v5706_v44 = vpop.f32.mrf.mxu1  ;;  %v5796_v37 = vadd.f32 %v14348_v29, %v14347_v45 }
 0x563   : > { %v12661_v56 = vpop.f32.mrf.mxu3 }
 0x564   : > { %14343 = vst [vmem:[#allocation15_spill] sm:$0xff] %v12659_v35  ;;  %v6621_v35 = vpack.c.bf16 %v12585_v36, %v12553_v12  ;;  %v12704_v12 = vld [vmem:[#allocation3 + $0x131] sm:$0xff] }
 0x565   : > { %14344 = vst [vmem:[#allocation84_spill] sm:$0xff] %v12661_v56  ;;  %v12663_v31 = vpop.f32.mrf.mxu0  ;;  %v6276_v56 = vld [vmem:[#allocation3 + $0x147] sm:$0xff] }
 0x566   : > { %14345 = vst [vmem:[#allocation85_spill] sm:$0xff] %v12663_v31  ;;  %v6947_v31 = vpack.c.bf16 %v12440_v49, %v12403_v55 }
 0x568   : > { %9007 = vmatmul.msk.bf16.gmra.mxu3 %vm2070_vm3, %v5978_v48  ;;  %v12687_v48 = vld [vmem:[#allocation3 + $0xd8] sm:$0xff] }
 0x569   : > { %v5910_v42 = vpop.f32.mrf.mxu2  ;;  %14349 = vst [vmem:[#allocation37_spill] sm:$0xff] %v12687_v48 }
 0x56a   : > { %v12671_v18 = vadd.f32 %v5910_v42, %v5706_v44  ;;  %v6723_v24 = vpop.f32.mrf.mxu1  ;;  %v6192_v44 = vadd.f32 %v12377_v62, %v5796_v37  ;;  %v6275_v42 = vld [vmem:[#allocation3 + $0x13f] sm:$0xff] }
 0x56b   : > { %v6843_v61 = vadd.f32 %v6723_v24, %v6517_v5  ;;  %v6116_v33 = vpop.f32.mrf.mxu3  ;;  %v12689_v5 = vld [vmem:[#allocation3 + $0xe0] sm:$0xff]  ;;  %v6305_v29 = vpack.c.bf16 %v6276_v56, %v6275_v42 }
 0x56c   : > { %14346 = vst [vmem:[#allocation86_spill] sm:$0xff] %v12671_v18  ;;  %v14351_v24 = vld [vmem:[#allocation7_spill] sm:$0xff] }
 0x56d   : > { %9048 = vmatmul.msk.bf16.gmra.mxu1 %vm2070_vm3, %v6621_v35  ;;  %v12685_v39 = vpop.f32.mrf.mxu0  ;;  %14350 = vst [vmem:[#allocation45_spill] sm:$0xff] %v12689_v5  ;;  %v12692_v45 = vadd.f32 %v6116_v33, %v14351_v24  ;;  %v12706_v33 = vld [vmem:[#allocation3 + $0x129] sm:$0xff] }
 0x56e   : > { %9073 = vmatmul.msk.bf16.gmra.mxu2 %vm2070_vm3, %v6947_v31  ;;  %v6518_v31 = vadd.f32 %v12311_v10, %v6192_v44  ;;  %v5979_v42 = vpack.c.bf16 %v12704_v12, %v12706_v33 }
 0x570   : > { %9033 = vmatmul.msk.bf16.gmra.mxu0 %vm2070_vm3, %v6305_v29  ;;  %v6622_v29 = vpack.c.bf16 %v12613_v38, %v12587_v13 }
 0x571   : > { %v7049_v62 = vpop.f32.mrf.mxu2 }
 0x572   : > { %v12697_v49 = vadd.f32 %v7049_v62, %v6843_v61  ;;  %v6725_v35 = vpop.f32.mrf.mxu1  ;;  %v6519_v61 = vadd.f32 %v12342_v8, %v12408_v9  ;;  %v6948_v62 = vpack.c.bf16 %v12471_v16, %v12438_v0  ;;  %v12723_v8 = vld [vmem:[#allocation3 + $0xe8] sm:$0xff]  ;;  %v12725_v9 = vld [vmem:[#allocation3 + $0xf0] sm:$0xff]  ;;  %v12760_v16 = vld [vmem:[#allocation3 + $0xf8] sm:$0xff] }
 0x573   : > { %v6844_v37 = vadd.f32 %v6725_v35, %v6518_v31  ;;  %v12700_v18 = vpop.f32.mrf.mxu3  ;;  %v6278_v31 = vld [vmem:[#allocation3 + $0x157] sm:$0xff]  ;;  %14354 = vst [vmem:[#allocation88_spill] sm:$0xff] %v12723_v8 }
 0x574   : > { %14352 = vst [vmem:[#allocation7_spill] sm:$0xff] %v12697_v49 }
 0x575   : > { %v12702_v36 = vpop.f32.mrf.mxu0  ;;  %14355 = vst [vmem:[#allocation89_spill] sm:$0xff] %v12725_v9 }
 0x576   : > { %14359 = vst [vmem:[#allocation91_spill] sm:$0xff] %v12760_v16 }
 0x578   : > { %9008 = vmatmul.msk.bf16.gmra.mxu3 %vm2070_vm3, %v5979_v42  ;;  %v14356_v42 = vld [vmem:[#allocation8_spill] sm:$0xff] }
 0x579   : > { %v7051_v56 = vpop.f32.mrf.mxu2 }
 0x57a   : > { %v12710_v24 = vadd.f32 %v7051_v56, %v6844_v37  ;;  %v6728_v10 = vpop.f32.mrf.mxu1  ;;  %v6277_v56 = vld [vmem:[#allocation3 + $0x14f] sm:$0xff] }
 0x57b   : > { %v6845_v44 = vadd.f32 %v6728_v10, %v6519_v61  ;;  %v6121_v35 = vpop.f32.mrf.mxu3  ;;  %v6306_v10 = vpack.c.bf16 %v6278_v31, %v6277_v56  ;;  %v12743_v31 = vld [vmem:[#allocation3 + $0x139] sm:$0xff] }
 0x57c   : > { %14353 = vst [vmem:[#allocation87_spill] sm:$0xff] %v12710_v24  ;;  %v12728_v61 = vadd.f32 %v6121_v35, %v14356_v42  ;;  %v12741_v35 = vld [vmem:[#allocation3 + $0x141] sm:$0xff] }
 0x57d   : > { %9049 = vmatmul.msk.bf16.gmra.mxu1 %vm2070_vm3, %v6622_v29  ;;  %v12721_v37 = vpop.f32.mrf.mxu0  ;;  %v5980_v42 = vpack.c.bf16 %v12741_v35, %v12743_v31 }
 0x57e   : > { %9074 = vmatmul.msk.bf16.gmra.mxu2 %vm2070_vm3, %v6948_v62  ;;  %v6520_v62 = vadd.f32 %v12388_v4, %v12429_v27 }
 0x580   : > { %9034 = vmatmul.msk.bf16.gmra.mxu0 %vm2070_vm3, %v6306_v10 }
 0x581   : > { %v7054_v0 = vpop.f32.mrf.mxu2 }
 0x582   : > { %v12733_v29 = vadd.f32 %v7054_v0, %v6845_v44  ;;  %v6730_v55 = vpop.f32.mrf.mxu1  ;;  %v6521_v44 = vadd.f32 %v12416_v43, %v12443_v53  ;;  %v6949_v0 = vpack.c.bf16 %v12503_v21, %v12469_v52  ;;  %v12762_v43 = vld [vmem:[#allocation3 + $0x100] sm:$0xff]  ;;  %v14361_v53 = vld [vmem:[#allocation25_spill] sm:$0xff]  ;;  %v12798_v52 = vld [vmem:[#allocation3 + $0x108] sm:$0xff] }
 0x583   : > { %v6846_v24 = vadd.f32 %v6730_v55, %v6520_v62  ;;  %v12737_v49 = vpop.f32.mrf.mxu3  ;;  %v6623_v55 = vpack.c.bf16 %v12649_v47, %v12615_v28  ;;  %14360 = vst [vmem:[#allocation92_spill] sm:$0xff] %v12762_v43  ;;  %v7217_v28 = vld [vmem:[#allocation3 + $0x37] sm:$0xff] }
 0x584   : > { %14357 = vst [vmem:[#allocation8_spill] sm:$0xff] %v12733_v29 }
 0x585   : > { %v12739_v38 = vpop.f32.mrf.mxu0  ;;  %14364 = vst [vmem:[#allocation94_spill] sm:$0xff] %v12798_v52 }
 0x588   : > { %9009 = vmatmul.msk.bf16.gmra.mxu3 %vm2070_vm3, %v5980_v42 }
 0x589   : > { %v7056_v56 = vpop.f32.mrf.mxu2 }
 0x58a   : > { %v12747_v10 = vadd.f32 %v7056_v56, %v6846_v24  ;;  %v6733_v4 = vpop.f32.mrf.mxu1  ;;  %v6279_v56 = vld [vmem:[#allocation3 + $0x15f] sm:$0xff] }
 0x58b   : > { %v6847_v27 = vadd.f32 %v6733_v4, %v6521_v44  ;;  %v6126_v62 = vpop.f32.mrf.mxu3  ;;  %v6307_v44 = vpack.c.bf16 %v12264_v26, %v6279_v56  ;;  %v12781_v26 = vld [vmem:[#allocation3 + $0x149] sm:$0xff] }
 0x58c   : > { %14358 = vst [vmem:[#allocation90_spill] sm:$0xff] %v12747_v10  ;;  %v12765_v42 = vadd.f32 %v6126_v62, %v14361_v53  ;;  %v12779_v62 = vld [vmem:[#allocation3 + $0x151] sm:$0xff] }
 0x58d   : > { %9050 = vmatmul.msk.bf16.gmra.mxu1 %vm2070_vm3, %v6623_v55  ;;  %v12758_v24 = vpop.f32.mrf.mxu0  ;;  %v6522_v55 = vadd.f32 %v12434_v17, %v12462_v1  ;;  %v5981_v53 = vpack.c.bf16 %v12779_v62, %v12781_v26 }
 0x58e   : > { %9075 = vmatmul.msk.bf16.gmra.mxu2 %vm2070_vm3, %v6949_v0 }
 0x590   : > { %9035 = vmatmul.msk.bf16.gmra.mxu0 %vm2070_vm3, %v6307_v44 }
 0x591   : > { %v7059_v21 = vpop.f32.mrf.mxu2 }
 0x592   : > { %v12771_v4 = vadd.f32 %v7059_v21, %v6847_v27  ;;  %v6735_v0 = vpop.f32.mrf.mxu1  ;;  %v6523_v27 = vadd.f32 %v12447_v63, %v12474_v14  ;;  %v6624_v21 = vpack.c.bf16 %v12687_v48, %v12651_v54  ;;  %v12800_v63 = vld [vmem:[#allocation3 + $0x110] sm:$0xff] }
 0x593   : > { %v6848_v10 = vadd.f32 %v6735_v0, %v6522_v55  ;;  %v12775_v29 = vpop.f32.mrf.mxu3  ;;  %v6950_v55 = vpack.c.bf16 %v12534_v3, %v12499_v25  ;;  %14365 = vst [vmem:[#allocation95_spill] sm:$0xff] %v12800_v63  ;;  %v12836_v25 = vld [vmem:[#allocation3 + $0x118] sm:$0xff] }
 0x594   : > { %14362 = vst [vmem:[#allocation25_spill] sm:$0xff] %v12771_v4 }
 0x595   : > { %v12777_v47 = vpop.f32.mrf.mxu0  ;;  %14368 = vst [vmem:[#allocation98_spill] sm:$0xff] %v12836_v25 }
 0x598   : > { %9010 = vmatmul.msk.bf16.gmra.mxu3 %vm2070_vm3, %v5981_v53 }
 0x599   : > { %v7061_v56 = vpop.f32.mrf.mxu2 }
 0x59a   : > { %v12785_v44 = vadd.f32 %v7061_v56, %v6848_v10  ;;  %v6738_v17 = vpop.f32.mrf.mxu1  ;;  %v6281_v56 = vld [vmem:[#allocation3 + $0x16f] sm:$0xff] }
 0x59b   : > { %v6849_v1 = vadd.f32 %v6738_v17, %v6523_v27  ;;  %v6131_v0 = vpop.f32.mrf.mxu3  ;;  %v6308_v53 = vpack.c.bf16 %v12349_v19, %v6281_v56  ;;  %v6524_v17 = vadd.f32 %v12465_v60, %v12494_v57  ;;  %v12819_v19 = vld [vmem:[#allocation3 + $0x159] sm:$0xff] }
 0x59c   : > { %14363 = vst [vmem:[#allocation93_spill] sm:$0xff] %v12785_v44  ;;  %v12803_v14 = vadd.f32 %v6131_v0, %v12127_v22  ;;  %v12817_v22 = vld [vmem:[#allocation3 + $0x161] sm:$0xff] }
 0x59d   : > { %9051 = vmatmul.msk.bf16.gmra.mxu1 %vm2070_vm3, %v6624_v21  ;;  %v12796_v10 = vpop.f32.mrf.mxu0  ;;  %v5982_v56 = vpack.c.bf16 %v12817_v22, %v12819_v19 }
 0x59e   : > { %9076 = vmatmul.msk.bf16.gmra.mxu2 %vm2070_vm3, %v6950_v55 }
 0x5a0   : > { %9036 = vmatmul.msk.bf16.gmra.mxu0 %vm2070_vm3, %v6308_v53 }
 0x5a1   : > { %v7064_v3 = vpop.f32.mrf.mxu2 }
 0x5a2   : > { %v12809_v27 = vadd.f32 %v7064_v3, %v6849_v1  ;;  %v6740_v21 = vpop.f32.mrf.mxu1  ;;  %v6525_v1 = vadd.f32 %v12478_v59, %v12506_v15  ;;  %v6625_v3 = vpack.c.bf16 %v12723_v8, %v12689_v5  ;;  %v12838_v59 = vld [vmem:[#allocation3 + $0x120] sm:$0xff] }
 0x5a3   : > { %v6850_v55 = vadd.f32 %v6740_v21, %v6524_v17  ;;  %v12813_v44 = vpop.f32.mrf.mxu3  ;;  %v6951_v17 = vpack.c.bf16 %v12567_v23, %v12532_v50  ;;  %v6284_v21 = vld [vmem:[#allocation3 + $0x187] sm:$0xff]  ;;  %14369 = vst [vmem:[#allocation99_spill] sm:$0xff] %v12838_v59 }
 0x5a4   : > { %14366 = vst [vmem:[#allocation96_spill] sm:$0xff] %v12809_v27 }
 0x5a5   : > { %v12815_v4 = vpop.f32.mrf.mxu0 }
 0x5a8   : > { %9011 = vmatmul.msk.bf16.gmra.mxu3 %vm2070_vm3, %v5982_v56  ;;  %v6309_v56 = vpack.c.bf16 %v6284_v21, %v12351_v6  ;;  %v12857_v6 = vld [vmem:[#allocation3 + $0x169] sm:$0xff] }
 0x5a9   : > { %v7066_v0 = vpop.f32.mrf.mxu2 }
 0x5aa   : > { %v12823_v53 = vadd.f32 %v7066_v0, %v6850_v55  ;;  %v6743_v60 = vpop.f32.mrf.mxu1 }
 0x5ab   : > { %v6851_v57 = vadd.f32 %v6743_v60, %v6525_v1  ;;  %v6136_v55 = vpop.f32.mrf.mxu3  ;;  %v6526_v60 = vadd.f32 %v12497_v40, %v12527_v30 }
 0x5ac   : > { %14367 = vst [vmem:[#allocation97_spill] sm:$0xff] %v12823_v53  ;;  %v12841_v15 = vadd.f32 %v6136_v55, %v12190_v46  ;;  %v12855_v46 = vld [vmem:[#allocation3 + $0x171] sm:$0xff] }
 0x5ad   : > { %9052 = vmatmul.msk.bf16.gmra.mxu1 %vm2070_vm3, %v6625_v3  ;;  %v12834_v0 = vpop.f32.mrf.mxu0  ;;  %v5983_v55 = vpack.c.bf16 %v12855_v46, %v12857_v6 }
 0x5ae   : > { %9077 = vmatmul.msk.bf16.gmra.mxu2 %vm2070_vm3, %v6951_v17 }
 0x5b0   : > { %9037 = vmatmul.msk.bf16.gmra.mxu0 %vm2070_vm3, %v6309_v56 }
 0x5b1   : > { %v7069_v23 = vpop.f32.mrf.mxu2 }
 0x5b2   : > { %v12847_v1 = vadd.f32 %v7069_v23, %v6851_v57  ;;  %v6745_v3 = vpop.f32.mrf.mxu1  ;;  %v14373_v57 = vld [vmem:[#allocation59_spill] sm:$0xff]  ;;  %v14374_v23 = vld [vmem:[#allocation54_spill] sm:$0xff] }
 0x5b3   : > { %v6852_v17 = vadd.f32 %v6745_v3, %v6526_v60  ;;  %v12851_v53 = vpop.f32.mrf.mxu3  ;;  %v6527_v50 = vadd.f32 %v14374_v23, %v14373_v57  ;;  %v6626_v60 = vpack.c.bf16 %v12760_v16, %v12725_v9  ;;  %v6952_v3 = vpack.c.bf16 %v12600_v2, %v12565_v32  ;;  %v12874_v57 = vld [vmem:[#allocation3 + $0x128] sm:$0xff]  ;;  %v12876_v23 = vld [vmem:[#allocation3 + $0x130] sm:$0xff] }
 0x5b4   : > { %14370 = vst [vmem:[#allocation100_spill] sm:$0xff] %v12847_v1  ;;  %v6286_v1 = vld [vmem:[#allocation3 + $0x197] sm:$0xff] }
 0x5b5   : > { %v12853_v27 = vpop.f32.mrf.mxu0  ;;  %14376 = vst [vmem:[#allocation54_spill] sm:$0xff] %v12874_v57 }
 0x5b6   : > { %14371 = vst [vmem:[#allocation101_spill] sm:$0xff] %v12853_v27 }
 0x5b7   : > { %14377 = vst [vmem:[#allocation103_spill] sm:$0xff] %v12876_v23 }
 0x5b8   : > { %9012 = vmatmul.msk.bf16.gmra.mxu3 %vm2070_vm3, %v5983_v55 }
 0x5b9   : > { %v7071_v21 = vpop.f32.mrf.mxu2 }
 0x5ba   : > { %v12861_v56 = vadd.f32 %v7071_v21, %v6852_v17  ;;  %v6748_v40 = vpop.f32.mrf.mxu1 }
 0x5bb   : > { %v6853_v30 = vadd.f32 %v6748_v40, %v6527_v50  ;;  %v6141_v17 = vpop.f32.mrf.mxu3  ;;  %v14378_v50 = vld [vmem:[#allocation24_spill] sm:$0xff] }
 0x5bc   : > { %14372 = vst [vmem:[#allocation102_spill] sm:$0xff] %v12861_v56  ;;  %v6285_v56 = vld [vmem:[#allocation3 + $0x18f] sm:$0xff]  ;;  %v12879_v55 = vadd.f32 %v6141_v17, %v14378_v50  ;;  %v12892_v17 = vld [vmem:[#allocation3 + $0x181] sm:$0xff] }
 0x5bd   : > { %9053 = vmatmul.msk.bf16.gmra.mxu1 %vm2070_vm3, %v6626_v60  ;;  %v12872_v21 = vpop.f32.mrf.mxu0  ;;  %v6310_v40 = vpack.c.bf16 %v6286_v1, %v6285_v56  ;;  %v12894_v1 = vld [vmem:[#allocation3 + $0x179] sm:$0xff] }
 0x5be   : > { %9078 = vmatmul.msk.bf16.gmra.mxu2 %vm2070_vm3, %v6952_v3  ;;  %14375 = vst [vmem:[#allocation59_spill] sm:$0xff] %v12872_v21  ;;  %v14380_v3 = vld [vmem:[#allocation58_spill] sm:$0xff]  ;;  %v5984_v50 = vpack.c.bf16 %v12892_v17, %v12894_v1  ;;  %v14388_v21 = vld [vmem:[#allocation71_spill] sm:$0xff] }
 0x5bf   : > { %v6528_v16 = vadd.f32 %v14380_v3, %v12558_v58 }
 0x5c0   : > { %9038 = vmatmul.msk.bf16.gmra.mxu0 %vm2070_vm3, %v6310_v40 }
 0x5c1   : > { %v7074_v2 = vpop.f32.mrf.mxu2 }
 0x5c2   : > { %v12884_v60 = vadd.f32 %v7074_v2, %v6853_v30  ;;  %v6750_v8 = vpop.f32.mrf.mxu1  ;;  %v14384_v30 = vld [vmem:[#allocation61_spill] sm:$0xff] }
 0x5c3   : > { %v6854_v9 = vadd.f32 %v6750_v8, %v6528_v16  ;;  %v12888_v48 = vpop.f32.mrf.mxu3  ;;  %v6529_v2 = vadd.f32 %v14384_v30, %v12570_v51  ;;  %v14385_v8 = vld [vmem:[#allocation38_spill] sm:$0xff]  ;;  %v14391_v30 = vld [vmem:[#allocation17_spill] sm:$0xff] }
 0x5c4   : > { %14379 = vst [vmem:[#allocation24_spill] sm:$0xff] %v12884_v60  ;;  %v14386_v16 = vld [vmem:[#allocation42_spill] sm:$0xff]  ;;  %v6627_v60 = vpack.c.bf16 %v12798_v52, %v12762_v43 }
 0x5c5   : > { %14381 = vst [vmem:[#allocation58_spill] sm:$0xff] %v12888_v48  ;;  %v12890_v5 = vpop.f32.mrf.mxu0  ;;  %v5826_v3 = vadd.f32 %v14386_v16, %v14385_v8  ;;  %v14398_v52 = vld [vmem:[#allocation26_spill] sm:$0xff] }
 0x5c6   : > { %14382 = vst [vmem:[#allocation104_spill] sm:$0xff] %v12890_v5  ;;  %v14387_v5 = vld [vmem:[#allocation72_spill] sm:$0xff]  ;;  %v14399_v43 = vld [vmem:[#allocation22_spill] sm:$0xff] }
 0x5c7   : > { %v6953_v54 = vpack.c.bf16 %v12633_v20, %v14387_v5  ;;  %v6204_v27 = vadd.f32 %v14388_v21, %v5826_v3  ;;  %v14393_v5 = vld [vmem:[#allocation36_spill] sm:$0xff]  ;;  %v14394_v21 = vld [vmem:[#allocation35_spill] sm:$0xff] }
 0x5c8   : > { %9013 = vmatmul.msk.bf16.gmra.mxu3 %vm2070_vm3, %v5984_v50  ;;  %v12916_v50 = vld [vmem:[#allocation3 + $0x140] sm:$0xff]  ;;  %v14395_v8 = vpack.c.bf16 %v14393_v5, %v14394_v21 }
 0x5c9   : > { %v7076_v56 = vpop.f32.mrf.mxu2 }
 0x5ca   : > { %v12898_v40 = vadd.f32 %v7076_v56, %v6854_v9  ;;  %v6753_v58 = vpop.f32.mrf.mxu1  ;;  %v12914_v56 = vld [vmem:[#allocation3 + $0x138] sm:$0xff] }
 0x5cb   : > { %v6855_v32 = vadd.f32 %v6753_v58, %v6529_v2  ;;  %v6146_v51 = vpop.f32.mrf.mxu3  ;;  %14390 = vst [vmem:[#allocation38_spill] sm:$0xff] %v12914_v56 }
 0x5cc   : > { %14383 = vst [vmem:[#allocation105_spill] sm:$0xff] %v12898_v40  ;;  %v12919_v2 = vadd.f32 %v6146_v51, %v14391_v30 }
 0x5cd   : > { %9054 = vmatmul.msk.bf16.gmra.mxu1 %vm2070_vm3, %v6627_v60  ;;  %v12912_v9 = vpop.f32.mrf.mxu0  ;;  %v14397_v60 = vld [vmem:[#allocation65_spill] sm:$0xff] }
 0x5ce   : > { %9079 = vmatmul.msk.bf16.gmra.mxu2 %vm2070_vm3, %v6953_v54  ;;  %14389 = vst [vmem:[#allocation61_spill] sm:$0xff] %v12912_v9  ;;  %v6530_v16 = vadd.f32 %v14397_v60, %v6204_v27  ;;  %v5871_v9 = vadd.f32 %v14399_v43, %v14398_v52  ;;  %v14403_v60 = vld [vmem:[#allocation47_spill] sm:$0xff] }
 0x5cf   : > { %14392 = vst [vmem:[#allocation42_spill] sm:$0xff] %v12919_v2  ;;  %v7218_v2 = vld [vmem:[#allocation3 + $0x3f] sm:$0xff] }
 0x5d0   : > { %9115 = vmatmul.msk.bf16.vlgmr.msra.gmra.mxu0 %vm2070_vm3, %v14395_v8  ;;  %v7265_v5 = vpack.c.bf16 %v7218_v2, %v7217_v28  ;;  %v14402_v8 = vld [vmem:[#allocation43_spill] sm:$0xff]  ;;  %v12954_v2 = vld [vmem:[#allocation3 + $0x150] sm:$0xff] }
 0x5d1   : > { %v7079_v20 = vpop.f32.mrf.mxu2  ;;  %v5831_v43 = vadd.f32 %v14403_v60, %v14402_v8  ;;  %v14408_v8 = vld [vmem:[#allocation29_spill] sm:$0xff] }
 0x5d2   : > { %v12927_v54 = vadd.f32 %v7079_v20, %v6855_v32  ;;  %v6755_v3 = vpop.f32.mrf.mxu1  ;;  %v14401_v32 = vld [vmem:[#allocation66_spill] sm:$0xff] }
 0x5d3   : > { %v6856_v40 = vadd.f32 %v6755_v3, %v6530_v16  ;;  %v6148_v51 = vpop.f32.mrf.mxu3  ;;  %v6531_v20 = vadd.f32 %v14401_v32, %v12618_v7  ;;  %v6628_v16 = vpack.c.bf16 %v12836_v25, %v12800_v63 }
 0x5d4   : > { %14396 = vst [vmem:[#allocation72_spill] sm:$0xff] %v12927_v54  ;;  %v12934_v58 = vadd.f32 %v6148_v51, %v5871_v9  ;;  %v14404_v9 = vld [vmem:[#allocation79_spill] sm:$0xff]  ;;  %v14405_v51 = vld [vmem:[#allocation78_spill] sm:$0xff] }
 0x5d5   : > { %v12932_v30 = vpop.f32.mrf.mxu0  ;;  %v6954_v3 = vpack.c.bf16 %v12667_v11, %v14404_v9  ;;  %v6206_v28 = vadd.f32 %v14405_v51, %v5831_v43 }
 0x5d8   : > { %9090 = vmatmul.msk.bf16.vlgmr.msra.gmra.mxu3 %vm2070_vm3, %v7265_v5  ;;  %v14406_v5 = vld [vmem:[#allocation34_spill] sm:$0xff] }
 0x5d9   : > { %v7081_v48 = vpop.f32.mrf.mxu2 }
 0x5da   : > { %v12936_v21 = vadd.f32 %v7081_v48, %v6856_v40  ;;  %v6758_v27 = vpop.f32.mrf.mxu1  ;;  %v12952_v40 = vld [vmem:[#allocation3 + $0x148] sm:$0xff] }
 0x5db   : > { %v6857_v52 = vadd.f32 %v6758_v27, %v6531_v20  ;;  %v6151_v7 = vpop.f32.mrf.mxu3  ;;  %v14407_v27 = vld [vmem:[#allocation46_spill] sm:$0xff] }
 0x5dc   : > { %14400 = vst [vmem:[#allocation71_spill] sm:$0xff] %v12936_v21  ;;  %v12957_v32 = vadd.f32 %v6151_v7, %v14406_v5  ;;  %v14409_v60 = vpack.c.bf16 %v14407_v27, %v14408_v8  ;;  %v7220_v7 = vld [vmem:[#allocation3 + $0x4f] sm:$0xff]  ;;  %v7219_v5 = vld [vmem:[#allocation3 + $0x47] sm:$0xff] }
 0x5dd   : > { %9055 = vmatmul.msk.bf16.gmra.mxu1 %vm2070_vm3, %v6628_v16  ;;  %v12950_v48 = vpop.f32.mrf.mxu0  ;;  %v14411_v16 = vld [vmem:[#allocation69_spill] sm:$0xff]  ;;  %v7266_v20 = vpack.c.bf16 %v7220_v7, %v7219_v5  ;;  %v14418_v5 = vld [vmem:[#allocation31_spill] sm:$0xff] }
 0x5de   : > { %9080 = vmatmul.msk.bf16.gmra.mxu2 %vm2070_vm3, %v6954_v3  ;;  %v6532_v9 = vadd.f32 %v14411_v16, %v6206_v28  ;;  %v14413_v27 = vld [vmem:[#allocation73_spill] sm:$0xff]  ;;  %v14415_v28 = vld [vmem:[#allocation10_spill] sm:$0xff] }
 0x5df   : > { %v6533_v8 = vadd.f32 %v14413_v27, %v12654_v34 }
 0x5e0   : > { %9116 = vmatmul.msk.bf16.gmra.mxu0 %vm2070_vm3, %v14409_v60 }
 0x5e1   : > { %v7084_v11 = vpop.f32.mrf.mxu2 }
 0x5e2   : > { %v12965_v43 = vadd.f32 %v7084_v11, %v6857_v52  ;;  %v6760_v3 = vpop.f32.mrf.mxu1  ;;  %v14414_v52 = vld [vmem:[#allocation32_spill] sm:$0xff] }
 0x5e3   : > { %v6858_v51 = vadd.f32 %v6760_v3, %v6532_v9  ;;  %v12968_v21 = vpop.f32.mrf.mxu3  ;;  %v5836_v11 = vadd.f32 %v14415_v28, %v14414_v52  ;;  %v6629_v9 = vpack.c.bf16 %v12874_v57, %v12838_v59  ;;  %v6955_v3 = vpack.c.bf16 %v12706_v33, %v12665_v41  ;;  %v14419_v33 = vld [vmem:[#allocation44_spill] sm:$0xff]  ;;  %v14423_v28 = vld [vmem:[#allocation77_spill] sm:$0xff] }
 0x5e4   : > { %14410 = vst [vmem:[#allocation17_spill] sm:$0xff] %v12965_v43  ;;  %v14416_v43 = vld [vmem:[#allocation84_spill] sm:$0xff] }
 0x5e5   : > { %v12970_v54 = vpop.f32.mrf.mxu0  ;;  %v6208_v7 = vadd.f32 %v14416_v43, %v5836_v11  ;;  %v14420_v43 = vld [vmem:[#allocation41_spill] sm:$0xff] }
 0x5e7   : > { %v6534_v11 = vadd.f32 %v14423_v28, %v6208_v7  ;;  %v14428_v7 = vld [vmem:[#allocation20_spill] sm:$0xff] }
 0x5e8   : > { %9091 = vmatmul.msk.bf16.gmra.mxu3 %vm2070_vm3, %v7266_v20  ;;  %v12988_v20 = vld [vmem:[#allocation3 + $0x158] sm:$0xff] }
 0x5e9   : > { %v7086_v25 = vpop.f32.mrf.mxu2 }
 0x5ea   : > { %v12972_v63 = vadd.f32 %v7086_v25, %v6858_v51  ;;  %v6763_v60 = vpop.f32.mrf.mxu1  ;;  %v12990_v51 = vld [vmem:[#allocation3 + $0x160] sm:$0xff] }
 0x5eb   : > { %v6859_v16 = vadd.f32 %v6763_v60, %v6533_v8  ;;  %v6156_v34 = vpop.f32.mrf.mxu3  ;;  %v14421_v60 = vpack.c.bf16 %v14419_v33, %v14420_v43  ;;  %v14426_v33 = vld [vmem:[#allocation81_spill] sm:$0xff] }
 0x5ec   : > { %14412 = vst [vmem:[#allocation36_spill] sm:$0xff] %v12972_v63  ;;  %v12993_v27 = vadd.f32 %v6156_v34, %v14418_v5  ;;  %v7222_v34 = vld [vmem:[#allocation3 + $0x5f] sm:$0xff]  ;;  %v7221_v5 = vld [vmem:[#allocation3 + $0x57] sm:$0xff]  ;;  %v6535_v43 = vadd.f32 %v14426_v33, %v12692_v45 }
 0x5ed   : > { %9056 = vmatmul.msk.bf16.gmra.mxu1 %vm2070_vm3, %v6629_v9  ;;  %v12986_v25 = vpop.f32.mrf.mxu0  ;;  %v7267_v8 = vpack.c.bf16 %v7222_v34, %v7221_v5  ;;  %v14430_v5 = vld [vmem:[#allocation49_spill] sm:$0xff] }
 0x5ee   : > { %9081 = vmatmul.msk.bf16.gmra.mxu2 %vm2070_vm3, %v6955_v3  ;;  %14417 = vst [vmem:[#allocation35_spill] sm:$0xff] %v12986_v25 }
 0x5f0   : > { %9117 = vmatmul.msk.bf16.gmra.mxu0 %vm2070_vm3, %v14421_v60 }
 0x5f1   : > { %v7089_v41 = vpop.f32.mrf.mxu2 }
 0x5f2   : > { %v13001_v52 = vadd.f32 %v7089_v41, %v6859_v16  ;;  %v6765_v9 = vpop.f32.mrf.mxu1  ;;  %v14427_v16 = vld [vmem:[#allocation13_spill] sm:$0xff] }
 0x5f3   : > { %v6860_v3 = vadd.f32 %v6765_v9, %v6534_v11  ;;  %v13004_v63 = vpop.f32.mrf.mxu3  ;;  %v5841_v41 = vadd.f32 %v14428_v7, %v14427_v16  ;;  %v6630_v11 = vpack.c.bf16 %v12914_v56, %v12876_v23  ;;  %v6956_v9 = vpack.c.bf16 %v12743_v31, %v12704_v12  ;;  %v14431_v31 = vld [vmem:[#allocation48_spill] sm:$0xff]  ;;  %v14435_v7 = vld [vmem:[#allocation85_spill] sm:$0xff] }
 0x5f4   : > { %14422 = vst [vmem:[#allocation65_spill] sm:$0xff] %v13001_v52 }
 0x5f5   : > { %v13006_v57 = vpop.f32.mrf.mxu0  ;;  %v6210_v34 = vadd.f32 %v12700_v18, %v5841_v41  ;;  %v14432_v18 = vld [vmem:[#allocation33_spill] sm:$0xff] }
 0x5f6   : > { %14424 = vst [vmem:[#allocation26_spill] sm:$0xff] %v13006_v57 }
 0x5f7   : > { %v6536_v41 = vadd.f32 %v14435_v7, %v6210_v34  ;;  %v14438_v34 = vld [vmem:[#allocation14_spill] sm:$0xff]  ;;  %v6631_v7 = vpack.c.bf16 %v12952_v40, %v12916_v50 }
 0x5f8   : > { %9092 = vmatmul.msk.bf16.gmra.mxu3 %vm2070_vm3, %v7267_v8  ;;  %v13024_v8 = vld [vmem:[#allocation3 + $0x168] sm:$0xff] }
 0x5f9   : > { %v7091_v59 = vpop.f32.mrf.mxu2 }
 0x5fa   : > { %v13008_v25 = vadd.f32 %v7091_v59, %v6860_v3  ;;  %v6768_v60 = vpop.f32.mrf.mxu1  ;;  %v13026_v3 = vld [vmem:[#allocation3 + $0x170] sm:$0xff] }
 0x5fb   : > { %v6861_v28 = vadd.f32 %v6768_v60, %v6535_v43  ;;  %v6161_v45 = vpop.f32.mrf.mxu3  ;;  %v14433_v60 = vpack.c.bf16 %v14431_v31, %v14432_v18  ;;  %v7223_v43 = vld [vmem:[#allocation3 + $0x67] sm:$0xff]  ;;  %v14439_v31 = vld [vmem:[#allocation9_spill] sm:$0xff] }
 0x5fc   : > { %14425 = vst [vmem:[#allocation22_spill] sm:$0xff] %v13008_v25  ;;  %v13029_v33 = vadd.f32 %v6161_v45, %v14430_v5  ;;  %v7224_v45 = vld [vmem:[#allocation3 + $0x6f] sm:$0xff]  ;;  %v14436_v5 = vld [vmem:[#allocation50_spill] sm:$0xff]  ;;  %v5846_v18 = vadd.f32 %v14439_v31, %v14438_v34 }
 0x5fd   : > { %9057 = vmatmul.msk.bf16.gmra.mxu1 %vm2070_vm3, %v6630_v11  ;;  %v13022_v59 = vpop.f32.mrf.mxu0 }
 0x5fe   : > { %9082 = vmatmul.msk.bf16.gmra.mxu2 %vm2070_vm3, %v6956_v9  ;;  %14429 = vst [vmem:[#allocation66_spill] sm:$0xff] %v13022_v59  ;;  %v7268_v59 = vpack.c.bf16 %v7224_v45, %v7223_v43  ;;  %v6212_v43 = vadd.f32 %v12737_v49, %v5846_v18  ;;  %v14442_v49 = vld [vmem:[#allocation51_spill] sm:$0xff] }
 0x5ff   : > { %v7226_v18 = vld [vmem:[#allocation3 + $0x7f] sm:$0xff] }
 0x600   : > { %9118 = vmatmul.msk.bf16.gmra.mxu0 %vm2070_vm3, %v14433_v60 }
 0x601   : > { %v7094_v12 = vpop.f32.mrf.mxu2 }
 0x602   : > { %v13037_v16 = vadd.f32 %v7094_v12, %v6861_v28  ;;  %v6770_v11 = vpop.f32.mrf.mxu1  ;;  %v6537_v28 = vadd.f32 %v12685_v39, %v12728_v61  ;;  %v13059_v61 = vld [vmem:[#allocation3 + $0x178] sm:$0xff] }
 0x603   : > { %v6862_v9 = vadd.f32 %v6770_v11, %v6536_v41  ;;  %v6163_v25 = vpop.f32.mrf.mxu3 }
 0x604   : > { %14434 = vst [vmem:[#allocation43_spill] sm:$0xff] %v13037_v16  ;;  %v13043_v56 = vadd.f32 %v6163_v25, %v14436_v5  ;;  %v6957_v25 = vpack.c.bf16 %v12781_v26, %v12741_v35  ;;  %v14441_v26 = vld [vmem:[#allocation52_spill] sm:$0xff] }
 0x605   : > { %v13040_v52 = vpop.f32.mrf.mxu0  ;;  %v14443_v45 = vpack.c.bf16 %v14441_v26, %v14442_v49 }
 0x608   : > { %9093 = vmatmul.msk.bf16.gmra.mxu3 %vm2070_vm3, %v7268_v59  ;;  %v14440_v59 = vld [vmem:[#allocation53_spill] sm:$0xff] }
 0x609   : > { %v7096_v23 = vpop.f32.mrf.mxu2 }
 0x60a   : > { %v13045_v57 = vadd.f32 %v7096_v23, %v6862_v9  ;;  %v6773_v12 = vpop.f32.mrf.mxu1  ;;  %v13061_v23 = vld [vmem:[#allocation3 + $0x180] sm:$0xff] }
 0x60b   : > { %v6863_v60 = vadd.f32 %v6773_v12, %v6537_v28  ;;  %v6166_v39 = vpop.f32.mrf.mxu3  ;;  %v6538_v28 = vadd.f32 %v12702_v36, %v6212_v43  ;;  %v14446_v36 = vld [vmem:[#allocation18_spill] sm:$0xff]  ;;  %v14447_v43 = vld [vmem:[#allocation11_spill] sm:$0xff] }
 0x60c   : > { %14437 = vst [vmem:[#allocation47_spill] sm:$0xff] %v13045_v57  ;;  %v13064_v41 = vadd.f32 %v6166_v39, %v14440_v59  ;;  %v7225_v39 = vld [vmem:[#allocation3 + $0x77] sm:$0xff]  ;;  %v5851_v26 = vadd.f32 %v14447_v43, %v14446_v36 }
 0x60d   : > { %9058 = vmatmul.msk.bf16.gmra.mxu1 %vm2070_vm3, %v6631_v7  ;;  %v13066_v11 = vpop.f32.mrf.mxu0  ;;  %v14444_v7 = vld [vmem:[#allocation57_spill] sm:$0xff]  ;;  %v7269_v57 = vpack.c.bf16 %v7226_v18, %v7225_v39  ;;  %v14449_v39 = vld [vmem:[#allocation56_spill] sm:$0xff] }
 0x60e   : > { %9083 = vmatmul.msk.bf16.gmra.mxu2 %vm2070_vm3, %v6957_v25 }
 0x610   : > { %9119 = vmatmul.msk.bf16.gmra.mxu0 %vm2070_vm3, %v14443_v45  ;;  %v6632_v45 = vpack.c.bf16 %v12988_v20, %v12954_v2 }
 0x611   : > { %v7099_v35 = vpop.f32.mrf.mxu2 }
 0x612   : > { %v13074_v5 = vadd.f32 %v7099_v35, %v6863_v60  ;;  %v6775_v12 = vpop.f32.mrf.mxu1  ;;  %v6539_v60 = vadd.f32 %v12721_v37, %v12765_v42  ;;  %v13096_v42 = vld [vmem:[#allocation3 + $0x188] sm:$0xff] }
 0x613   : > { %v6864_v34 = vadd.f32 %v6775_v12, %v6538_v28  ;;  %v6168_v31 = vpop.f32.mrf.mxu3  ;;  %v6958_v28 = vpack.c.bf16 %v12819_v19, %v12779_v62  ;;  %v6214_v12 = vadd.f32 %v12775_v29, %v5851_v26  ;;  %v14450_v62 = vld [vmem:[#allocation55_spill] sm:$0xff]  ;;  %v7228_v26 = vld [vmem:[#allocation3 + $0x8f] sm:$0xff] }
 0x614   : > { %v13078_v25 = vadd.f32 %v6168_v31, %v14444_v7  ;;  %v14451_v19 = vpack.c.bf16 %v14449_v39, %v14450_v62 }
 0x615   : > { %v13080_v9 = vpop.f32.mrf.mxu0 }
 0x618   : > { %9094 = vmatmul.msk.bf16.gmra.mxu3 %vm2070_vm3, %v7269_v57  ;;  %v13098_v57 = vld [vmem:[#allocation3 + $0x190] sm:$0xff] }
 0x619   : > { %v7101_v59 = vpop.f32.mrf.mxu2 }
 0x61a   : > { %v13082_v16 = vadd.f32 %v7101_v59, %v6864_v34  ;;  %v6778_v35 = vpop.f32.mrf.mxu1  ;;  %v14448_v34 = vld [vmem:[#allocation60_spill] sm:$0xff]  ;;  %v6540_v59 = vadd.f32 %v12739_v38, %v6214_v12  ;;  %v14453_v38 = vld [vmem:[#allocation19_spill] sm:$0xff] }
 0x61b   : > { %v6865_v49 = vadd.f32 %v6778_v35, %v6539_v60  ;;  %v6171_v37 = vpop.f32.mrf.mxu3  ;;  %v14454_v12 = vld [vmem:[#allocation12_spill] sm:$0xff] }
 0x61c   : > { %14445 = vst [vmem:[#allocation79_spill] sm:$0xff] %v13082_v16  ;;  %v13101_v31 = vadd.f32 %v6171_v37, %v14448_v34  ;;  %v7227_v37 = vld [vmem:[#allocation3 + $0x87] sm:$0xff]  ;;  %v5856_v39 = vadd.f32 %v14454_v12, %v14453_v38  ;;  %v14461_v12 = vld [vmem:[#allocation70_spill] sm:$0xff] }
 0x61d   : > { %9059 = vmatmul.msk.bf16.gmra.mxu1 %vm2070_vm3, %v6632_v45  ;;  %v13112_v35 = vpop.f32.mrf.mxu0  ;;  %v14452_v45 = vld [vmem:[#allocation64_spill] sm:$0xff]  ;;  %v7270_v18 = vpack.c.bf16 %v7228_v26, %v7227_v37  ;;  %v14456_v26 = vld [vmem:[#allocation63_spill] sm:$0xff] }
 0x61e   : > { %9084 = vmatmul.msk.bf16.gmra.mxu2 %vm2070_vm3, %v6958_v28 }
 0x620   : > { %9120 = vmatmul.msk.bf16.gmra.mxu0 %vm2070_vm3, %v14451_v19  ;;  %v6633_v19 = vpack.c.bf16 %v13024_v8, %v12990_v51 }
 0x621   : > { %v7104_v7 = vpop.f32.mrf.mxu2 }
 0x622   : > { %v13109_v29 = vadd.f32 %v7104_v7, %v6865_v49  ;;  %v6780_v60 = vpop.f32.mrf.mxu1  ;;  %v6541_v49 = vadd.f32 %v12758_v24, %v12803_v14  ;;  %v14455_v14 = vld [vmem:[#allocation67_spill] sm:$0xff] }
 0x623   : > { %v6866_v36 = vadd.f32 %v6780_v60, %v6540_v59  ;;  %v6173_v43 = vpop.f32.mrf.mxu3  ;;  %v6959_v59 = vpack.c.bf16 %v12857_v6, %v12817_v22 }
 0x624   : > { %v13115_v28 = vadd.f32 %v6173_v43, %v14452_v45  ;;  %v14457_v45 = vld [vmem:[#allocation62_spill] sm:$0xff] }
 0x625   : > { %v13128_v60 = vpop.f32.mrf.mxu0  ;;  %v14458_v37 = vpack.c.bf16 %v14456_v26, %v14457_v45  ;;  %v6634_v45 = vpack.c.bf16 %v13059_v61, %v13026_v3 }
 0x628   : > { %9095 = vmatmul.msk.bf16.gmra.mxu3 %vm2070_vm3, %v7270_v18 }
 0x629   : > { %v7106_v34 = vpop.f32.mrf.mxu2 }
 0x62a   : > { %v13117_v16 = vadd.f32 %v7106_v34, %v6866_v36  ;;  %v6783_v7 = vpop.f32.mrf.mxu1  ;;  %v6216_v36 = vadd.f32 %v12813_v44, %v5856_v39 }
 0x62b   : > { %v6867_v62 = vadd.f32 %v6783_v7, %v6541_v49  ;;  %v6176_v24 = vpop.f32.mrf.mxu3  ;;  %v7230_v7 = vld [vmem:[#allocation3 + $0x9f] sm:$0xff] }
 0x62c   : > { %v13134_v18 = vadd.f32 %v6176_v24, %v14455_v14  ;;  %v6542_v22 = vadd.f32 %v12777_v47, %v6216_v36  ;;  %v14463_v47 = vld [vmem:[#allocation23_spill] sm:$0xff]  ;;  %v14464_v36 = vld [vmem:[#allocation30_spill] sm:$0xff] }
 0x62d   : > { %9060 = vmatmul.msk.bf16.gmra.mxu1 %vm2070_vm3, %v6633_v19  ;;  %v13145_v38 = vpop.f32.mrf.mxu0  ;;  %v7229_v19 = vld [vmem:[#allocation3 + $0x97] sm:$0xff] }
 0x62e   : > { %9085 = vmatmul.msk.bf16.gmra.mxu2 %vm2070_vm3, %v6959_v59  ;;  %v7271_v24 = vpack.c.bf16 %v7230_v7, %v7229_v19 }
 0x630   : > { %9121 = vmatmul.msk.bf16.gmra.mxu0 %vm2070_vm3, %v14458_v37  ;;  %v6960_v37 = vpack.c.bf16 %v12894_v1, %v12855_v46 }
 0x631   : > { %v7109_v43 = vpop.f32.mrf.mxu2 }
 0x632   : > { %v13140_v34 = vadd.f32 %v7109_v43, %v6867_v62  ;;  %v6785_v6 = vpop.f32.mrf.mxu1  ;;  %v6543_v62 = vadd.f32 %v12796_v10, %v12841_v15  ;;  %v5861_v43 = vadd.f32 %v14464_v36, %v14463_v47  ;;  %v14465_v15 = vld [vmem:[#allocation76_spill] sm:$0xff] }
 0x633   : > { %v13143_v44 = vadd.f32 %v6785_v6, %v6542_v22  ;;  %v6178_v49 = vpop.f32.mrf.mxu3  ;;  %v14470_v47 = vld [vmem:[#allocation80_spill] sm:$0xff] }
 0x634   : > { %14459 = vst [vmem:[#allocation78_spill] sm:$0xff] %v13140_v34  ;;  %v13148_v39 = vadd.f32 %v6178_v49, %v14461_v12  ;;  %v6218_v22 = vadd.f32 %v12851_v53, %v5861_v43  ;;  %v14466_v12 = vld [vmem:[#allocation68_spill] sm:$0xff] }
 0x635   : > { %14460 = vst [vmem:[#allocation34_spill] sm:$0xff] %v13143_v44  ;;  %v13167_v7 = vpop.f32.mrf.mxu0  ;;  %v14467_v19 = vpack.c.bf16 %v12587_v13, %v14466_v12  ;;  %v7231_v43 = vld [vmem:[#allocation3 + $0xa7] sm:$0xff]  ;;  %v6545_v13 = vadd.f32 %v12834_v0, %v12879_v55 }
 0x636   : > { %v6544_v53 = vadd.f32 %v12815_v4, %v6218_v22  ;;  %v14472_v4 = vld [vmem:[#allocation16_spill] sm:$0xff]  ;;  %v14473_v22 = vld [vmem:[#allocation21_spill] sm:$0xff]  ;;  %v14475_v55 = vld [vmem:[#allocation15_spill] sm:$0xff] }
 0x638   : > { %9096 = vmatmul.msk.bf16.gmra.mxu3 %vm2070_vm3, %v7271_v24 }
 0x639   : > { %v13150_v59 = vpop.f32.mrf.mxu2 }
 0x63a   : > { %14462 = vst [vmem:[#allocation46_spill] sm:$0xff] %v13150_v59  ;;  %v6788_v14 = vpop.f32.mrf.mxu1 }
 0x63b   : > { %v6869_v26 = vadd.f32 %v6788_v14, %v6543_v62  ;;  %v6181_v10 = vpop.f32.mrf.mxu3  ;;  %v7232_v14 = vld [vmem:[#allocation3 + $0xaf] sm:$0xff] }
 0x63c   : > { %v13165_v6 = vadd.f32 %v6181_v10, %v14465_v15  ;;  %v7272_v10 = vpack.c.bf16 %v7232_v14, %v7231_v43  ;;  %v14476_v43 = vld [vmem:[#allocation75_spill] sm:$0xff] }
 0x63d   : > { %9061 = vmatmul.msk.bf16.gmra.mxu1 %vm2070_vm3, %v6634_v45 }
 0x63e   : > { %9086 = vmatmul.msk.bf16.gmra.mxu2 %vm2070_vm3, %v6960_v37  ;;  %v6936_v37 = vld [vmem:[#allocation3 + $0x189] sm:$0xff] }
 0x640   : > { %9122 = vmatmul.msk.bf16.gmra.mxu0 %vm2070_vm3, %v14467_v19  ;;  %v6635_v19 = vpack.c.bf16 %v13096_v42, %v13061_v23 }
 0x641   : > { %v7114_v49 = vpop.f32.mrf.mxu2 }
 0x642   : > { %v13173_v24 = vadd.f32 %v7114_v49, %v6869_v26  ;;  %v6790_v46 = vpop.f32.mrf.mxu1  ;;  %v13185_v26 = vpop.f32.mrf.mxu0  ;;  %v5866_v49 = vadd.f32 %v14473_v22, %v14472_v4 }
 0x643   : > { %v13176_v1 = vadd.f32 %v6790_v46, %v6544_v53  ;;  %v6183_v62 = vpop.f32.mrf.mxu3  ;;  %v6961_v53 = vpack.c.bf16 %v6936_v37, %v12892_v17  ;;  %v14474_v46 = vld [vmem:[#allocation58_spill] sm:$0xff] }
 0x644   : > { %14468 = vst [vmem:[#allocation29_spill] sm:$0xff] %v13173_v24  ;;  %v13179_v36 = vadd.f32 %v6183_v62, %v14470_v47  ;;  %v6220_v62 = vadd.f32 %v14474_v46, %v5866_v49  ;;  %v14482_v46 = vld [vmem:[#allocation86_spill] sm:$0xff]  ;;  %v14494_v24 = vld [vmem:[#allocation87_spill] sm:$0xff] }
 0x645   : > { %14469 = vst [vmem:[#allocation69_spill] sm:$0xff] %v13176_v1 }
 0x648   : > { %9097 = vmatmul.msk.bf16.gmra.mxu3 %vm2070_vm3, %v7272_v10  ;;  %v14477_v10 = vld [vmem:[#allocation74_spill] sm:$0xff] }
 0x649   : > { %v13181_v45 = vpop.f32.mrf.mxu2  ;;  %v14478_v4 = vpack.c.bf16 %v14476_v43, %v14477_v10  ;;  %v13215_v43 = vld [vmem:[#allocation3 + $0x198] sm:$0xff] }
 0x64a   : > { %14471 = vst [vmem:[#allocation73_spill] sm:$0xff] %v13181_v45  ;;  %v6793_v15 = vpop.f32.mrf.mxu1  ;;  %v13208_v49 = vpop.f32.mrf.mxu0  ;;  %v6937_v10 = vld [vmem:[#allocation3 + $0x191] sm:$0xff] }
 0x64b   : > { %v6871_v12 = vadd.f32 %v6793_v15, %v6545_v13  ;;  %v6186_v0 = vpop.f32.mrf.mxu3  ;;  %v14480_v15 = vld [vmem:[#allocation101_spill] sm:$0xff]  ;;  %14484 = vst [vmem:[#allocation31_spill] sm:$0xff] %v13215_v43 }
 0x64c   : > { %v13197_v14 = vadd.f32 %v6186_v0, %v14475_v55  ;;  %v6546_v17 = vadd.f32 %v14480_v15, %v6220_v62  ;;  %v7233_v55 = vld [vmem:[#allocation3 + $0xb7] sm:$0xff]  ;;  %v14486_v62 = vld [vmem:[#allocation59_spill] sm:$0xff] }
 0x64d   : > { %9062 = vmatmul.msk.bf16.gmra.mxu1 %vm2070_vm3, %v6635_v19 }
 0x64e   : > { %9087 = vmatmul.msk.bf16.gmra.mxu2 %vm2070_vm3, %v6961_v53  ;;  %v7234_v53 = vld [vmem:[#allocation3 + $0xbf] sm:$0xff] }
 0x650   : > { %9123 = vmatmul.msk.bf16.gmra.mxu0 %vm2070_vm3, %v14478_v4  ;;  %v14485_v4 = vld [vmem:[#allocation42_spill] sm:$0xff] }
 0x651   : > { %v7119_v47 = vpop.f32.mrf.mxu2  ;;  %v6547_v15 = vadd.f32 %v14486_v62, %v14485_v4  ;;  %v14488_v4 = vld [vmem:[#allocation83_spill] sm:$0xff]  ;;  %v14489_v62 = vld [vmem:[#allocation82_spill] sm:$0xff] }
 0x652   : > { %v13203_v13 = vadd.f32 %v7119_v47, %v6871_v12  ;;  %v6795_v37 = vpop.f32.mrf.mxu1  ;;  %v6938_v12 = vld [vmem:[#allocation3 + $0x199] sm:$0xff]  ;;  %v7273_v47 = vpack.c.bf16 %v7234_v53, %v7233_v55  ;;  %v14490_v1 = vpack.c.bf16 %v14488_v4, %v14489_v62  ;;  %v7870_v4 = vld [vmem:[#allocation3 + $0x41] sm:$0xff] }
 0x653   : > { %v13206_v22 = vadd.f32 %v6795_v37, %v6546_v17  ;;  %v6188_v19 = vpop.f32.mrf.mxu3 }
 0x654   : > { %14479 = vst [vmem:[#allocation32_spill] sm:$0xff] %v13203_v13  ;;  %v13211_v0 = vadd.f32 %v6188_v19, %v14482_v46  ;;  %v6962_v19 = vpack.c.bf16 %v6938_v12, %v6937_v10  ;;  %v14487_v13 = vld [vmem:[#allocation7_spill] sm:$0xff]  ;;  %v14492_v10 = vld [vmem:[#allocation104_spill] sm:$0xff] }
 0x655   : > { %14481 = vst [vmem:[#allocation10_spill] sm:$0xff] %v13206_v22  ;;  %v6636_v22 = vpack.c.bf16 %v13215_v43, %v13098_v57  ;;  %v6548_v12 = vadd.f32 %v14492_v10, %v12934_v58  ;;  %v7869_v58 = vld [vmem:[#allocation3 + $0x39] sm:$0xff]  ;;  %v14497_v10 = vld [vmem:[#allocation28_spill] sm:$0xff]  ;;  %v7876_v43 = vld [vmem:[#allocation3 + $0x71] sm:$0xff] }
 0x658   : > { %9098 = vmatmul.msk.bf16.gmra.mxu3 %vm2070_vm3, %v7273_v47 }
 0x659   : > { %v13213_v45 = vpop.f32.mrf.mxu2 }
 0x65a   : > { %14483 = vst [vmem:[#allocation84_spill] sm:$0xff] %v13213_v45  ;;  %v6798_v17 = vpop.f32.mrf.mxu1  ;;  %v13224_v45 = vpop.f32.mrf.mxu0 }
 0x65b   : > { %v6873_v37 = vadd.f32 %v6798_v17, %v6547_v15  ;;  %v7375_v46 = vpop.f32.mrf.mxu3 }
 0x65c   : > { %v13227_v53 = vadd.f32 %v7375_v46, %v14487_v13  ;;  %v7235_v13 = vld [vmem:[#allocation3 + $0xc7] sm:$0xff] }
 0x65d   : > { %9063 = vmatmul.msk.bf16.gmra.mxu1 %vm2070_vm3, %v6636_v22 }
 0x65e   : > { %9088 = vmatmul.msk.bf16.gmra.mxu2 %vm2070_vm3, %v6962_v19  ;;  %v7236_v19 = vld [vmem:[#allocation3 + $0xcf] sm:$0xff] }
 0x660   : > { %9124 = vmatmul.msk.bf16.gmra.mxu0 %vm2070_vm3, %v14490_v1  ;;  %v7274_v1 = vpack.c.bf16 %v7236_v19, %v7235_v13  ;;  %v14500_v13 = vld [vmem:[#allocation45_spill] sm:$0xff] }
 0x661   : > { %v7124_v55 = vpop.f32.mrf.mxu2 }
 0x662   : > { %v13233_v47 = vadd.f32 %v7124_v55, %v6873_v37  ;;  %v6800_v22 = vpop.f32.mrf.mxu1  ;;  %v13242_v46 = vpop.f32.mrf.mxu0  ;;  %v14496_v37 = vld [vmem:[#allocation61_spill] sm:$0xff] }
 0x663   : > { %v13237_v15 = vadd.f32 %v6800_v22, %v6548_v12  ;;  %v7377_v17 = vpop.f32.mrf.mxu3  ;;  %v6549_v55 = vadd.f32 %v14496_v37, %v12957_v32  ;;  %v14498_v12 = vld [vmem:[#allocation27_spill] sm:$0xff]  ;;  %v14501_v32 = vld [vmem:[#allocation37_spill] sm:$0xff] }
 0x664   : > { %14491 = vst [vmem:[#allocation44_spill] sm:$0xff] %v13233_v47  ;;  %v13240_v59 = vadd.f32 %v7377_v17, %v14494_v24  ;;  %v5876_v22 = vadd.f32 %v14498_v12, %v14497_v10  ;;  %v7917_v24 = vpack.c.bf16 %v7870_v4, %v7869_v58  ;;  %v14502_v37 = vpack.c.bf16 %v14500_v13, %v14501_v32  ;;  %v7238_v58 = vld [vmem:[#allocation3 + $0xdf] sm:$0xff]  ;;  %v14508_v32 = vld [vmem:[#allocation40_spill] sm:$0xff] }
 0x665   : > { %14493 = vst [vmem:[#allocation41_spill] sm:$0xff] %v13237_v15  ;;  %v14505_v12 = vld [vmem:[#allocation90_spill] sm:$0xff] }
 0x666   : > { %v6224_v17 = vadd.f32 %v12968_v21, %v5876_v22 }
 0x668   : > { %9099 = vmatmul.msk.bf16.gmra.mxu3 %vm2070_vm3, %v7274_v1  ;;  %v6550_v10 = vadd.f32 %v12932_v30, %v6224_v17  ;;  %v7871_v30 = vld [vmem:[#allocation3 + $0x49] sm:$0xff]  ;;  %v14507_v17 = vld [vmem:[#allocation39_spill] sm:$0xff] }
 0x669   : > { %v13244_v44 = vpop.f32.mrf.mxu2 }
 0x66a   : > { %14495 = vst [vmem:[#allocation77_spill] sm:$0xff] %v13244_v44  ;;  %v6803_v62 = vpop.f32.mrf.mxu1  ;;  %v14499_v44 = vld [vmem:[#allocation8_spill] sm:$0xff] }
 0x66b   : > { %v6875_v15 = vadd.f32 %v6803_v62, %v6549_v55  ;;  %v7380_v47 = vpop.f32.mrf.mxu3  ;;  %v13263_v55 = vpop.f32.mrf.mxu0 }
 0x66c   : > { %v13254_v34 = vadd.f32 %v7380_v47, %v14499_v44  ;;  %v7237_v47 = vld [vmem:[#allocation3 + $0xd7] sm:$0xff] }
 0x66d   : > { %9140 = vmatmul.msk.bf16.vlgmr.msra.gmra.mxu1 %vm2070_vm3, %v7917_v24  ;;  %v7872_v24 = vld [vmem:[#allocation3 + $0x51] sm:$0xff]  ;;  %v7275_v13 = vpack.c.bf16 %v7238_v58, %v7237_v47 }
 0x66e   : > { %v14509_v58 = vld [vmem:[#allocation25_spill] sm:$0xff] }
 0x670   : > { %9125 = vmatmul.msk.bf16.gmra.mxu0 %vm2070_vm3, %v14502_v37  ;;  %v5881_v37 = vadd.f32 %v14508_v32, %v14507_v17  ;;  %v14515_v32 = vld [vmem:[#allocation93_spill] sm:$0xff] }
 0x671   : > { %v7129_v19 = vpop.f32.mrf.mxu2 }
 0x672   : > { %v13260_v1 = vadd.f32 %v7129_v19, %v6875_v15  ;;  %v6805_v4 = vpop.f32.mrf.mxu1  ;;  %v6551_v15 = vadd.f32 %v12950_v48, %v12993_v27  ;;  %v14510_v27 = vld [vmem:[#allocation89_spill] sm:$0xff] }
 0x673   : > { %v13265_v21 = vadd.f32 %v6805_v4, %v6550_v10  ;;  %v7382_v62 = vpop.f32.mrf.mxu3  ;;  %v7918_v4 = vpack.c.bf16 %v7872_v24, %v7871_v30  ;;  %v7240_v30 = vld [vmem:[#allocation3 + $0xef] sm:$0xff] }
 0x674   : > { %14503 = vst [vmem:[#allocation81_spill] sm:$0xff] %v13260_v1  ;;  %v13268_v44 = vadd.f32 %v7382_v62, %v14505_v12  ;;  %v6226_v62 = vadd.f32 %v13004_v63, %v5881_v37 }
 0x675   : > { %14504 = vst [vmem:[#allocation13_spill] sm:$0xff] %v13265_v21  ;;  %v13277_v21 = vpop.f32.mrf.mxu0 }
 0x676   : > { %v6552_v24 = vadd.f32 %v12970_v54, %v6226_v62  ;;  %v7873_v54 = vld [vmem:[#allocation3 + $0x59] sm:$0xff] }
 0x678   : > { %9100 = vmatmul.msk.bf16.gmra.mxu3 %vm2070_vm3, %v7275_v13 }
 0x679   : > { %v13270_v22 = vpop.f32.mrf.mxu2 }
 0x67a   : > { %14506 = vst [vmem:[#allocation20_spill] sm:$0xff] %v13270_v22  ;;  %v6808_v19 = vpop.f32.mrf.mxu1  ;;  %v14511_v22 = vld [vmem:[#allocation88_spill] sm:$0xff] }
 0x67b   : > { %v6877_v10 = vadd.f32 %v6808_v19, %v6551_v15  ;;  %v7385_v12 = vpop.f32.mrf.mxu3  ;;  %v14512_v1 = vpack.c.bf16 %v14510_v27, %v14511_v22  ;;  %v7874_v22 = vld [vmem:[#allocation3 + $0x61] sm:$0xff] }
 0x67c   : > { %v13282_v47 = vadd.f32 %v7385_v12, %v14509_v58  ;;  %v7919_v27 = vpack.c.bf16 %v7874_v22, %v7873_v54  ;;  %v7242_v54 = vld [vmem:[#allocation3 + $0xff] sm:$0xff] }
 0x67d   : > { %9141 = vmatmul.msk.bf16.gmra.mxu1 %vm2070_vm3, %v7918_v4  ;;  %v13293_v17 = vpop.f32.mrf.mxu0  ;;  %v7239_v4 = vld [vmem:[#allocation3 + $0xe7] sm:$0xff] }
 0x67e   : > { %v7276_v58 = vpack.c.bf16 %v7240_v30, %v7239_v4  ;;  %v14520_v30 = vld [vmem:[#allocation91_spill] sm:$0xff] }
 0x680   : > { %9126 = vmatmul.msk.bf16.gmra.mxu0 %vm2070_vm3, %v14512_v1  ;;  %v14517_v1 = vld [vmem:[#allocation35_spill] sm:$0xff] }
 0x681   : > { %v7134_v48 = vpop.f32.mrf.mxu2 }
 0x682   : > { %v13288_v13 = vadd.f32 %v7134_v48, %v6877_v10  ;;  %v6810_v15 = vpop.f32.mrf.mxu1  ;;  %v6553_v10 = vadd.f32 %v14517_v1, %v13029_v33 }
 0x683   : > { %v13291_v19 = vadd.f32 %v6810_v15, %v6552_v24  ;;  %v7387_v63 = vpop.f32.mrf.mxu3  ;;  %v14518_v15 = vld [vmem:[#allocation96_spill] sm:$0xff] }
 0x684   : > { %14513 = vst [vmem:[#allocation49_spill] sm:$0xff] %v13288_v13  ;;  %v13296_v37 = vadd.f32 %v7387_v63, %v14515_v32 }
 0x685   : > { %14514 = vst [vmem:[#allocation48_spill] sm:$0xff] %v13291_v19  ;;  %v13307_v32 = vpop.f32.mrf.mxu0  ;;  %v14519_v19 = vld [vmem:[#allocation92_spill] sm:$0xff] }
 0x686   : > { %v14521_v4 = vpack.c.bf16 %v14519_v19, %v14520_v30  ;;  %v14527_v30 = vld [vmem:[#allocation66_spill] sm:$0xff] }
 0x688   : > { %9101 = vmatmul.msk.bf16.gmra.mxu3 %vm2070_vm3, %v7276_v58  ;;  %v14523_v58 = vld [vmem:[#allocation26_spill] sm:$0xff] }
 0x689   : > { %v13298_v12 = vpop.f32.mrf.mxu2  ;;  %v6554_v1 = vadd.f32 %v14523_v58, %v13043_v56  ;;  %v7875_v56 = vld [vmem:[#allocation3 + $0x69] sm:$0xff] }
 0x68a   : > { %14516 = vst [vmem:[#allocation33_spill] sm:$0xff] %v13298_v12  ;;  %v6813_v48 = vpop.f32.mrf.mxu1 }
 0x68b   : > { %v6879_v62 = vadd.f32 %v6813_v48, %v6553_v10  ;;  %v7390_v24 = vpop.f32.mrf.mxu3 }
 0x68c   : > { %v13305_v63 = vadd.f32 %v7390_v24, %v14518_v15  ;;  %v7241_v15 = vld [vmem:[#allocation3 + $0xf7] sm:$0xff] }
 0x68d   : > { %9142 = vmatmul.msk.bf16.gmra.mxu1 %vm2070_vm3, %v7919_v27  ;;  %v14525_v27 = vld [vmem:[#allocation97_spill] sm:$0xff]  ;;  %v7277_v19 = vpack.c.bf16 %v7242_v54, %v7241_v15  ;;  %v14530_v54 = vld [vmem:[#allocation94_spill] sm:$0xff] }
 0x690   : > { %9127 = vmatmul.msk.bf16.gmra.mxu0 %vm2070_vm3, %v14521_v4 }
 0x691   : > { %v7139_v12 = vpop.f32.mrf.mxu2 }
 0x692   : > { %v13313_v33 = vadd.f32 %v7139_v12, %v6879_v62  ;;  %v6815_v22 = vpop.f32.mrf.mxu1  ;;  %v6555_v12 = vadd.f32 %v14527_v30, %v13064_v41  ;;  %v13326_v62 = vpop.f32.mrf.mxu0  ;;  %v6556_v30 = vadd.f32 %v13040_v52, %v13078_v25  ;;  %v7877_v52 = vld [vmem:[#allocation3 + $0x79] sm:$0xff] }
 0x693   : > { %v13317_v10 = vadd.f32 %v6815_v22, %v6554_v1  ;;  %v7392_v48 = vpop.f32.mrf.mxu3  ;;  %v7920_v1 = vpack.c.bf16 %v7876_v43, %v7875_v56  ;;  %v7244_v56 = vld [vmem:[#allocation3 + $0x10f] sm:$0xff] }
 0x694   : > { %14522 = vst [vmem:[#allocation85_spill] sm:$0xff] %v13313_v33  ;;  %v13320_v24 = vadd.f32 %v7392_v48, %v14525_v27  ;;  %v14528_v48 = vld [vmem:[#allocation100_spill] sm:$0xff] }
 0x695   : > { %14524 = vst [vmem:[#allocation50_spill] sm:$0xff] %v13317_v10  ;;  %v14529_v10 = vld [vmem:[#allocation95_spill] sm:$0xff] }
 0x696   : > { %v14531_v15 = vpack.c.bf16 %v14529_v10, %v14530_v54  ;;  %v7878_v10 = vld [vmem:[#allocation3 + $0x81] sm:$0xff] }
 0x698   : > { %9102 = vmatmul.msk.bf16.gmra.mxu3 %vm2070_vm3, %v7277_v19 }
 0x699   : > { %v13322_v13 = vpop.f32.mrf.mxu2 }
 0x69a   : > { %14526 = vst [vmem:[#allocation14_spill] sm:$0xff] %v13322_v13  ;;  %v6818_v4 = vpop.f32.mrf.mxu1  ;;  %v13343_v43 = vpop.f32.mrf.mxu0 }
 0x69b   : > { %v6881_v58 = vadd.f32 %v6818_v4, %v6555_v12  ;;  %v7395_v22 = vpop.f32.mrf.mxu3 }
 0x69c   : > { %v13331_v27 = vadd.f32 %v7395_v22, %v14528_v48  ;;  %v7243_v48 = vld [vmem:[#allocation3 + $0x107] sm:$0xff] }
 0x69d   : > { %9143 = vmatmul.msk.bf16.gmra.mxu1 %vm2070_vm3, %v7920_v1  ;;  %v14534_v1 = vld [vmem:[#allocation102_spill] sm:$0xff]  ;;  %v7278_v54 = vpack.c.bf16 %v7244_v56, %v7243_v48 }
 0x69e   : > { %v14538_v56 = vld [vmem:[#allocation98_spill] sm:$0xff] }
 0x6a0   : > { %9128 = vmatmul.msk.bf16.gmra.mxu0 %vm2070_vm3, %v14531_v15  ;;  %v7921_v15 = vpack.c.bf16 %v7878_v10, %v7877_v52  ;;  %v14542_v52 = vld [vmem:[#allocation105_spill] sm:$0xff] }
 0x6a1   : > { %v7144_v13 = vpop.f32.mrf.mxu2 }
 0x6a2   : > { %v13337_v41 = vadd.f32 %v7144_v13, %v6881_v58  ;;  %v6820_v19 = vpop.f32.mrf.mxu1  ;;  %v6557_v13 = vadd.f32 %v13066_v11, %v13101_v31  ;;  %v6558_v31 = vadd.f32 %v13080_v9, %v13115_v28  ;;  %v7879_v9 = vld [vmem:[#allocation3 + $0x89] sm:$0xff] }
 0x6a3   : > { %v13341_v12 = vadd.f32 %v6820_v19, %v6556_v30  ;;  %v7397_v4 = vpop.f32.mrf.mxu3  ;;  %v13354_v19 = vpop.f32.mrf.mxu0 }
 0x6a4   : > { %14532 = vst [vmem:[#allocation9_spill] sm:$0xff] %v13337_v41  ;;  %v13346_v22 = vadd.f32 %v7397_v4, %v14534_v1  ;;  %v14536_v4 = vld [vmem:[#allocation24_spill] sm:$0xff] }
 0x6a5   : > { %14533 = vst [vmem:[#allocation53_spill] sm:$0xff] %v13341_v12  ;;  %v14537_v12 = vld [vmem:[#allocation99_spill] sm:$0xff] }
 0x6a6   : > { %v14539_v48 = vpack.c.bf16 %v14537_v12, %v14538_v56  ;;  %v7880_v12 = vld [vmem:[#allocation3 + $0x91] sm:$0xff] }
 0x6a8   : > { %9103 = vmatmul.msk.bf16.gmra.mxu3 %vm2070_vm3, %v7278_v54 }
 0x6a9   : > { %v13348_v33 = vpop.f32.mrf.mxu2 }
 0x6aa   : > { %14535 = vst [vmem:[#allocation52_spill] sm:$0xff] %v13348_v33  ;;  %v6823_v58 = vpop.f32.mrf.mxu1 }
 0x6ab   : > { %v6883_v25 = vadd.f32 %v6823_v58, %v6557_v13  ;;  %v7400_v30 = vpop.f32.mrf.mxu3  ;;  %v7246_v58 = vld [vmem:[#allocation3 + $0x11f] sm:$0xff] }
 0x6ac   : > { %v13357_v1 = vadd.f32 %v7400_v30, %v14536_v4  ;;  %v7245_v30 = vld [vmem:[#allocation3 + $0x117] sm:$0xff]  ;;  %v13372_v4 = vpop.f32.mrf.mxu0 }
 0x6ad   : > { %9144 = vmatmul.msk.bf16.gmra.mxu1 %vm2070_vm3, %v7921_v15  ;;  %v7279_v56 = vpack.c.bf16 %v7246_v58, %v7245_v30 }
 0x6b0   : > { %9129 = vmatmul.msk.bf16.gmra.mxu0 %vm2070_vm3, %v14539_v48  ;;  %v7922_v48 = vpack.c.bf16 %v7880_v12, %v7879_v9 }
 0x6b1   : > { %v7149_v33 = vpop.f32.mrf.mxu2 }
 0x6b2   : > { %v13363_v11 = vadd.f32 %v7149_v33, %v6883_v25  ;;  %v6825_v10 = vpop.f32.mrf.mxu1  ;;  %v6559_v33 = vadd.f32 %v13112_v35, %v13134_v18  ;;  %v6560_v35 = vadd.f32 %v13128_v60, %v13148_v39  ;;  %v7881_v60 = vld [vmem:[#allocation3 + $0x99] sm:$0xff] }
 0x6b3   : > { %v13367_v54 = vadd.f32 %v6825_v10, %v6558_v31  ;;  %v7402_v13 = vpop.f32.mrf.mxu3  ;;  %v14544_v10 = vld [vmem:[#allocation72_spill] sm:$0xff] }
 0x6b4   : > { %14540 = vst [vmem:[#allocation51_spill] sm:$0xff] %v13363_v11  ;;  %v13370_v15 = vadd.f32 %v7402_v13, %v14542_v52  ;;  %v13391_v18 = vpop.f32.mrf.mxu0 }
 0x6b5   : > { %14541 = vst [vmem:[#allocation57_spill] sm:$0xff] %v13367_v54  ;;  %v14545_v54 = vld [vmem:[#allocation103_spill] sm:$0xff] }
 0x6b8   : > { %9104 = vmatmul.msk.bf16.gmra.mxu3 %vm2070_vm3, %v7279_v56 }
 0x6b9   : > { %v13374_v41 = vpop.f32.mrf.mxu2 }
 0x6ba   : > { %14543 = vst [vmem:[#allocation18_spill] sm:$0xff] %v13374_v41  ;;  %v6828_v25 = vpop.f32.mrf.mxu1  ;;  %v14546_v41 = vld [vmem:[#allocation54_spill] sm:$0xff] }
 0x6bb   : > { %v6885_v28 = vadd.f32 %v6828_v25, %v6559_v33  ;;  %v7405_v31 = vpop.f32.mrf.mxu3  ;;  %v14547_v11 = vpack.c.bf16 %v14545_v54, %v14546_v41  ;;  %v7248_v33 = vld [vmem:[#allocation3 + $0x12f] sm:$0xff]  ;;  %v14548_v25 = vld [vmem:[#allocation71_spill] sm:$0xff]  ;;  %v6561_v54 = vadd.f32 %v13145_v38, %v13165_v6  ;;  %v6562_v6 = vadd.f32 %v13167_v7, %v13179_v36 }
 0x6bc   : > { %v13381_v13 = vadd.f32 %v7405_v31, %v14544_v10  ;;  %v7882_v41 = vld [vmem:[#allocation3 + $0xa1] sm:$0xff]  ;;  %v7883_v7 = vld [vmem:[#allocation3 + $0xa9] sm:$0xff] }
 0x6bd   : > { %9145 = vmatmul.msk.bf16.gmra.mxu1 %vm2070_vm3, %v7922_v48  ;;  %v7247_v48 = vld [vmem:[#allocation3 + $0x127] sm:$0xff]  ;;  %v7923_v10 = vpack.c.bf16 %v7882_v41, %v7881_v60 }
 0x6c0   : > { %9130 = vmatmul.msk.bf16.gmra.mxu0 %vm2070_vm3, %v14547_v11  ;;  %v7280_v11 = vpack.c.bf16 %v7248_v33, %v7247_v48  ;;  %v14551_v33 = vld [vmem:[#allocation38_spill] sm:$0xff] }
 0x6c1   : > { %v7154_v52 = vpop.f32.mrf.mxu2  ;;  %v14552_v48 = vpack.c.bf16 %v12916_v50, %v14551_v33  ;;  %v7884_v50 = vld [vmem:[#allocation3 + $0xb1] sm:$0xff] }
 0x6c2   : > { %v13387_v58 = vadd.f32 %v7154_v52, %v6885_v28  ;;  %v6830_v30 = vpop.f32.mrf.mxu1  ;;  %v13403_v52 = vpop.f32.mrf.mxu0 }
 0x6c3   : > { %v13393_v12 = vadd.f32 %v6830_v30, %v6560_v35  ;;  %v7407_v56 = vpop.f32.mrf.mxu3  ;;  %v14550_v30 = vld [vmem:[#allocation17_spill] sm:$0xff] }
 0x6c4   : > { %v13396_v9 = vadd.f32 %v7407_v56, %v14548_v25 }
 0x6c8   : > { %9105 = vmatmul.msk.bf16.gmra.mxu3 %vm2070_vm3, %v7280_v11 }
 0x6c9   : > { %v13398_v31 = vpop.f32.mrf.mxu2 }
 0x6ca   : > { %14549 = vst [vmem:[#allocation11_spill] sm:$0xff] %v13398_v31  ;;  %v6833_v28 = vpop.f32.mrf.mxu1  ;;  %v13419_v60 = vpop.f32.mrf.mxu0 }
 0x6cb   : > { %v6887_v39 = vadd.f32 %v6833_v28, %v6561_v54  ;;  %v7410_v35 = vpop.f32.mrf.mxu3  ;;  %v7250_v28 = vld [vmem:[#allocation3 + $0x13f] sm:$0xff] }
 0x6cc   : > { %v13407_v56 = vadd.f32 %v7410_v35, %v14550_v30  ;;  %v7249_v30 = vld [vmem:[#allocation3 + $0x137] sm:$0xff] }
 0x6cd   : > { %9146 = vmatmul.msk.bf16.gmra.mxu1 %vm2070_vm3, %v7923_v10  ;;  %v14554_v10 = vld [vmem:[#allocation36_spill] sm:$0xff]  ;;  %v7281_v33 = vpack.c.bf16 %v7250_v28, %v7249_v30  ;;  %v14557_v28 = vpack.c.bf16 %v12954_v2, %v12952_v40  ;;  %v7885_v2 = vld [vmem:[#allocation3 + $0xb9] sm:$0xff] }
 0x6d0   : > { %9131 = vmatmul.msk.bf16.gmra.mxu0 %vm2070_vm3, %v14552_v48  ;;  %v7924_v48 = vpack.c.bf16 %v7884_v50, %v7883_v7 }
 0x6d1   : > { %v7159_v25 = vpop.f32.mrf.mxu2 }
 0x6d2   : > { %v13413_v38 = vadd.f32 %v7159_v25, %v6887_v39  ;;  %v6835_v41 = vpop.f32.mrf.mxu1  ;;  %v6563_v39 = vadd.f32 %v13185_v26, %v13197_v14  ;;  %v6564_v14 = vadd.f32 %v13208_v49, %v13211_v0  ;;  %v7821_v49 = vadd.f32 %v13224_v45, %v13227_v53  ;;  %v13470_v53 = vld [vmem:[%s13954_s6] ss:$0 sm:$0xff] }
 0x6d3   : > { %v13417_v11 = vadd.f32 %v6835_v41, %v6562_v6  ;;  %v7412_v54 = vpop.f32.mrf.mxu3  ;;  %v14556_v41 = vld [vmem:[#allocation65_spill] sm:$0xff] }
 0x6d4   : > { %v13422_v35 = vadd.f32 %v7412_v54, %v14554_v10  ;;  %v13433_v10 = vpop.f32.mrf.mxu0 }
 0x6d5   : > { %14553 = vst [vmem:[#allocation60_spill] sm:$0xff] %v13417_v11 }
 0x6d8   : > { %9106 = vmatmul.msk.bf16.gmra.mxu3 %vm2070_vm3, %v7281_v33 }
 0x6d9   : > { %v13424_v31 = vpop.f32.mrf.mxu2 }
 0x6da   : > { %14555 = vst [vmem:[#allocation56_spill] sm:$0xff] %v13424_v31  ;;  %v6838_v25 = vpop.f32.mrf.mxu1 }
 0x6db   : > { %v6889_v36 = vadd.f32 %v6838_v25, %v6563_v39  ;;  %v7415_v6 = vpop.f32.mrf.mxu3  ;;  %v7252_v39 = vld [vmem:[#allocation3 + $0x14f] sm:$0xff]  ;;  %v14559_v25 = vld [vmem:[#allocation22_spill] sm:$0xff] }
 0x6dc   : > { %v13431_v54 = vadd.f32 %v7415_v6, %v14556_v41  ;;  %v7886_v6 = vld [vmem:[#allocation3 + $0xc1] sm:$0xff]  ;;  %v13448_v11 = vpop.f32.mrf.mxu0 }
 0x6dd   : > { %9147 = vmatmul.msk.bf16.gmra.mxu1 %vm2070_vm3, %v7924_v48  ;;  %v7251_v48 = vld [vmem:[#allocation3 + $0x147] sm:$0xff]  ;;  %v7925_v0 = vpack.c.bf16 %v7886_v6, %v7885_v2 }
 0x6de   : > { %v7282_v41 = vpack.c.bf16 %v7252_v39, %v7251_v48  ;;  %v7822_v39 = vadd.f32 %v13242_v46, %v13240_v59  ;;  %v14562_v2 = vld [vmem:[#allocation47_spill] sm:$0xff] }
 0x6e0   : > { %9132 = vmatmul.msk.bf16.gmra.mxu0 %vm2070_vm3, %v14557_v28 }
 0x6e1   : > { %v7164_v31 = vpop.f32.mrf.mxu2 }
 0x6e2   : > { %v13439_v26 = vadd.f32 %v7164_v31, %v6889_v36  ;;  %v6840_v30 = vpop.f32.mrf.mxu1  ;;  %v13456_v36 = vld [vmem:[%s13953_s5] ss:$0 sm:$0xff] }
 0x6e3   : > { %v13443_v50 = vadd.f32 %v6840_v30, %v6564_v14  ;;  %v7417_v33 = vpop.f32.mrf.mxu3  ;;  %v14560_v14 = vld [vmem:[#allocation43_spill] sm:$0xff] }
 0x6e4   : > { %v13446_v7 = vadd.f32 %v7417_v33, %v14559_v25  ;;  %v14561_v33 = vpack.c.bf16 %v12990_v51, %v12988_v20  ;;  %v13474_v6 = vpop.f32.mrf.mxu0 }
 0x6e5   : > { %14558 = vst [vmem:[#allocation55_spill] sm:$0xff] %v13443_v50 }
 0x6e8   : > { %9107 = vmatmul.msk.bf16.gmra.mxu3 %vm2070_vm3, %v7282_v41 }
 0x6ea   : > { %v8027_v40 = vpop.f32.mrf.mxu1 }
 0x6eb   : > { %v8147_v31 = vadd.f32 %v8027_v40, %v7821_v49  ;;  %v7420_v28 = vpop.f32.mrf.mxu3  ;;  %v7254_v40 = vld [vmem:[#allocation3 + $0x15f] sm:$0xff] }
 0x6ec   : > { %v13460_v30 = vadd.f32 %v7420_v28, %v14560_v14  ;;  %v7888_v28 = vld [vmem:[#allocation3 + $0xd1] sm:$0xff] }
 0x6ed   : > { %9148 = vmatmul.msk.bf16.gmra.mxu1 %vm2070_vm3, %v7925_v0  ;;  %v8199_v45 = vmul.f32 %v13456_v36, %v8147_v31  ;;  %v7253_v31 = vld [vmem:[#allocation3 + $0x157] sm:$0xff] }
 0x6ee   : > { %v7283_v14 = vpack.c.bf16 %v7254_v40, %v7253_v31  ;;  %v14563_v40 = vpack.c.bf16 %v13026_v3, %v13024_v8  ;;  %v7255_v3 = vld [vmem:[#allocation3 + $0x167] sm:$0xff] }
 0x6ef   : > { %v8251_v41 = vadd.f32 %v13470_v53, %v8199_v45 }
 0x6f0   : > { %9133 = vmatmul.msk.bf16.gmra.mxu0 %vm2070_vm3, %v14561_v33 }
 0x6f1   : > { %v8299_v33 = vmax.f32 %v8251_v41, 0.0 }
 0x6f2   : > { %v8029_v25 = vpop.f32.mrf.mxu1 }
 0x6f3   : > { %v8148_v48 = vadd.f32 %v8029_v25, %v7822_v39  ;;  %v7422_v51 = vpop.f32.mrf.mxu3  ;;  %v7887_v39 = vld [vmem:[#allocation3 + $0xc9] sm:$0xff]  ;;  %v7823_v25 = vadd.f32 %v13263_v55, %v13254_v34  ;;  %v7824_v34 = vadd.f32 %v13277_v21, %v13268_v44 }
 0x6f4   : > { %v13479_v49 = vadd.f32 %v7422_v51, %v14562_v2  ;;  %v13487_v51 = vpop.f32.mrf.mxu0 }
 0x6f5   : > { %v8200_v20 = vmul.f32 %v13456_v36, %v8148_v48  ;;  %v7926_v48 = vpack.c.bf16 %v7888_v28, %v7887_v39 }
 0x6f7   : > { %v8252_v0 = vadd.f32 %v13470_v53, %v8200_v20 }
 0x6f8   : > { %9108 = vmatmul.msk.bf16.gmra.mxu3 %vm2070_vm3, %v7283_v14 }
 0x6f9   : > { %v8300_v59 = vmax.f32 %v8252_v0, 0.0 }
 0x6fa   : > { %v8032_v46 = vpop.f32.mrf.mxu1 }
 0x6fb   : > { %v8347_v45 = vpack.c.bf16 %v8300_v59, %v8299_v33  ;;  %v8149_v50 = vadd.f32 %v8032_v46, %v7823_v25  ;;  %v7425_v20 = vpop.f32.mrf.mxu3  ;;  %v7256_v33 = vld [vmem:[#allocation3 + $0x16f] sm:$0xff]  ;;  %v7889_v25 = vld [vmem:[#allocation3 + $0xd9] sm:$0xff] }
 0x6fc   : > { %v13490_v41 = vadd.f32 %v7425_v20, %v13074_v5  ;;  %v14564_v5 = vld [vmem:[#allocation79_spill] sm:$0xff]  ;;  %v13505_v46 = vpop.f32.mrf.mxu0  ;;  %v7284_v39 = vpack.c.bf16 %v7256_v33, %v7255_v3 }
 0x6fd   : > { %9149 = vmatmul.msk.bf16.gmra.mxu1 %vm2070_vm3, %v7926_v48  ;;  %9168 = vmatmul.msk.bf16.vlgmr.msra.gmra.mxu2 %vm8383_vm1, %v8347_v45  ;;  %v8201_v2 = vmul.f32 %v13456_v36, %v8149_v50  ;;  %v7890_v50 = vld [vmem:[#allocation3 + $0xe1] sm:$0xff]  ;;  %v7825_v48 = vadd.f32 %v13293_v17, %v13282_v47  ;;  %v7826_v47 = vadd.f32 %v13307_v32, %v13296_v37 }
 0x6fe   : > { %v7927_v20 = vpack.c.bf16 %v7890_v50, %v7889_v25  ;;  %v7892_v50 = vld [vmem:[#allocation3 + $0xf1] sm:$0xff] }
 0x6ff   : > { %v8253_v31 = vadd.f32 %v13470_v53, %v8201_v2 }
 0x700   : > { %9134 = vmatmul.msk.bf16.gmra.mxu0 %vm2070_vm3, %v14563_v40 }
 0x701   : > { %v8301_v45 = vmax.f32 %v8253_v31, 0.0 }
 0x702   : > { %v8034_v55 = vpop.f32.mrf.mxu1 }
 0x703   : > { %v8150_v0 = vadd.f32 %v8034_v55, %v7824_v34  ;;  %v7427_v14 = vpop.f32.mrf.mxu3 }
 0x704   : > { %v13502_v59 = vadd.f32 %v7427_v14, %v14564_v5  ;;  %v13522_v17 = vpop.f32.mrf.mxu0 }
 0x705   : > { %v8202_v28 = vmul.f32 %v13456_v36, %v8150_v0  ;;  %v14565_v0 = vpack.c.bf16 %v13061_v23, %v13059_v61  ;;  %v7257_v23 = vld [vmem:[#allocation3 + $0x177] sm:$0xff] }
 0x707   : > { %v8254_v8 = vadd.f32 %v13470_v53, %v8202_v28 }
 0x708   : > { %9109 = vmatmul.msk.bf16.gmra.mxu3 %vm2070_vm3, %v7284_v39 }
 0x709   : > { %v8302_v21 = vmax.f32 %v8254_v8, 0.0  ;;  %v7258_v8 = vld [vmem:[#allocation3 + $0x17f] sm:$0xff] }
 0x70a   : > { %v8037_v44 = vpop.f32.mrf.mxu1  ;;  %v7285_v39 = vpack.c.bf16 %v7258_v8, %v7257_v23 }
 0x70b   : > { %v8348_v40 = vpack.c.bf16 %v8302_v21, %v8301_v45  ;;  %v8151_v2 = vadd.f32 %v8037_v44, %v7825_v48  ;;  %v7430_v34 = vpop.f32.mrf.mxu3  ;;  %v7891_v21 = vld [vmem:[#allocation3 + $0xe9] sm:$0xff]  ;;  %v7827_v44 = vadd.f32 %v13326_v62, %v13305_v63 }
 0x70c   : > { %v13513_v55 = vadd.f32 %v7430_v34, %v13109_v29  ;;  %v7928_v25 = vpack.c.bf16 %v7892_v50, %v7891_v21  ;;  %v7828_v34 = vadd.f32 %v13343_v43, %v13320_v24  ;;  %v7829_v24 = vadd.f32 %v13354_v19, %v13331_v27  ;;  %v7588_v50 = vld [vmem:[#allocation3 + $0x1a0] sm:$0xff] }
 0x70d   : > { %9150 = vmatmul.msk.bf16.gmra.mxu1 %vm2070_vm3, %v7927_v20  ;;  %9169 = vmatmul.msk.bf16.gmra.mxu2 %vm8383_vm1, %v8348_v40  ;;  %v8203_v31 = vmul.f32 %v13456_v36, %v8151_v2  ;;  %v13533_v20 = vpop.f32.mrf.mxu0  ;;  %v14566_v40 = vpack.c.bf16 %v13098_v57, %v13096_v42  ;;  %v7894_v42 = vld [vmem:[#allocation3 + $0x101] sm:$0xff] }
 0x70f   : > { %v8255_v33 = vadd.f32 %v13470_v53, %v8203_v31 }
 0x710   : > { %9135 = vmatmul.msk.bf16.gmra.mxu0 %vm2070_vm3, %v14565_v0 }
 0x711   : > { %v8303_v45 = vmax.f32 %v8255_v33, 0.0  ;;  %v7259_v33 = vld [vmem:[#allocation3 + $0x187] sm:$0xff] }
 0x712   : > { %v8039_v28 = vpop.f32.mrf.mxu1 }
 0x713   : > { %v8152_v14 = vadd.f32 %v8039_v28, %v7826_v47  ;;  %v7432_v29 = vpop.f32.mrf.mxu3  ;;  %v7260_v47 = vld [vmem:[#allocation3 + $0x18f] sm:$0xff] }
 0x714   : > { %v13527_v3 = vadd.f32 %v7432_v29, %v13117_v16  ;;  %v7286_v57 = vpack.c.bf16 %v7260_v47, %v7259_v33 }
 0x715   : > { %v8204_v5 = vmul.f32 %v13456_v36, %v8152_v14  ;;  %v13546_v28 = vpop.f32.mrf.mxu0 }
 0x717   : > { %v8256_v61 = vadd.f32 %v13470_v53, %v8204_v5 }
 0x718   : > { %9110 = vmatmul.msk.bf16.gmra.mxu3 %vm2070_vm3, %v7285_v39 }
 0x719   : > { %v8304_v37 = vmax.f32 %v8256_v61, 0.0  ;;  %v7893_v61 = vld [vmem:[#allocation3 + $0xf9] sm:$0xff] }
 0x71a   : > { %v8042_v32 = vpop.f32.mrf.mxu1  ;;  %v7929_v43 = vpack.c.bf16 %v7894_v42, %v7893_v61 }
 0x71b   : > { %v8349_v48 = vpack.c.bf16 %v8304_v37, %v8303_v45  ;;  %v8153_v16 = vadd.f32 %v8042_v32, %v7827_v44  ;;  %v14567_v45 = vld [vmem:[#allocation31_spill] sm:$0xff]  ;;  %v7830_v44 = vadd.f32 %v13372_v4, %v13346_v22  ;;  %v7831_v22 = vadd.f32 %v13391_v18, %v13357_v1 }
 0x71c   : > { %v7613_v37 = vpack.c.bf16 %v7588_v50, %v14567_v45  ;;  %v7264_v50 = vld [vmem:[#allocation3 + $0x1af] sm:$0xff] }
 0x71d   : > { %9151 = vmatmul.msk.bf16.gmra.mxu1 %vm2070_vm3, %v7928_v25  ;;  %9170 = vmatmul.msk.bf16.gmra.mxu2 %vm8383_vm1, %v8349_v48  ;;  %v8205_v2 = vmul.f32 %v13456_v36, %v8153_v16  ;;  %v13555_v32 = vpop.f32.mrf.mxu0  ;;  %v7261_v16 = vld [vmem:[#allocation3 + $0x197] sm:$0xff] }
 0x71f   : > { %v8257_v0 = vadd.f32 %v13470_v53, %v8205_v2 }
 0x720   : > { %9136 = vmatmul.msk.bf16.gmra.mxu0 %vm2070_vm3, %v14566_v40  ;;  %v7262_v40 = vld [vmem:[#allocation3 + $0x19f] sm:$0xff] }
 0x721   : > { %v8305_v5 = vmax.f32 %v8257_v0, 0.0 }
 0x722   : > { %v8044_v63 = vpop.f32.mrf.mxu1 }
 0x723   : > { %v8154_v62 = vadd.f32 %v8044_v63, %v7828_v34  ;;  %v7896_v34 = vld [vmem:[#allocation3 + $0x111] sm:$0xff]  ;;  %v7287_v63 = vpack.c.bf16 %v7262_v40, %v7261_v16 }
 0x725   : > { %v8206_v31 = vmul.f32 %v13456_v36, %v8154_v62 }
 0x727   : > { %v8258_v14 = vadd.f32 %v13470_v53, %v8206_v31  ;;  %v13564_v31 = vpop.f32.mrf.mxu0 }
 0x728   : > { %9111 = vmatmul.msk.bf16.gmra.mxu3 %vm2070_vm3, %v7286_v57 }
 0x729   : > { %v8306_v29 = vmax.f32 %v8258_v14, 0.0  ;;  %v7895_v14 = vld [vmem:[#allocation3 + $0x109] sm:$0xff] }
 0x72a   : > { %v8047_v8 = vpop.f32.mrf.mxu1  ;;  %v7930_v4 = vpack.c.bf16 %v7896_v34, %v7895_v14 }
 0x72b   : > { %v8350_v23 = vpack.c.bf16 %v8306_v29, %v8305_v5  ;;  %v8155_v39 = vadd.f32 %v8047_v8, %v7829_v24  ;;  %v7832_v5 = vadd.f32 %v13403_v52, %v13370_v15  ;;  %v7589_v29 = vld [vmem:[#allocation3 + $0x1a8] sm:$0xff]  ;;  %v7590_v8 = vld [vmem:[#allocation3 + $0x1b0] sm:$0xff] }
 0x72c   : > { %v7614_v24 = vpack.c.bf16 %v7590_v8, %v7589_v29 }
 0x72d   : > { %9152 = vmatmul.msk.bf16.gmra.mxu1 %vm2070_vm3, %v7929_v43  ;;  %9171 = vmatmul.msk.bf16.gmra.mxu2 %vm8383_vm1, %v8350_v23  ;;  %v8207_v21 = vmul.f32 %v13456_v36, %v8155_v39  ;;  %v7263_v23 = vld [vmem:[#allocation3 + $0x1a7] sm:$0xff] }
 0x72e   : > { %v7288_v45 = vpack.c.bf16 %v7264_v50, %v7263_v23 }
 0x72f   : > { %v8259_v25 = vadd.f32 %v13470_v53, %v8207_v21  ;;  %v13574_v1 = vpop.f32.mrf.mxu0  ;;  %v7898_v21 = vld [vmem:[#allocation3 + $0x121] sm:$0xff] }
 0x730   : > { %9137 = vmatmul.msk.bf16.gmra.mxu0 %vm2070_vm3, %v7613_v37 }
 0x731   : > { %v8307_v62 = vmax.f32 %v8259_v25, 0.0 }
 0x732   : > { %v8049_v27 = vpop.f32.mrf.mxu1 }
 0x733   : > { %v8156_v19 = vadd.f32 %v8049_v27, %v7830_v44  ;;  %v7897_v27 = vld [vmem:[#allocation3 + $0x119] sm:$0xff] }
 0x734   : > { %v7931_v25 = vpack.c.bf16 %v7898_v21, %v7897_v27  ;;  %v7838_v21 = vadd.f32 %v13505_v46, %v13446_v7  ;;  %v7903_v46 = vld [vmem:[#allocation3 + $0x149] sm:$0xff] }
 0x735   : > { %v8208_v48 = vmul.f32 %v13456_v36, %v8156_v19  ;;  %v7833_v19 = vadd.f32 %v13419_v60, %v13381_v13  ;;  %v7900_v60 = vld [vmem:[#allocation3 + $0x131] sm:$0xff] }
 0x737   : > { %v8260_v2 = vadd.f32 %v13470_v53, %v8208_v48 }
 0x738   : > { %9112 = vmatmul.msk.bf16.gmra.mxu3 %vm2070_vm3, %v7287_v63 }
 0x739   : > { %v8308_v0 = vmax.f32 %v8260_v2, 0.0  ;;  %v7834_v2 = vadd.f32 %v13433_v10, %v13396_v9  ;;  %v7836_v10 = vadd.f32 %v13474_v6, %v13422_v35 }
 0x73a   : > { %v8052_v47 = vpop.f32.mrf.mxu1 }
 0x73b   : > { %v8351_v33 = vpack.c.bf16 %v8308_v0, %v8307_v62  ;;  %v8157_v42 = vadd.f32 %v8052_v47, %v7831_v22 }
 0x73d   : > { %9153 = vmatmul.msk.bf16.gmra.mxu1 %vm2070_vm3, %v7930_v4  ;;  %9172 = vmatmul.msk.bf16.gmra.mxu2 %vm8383_vm1, %v8351_v33  ;;  %v8209_v57 = vmul.f32 %v13456_v36, %v8157_v42  ;;  %v7899_v4 = vld [vmem:[#allocation3 + $0x129] sm:$0xff]  ;;  %v7835_v33 = vadd.f32 %v13448_v11, %v13407_v56  ;;  %v7902_v11 = vld [vmem:[#allocation3 + $0x141] sm:$0xff] }
 0x73e   : > { %v7932_v42 = vpack.c.bf16 %v7900_v60, %v7899_v4 }
 0x73f   : > { %v8261_v18 = vadd.f32 %v13470_v53, %v8209_v57 }
 0x740   : > { %9138 = vmatmul.msk.bf16.gmra.mxu0 %vm2070_vm3, %v7614_v24 }
 0x741   : > { %v8309_v15 = vmax.f32 %v8261_v18, 0.0  ;;  %v7901_v18 = vld [vmem:[#allocation3 + $0x139] sm:$0xff] }
 0x742   : > { %v8054_v61 = vpop.f32.mrf.mxu1 }
 0x743   : > { %v8158_v43 = vadd.f32 %v8054_v61, %v7832_v5 }
 0x745   : > { %v8210_v39 = vmul.f32 %v13456_v36, %v8158_v43 }
 0x747   : > { %v8262_v37 = vadd.f32 %v13470_v53, %v8210_v39  ;;  %v7837_v39 = vadd.f32 %v13487_v51, %v13431_v54 }
 0x748   : > { %9113 = vmatmul.msk.bf16.gmra.mxu3 %vm2070_vm3, %v7288_v45  ;;  %v7933_v45 = vpack.c.bf16 %v7902_v11, %v7901_v18 }
 0x749   : > { %v8310_v52 = vmax.f32 %v8262_v37, 0.0 }
 0x74a   : > { %v8057_v44 = vpop.f32.mrf.mxu1 }
 0x74b   : > { %v8352_v48 = vpack.c.bf16 %v8310_v52, %v8309_v15  ;;  %v8159_v16 = vadd.f32 %v8057_v44, %v7833_v19  ;;  %v13608_v44 = vpop.f32.mrf.mxu3  ;;  %v13613_v19 = vpop.f32.mrf.mxu2 }
 0x74d   : > { %9154 = vmatmul.msk.bf16.gmra.mxu1 %vm2070_vm3, %v7931_v25  ;;  %9173 = vmatmul.msk.bf16.gmra.mxu2 %vm8383_vm1, %v8352_v48  ;;  %v8211_v40 = vmul.f32 %v13456_v36, %v8159_v16  ;;  %v7904_v25 = vld [vmem:[#allocation3 + $0x151] sm:$0xff] }
 0x74f   : > { %v8263_v62 = vadd.f32 %v13470_v53, %v8211_v40  ;;  %v13616_v40 = vpop.f32.mrf.mxu0 }
 0x751   : > { %v8311_v47 = vmax.f32 %v8263_v62, 0.0 }
 0x752   : > { %v8059_v34 = vpop.f32.mrf.mxu1 }
 0x753   : > { %v8160_v63 = vadd.f32 %v8059_v34, %v7834_v2  ;;  %v7839_v2 = vadd.f32 %v13522_v17, %v13460_v30  ;;  %v7934_v34 = vpack.c.bf16 %v7904_v25, %v7903_v46  ;;  %v7840_v17 = vadd.f32 %v13533_v20, %v13479_v49  ;;  %v7907_v25 = vld [vmem:[#allocation3 + $0x169] sm:$0xff] }
 0x755   : > { %v8212_v0 = vmul.f32 %v13456_v36, %v8160_v63 }
 0x757   : > { %v8264_v13 = vadd.f32 %v13470_v53, %v8212_v0  ;;  %v13627_v0 = vld [vmem:[%s13956_s8] ss:$0 sm:$0xff]  ;;  %v13638_v4 = vpop.f32.mrf.mxu0 }
 0x759   : > { %v8312_v14 = vmax.f32 %v8264_v13, 0.0  ;;  %v13629_v13 = vpop.f32.mrf.mxu3 }
 0x75a   : > { %v8062_v22 = vpop.f32.mrf.mxu1 }
 0x75b   : > { %v8353_v57 = vpack.c.bf16 %v8312_v14, %v8311_v47  ;;  %v8161_v5 = vadd.f32 %v8062_v22, %v7835_v33 }
 0x75d   : > { %9155 = vmatmul.msk.bf16.gmra.mxu1 %vm2070_vm3, %v7932_v42  ;;  %9174 = vmatmul.msk.bf16.gmra.mxu2 %vm8383_vm1, %v8353_v57  ;;  %v8213_v9 = vmul.f32 %v13456_v36, %v8161_v5 }
 0x75f   : > { %v8265_v61 = vadd.f32 %v13470_v53, %v8213_v9 }
 0x761   : > { %v8313_v43 = vmax.f32 %v8265_v61, 0.0  ;;  %v13643_v5 = vpop.f32.mrf.mxu3  ;;  %v7905_v61 = vld [vmem:[#allocation3 + $0x159] sm:$0xff] }
 0x762   : > { %v8064_v29 = vpop.f32.mrf.mxu1 }
 0x763   : > { %v8162_v8 = vadd.f32 %v8064_v29, %v7836_v10  ;;  %v7906_v10 = vld [vmem:[#allocation3 + $0x161] sm:$0xff] }
 0x765   : > { %v8214_v24 = vmul.f32 %v13456_v36, %v8162_v8 }
 0x767   : > { %v8266_v56 = vadd.f32 %v13470_v53, %v8214_v24  ;;  %v7841_v24 = vadd.f32 %v13546_v28, %v13490_v41 }
 0x769   : > { %v8314_v23 = vmax.f32 %v8266_v56, 0.0  ;;  %v7935_v56 = vpack.c.bf16 %v7906_v10, %v7905_v61 }
 0x76a   : > { %v8067_v50 = vpop.f32.mrf.mxu1 }
 0x76b   : > { %v8354_v37 = vpack.c.bf16 %v8314_v23, %v8313_v43  ;;  %v8163_v35 = vadd.f32 %v8067_v50, %v7837_v39  ;;  %v13651_v23 = vpop.f32.mrf.mxu0 }
 0x76d   : > { %9156 = vmatmul.msk.bf16.gmra.mxu1 %vm2070_vm3, %v7933_v45  ;;  %9175 = vmatmul.msk.bf16.gmra.mxu2 %vm8383_vm1, %v8354_v37  ;;  %v8215_v6 = vmul.f32 %v13456_v36, %v8163_v35  ;;  %v7842_v45 = vadd.f32 %v13555_v32, %v13502_v59  ;;  %v13657_v37 = vpop.f32.mrf.mxu3 }
 0x76f   : > { %v8267_v54 = vadd.f32 %v13470_v53, %v8215_v6 }
 0x771   : > { %v8315_v48 = vmax.f32 %v8267_v54, 0.0  ;;  %v7908_v54 = vld [vmem:[#allocation3 + $0x171] sm:$0xff] }
 0x772   : > { %v8069_v15 = vpop.f32.mrf.mxu1 }
 0x773   : > { %v8164_v52 = vadd.f32 %v8069_v15, %v7838_v21  ;;  %v13663_v15 = vpop.f32.mrf.mxu0 }
 0x775   : > { %v8216_v51 = vmul.f32 %v13456_v36, %v8164_v52  ;;  %v13669_v46 = vpop.f32.mrf.mxu3 }
 0x777   : > { %v8268_v27 = vadd.f32 %v13470_v53, %v8216_v51 }
 0x779   : > { %v8316_v16 = vmax.f32 %v8268_v27, 0.0 }
 0x77a   : > { %v8072_v7 = vpop.f32.mrf.mxu1 }
 0x77b   : > { %v8355_v63 = vpack.c.bf16 %v8316_v16, %v8315_v48  ;;  %v8165_v62 = vadd.f32 %v8072_v7, %v7839_v2  ;;  %v7843_v48 = vadd.f32 %v13564_v31, %v13513_v55  ;;  %v7936_v16 = vpack.c.bf16 %v7908_v54, %v7907_v25 }
 0x77d   : > { %9157 = vmatmul.msk.bf16.gmra.mxu1 %vm2070_vm3, %v7934_v34  ;;  %9176 = vmatmul.msk.bf16.gmra.mxu2 %vm8383_vm1, %v8355_v63  ;;  %v8217_v47 = vmul.f32 %v13456_v36, %v8165_v62 }
 0x77f   : > { %v8269_v33 = vadd.f32 %v13470_v53, %v8217_v47  ;;  %v13677_v47 = vpop.f32.mrf.mxu0 }
 0x780   : > { %v8465_v60 = vpop.f32.mrf.mxu2 }
 0x781   : > { %v8466_v30 = vadd.f32 %v13627_v0, %v8465_v60  ;;  %v8317_v49 = vmax.f32 %v8269_v33, 0.0  ;;  %v7844_v60 = vadd.f32 %v13574_v1, %v13527_v3 }
 0x782   : > { %v8074_v14 = vpop.f32.mrf.mxu1 }
 0x783   : > { %8585 = vst [vmem:[%s13635_s17] sm:$0xff] %v8466_v30  ;;  %v8166_v22 = vadd.f32 %v8074_v14, %v7840_v17  ;;  %v13682_v14 = vpop.f32.mrf.mxu3 }
 0x785   : > { %v8218_v42 = vmul.f32 %v13456_v36, %v8166_v22  ;;  %v14568_v22 = vld [vmem:[#allocation78_spill] sm:$0xff] }
 0x786   : > { %v7519_v33 = vadd.f32 %v13608_v44, %v14568_v22 }
 0x787   : > { %v8270_v57 = vadd.f32 %v13470_v53, %v8218_v42  ;;  %v13692_v44 = vpop.f32.mrf.mxu0 }
 0x788   : > { %v8467_v9 = vpop.f32.mrf.mxu2 }
 0x789   : > { %v8318_v20 = vmax.f32 %v8270_v57, 0.0  ;;  %v8468_v29 = vadd.f32 %v13627_v0, %v8467_v9  ;;  %v7910_v9 = vld [vmem:[#allocation3 + $0x181] sm:$0xff] }
 0x78a   : > { %v8077_v8 = vpop.f32.mrf.mxu1 }
 0x78b   : > { %8586 = vst [vmem:[%s13635_s17 + $0x8] sm:$0xff] %v8468_v29  ;;  %v8356_v11 = vpack.c.bf16 %v8318_v20, %v8317_v49  ;;  %v8167_v43 = vadd.f32 %v8077_v8, %v7841_v24  ;;  %v7909_v20 = vld [vmem:[#allocation3 + $0x179] sm:$0xff]  ;;  %v7845_v24 = vadd.f32 %v13616_v40, %v7519_v33 }
 0x78c   : > { %v14569_v29 = vld [vmem:[#allocation34_spill] sm:$0xff] }
 0x78d   : > { %9158 = vmatmul.msk.bf16.gmra.mxu1 %vm2070_vm3, %v7935_v56  ;;  %9177 = vmatmul.msk.bf16.gmra.mxu2 %vm8383_vm1, %v8356_v11  ;;  %v8219_v18 = vmul.f32 %v13456_v36, %v8167_v43  ;;  %v14570_v8 = vld [vmem:[#allocation46_spill] sm:$0xff]  ;;  %v7937_v56 = vpack.c.bf16 %v7910_v9, %v7909_v20 }
 0x78e   : > { %v7194_v61 = vadd.f32 %v14570_v8, %v14569_v29  ;;  %v7913_v29 = vld [vmem:[#allocation3 + $0x199] sm:$0xff]  ;;  %v7914_v8 = vld [vmem:[#allocation3 + $0x1a1] sm:$0xff] }
 0x78f   : > { %v8271_v35 = vadd.f32 %v13470_v53, %v8219_v18  ;;  %v13697_v18 = vpop.f32.mrf.mxu3 }
 0x790   : > { %v8470_v50 = vpop.f32.mrf.mxu2  ;;  %v7520_v43 = vadd.f32 %v13629_v13, %v7194_v61 }
 0x791   : > { %v8471_v39 = vadd.f32 %v13627_v0, %v8470_v50  ;;  %v8319_v51 = vmax.f32 %v8271_v35, 0.0 }
 0x792   : > { %v8079_v41 = vpop.f32.mrf.mxu1  ;;  %v7846_v40 = vadd.f32 %v13638_v4, %v7520_v43  ;;  %v14575_v43 = vld [vmem:[#allocation10_spill] sm:$0xff] }
 0x793   : > { %8587 = vst [vmem:[%s13635_s17 + $0x10] sm:$0xff] %v8471_v39  ;;  %v8168_v28 = vadd.f32 %v8079_v41, %v7842_v45 }
 0x795   : > { %v8220_v6 = vmul.f32 %v13456_v36, %v8168_v28 }
 0x797   : > { %v8272_v21 = vadd.f32 %v13470_v53, %v8220_v6 }
 0x798   : > { %v8472_v52 = vpop.f32.mrf.mxu2 }
 0x799   : > { %v8320_v27 = vmax.f32 %v8272_v21, 0.0  ;;  %v8473_v59 = vadd.f32 %v13627_v0, %v8472_v52  ;;  %v13705_v21 = vpop.f32.mrf.mxu0  ;;  %v14571_v52 = vld [vmem:[#allocation29_spill] sm:$0xff] }
 0x79a   : > { %v8082_v32 = vpop.f32.mrf.mxu1  ;;  %v7521_v54 = vadd.f32 %v13643_v5, %v14571_v52 }
 0x79b   : > { %8588 = vst [vmem:[%s13635_s17 + $0x18] sm:$0xff] %v8473_v59  ;;  %v8357_v7 = vpack.c.bf16 %v8320_v27, %v8319_v51  ;;  %v8169_v2 = vadd.f32 %v8082_v32, %v7843_v48  ;;  %v7912_v59 = vld [vmem:[#allocation3 + $0x191] sm:$0xff]  ;;  %v13711_v48 = vpop.f32.mrf.mxu3 }
 0x79c   : > { %v7847_v5 = vadd.f32 %v13651_v23, %v7521_v54 }
 0x79d   : > { %9159 = vmatmul.msk.bf16.gmra.mxu1 %vm2070_vm3, %v7936_v16  ;;  %9178 = vmatmul.msk.bf16.gmra.mxu2 %vm8383_vm1, %v8357_v7  ;;  %v8221_v63 = vmul.f32 %v13456_v36, %v8169_v2  ;;  %v7911_v7 = vld [vmem:[#allocation3 + $0x189] sm:$0xff] }
 0x79e   : > { %v14572_v2 = vld [vmem:[#allocation69_spill] sm:$0xff] }
 0x79f   : > { %v8273_v30 = vadd.f32 %v13470_v53, %v8221_v63 }
 0x7a0   : > { %v8475_v34 = vpop.f32.mrf.mxu2 }
 0x7a1   : > { %v8476_v62 = vadd.f32 %v13627_v0, %v8475_v34  ;;  %v8321_v3 = vmax.f32 %v8273_v30, 0.0  ;;  %v14573_v34 = vld [vmem:[#allocation73_spill] sm:$0xff]  ;;  %v13720_v30 = vpop.f32.mrf.mxu0 }
 0x7a2   : > { %v8084_v55 = vpop.f32.mrf.mxu1  ;;  %v7196_v63 = vadd.f32 %v14573_v34, %v14572_v2 }
 0x7a3   : > { %8589 = vst [vmem:[%s13635_s17 + $0x20] sm:$0xff] %v8476_v62  ;;  %v8170_v31 = vadd.f32 %v8084_v55, %v7844_v60  ;;  %v7938_v60 = vpack.c.bf16 %v7912_v59, %v7911_v7  ;;  %v13726_v9 = vpop.f32.mrf.mxu3 }
 0x7a4   : > { %v7522_v55 = vadd.f32 %v13657_v37, %v7196_v63 }
 0x7a5   : > { %v8222_v17 = vmul.f32 %v13456_v36, %v8170_v31 }
 0x7a7   : > { %v8274_v42 = vadd.f32 %v13470_v53, %v8222_v17 }
 0x7a8   : > { %v8477_v57 = vpop.f32.mrf.mxu2 }
 0x7a9   : > { %v8322_v1 = vmax.f32 %v8274_v42, 0.0  ;;  %v8478_v10 = vadd.f32 %v13627_v0, %v8477_v57  ;;  %v7848_v42 = vadd.f32 %v13663_v15, %v7522_v55  ;;  %v14578_v55 = vld [vmem:[#allocation41_spill] sm:$0xff] }
 0x7aa   : > { %v8087_v49 = vpop.f32.mrf.mxu1 }
 0x7ab   : > { %8590 = vst [vmem:[%s13635_s17 + $0x28] sm:$0xff] %v8478_v10  ;;  %v8358_v11 = vpack.c.bf16 %v8322_v1, %v8321_v3  ;;  %v8171_v50 = vadd.f32 %v8087_v49, %v7845_v24  ;;  %v14574_v1 = vld [vmem:[#allocation32_spill] sm:$0xff] }
 0x7ac   : > { %v7523_v10 = vadd.f32 %v13669_v46, %v14574_v1 }
 0x7ad   : > { %9160 = vmatmul.msk.bf16.gmra.mxu1 %vm2070_vm3, %v7937_v56  ;;  %9179 = vmatmul.msk.bf16.gmra.mxu2 %vm8383_vm1, %v8358_v11  ;;  %v8223_v45 = vmul.f32 %v13456_v36, %v8171_v50  ;;  %v13734_v56 = vpop.f32.mrf.mxu0  ;;  %v14576_v50 = vld [vmem:[#allocation84_spill] sm:$0xff] }
 0x7ae   : > { %v7849_v46 = vadd.f32 %v13677_v47, %v7523_v10 }
 0x7af   : > { %v8275_v13 = vadd.f32 %v13470_v53, %v8223_v45 }
 0x7b0   : > { %v8480_v39 = vpop.f32.mrf.mxu2 }
 0x7b1   : > { %v8481_v41 = vadd.f32 %v13627_v0, %v8480_v39  ;;  %v8323_v32 = vmax.f32 %v8275_v13, 0.0  ;;  %v7198_v39 = vadd.f32 %v14576_v50, %v14575_v43 }
 0x7b2   : > { %v8089_v28 = vpop.f32.mrf.mxu1 }
 0x7b3   : > { %8591 = vst [vmem:[%s13635_s17 + $0x30] sm:$0xff] %v8481_v41  ;;  %v8172_v35 = vadd.f32 %v8089_v28, %v7846_v40  ;;  %v7939_v41 = vpack.c.bf16 %v7914_v8, %v7913_v29  ;;  %v7524_v40 = vadd.f32 %v13682_v14, %v7198_v39  ;;  %v14580_v29 = vld [vmem:[#allocation81_spill] sm:$0xff] }
 0x7b4   : > { %v7527_v8 = vadd.f32 %v13726_v9, %v14580_v29  ;;  %v14581_v39 = vld [vmem:[#allocation13_spill] sm:$0xff] }
 0x7b5   : > { %v8224_v6 = vmul.f32 %v13456_v36, %v8172_v35  ;;  %v7457_v35 = vpop.f32.mrf.mxu3  ;;  %v7850_v54 = vadd.f32 %v13692_v44, %v7524_v40  ;;  %v7783_v47 = vpop.f32.mrf.mxu0 }
 0x7b6   : > { %v7853_v40 = vadd.f32 %v13734_v56, %v7527_v8 }
 0x7b7   : > { %v8276_v51 = vadd.f32 %v13470_v53, %v8224_v6 }
 0x7b8   : > { %v8482_v27 = vpop.f32.mrf.mxu2 }
 0x7b9   : > { %v8324_v25 = vmax.f32 %v8276_v51, 0.0  ;;  %v8483_v4 = vadd.f32 %v13627_v0, %v8482_v27 }
 0x7ba   : > { %v8092_v16 = vpop.f32.mrf.mxu1 }
 0x7bb   : > { %v8359_v62 = vpack.c.bf16 %v8324_v25, %v8323_v32  ;;  %8592 = vst [vmem:[%s13635_s17 + $0x38] sm:$0xff] %v8483_v4  ;;  %v8173_v31 = vadd.f32 %v8092_v16, %v7847_v5  ;;  %v7915_v32 = vld [vmem:[#allocation3 + $0x1a9] sm:$0xff]  ;;  %v7916_v25 = vld [vmem:[#allocation3 + $0x1b1] sm:$0xff] }
 0x7bc   : > { %v14577_v4 = vld [vmem:[#allocation44_spill] sm:$0xff]  ;;  %v7940_v5 = vpack.c.bf16 %v7916_v25, %v7915_v32 }
 0x7bd   : > { %9161 = vmatmul.msk.bf16.gmra.mxu1 %vm2070_vm3, %v7938_v60  ;;  %9180 = vmatmul.msk.bf16.gmra.mxu2 %vm8383_vm1, %v8359_v62  ;;  %v8225_v22 = vmul.f32 %v13456_v36, %v8173_v31  ;;  %v7525_v16 = vadd.f32 %v13697_v18, %v14577_v4  ;;  %v7460_v2 = vpop.f32.mrf.mxu3  ;;  %v14579_v31 = vld [vmem:[#allocation77_spill] sm:$0xff] }
 0x7bf   : > { %v8277_v37 = vadd.f32 %v13470_v53, %v8225_v22 }
 0x7c0   : > { %v8485_v17 = vpop.f32.mrf.mxu2 }
 0x7c1   : > { %v8486_v33 = vadd.f32 %v13627_v0, %v8485_v17  ;;  %v8325_v61 = vmax.f32 %v8277_v37, 0.0  ;;  %v7200_v17 = vadd.f32 %v14579_v31, %v14578_v55 }
 0x7c2   : > { %v8094_v57 = vpop.f32.mrf.mxu1 }
 0x7c3   : > { %8593 = vst [vmem:[%s13635_s17 + $0x40] sm:$0xff] %v8486_v33  ;;  %v8174_v23 = vadd.f32 %v8094_v57, %v7848_v42  ;;  %v7851_v33 = vadd.f32 %v13705_v21, %v7525_v16  ;;  %v7526_v18 = vadd.f32 %v13711_v48, %v7200_v17  ;;  %v7786_v57 = vpop.f32.mrf.mxu0 }
 0x7c5   : > { %v8226_v3 = vmul.f32 %v13456_v36, %v8174_v23  ;;  %v7852_v1 = vadd.f32 %v13720_v30, %v7526_v18  ;;  %v7462_v10 = vpop.f32.mrf.mxu3 }
 0x7c7   : > { %v8278_v49 = vadd.f32 %v13470_v53, %v8226_v3 }
 0x7c8   : > { %v8487_v20 = vpop.f32.mrf.mxu2 }
 0x7c9   : > { %v8326_v15 = vmax.f32 %v8278_v49, 0.0  ;;  %v8488_v24 = vadd.f32 %v13627_v0, %v8487_v20 }
 0x7ca   : > { %v8097_v11 = vpop.f32.mrf.mxu1 }
 0x7cb   : > { %v8360_v45 = vpack.c.bf16 %v8326_v15, %v8325_v61  ;;  %8594 = vst [vmem:[%s13635_s17 + $0x48] sm:$0xff] %v8488_v24  ;;  %v8175_v28 = vadd.f32 %v8097_v11, %v7849_v46  ;;  %v7788_v15 = vpop.f32.mrf.mxu0 }
 0x7cd   : > { %9162 = vmatmul.msk.bf16.gmra.mxu1 %vm2070_vm3, %v7939_v41  ;;  %9181 = vmatmul.msk.bf16.gmra.mxu2 %vm8383_vm1, %v8360_v45  ;;  %v8227_v6 = vmul.f32 %v13456_v36, %v8175_v28  ;;  %v14582_v45 = vld [vmem:[#allocation20_spill] sm:$0xff]  ;;  %v7465_v28 = vpop.f32.mrf.mxu3 }
 0x7ce   : > { %v7202_v46 = vadd.f32 %v14582_v45, %v14581_v39 }
 0x7cf   : > { %v8279_v14 = vadd.f32 %v13470_v53, %v8227_v6 }
 0x7d0   : > { %v8490_v13 = vpop.f32.mrf.mxu2 }
 0x7d1   : > { %v8491_v52 = vadd.f32 %v13627_v0, %v8490_v13  ;;  %v8327_v63 = vmax.f32 %v8279_v14, 0.0  ;;  %v7528_v13 = vadd.f32 %v7457_v35, %v7202_v46  ;;  %v14583_v35 = vld [vmem:[#allocation49_spill] sm:$0xff] }
 0x7d2   : > { %v8099_v51 = vpop.f32.mrf.mxu1  ;;  %v7529_v4 = vadd.f32 %v7460_v2, %v14583_v35 }
 0x7d3   : > { %8595 = vst [vmem:[%s13635_s17 + $0x50] sm:$0xff] %v8491_v52  ;;  %v8176_v27 = vadd.f32 %v8099_v51, %v7850_v54  ;;  %v7854_v51 = vadd.f32 %v7783_v47, %v7528_v13 }
 0x7d4   : > { %v7855_v31 = vadd.f32 %v7786_v57, %v7529_v4 }
 0x7d5   : > { %v8228_v59 = vmul.f32 %v13456_v36, %v8176_v27  ;;  %v7791_v27 = vpop.f32.mrf.mxu0  ;;  %v7467_v25 = vpop.f32.mrf.mxu3 }
 0x7d7   : > { %v8280_v7 = vadd.f32 %v13470_v53, %v8228_v59 }
 0x7d8   : > { %v8492_v34 = vpop.f32.mrf.mxu2 }
 0x7d9   : > { %v8328_v44 = vmax.f32 %v8280_v7, 0.0  ;;  %v8493_v62 = vadd.f32 %v13627_v0, %v8492_v34 }
 0x7da   : > { %v8102_v60 = vpop.f32.mrf.mxu1 }
 0x7db   : > { %v8361_v22 = vpack.c.bf16 %v8328_v44, %v8327_v63  ;;  %8596 = vst [vmem:[%s13635_s17 + $0x58] sm:$0xff] %v8493_v62  ;;  %v8177_v42 = vadd.f32 %v8102_v60, %v7851_v33  ;;  %v14584_v62 = vld [vmem:[#allocation48_spill] sm:$0xff] }
 0x7dd   : > { %9163 = vmatmul.msk.bf16.gmra.mxu1 %vm2070_vm3, %v7940_v5  ;;  %9182 = vmatmul.msk.bf16.gmra.mxu2 %vm8383_vm1, %v8361_v22  ;;  %v8229_v37 = vmul.f32 %v13456_v36, %v8177_v42  ;;  %v14585_v5 = vld [vmem:[#allocation33_spill] sm:$0xff]  ;;  %v7793_v17 = vpop.f32.mrf.mxu0  ;;  %v7470_v2 = vpop.f32.mrf.mxu3 }
 0x7de   : > { %v7204_v60 = vadd.f32 %v14585_v5, %v14584_v62 }
 0x7df   : > { %v8281_v48 = vadd.f32 %v13470_v53, %v8229_v37 }
 0x7e0   : > { %v8495_v23 = vpop.f32.mrf.mxu2  ;;  %v7530_v22 = vadd.f32 %v7462_v10, %v7204_v60  ;;  %v14586_v10 = vld [vmem:[#allocation85_spill] sm:$0xff] }
 0x7e1   : > { %v8496_v3 = vadd.f32 %v13627_v0, %v8495_v23  ;;  %v8329_v11 = vmax.f32 %v8281_v48, 0.0  ;;  %v7531_v48 = vadd.f32 %v7465_v28, %v14586_v10 }
 0x7e2   : > { %v8104_v49 = vpop.f32.mrf.mxu1  ;;  %v7856_v37 = vadd.f32 %v7788_v15, %v7530_v22 }
 0x7e3   : > { %8597 = vst [vmem:[%s13635_s17 + $0x60] sm:$0xff] %v8496_v3  ;;  %v8178_v21 = vadd.f32 %v8104_v49, %v7852_v1  ;;  %v7857_v45 = vadd.f32 %v7791_v27, %v7531_v48 }
 0x7e5   : > { %v8230_v20 = vmul.f32 %v13456_v36, %v8178_v21  ;;  %v7796_v21 = vpop.f32.mrf.mxu0  ;;  %v7472_v15 = vpop.f32.mrf.mxu3 }
 0x7e7   : > { %v8282_v61 = vadd.f32 %v13470_v53, %v8230_v20 }
 0x7e8   : > { %v8497_v24 = vpop.f32.mrf.mxu2 }
 0x7e9   : > { %v8330_v43 = vmax.f32 %v8282_v61, 0.0  ;;  %v8498_v30 = vadd.f32 %v13627_v0, %v8497_v24 }
 0x7ea   : > { %v8107_v50 = vpop.f32.mrf.mxu1 }
 0x7eb   : > { %v8362_v41 = vpack.c.bf16 %v8330_v43, %v8329_v11  ;;  %8598 = vst [vmem:[%s13635_s17 + $0x68] sm:$0xff] %v8498_v30  ;;  %v8179_v9 = vadd.f32 %v8107_v50, %v7853_v40  ;;  %v14587_v43 = vld [vmem:[#allocation50_spill] sm:$0xff] }
 0x7ec   : > { %v14588_v30 = vld [vmem:[#allocation14_spill] sm:$0xff] }
 0x7ed   : > { %9183 = vmatmul.msk.bf16.gmra.mxu2 %vm8383_vm1, %v8362_v41  ;;  %v8231_v52 = vmul.f32 %v13456_v36, %v8179_v9  ;;  %v7206_v50 = vadd.f32 %v14588_v30, %v14587_v43  ;;  %v7798_v40 = vpop.f32.mrf.mxu0 }
 0x7ef   : > { %v8283_v32 = vadd.f32 %v13470_v53, %v8231_v52  ;;  %v7532_v46 = vadd.f32 %v7467_v25, %v7206_v50 }
 0x7f0   : > { %v8500_v6 = vpop.f32.mrf.mxu2 }
 0x7f1   : > { %v8501_v54 = vadd.f32 %v13627_v0, %v8500_v6  ;;  %v8331_v34 = vmax.f32 %v8283_v32, 0.0  ;;  %v7858_v6 = vadd.f32 %v7793_v17, %v7532_v46 }
 0x7f2   : > { %v8109_v14 = vpop.f32.mrf.mxu1 }
 0x7f3   : > { %8599 = vst [vmem:[%s13635_s17 + $0x70] sm:$0xff] %v8501_v54  ;;  %v8180_v59 = vadd.f32 %v8109_v14, %v7854_v51  ;;  %v7475_v51 = vpop.f32.mrf.mxu3 }
 0x7f5   : > { %v8232_v56 = vmul.f32 %v13456_v36, %v8180_v59  ;;  %v14589_v59 = vld [vmem:[#allocation9_spill] sm:$0xff] }
 0x7f6   : > { %v7533_v32 = vadd.f32 %v7470_v2, %v14589_v59 }
 0x7f7   : > { %v8284_v16 = vadd.f32 %v13470_v53, %v8232_v56 }
 0x7f8   : > { %v8502_v7 = vpop.f32.mrf.mxu2  ;;  %v7859_v5 = vadd.f32 %v7796_v21, %v7533_v32 }
 0x7f9   : > { %v8332_v63 = vmax.f32 %v8284_v16, 0.0  ;;  %v8503_v44 = vadd.f32 %v13627_v0, %v8502_v7  ;;  %v7801_v7 = vpop.f32.mrf.mxu0 }
 0x7fa   : > { %v8112_v47 = vpop.f32.mrf.mxu1 }
 0x7fb   : > { %v8363_v55 = vpack.c.bf16 %v8332_v63, %v8331_v34  ;;  %8600 = vst [vmem:[%s13635_s17 + $0x78] sm:$0xff] %v8503_v44  ;;  %v8181_v33 = vadd.f32 %v8112_v47, %v7855_v31  ;;  %v14590_v63 = vld [vmem:[#allocation53_spill] sm:$0xff]  ;;  %v14591_v44 = vld [vmem:[#allocation52_spill] sm:$0xff]  ;;  %v7477_v31 = vpop.f32.mrf.mxu3 }
 0x7fc   : > { %v7208_v47 = vadd.f32 %v14591_v44, %v14590_v63 }
 0x7fd   : > { %9184 = vmatmul.msk.bf16.gmra.mxu2 %vm8383_vm1, %v8363_v55  ;;  %v8233_v42 = vmul.f32 %v13456_v36, %v8181_v33 }
 0x7fe   : > { %v7534_v60 = vadd.f32 %v7472_v15, %v7208_v47 }
 0x7ff   : > { %v8285_v49 = vadd.f32 %v13470_v53, %v8233_v42 }
 0x800   : > { %v8505_v18 = vpop.f32.mrf.mxu2  ;;  %v7860_v33 = vadd.f32 %v7798_v40, %v7534_v60 }
 0x801   : > { %v8506_v23 = vadd.f32 %v13627_v0, %v8505_v18  ;;  %v8333_v8 = vmax.f32 %v8285_v49, 0.0  ;;  %v7803_v42 = vpop.f32.mrf.mxu0 }
 0x802   : > { %v8114_v3 = vpop.f32.mrf.mxu1 }
 0x803   : > { %8601 = vst [vmem:[%s13635_s17 + $0x80] sm:$0xff] %v8506_v23  ;;  %v8182_v1 = vadd.f32 %v8114_v3, %v7856_v37  ;;  %v13817_v23 = vld [vmem:[%s13954_s6] ss:$0 sm:$0xff]  ;;  %v7480_v21 = vpop.f32.mrf.mxu3 }
 0x804   : > { %v13823_v3 = vld [vmem:[%s13953_s5] ss:$0 sm:$0xff] }
 0x805   : > { %v8234_v57 = vmul.f32 %v13456_v36, %v8182_v1  ;;  %v14592_v1 = vld [vmem:[#allocation51_spill] sm:$0xff] }
 0x806   : > { %v7535_v49 = vadd.f32 %v7475_v51, %v14592_v1  ;;  %v14596_v1 = vld [vmem:[#allocation60_spill] sm:$0xff] }
 0x807   : > { %v8286_v20 = vadd.f32 %v13470_v53, %v8234_v57 }
 0x808   : > { %v8507_v29 = vpop.f32.mrf.mxu2  ;;  %v7861_v43 = vadd.f32 %v7801_v7, %v7535_v49  ;;  %v14597_v49 = vld [vmem:[#allocation56_spill] sm:$0xff] }
 0x809   : > { %v8334_v61 = vmax.f32 %v8286_v20, 0.0  ;;  %v8508_v24 = vadd.f32 %v13627_v0, %v8507_v29 }
 0x80a   : > { %v8117_v11 = vpop.f32.mrf.mxu1 }
 0x80b   : > { %v8364_v39 = vpack.c.bf16 %v8334_v61, %v8333_v8  ;;  %8602 = vst [vmem:[%s13635_s17 + $0x88] sm:$0xff] %v8508_v24  ;;  %v8183_v41 = vadd.f32 %v8117_v11, %v7857_v45  ;;  %v14593_v61 = vld [vmem:[#allocation57_spill] sm:$0xff]  ;;  %v14594_v24 = vld [vmem:[#allocation18_spill] sm:$0xff] }
 0x80c   : > { %v7210_v15 = vadd.f32 %v14594_v24, %v14593_v61 }
 0x80d   : > { %9185 = vmatmul.msk.bf16.gmra.mxu2 %vm8383_vm1, %v8364_v39  ;;  %v8235_v13 = vmul.f32 %v13456_v36, %v8183_v41  ;;  %v7806_v39 = vpop.f32.mrf.mxu0 }
 0x80e   : > { %v7536_v30 = vadd.f32 %v7477_v31, %v7210_v15 }
 0x80f   : > { %v8287_v14 = vadd.f32 %v13470_v53, %v8235_v13 }
 0x810   : > { %v8510_v28 = vpop.f32.mrf.mxu2  ;;  %v7862_v40 = vadd.f32 %v7803_v42, %v7536_v30 }
 0x811   : > { %v8511_v9 = vadd.f32 %v13627_v0, %v8510_v28  ;;  %v8335_v35 = vmax.f32 %v8287_v14, 0.0  ;;  %v7482_v28 = vpop.f32.mrf.mxu3 }
 0x812   : > { %v8119_v52 = vpop.f32.mrf.mxu1 }
 0x813   : > { %8603 = vst [vmem:[%s13635_s17 + $0x90] sm:$0xff] %v8511_v9  ;;  %v8184_v54 = vadd.f32 %v8119_v52, %v7858_v6 }
 0x815   : > { %v8236_v27 = vmul.f32 %v13456_v36, %v8184_v54  ;;  %v7537_v54 = vadd.f32 %v7480_v21, %v13387_v58  ;;  %v7808_v14 = vpop.f32.mrf.mxu0 }
 0x817   : > { %v8288_v56 = vadd.f32 %v13470_v53, %v8236_v27  ;;  %v7863_v7 = vadd.f32 %v7806_v39, %v7537_v54 }
 0x818   : > { %v8512_v25 = vpop.f32.mrf.mxu2 }
 0x819   : > { %v8336_v4 = vmax.f32 %v8288_v56, 0.0  ;;  %v8513_v16 = vadd.f32 %v13627_v0, %v8512_v25 }
 0x81a   : > { %v8122_v34 = vpop.f32.mrf.mxu1 }
 0x81b   : > { %v8365_v62 = vpack.c.bf16 %v8336_v4, %v8335_v35  ;;  %8604 = vst [vmem:[%s13635_s17 + $0x98] sm:$0xff] %v8513_v16  ;;  %v8185_v55 = vadd.f32 %v8122_v34, %v7859_v5  ;;  %v14595_v35 = vld [vmem:[#allocation11_spill] sm:$0xff]  ;;  %v7485_v34 = vpop.f32.mrf.mxu3 }
 0x81c   : > { %v7212_v4 = vadd.f32 %v14595_v35, %v13393_v12 }
 0x81d   : > { %9186 = vmatmul.msk.bf16.gmra.mxu2 %vm8383_vm1, %v8365_v62  ;;  %v8237_v17 = vmul.f32 %v13456_v36, %v8185_v55  ;;  %v7811_v60 = vpop.f32.mrf.mxu0 }
 0x81e   : > { %v7538_v63 = vadd.f32 %v7482_v28, %v7212_v4 }
 0x81f   : > { %v8289_v37 = vadd.f32 %v13817_v23, %v8237_v17 }
 0x820   : > { %v8515_v53 = vpop.f32.mrf.mxu2  ;;  %v7864_v5 = vadd.f32 %v7808_v14, %v7538_v63 }
 0x821   : > { %v8516_v22 = vadd.f32 %v13627_v0, %v8515_v53  ;;  %v8337_v48 = vmax.f32 %v8289_v37, 0.0 }
 0x822   : > { %v8124_v2 = vpop.f32.mrf.mxu1 }
 0x823   : > { %8605 = vst [vmem:[%s13635_s17 + $0xa0] sm:$0xff] %v8516_v22  ;;  %v8186_v18 = vadd.f32 %v8124_v2, %v7860_v33  ;;  %v7487_v17 = vpop.f32.mrf.mxu3  ;;  %v7539_v22 = vadd.f32 %v7485_v34, %v13413_v38 }
 0x825   : > { %v8238_v36 = vmul.f32 %v13823_v3, %v8186_v18 }
 0x827   : > { %v8290_v57 = vadd.f32 %v13817_v23, %v8238_v36 }
 0x828   : > { %v8517_v10 = vpop.f32.mrf.mxu2 }
 0x829   : > { %v8338_v20 = vmax.f32 %v8290_v57, 0.0  ;;  %v8518_v29 = vadd.f32 %v13627_v0, %v8517_v10  ;;  %v7214_v57 = vadd.f32 %v14597_v49, %v14596_v1  ;;  %v7865_v10 = vadd.f32 %v7811_v60, %v7539_v22 }
 0x82a   : > { %v8127_v8 = vpop.f32.mrf.mxu1 }
 0x82b   : > { %v8366_v11 = vpack.c.bf16 %v8338_v20, %v8337_v48  ;;  %8606 = vst [vmem:[%s13635_s17 + $0xa8] sm:$0xff] %v8518_v29  ;;  %v8187_v50 = vadd.f32 %v8127_v8, %v7861_v43  ;;  %v7813_v48 = vpop.f32.mrf.mxu0  ;;  %v7540_v20 = vadd.f32 %v7487_v17, %v7214_v57  ;;  %v7490_v38 = vpop.f32.mrf.mxu3 }
 0x82d   : > { %9187 = vmatmul.msk.bf16.gmra.mxu2 %vm8383_vm1, %v8366_v11  ;;  %v8239_v46 = vmul.f32 %v13823_v3, %v8187_v50  ;;  %v7866_v15 = vadd.f32 %v7813_v48, %v7540_v20 }
 0x82f   : > { %v8291_v6 = vadd.f32 %v13817_v23, %v8239_v46 }
 0x830   : > { %v8520_v45 = vpop.f32.mrf.mxu2 }
 0x831   : > { %v8521_v41 = vadd.f32 %v13627_v0, %v8520_v45  ;;  %v8339_v59 = vmax.f32 %v8291_v6, 0.0  ;;  %v7541_v45 = vadd.f32 %v7490_v38, %v13439_v26 }
 0x832   : > { %v8129_v13 = vpop.f32.mrf.mxu1 }
 0x833   : > { %8607 = vst [vmem:[%s13635_s17 + $0xb0] sm:$0xff] %v8521_v41  ;;  %v8188_v9 = vadd.f32 %v8129_v13, %v7862_v40  ;;  %v7816_v30 = vpop.f32.mrf.mxu0 }
 0x835   : > { %v8240_v52 = vmul.f32 %v13823_v3, %v8188_v9  ;;  %v7492_v9 = vpop.f32.mrf.mxu3 }
 0x837   : > { %v8292_v51 = vadd.f32 %v13817_v23, %v8240_v52  ;;  %v14598_v52 = vld [vmem:[#allocation55_spill] sm:$0xff] }
 0x838   : > { %v8522_v27 = vpop.f32.mrf.mxu2  ;;  %v7216_v54 = vadd.f32 %v13613_v19, %v14598_v52 }
 0x839   : > { %v8340_v32 = vmax.f32 %v8292_v51, 0.0  ;;  %v8523_v56 = vadd.f32 %v13627_v0, %v8522_v27  ;;  %v7867_v51 = vadd.f32 %v7816_v30, %v7541_v45 }
 0x83a   : > { %v8132_v25 = vpop.f32.mrf.mxu1  ;;  %v7542_v27 = vadd.f32 %v7492_v9, %v7216_v54 }
 0x83b   : > { %v8367_v16 = vpack.c.bf16 %v8340_v32, %v8339_v59  ;;  %8608 = vst [vmem:[%s13635_s17 + $0xb8] sm:$0xff] %v8523_v56  ;;  %v8189_v44 = vadd.f32 %v8132_v25, %v7863_v7  ;;  %v7818_v26 = vpop.f32.mrf.mxu0 }
 0x83c   : > { %v7868_v56 = vadd.f32 %v7818_v26, %v7542_v27 }
 0x83d   : > { %9188 = vmatmul.msk.bf16.gmra.mxu2 %vm8383_vm1, %v8367_v16  ;;  %v8241_v47 = vmul.f32 %v13823_v3, %v8189_v44 }
 0x83f   : > { %v8293_v12 = vadd.f32 %v13817_v23, %v8241_v47 }
 0x840   : > { %v8525_v58 = vpop.f32.mrf.mxu2 }
 0x841   : > { %v8526_v62 = vadd.f32 %v13627_v0, %v8525_v58  ;;  %v8341_v18 = vmax.f32 %v8293_v12, 0.0 }
 0x842   : > { %v8134_v55 = vpop.f32.mrf.mxu1 }
 0x843   : > { %8609 = vst [vmem:[%s13635_s17 + $0xc0] sm:$0xff] %v8526_v62  ;;  %v8190_v31 = vadd.f32 %v8134_v55, %v7864_v5 }
 0x845   : > { %v8242_v53 = vmul.f32 %v13823_v3, %v8190_v31 }
 0x847   : > { %v8294_v33 = vadd.f32 %v13817_v23, %v8242_v53 }
 0x848   : > { %v8527_v2 = vpop.f32.mrf.mxu2 }
 0x849   : > { %v8342_v42 = vmax.f32 %v8294_v33, 0.0  ;;  %v8528_v37 = vadd.f32 %v13627_v0, %v8527_v2 }
 0x84a   : > { %v8137_v36 = vpop.f32.mrf.mxu1 }
 0x84b   : > { %v8368_v21 = vpack.c.bf16 %v8342_v42, %v8341_v18  ;;  %8610 = vst [vmem:[%s13635_s17 + $0xc8] sm:$0xff] %v8528_v37  ;;  %v8191_v29 = vadd.f32 %v8137_v36, %v7865_v10 }
 0x84d   : > { %9189 = vmatmul.msk.bf16.gmra.mxu2 %vm8383_vm1, %v8368_v21  ;;  %v8243_v61 = vmul.f32 %v13823_v3, %v8191_v29 }
 0x84f   : > { %v8295_v50 = vadd.f32 %v13817_v23, %v8243_v61 }
 0x850   : > { %v8530_v8 = vpop.f32.mrf.mxu2 }
 0x851   : > { %v8531_v24 = vadd.f32 %v13627_v0, %v8530_v8  ;;  %v8343_v40 = vmax.f32 %v8295_v50, 0.0 }
 0x852   : > { %v8139_v11 = vpop.f32.mrf.mxu1 }
 0x853   : > { %8611 = vst [vmem:[%s13635_s17 + $0xd0] sm:$0xff] %v8531_v24  ;;  %v8192_v43 = vadd.f32 %v8139_v11, %v7866_v15 }
 0x855   : > { %v8244_v39 = vmul.f32 %v13823_v3, %v8192_v43 }
 0x857   : > { %v8296_v46 = vadd.f32 %v13817_v23, %v8244_v39 }
 0x858   : > { %v8532_v41 = vpop.f32.mrf.mxu2 }
 0x859   : > { %v8344_v28 = vmax.f32 %v8296_v46, 0.0  ;;  %v8533_v13 = vadd.f32 %v13627_v0, %v8532_v41 }
 0x85a   : > { %v8142_v6 = vpop.f32.mrf.mxu1 }
 0x85b   : > { %v8369_v14 = vpack.c.bf16 %v8344_v28, %v8343_v40  ;;  %8612 = vst [vmem:[%s13635_s17 + $0xd8] sm:$0xff] %v8533_v13  ;;  %v8193_v59 = vadd.f32 %v8142_v6, %v7867_v51 }
 0x85d   : > { %9190 = vmatmul.msk.bf16.gmra.mxu2 %vm8383_vm1, %v8369_v14  ;;  %v8245_v25 = vmul.f32 %v13823_v3, %v8193_v59 }
 0x85f   : > { %v8297_v19 = vadd.f32 %v13817_v23, %v8245_v25 }
 0x860   : > { %v8535_v32 = vpop.f32.mrf.mxu2 }
 0x861   : > { %v8536_v35 = vadd.f32 %v13627_v0, %v8535_v32  ;;  %v8345_v44 = vmax.f32 %v8297_v19, 0.0 }
 0x862   : > { %v8144_v4 = vpop.f32.mrf.mxu1 }
 0x863   : > { %8613 = vst [vmem:[%s13635_s17 + $0xe0] sm:$0xff] %v8536_v35  ;;  %v8194_v16 = vadd.f32 %v8144_v4, %v7868_v56 }
 0x865   : > { %v8246_v7 = vmul.f32 %v13823_v3, %v8194_v16 }
 0x867   : > { %v8298_v34 = vadd.f32 %v13817_v23, %v8246_v7 }
 0x868   : > { %v8537_v63 = vpop.f32.mrf.mxu2 }
 0x869   : > { %v8346_v58 = vmax.f32 %v8298_v34, 0.0  ;;  %v8538_v47 = vadd.f32 %v13627_v0, %v8537_v63 }
 0x86b   : > { %v8370_v62 = vpack.c.bf16 %v8346_v58, %v8345_v44  ;;  %8614 = vst [vmem:[%s13635_s17 + $0xe8] sm:$0xff] %v8538_v47 }
 0x86d   : > { %9191 = vmatmul.msk.bf16.gmra.mxu2 %vm8383_vm1, %v8370_v62 }
 0x870   : > { %v8540_v5 = vpop.f32.mrf.mxu2 }
 0x871   : > { %v8541_v60 = vadd.f32 %v13627_v0, %v8540_v5 }
 0x873   : > { %8615 = vst [vmem:[%s13635_s17 + $0xf0] sm:$0xff] %v8541_v60 }
 0x878   : > { %v8542_v3 = vpop.f32.mrf.mxu2 }
 0x879   : > { %v8543_v23 = vadd.f32 %v13627_v0, %v8542_v3 }
 0x87b   : > { %8616 = vst [vmem:[%s13635_s17 + $0xf8] sm:$0xff] %v8543_v23 }
 0x880   : > { %v8545_v55 = vpop.f32.mrf.mxu2 }
 0x881   : > { %v8546_v31 = vadd.f32 %v13627_v0, %v8545_v55 }
 0x883   : > { %8617 = vst [vmem:[%s13635_s17 + $0x100] sm:$0xff] %v8546_v31 }
 0x888   : > { %v8547_v12 = vpop.f32.mrf.mxu2 }
 0x889   : > { %v8548_v53 = vadd.f32 %v13627_v0, %v8547_v12 }
 0x88b   : > { %8618 = vst [vmem:[%s13635_s17 + $0x108] sm:$0xff] %v8548_v53 }
 0x890   : > { %v8550_v17 = vpop.f32.mrf.mxu2 }
 0x891   : > { %v8551_v22 = vadd.f32 %v13627_v0, %v8550_v17 }
 0x893   : > { %8619 = vst [vmem:[%s13635_s17 + $0x110] sm:$0xff] %v8551_v22 }
 0x898   : > { %v8552_v33 = vpop.f32.mrf.mxu2 }
 0x899   : > { %v8553_v2 = vadd.f32 %v13627_v0, %v8552_v33 }
 0x89b   : > { %8620 = vst [vmem:[%s13635_s17 + $0x118] sm:$0xff] %v8553_v2 }
 0x8a0   : > { %v8555_v18 = vpop.f32.mrf.mxu2 }
 0x8a1   : > { %v8556_v42 = vadd.f32 %v13627_v0, %v8555_v18 }
 0x8a3   : > { %8621 = vst [vmem:[%s13635_s17 + $0x120] sm:$0xff] %v8556_v42 }
 0x8a8   : > { %v8557_v37 = vpop.f32.mrf.mxu2 }
 0x8a9   : > { %v8558_v36 = vadd.f32 %v13627_v0, %v8557_v37 }
 0x8ab   : > { %8622 = vst [vmem:[%s13635_s17 + $0x128] sm:$0xff] %v8558_v36 }
 0x8b0   : > { %v8560_v1 = vpop.f32.mrf.mxu2 }
 0x8b1   : > { %v8561_v49 = vadd.f32 %v13627_v0, %v8560_v1 }
 0x8b3   : > { %8623 = vst [vmem:[%s13635_s17 + $0x130] sm:$0xff] %v8561_v49 }
 0x8b8   : > { %v8562_v57 = vpop.f32.mrf.mxu2 }
 0x8b9   : > { %v8563_v21 = vadd.f32 %v13627_v0, %v8562_v57 }
 0x8bb   : > { %8624 = vst [vmem:[%s13635_s17 + $0x138] sm:$0xff] %v8563_v21 }
 0x8c0   : > { %v8565_v10 = vpop.f32.mrf.mxu2 }
 0x8c1   : > { %v8566_v48 = vadd.f32 %v13627_v0, %v8565_v10 }
 0x8c3   : > { %8625 = vst [vmem:[%s13635_s17 + $0x140] sm:$0xff] %v8566_v48 }
 0x8c8   : > { %v8567_v20 = vpop.f32.mrf.mxu2 }
 0x8c9   : > { %v8568_v29 = vadd.f32 %v13627_v0, %v8567_v20 }
 0x8cb   : > { %8626 = vst [vmem:[%s13635_s17 + $0x148] sm:$0xff] %v8568_v29 }
 0x8d0   : > { %v8570_v38 = vpop.f32.mrf.mxu2 }
 0x8d1   : > { %v8571_v8 = vadd.f32 %v13627_v0, %v8570_v38 }
 0x8d3   : > { %8627 = vst [vmem:[%s13635_s17 + $0x150] sm:$0xff] %v8571_v8 }
 0x8d8   : > { %v8572_v61 = vpop.f32.mrf.mxu2 }
 0x8d9   : > { %v8573_v24 = vadd.f32 %v13627_v0, %v8572_v61 }
 0x8db   : > { %8628 = vst [vmem:[%s13635_s17 + $0x158] sm:$0xff] %v8573_v24 }
 0x8e0   : > { %v8575_v15 = vpop.f32.mrf.mxu2 }
 0x8e1   : > { %v8576_v11 = vadd.f32 %v13627_v0, %v8575_v15 }
 0x8e3   : > { %8629 = vst [vmem:[%s13635_s17 + $0x160] sm:$0xff] %v8576_v11 }
 0x8e8   : > { %v8577_v43 = vpop.f32.mrf.mxu2 }
 0x8e9   : > { %v8578_v30 = vadd.f32 %v13627_v0, %v8577_v43 }
 0x8eb   : > { %8630 = vst [vmem:[%s13635_s17 + $0x168] sm:$0xff] %v8578_v30 }
 0x8f0   : > { %v8580_v50 = vpop.f32.mrf.mxu2 }
 0x8f1   : > { %v8581_v39 = vadd.f32 %v13627_v0, %v8580_v50 }
 0x8f3   : > { %8631 = vst [vmem:[%s13635_s17 + $0x170] sm:$0xff] %v8581_v39 }
 0x8f8   : > { %v8582_v45 = vpop.f32.mrf.mxu2 }
 0x8f9   : > { %v8583_v46 = vadd.f32 %v13627_v0, %v8582_v45 }
 0x8fb   : > { %8632 = vst [vmem:[%s13635_s17 + $0x178] sm:$0xff] %v8583_v46 }
 0x8fc   : > { %9290 = shalt.err (!%p9287_p3)
}
 0x8fd   : > { %s9329_s28 = smov 128   ;;  %s9330_s17 = smov 8  }
 0x8fe   : > { %9202 = dma.vmem_to_hbm [thread:$0]  (%p9419_p5), %s8647_s14, 6144, %s8649_s16, %s8634_s22, %s9329_s28, %s9329_s28, %s9330_s17  }
 0x8ff PF: > { %p9208_p4 = scmp.ge.s32.totalorder %s9325_s12, 2  ;;  %s8663_s29 = sand.u32 1, %s9313_s30  }
 0x900   : > { %s8664_s24 = scalar_lea.sflag [#allocation5], %s8663_s29 }
 0x901   : > { %p9205_p7 = pnand %p9208_p4, %p9423_p6 }
 0x903   : > { %p9206_p8 = pneg %p9205_p7 }
 0x905   : > { %9308 = dma.done.wait (%p9206_p8), %s8664_s24, 6144  }
 0x906   : > { %9310 = vsyncadd (%p9206_p8), %s8664_s24, 4294961152  ;;  %p19_p9 = scmp.ge.s32.totalorder %s9406_s15, 4   ;;  %s14599_s30 = smov %s9317_s10 }
 0x907   : > { %s14600_s10 = smov %s9321_s11  ;;  %s14601_s11 = smov %s9417_s18 }
 0x908   : > { %s14602_s12 = smov %s9406_s15  ;;  %21 = sbr.rel (!%p19_p9) target bundleno = 3 (0x3), region = 107 }
 0x90d   :  { %8670 = vsyncpa [#allocation5], 1 }
 0x90e   :  { %8672 = vsyncpa [#allocation5 + $0x1], 1 }

</bundles_post_ra>
